<compile_context>
chip_gen: v7x
topology: tpu7x:2x2x1
jax: 0.10.0
libtpu: 0.0.40
codegen_flags: <defaults>
</compile_context>

<pallas_src>
import jax
import jax.numpy as jnp
from jax import lax
from jax.experimental import pallas as pl
from jax.experimental.pallas import tpu as pltpu

ACT_DTYPE = jnp.bfloat16           # inter-layer activations / MXU operands
EPS = 1e-5                         # BatchNorm2d default eps


# ---------------------------------------------------------------------------
# helpers
# ---------------------------------------------------------------------------
def _pick_tile(dim, max_tile, quantum):
    """Largest tile <= max_tile that divides `dim` exactly and satisfies the
    (8,128) block rule (multiple of `quantum`, or the full dim).
    NOTE: falls back to the full dim if no aligned divisor exists; shapes used
    here are friendly so this never blows the VMEM budget."""
    if dim <= max_tile:
        return dim
    for t in range(max_tile, 0, -1):
        if dim % t == 0 and t % quantum == 0:
            return t
    return dim


# ---------------------------------------------------------------------------
# Fused single-K GEMM kernel
#   out = act( relu(a*scale+shift) @ w + bias )      (bf16 MXU, f32 math)
#   optional extra outputs: per-column sum / sum-of-squares of the raw product
#   (BatchNorm batch stats), accumulated in place across the M grid axis.
# ---------------------------------------------------------------------------
def _make_gemm_kernel(fuse_bn, has_bias, activation, with_stats, multi_m):
    def kernel(*refs):
        idx = 0
        a_ref = refs[idx]; idx += 1
        if fuse_bn:
            scale_ref = refs[idx]; shift_ref = refs[idx + 1]; idx += 2
        w_ref = refs[idx]; idx += 1
        if has_bias:
            bias_ref = refs[idx]; idx += 1
        o_ref = refs[idx]; idx += 1
        if with_stats:
            s1_ref = refs[idx]; s2_ref = refs[idx + 1]; idx += 2

        # --- prologue: previous layer's BatchNorm + ReLU on the A tile ------
        a = a_ref[...]
        if fuse_bn:
            a = jnp.maximum(a.astype(jnp.float32) * scale_ref[...]
                            + shift_ref[...], 0.0)
            a = a.astype(ACT_DTYPE)

        # --- single-K MXU dot (no accumulator scratch needed) ---------------
        y = jnp.dot(a, w_ref[...], preferred_element_type=jnp.float32)

        # --- epilogue --------------------------------------------------------
        out = y
        if has_bias:
            out = out + bias_ref[...]
        if activation == "relu":
            out = jnp.maximum(out, 0.0)
        elif activation == "tanh":
            out = jnp.tanh(out)
        o_ref[...] = out.astype(o_ref.dtype)

        # --- BatchNorm batch stats from the raw (pre-BN) product -------------
        if with_stats:
            col_sum = jnp.sum(y, axis=0, keepdims=True)
            col_sq = jnp.sum(y * y, axis=0, keepdims=True)
            if not multi_m:
                s1_ref[...] = col_sum
                s2_ref[...] = col_sq
            else:
                i = pl.program_id(1)

                @pl.when(i == 0)
                def _():
                    s1_ref[...] = jnp.zeros_like(s1_ref)
                    s2_ref[...] = jnp.zeros_like(s2_ref)

                s1_ref[...] += col_sum
                s2_ref[...] += col_sq

    return kernel


def fused_gemm(a, w, *, scale=None, shift=None, bias=None, activation=None,
               with_stats=False, out_dtype=ACT_DTYPE, tm_max=1024, tn_max=512):
    """a: (M, K) bf16, w: (K, N) bf16 -> (M, N) [, (1,N) col sums, (1,N) sumsq].

    K is always a single block (tiny for this model); for much larger Cin a K
    grid axis + f32 accumulator would be reintroduced (v7x VMEM budget)."""
    M, K = a.shape
    K2, N = w.shape
    assert K2 == K
    fuse_bn = scale is not None
    has_bias = bias is not None

    tm = _pick_tile(M, tm_max, 8)
    tn = _pick_tile(N, tn_max, 128)
    gm, gn = M // tm, N // tn
    grid = (gn, gm)                                    # N outer (parallel), M inner

    in_specs = [pl.BlockSpec((tm, K), lambda j, i: (i, 0))]
    inputs = [a]
    if fuse_bn:
        in_specs += [pl.BlockSpec((1, K), lambda j, i: (0, 0)),
                     pl.BlockSpec((1, K), lambda j, i: (0, 0))]
        inputs += [scale.reshape(1, K).astype(jnp.float32),
                   shift.reshape(1, K).astype(jnp.float32)]
    in_specs.append(pl.BlockSpec((K, tn), lambda j, i: (0, j)))
    inputs.append(w)
    if has_bias:
        in_specs.append(pl.BlockSpec((1, tn), lambda j, i: (0, j)))
        inputs.append(bias.reshape(1, N).astype(jnp.float32))

    out_spec_main = pl.BlockSpec((tm, tn), lambda j, i: (i, j))
    if with_stats:
        out_shape = (jax.ShapeDtypeStruct((M, N), out_dtype),
                     jax.ShapeDtypeStruct((1, N), jnp.float32),
                     jax.ShapeDtypeStruct((1, N), jnp.float32))
        out_specs = [out_spec_main,
                     pl.BlockSpec((1, tn), lambda j, i: (0, j)),
                     pl.BlockSpec((1, tn), lambda j, i: (0, j))]
        # M axis must stay "arbitrary": stats accumulate in place across it.
        dims = ("parallel", "arbitrary")
    else:
        out_shape = jax.ShapeDtypeStruct((M, N), out_dtype)
        out_specs = out_spec_main
        dims = ("parallel", "parallel")

    return pl.pallas_call(
        _make_gemm_kernel(fuse_bn, has_bias, activation, with_stats, gm > 1),
        out_shape=out_shape,
        grid_spec=pltpu.PrefetchScalarGridSpec(
            num_scalar_prefetch=0,
            grid=grid,
            in_specs=in_specs,
            out_specs=out_specs),
        compiler_params=pltpu.CompilerParams(dimension_semantics=dims),
    )(*inputs)


# ---------------------------------------------------------------------------
# stride-2 ConvTranspose2d(k=4, p=1): merged-phase lowering
#   out[n, 2qh+rh, 2qw+rw, co] =
#     sum_{dh,dw,ci} xpad[n, qh+rh+dh, qw+rw+dw, ci] * w[ci, co, 3-rh-2dh, 3-rw-2dw]
#   The union of tap positions over the 4 phases is a 3x3 window, so one
#   9-tap im2col feeds a (9*Cin, 4*Cout) block weight whose unused taps per
#   phase are structural zeros; all 4 phases land interleaved in the lanes.
# ---------------------------------------------------------------------------
def _im2col9(x_nhwc, fill_c):
    """(N,H,W,C) -> (N*H*W, 9*C) 3x3-tap patch matrix over a 1-padded input.
    The pad border is filled with the per-channel value whose BatchNorm+ReLU
    is exactly zero, so the consumer GEMM can apply BN+ReLU in its prologue."""
    N, H, W, C = x_nhwc.shape
    xp = jnp.broadcast_to(fill_c.astype(x_nhwc.dtype).reshape(1, 1, 1, C),
                          (N, H + 2, W + 2, C))
    xp = lax.dynamic_update_slice(xp, x_nhwc, (0, 1, 1, 0))
    taps = [xp[:, th:th + H, tw:tw + W, :]
            for th in range(3) for tw in range(3)]
    a = jnp.stack(taps, axis=3)                        # (N, H, W, 9, C)
    return a.reshape(N * H * W, 9 * C)


def _merged_phase_weight(w):
    """torch ConvTranspose2d weight (Cin, Cout, 4, 4), stride=2, pad=1
    -> block matrix (9*Cin, 4*Cout); column group p = 2*rh+rw."""
    Cin, Cout, kH, kW = w.shape
    wb = jnp.zeros((9, Cin, 4, Cout), jnp.float32)
    for rh in range(2):
        for rw in range(2):
            p = 2 * rh + rw
            for dh in range(2):
                for dw in range(2):
                    t = 3 * (rh + dh) + (rw + dw)
                    wb = wb.at[t, :, p, :].set(
                        w[:, :, (kH - 1) - rh - 2 * dh, (kW - 1) - rw - 2 * dw])
    return wb.reshape(9 * Cin, 4 * Cout)


def _depth_to_space(y, n, h, w, c):
    """(n*h*w, 4*c) with lanes ordered (rh, rw, c) -> (n, 2h, 2w, c)."""
    y = y.reshape(n, h, w, 2, 2, c)
    return y.transpose(0, 1, 3, 2, 4, 5).reshape(n, 2 * h, 2 * w, c)


def _bn_stats_to_affine(s1, s2, cout, count, gamma, beta):
    """Per-channel BN scale/shift (and the pad-fill value) from fused GEMM
    column stats; columns are grouped (tap-or-phase, channel)."""
    mean = s1.reshape(-1, cout).sum(axis=0) / count
    ex2 = s2.reshape(-1, cout).sum(axis=0) / count
    var = jnp.maximum(ex2 - mean * mean, 0.0)          # guard tiny negatives
    scale = gamma * lax.rsqrt(var + EPS)
    shift = beta - mean * scale
    # value whose BN+ReLU is exactly 0 (needs gamma != 0; true here: gamma=1).
    fill = jnp.where(scale == 0.0, 0.0, -shift / scale)
    return scale, shift, fill


# ---------------------------------------------------------------------------
# Generator forward (NHWC internally, raw pre-BN bf16 activations between
# layers; BN+ReLU applied in the next GEMM's prologue, stats fused in GEMM)
# ---------------------------------------------------------------------------
def generator_forward(x_nchw, params):
    nb = x_nchw.shape[0]

    # -- block 0: ConvTranspose2d(noise, f*16, k=4, s=1, p=0) on a 1x1 input
    #    == dense GEMM (nb, Cin) @ (Cin, 4*4*Cout); BN column-stats fused.
    l0 = params["l0"]
    c0 = l0["gamma"].shape[0]
    a0 = x_nchw.reshape(nb, -1).astype(ACT_DTYPE)
    y0, s1, s2 = fused_gemm(a0, l0["wmat"], with_stats=True)
    scale, shift, fill = _bn_stats_to_affine(s1, s2, c0, nb * 16,
                                             l0["gamma"], l0["beta"])
    x = y0.reshape(nb, 4, 4, c0)                       # raw pre-BN, NHWC bf16

    # -- blocks 1..3: ConvTranspose2d(k=4, s=2, p=1) + BN + ReLU
    #    (previous layer's BN+ReLU fused into this GEMM's prologue)
    for blk in params["blocks"]:
        n_, h_, w_, _ = x.shape
        cout = blk["gamma"].shape[0]
        a = _im2col9(x, fill)                          # (n*h*w, 9*cin)
        y, s1, s2 = fused_gemm(a, blk["wp"],
                               scale=jnp.tile(scale, 9),
                               shift=jnp.tile(shift, 9),
                               with_stats=True)
        scale, shift, fill = _bn_stats_to_affine(s1, s2, cout, 4 * n_ * h_ * w_,
                                                 blk["gamma"], blk["beta"])
        x = _depth_to_space(y, n_, h_, w_, cout)       # raw pre-BN, NHWC bf16

    # -- final: ConvTranspose2d(f*2, img_ch, k=4, s=2, p=1) + bias + tanh
    #    (last block's BN+ReLU in prologue; bias + tanh in epilogue)
    fin = params["final"]
    n_, h_, w_, _ = x.shape
    cimg = fin["bias"].shape[0]
    a = _im2col9(x, fill)
    y = fused_gemm(a, fin["wp"],
                   scale=jnp.tile(scale, 9), shift=jnp.tile(shift, 9),
                   bias=jnp.tile(fin["bias"], 4), activation="tanh",
                   with_stats=False, out_dtype=jnp.float32)
    out = _depth_to_space(y, n_, h_, w_, cimg)
    return out.transpose(0, 3, 1, 2)                   # NHWC -> NCHW


# ---------------------------------------------------------------------------
# Parameters (DCGAN-style N(0, 0.02) init) + hoisted preprocessing
# ---------------------------------------------------------------------------
def init_raw_params(key, noise_dim, img_channels, features):
    cfg = [(noise_dim,     features * 16, 1, 0),
           (features * 16, features * 8,  2, 1),
           (features * 8,  features * 4,  2, 1),
           (features * 4,  features * 2,  2, 1)]
    blocks = []
    for (cin, cout, s, p) in cfg:
        key, wk = jax.random.split(key)
        blocks.append({
            "w": 0.02 * jax.random.normal(wk, (cin, cout, 4, 4), jnp.float32),
            "gamma": jnp.ones((cout,), jnp.float32),
            "beta": jnp.zeros((cout,), jnp.float32),
            "stride": s, "padding": p})
    key, wk, bk = jax.random.split(key, 3)
    final_w = 0.02 * jax.random.normal(wk, (features * 2, img_channels, 4, 4),
                                       jnp.float32)
    final_b = 0.02 * jax.random.normal(bk, (img_channels,), jnp.float32)
    return {"blocks": blocks, "final_w": final_w, "final_b": final_b}


def prepare_params(raw):
    """Per-layer weight preprocessing done ONCE, outside the jitted forward."""
    b0 = raw["blocks"][0]
    l0 = {"wmat": jnp.transpose(b0["w"], (0, 2, 3, 1))
                     .reshape(b0["w"].shape[0], -1).astype(ACT_DTYPE),
          "gamma": b0["gamma"], "beta": b0["beta"]}
    blocks = [{"wp": _merged_phase_weight(b["w"]).astype(ACT_DTYPE),
               "gamma": b["gamma"], "beta": b["beta"]}
              for b in raw["blocks"][1:]]
    final = {"wp": _merged_phase_weight(raw["final_w"]).astype(ACT_DTYPE),
             "bias": raw["final_b"].astype(jnp.float32)}
    return {"l0": l0, "blocks": blocks, "final": final}


# ---------------------------------------------------------------------------
# Pure-XLA f32 reference (for a loose self-check of the bf16 Pallas path)
# ---------------------------------------------------------------------------
def _ref_conv_transpose(x_nchw, w, stride, padding):
    k = w.shape[2]
    w_f = jnp.flip(w, axis=(2, 3)).transpose(1, 0, 2, 3)     # (Cout, Cin, kH, kW)
    pad = k - 1 - padding
    return lax.conv_general_dilated(
        x_nchw, w_f, window_strides=(1, 1),
        padding=[(pad, pad), (pad, pad)],
        lhs_dilation=(stride, stride),
        dimension_numbers=("NCHW", "OIHW", "NCHW"))


def reference_forward(x_nchw, raw):
    x = x_nchw
    for blk in raw["blocks"]:
        y = _ref_conv_transpose(x, blk["w"], blk["stride"], blk["padding"])
        mean = y.mean(axis=(0, 2, 3), keepdims=True)
        var = y.var(axis=(0, 2, 3), keepdims=True)            # biased, train mode
        y = (y - mean) * lax.rsqrt(var + EPS)
        y = y * blk["gamma"].reshape(1, -1, 1, 1) + blk["beta"].reshape(1, -1, 1, 1)
        x = jnp.maximum(y, 0.0)
    y = _ref_conv_transpose(x, raw["final_w"], 2, 1)
    y = y + raw["final_b"].reshape(1, -1, 1, 1)
    return jnp.tanh(y)


if __name__ == "__main__":
    key = jax.random.PRNGKey(0)
    noise_dim, img_channels, features, batch = 16, 3, 4, 2

    pkey, xkey = jax.random.split(key)
    raw = init_raw_params(pkey, noise_dim, img_channels, features)
    params = prepare_params(raw)

    # Generator input: (N, noise, 1, 1) as in DCGAN.
    x = jax.random.normal(xkey, (batch, noise_dim, 1, 1), jnp.float32)

    fwd = jax.jit(generator_forward)
    out = jax.block_until_ready(fwd(x, params))

    expected = (batch, img_channels, 64, 64)
    assert out.shape == expected, (out.shape, expected)
    assert bool(jnp.all(jnp.isfinite(out)))
    assert bool(jnp.all(jnp.abs(out) <= 1.0 + 1e-6))          # tanh range

    # sanity check vs a pure-XLA f32 reference (bf16 MXU operands -> loose tol)
    ref = reference_forward(x, raw)
    max_err = float(jnp.max(jnp.abs(out.astype(jnp.float32) - ref)))
    assert max_err < 5e-2, f"max |err| vs f32 reference = {max_err}"

    print("KERNEL_OK")
</pallas_src>

<mosaic_0001>
module attributes {stable_mosaic.version = 11 : i64} {
  func.func @kernel(%arg0: i32, %arg1: i32, %arg2: memref<2x16xbf16, #tpu.memory_space<vmem>>, %arg3: memref<16x512xbf16, #tpu.memory_space<vmem>>, %arg4: memref<2x512xbf16, #tpu.memory_space<vmem>>, %arg5: memref<1x512xf32, #tpu.memory_space<vmem>>, %arg6: memref<1x512xf32, #tpu.memory_space<vmem>>) attributes {dimension_semantics = [#tpu.dimension_semantics<parallel>, #tpu.dimension_semantics<arbitrary>], iteration_bounds = array<i64: 2, 1>, scalar_prefetch = 0 : i64, scratch_operands = 0 : i64, tpu.core_type = #tpu.core_type<tc>, window_params = [{transform_indices = @transform_0, window_bounds = array<i64: 2, 16>}, {transform_indices = @transform_1, window_bounds = array<i64: 16, 512>}, {transform_indices = @transform_2, window_bounds = array<i64: 2, 512>}, {transform_indices = @transform_3, window_bounds = array<i64: 1, 512>}, {transform_indices = @transform_4, window_bounds = array<i64: 1, 512>}]} {
    %c0 = arith.constant 0 : index
    %c0_0 = arith.constant 0 : index
    %0 = vector.load %arg2[%c0, %c0_0] : memref<2x16xbf16, #tpu.memory_space<vmem>>, vector<2x16xbf16>
    %c0_1 = arith.constant 0 : index
    %c0_2 = arith.constant 0 : index
    %1 = vector.load %arg3[%c0_1, %c0_2] : memref<16x512xbf16, #tpu.memory_space<vmem>>, vector<16x512xbf16>
    %cst = arith.constant dense<0.000000e+00> : vector<2x512xf32>
    %2 = tpu.matmul %0, %1, %cst {dimension_numbers = #tpu.dot_dimension_numbers<[1], [0], [0], [1], [0, 0, 1, 1], [], []>} : vector<2x16xbf16>, vector<16x512xbf16>, vector<2x512xf32> -> vector<2x512xf32>
    %3 = arith.truncf %2 : vector<2x512xf32> to vector<2x512xbf16>
    %c0_3 = arith.constant 0 : index
    %c0_4 = arith.constant 0 : index
    %4 = vector.load %arg4[%c0_3, %c0_4] : memref<2x512xbf16, #tpu.memory_space<vmem>>, vector<2x512xbf16>
    tpu.vector_store %arg4[%c0_3, %c0_4], %3 {strides = array<i32>} : memref<2x512xbf16, #tpu.memory_space<vmem>>, vector<2x512xbf16>,
    %cst_5 = arith.constant dense<0.000000e+00> : vector<512xf32>
    %5 = vector.multi_reduction <add>, %2, %cst_5 [0] : vector<2x512xf32> to vector<512xf32>
    %6 = vector.shape_cast %5 : vector<512xf32> to vector<1x512xf32>
    %7 = arith.mulf %2, %2 : vector<2x512xf32>
    %cst_6 = arith.constant dense<0.000000e+00> : vector<512xf32>
    %8 = vector.multi_reduction <add>, %7, %cst_6 [0] : vector<2x512xf32> to vector<512xf32>
    %9 = vector.shape_cast %8 : vector<512xf32> to vector<1x512xf32>
    %c0_7 = arith.constant 0 : index
    %c0_8 = arith.constant 0 : index
    %10 = vector.load %arg5[%c0_7, %c0_8] : memref<1x512xf32, #tpu.memory_space<vmem>>, vector<1x512xf32>
    tpu.vector_store %arg5[%c0_7, %c0_8], %6 {strides = array<i32>} : memref<1x512xf32, #tpu.memory_space<vmem>>, vector<1x512xf32>,
    %c0_9 = arith.constant 0 : index
    %c0_10 = arith.constant 0 : index
    %11 = vector.load %arg6[%c0_9, %c0_10] : memref<1x512xf32, #tpu.memory_space<vmem>>, vector<1x512xf32>
    tpu.vector_store %arg6[%c0_9, %c0_10], %9 {strides = array<i32>} : memref<1x512xf32, #tpu.memory_space<vmem>>, vector<1x512xf32>,
    return
  }
  func.func @transform_0(%arg0: i32, %arg1: i32) -> (i32, i32) {
    %c0_i32 = arith.constant 0 : i32
    %c0_i32_0 = arith.constant 0 : i32
    return %arg1, %c0_i32 : i32, i32
  }
  func.func @transform_1(%arg0: i32, %arg1: i32) -> (i32, i32) {
    %c0_i32 = arith.constant 0 : i32
    %c0_i32_0 = arith.constant 0 : i32
    return %c0_i32, %arg0 : i32, i32
  }
  func.func @transform_2(%arg0: i32, %arg1: i32) -> (i32, i32) {
    %c0_i32 = arith.constant 0 : i32
    return %arg1, %arg0 : i32, i32
  }
  func.func @transform_3(%arg0: i32, %arg1: i32) -> (i32, i32) {
    %c0_i32 = arith.constant 0 : i32
    %c0_i32_0 = arith.constant 0 : i32
    return %c0_i32, %arg0 : i32, i32
  }
  func.func @transform_4(%arg0: i32, %arg1: i32) -> (i32, i32) {
    %c0_i32 = arith.constant 0 : i32
    %c0_i32_0 = arith.constant 0 : i32
    return %c0_i32, %arg0 : i32, i32
  }
}

module attributes {stable_mosaic.version = 11 : i64} {
  func.func @kernel(%arg0: i32, %arg1: i32, %arg2: memref<32x576xbf16, #tpu.memory_space<vmem>>, %arg3: memref<1x576xf32, #tpu.memory_space<vmem>>, %arg4: memref<1x576xf32, #tpu.memory_space<vmem>>, %arg5: memref<576x128xbf16, #tpu.memory_space<vmem>>, %arg6: memref<32x128xbf16, #tpu.memory_space<vmem>>, %arg7: memref<1x128xf32, #tpu.memory_space<vmem>>, %arg8: memref<1x128xf32, #tpu.memory_space<vmem>>) attributes {dimension_semantics = [#tpu.dimension_semantics<parallel>, #tpu.dimension_semantics<arbitrary>], iteration_bounds = array<i64: 1, 1>, scalar_prefetch = 0 : i64, scratch_operands = 0 : i64, tpu.core_type = #tpu.core_type<tc>, window_params = [{transform_indices = @transform_0, window_bounds = array<i64: 32, 576>}, {pipeline_mode = #tpu.pipeline_mode<synchronous>, transform_indices = @transform_1, window_bounds = array<i64: 1, 576>}, {pipeline_mode = #tpu.pipeline_mode<synchronous>, transform_indices = @transform_2, window_bounds = array<i64: 1, 576>}, {transform_indices = @transform_3, window_bounds = array<i64: 576, 128>}, {transform_indices = @transform_4, window_bounds = array<i64: 32, 128>}, {transform_indices = @transform_5, window_bounds = array<i64: 1, 128>}, {transform_indices = @transform_6, window_bounds = array<i64: 1, 128>}]} {
    %c0 = arith.constant 0 : index
    %c0_0 = arith.constant 0 : index
    %0 = vector.load %arg2[%c0, %c0_0] : memref<32x576xbf16, #tpu.memory_space<vmem>>, vector<32x576xbf16>
    %1 = arith.extf %0 : vector<32x576xbf16> to vector<32x576xf32>
    %c0_1 = arith.constant 0 : index
    %c0_2 = arith.constant 0 : index
    %2 = vector.load %arg3[%c0_1, %c0_2] : memref<1x576xf32, #tpu.memory_space<vmem>>, vector<1x576xf32>
    %3 = vector.broadcast %2 : vector<1x576xf32> to vector<32x576xf32>
    %4 = arith.mulf %1, %3 : vector<32x576xf32>
    %c0_3 = arith.constant 0 : index
    %c0_4 = arith.constant 0 : index
    %5 = vector.load %arg4[%c0_3, %c0_4] : memref<1x576xf32, #tpu.memory_space<vmem>>, vector<1x576xf32>
    %6 = vector.broadcast %5 : vector<1x576xf32> to vector<32x576xf32>
    %7 = arith.addf %4, %6 : vector<32x576xf32>
    %cst = arith.constant 0.000000e+00 : f32
    %8 = vector.broadcast %cst : f32 to vector<32x576xf32>
    %9 = arith.maximumf %7, %8 : vector<32x576xf32>
    %10 = arith.truncf %9 : vector<32x576xf32> to vector<32x576xbf16>
    %c0_5 = arith.constant 0 : index
    %c0_6 = arith.constant 0 : index
    %11 = vector.load %arg5[%c0_5, %c0_6] : memref<576x128xbf16, #tpu.memory_space<vmem>>, vector<576x128xbf16>
    %cst_7 = arith.constant dense<0.000000e+00> : vector<32x128xf32>
    %12 = tpu.matmul %10, %11, %cst_7 {dimension_numbers = #tpu.dot_dimension_numbers<[1], [0], [0], [1], [0, 0, 1, 1], [], []>} : vector<32x576xbf16>, vector<576x128xbf16>, vector<32x128xf32> -> vector<32x128xf32>
    %13 = arith.truncf %12 : vector<32x128xf32> to vector<32x128xbf16>
    %c0_8 = arith.constant 0 : index
    %c0_9 = arith.constant 0 : index
    %14 = vector.load %arg6[%c0_8, %c0_9] : memref<32x128xbf16, #tpu.memory_space<vmem>>, vector<32x128xbf16>
    tpu.vector_store %arg6[%c0_8, %c0_9], %13 {strides = array<i32>} : memref<32x128xbf16, #tpu.memory_space<vmem>>, vector<32x128xbf16>,
    %cst_10 = arith.constant dense<0.000000e+00> : vector<128xf32>
    %15 = vector.multi_reduction <add>, %12, %cst_10 [0] : vector<32x128xf32> to vector<128xf32>
    %16 = vector.shape_cast %15 : vector<128xf32> to vector<1x128xf32>
    %17 = arith.mulf %12, %12 : vector<32x128xf32>
    %cst_11 = arith.constant dense<0.000000e+00> : vector<128xf32>
    %18 = vector.multi_reduction <add>, %17, %cst_11 [0] : vector<32x128xf32> to vector<128xf32>
    %19 = vector.shape_cast %18 : vector<128xf32> to vector<1x128xf32>
    %c0_12 = arith.constant 0 : index
    %c0_13 = arith.constant 0 : index
    %20 = vector.load %arg7[%c0_12, %c0_13] : memref<1x128xf32, #tpu.memory_space<vmem>>, vector<1x128xf32>
    tpu.vector_store %arg7[%c0_12, %c0_13], %16 {strides = array<i32>} : memref<1x128xf32, #tpu.memory_space<vmem>>, vector<1x128xf32>,
    %c0_14 = arith.constant 0 : index
    %c0_15 = arith.constant 0 : index
    %21 = vector.load %arg8[%c0_14, %c0_15] : memref<1x128xf32, #tpu.memory_space<vmem>>, vector<1x128xf32>
    tpu.vector_store %arg8[%c0_14, %c0_15], %19 {strides = array<i32>} : memref<1x128xf32, #tpu.memory_space<vmem>>, vector<1x128xf32>,
    return
  }
  func.func @transform_0(%arg0: i32, %arg1: i32) -> (i32, i32) {
    %c0_i32 = arith.constant 0 : i32
    %c0_i32_0 = arith.constant 0 : i32
    return %arg1, %c0_i32 : i32, i32
  }
  func.func @transform_1(%arg0: i32, %arg1: i32) -> (i32, i32) {
    %c0_i32 = arith.constant 0 : i32
    %c0_i32_0 = arith.constant 0 : i32
    %c0_i32_1 = arith.constant 0 : i32
    return %c0_i32, %c0_i32_0 : i32, i32
  }
  func.func @transform_2(%arg0: i32, %arg1: i32) -> (i32, i32) {
    %c0_i32 = arith.constant 0 : i32
    %c0_i32_0 = arith.constant 0 : i32
    %c0_i32_1 = arith.constant 0 : i32
    return %c0_i32, %c0_i32_0 : i32, i32
  }
  func.func @transform_3(%arg0: i32, %arg1: i32) -> (i32, i32) {
    %c0_i32 = arith.constant 0 : i32
    %c0_i32_0 = arith.constant 0 : i32
    return %c0_i32, %arg0 : i32, i32
  }
  func.func @transform_4(%arg0: i32, %arg1: i32) -> (i32, i32) {
    %c0_i32 = arith.constant 0 : i32
    return %arg1, %arg0 : i32, i32
  }
  func.func @transform_5(%arg0: i32, %arg1: i32) -> (i32, i32) {
    %c0_i32 = arith.constant 0 : i32
    %c0_i32_0 = arith.constant 0 : i32
    return %c0_i32, %arg0 : i32, i32
  }
  func.func @transform_6(%arg0: i32, %arg1: i32) -> (i32, i32) {
    %c0_i32 = arith.constant 0 : i32
    %c0_i32_0 = arith.constant 0 : i32
    return %c0_i32, %arg0 : i32, i32
  }
}

module attributes {stable_mosaic.version = 11 : i64} {
  func.func @kernel(%arg0: i32, %arg1: i32, %arg2: memref<128x288xbf16, #tpu.memory_space<vmem>>, %arg3: memref<1x288xf32, #tpu.memory_space<vmem>>, %arg4: memref<1x288xf32, #tpu.memory_space<vmem>>, %arg5: memref<288x64xbf16, #tpu.memory_space<vmem>>, %arg6: memref<128x64xbf16, #tpu.memory_space<vmem>>, %arg7: memref<1x64xf32, #tpu.memory_space<vmem>>, %arg8: memref<1x64xf32, #tpu.memory_space<vmem>>) attributes {dimension_semantics = [#tpu.dimension_semantics<parallel>, #tpu.dimension_semantics<arbitrary>], iteration_bounds = array<i64: 1, 1>, scalar_prefetch = 0 : i64, scratch_operands = 0 : i64, tpu.core_type = #tpu.core_type<tc>, window_params = [{transform_indices = @transform_0, window_bounds = array<i64: 128, 288>}, {pipeline_mode = #tpu.pipeline_mode<synchronous>, transform_indices = @transform_1, window_bounds = array<i64: 1, 288>}, {pipeline_mode = #tpu.pipeline_mode<synchronous>, transform_indices = @transform_2, window_bounds = array<i64: 1, 288>}, {transform_indices = @transform_3, window_bounds = array<i64: 288, 64>}, {transform_indices = @transform_4, window_bounds = array<i64: 128, 64>}, {transform_indices = @transform_5, window_bounds = array<i64: 1, 64>}, {transform_indices = @transform_6, window_bounds = array<i64: 1, 64>}]} {
    %c0 = arith.constant 0 : index
    %c0_0 = arith.constant 0 : index
    %0 = vector.load %arg2[%c0, %c0_0] : memref<128x288xbf16, #tpu.memory_space<vmem>>, vector<128x288xbf16>
    %1 = arith.extf %0 : vector<128x288xbf16> to vector<128x288xf32>
    %c0_1 = arith.constant 0 : index
    %c0_2 = arith.constant 0 : index
    %2 = vector.load %arg3[%c0_1, %c0_2] : memref<1x288xf32, #tpu.memory_space<vmem>>, vector<1x288xf32>
    %3 = vector.broadcast %2 : vector<1x288xf32> to vector<128x288xf32>
    %4 = arith.mulf %1, %3 : vector<128x288xf32>
    %c0_3 = arith.constant 0 : index
    %c0_4 = arith.constant 0 : index
    %5 = vector.load %arg4[%c0_3, %c0_4] : memref<1x288xf32, #tpu.memory_space<vmem>>, vector<1x288xf32>
    %6 = vector.broadcast %5 : vector<1x288xf32> to vector<128x288xf32>
    %7 = arith.addf %4, %6 : vector<128x288xf32>
    %cst = arith.constant 0.000000e+00 : f32
    %8 = vector.broadcast %cst : f32 to vector<128x288xf32>
    %9 = arith.maximumf %7, %8 : vector<128x288xf32>
    %10 = arith.truncf %9 : vector<128x288xf32> to vector<128x288xbf16>
    %c0_5 = arith.constant 0 : index
    %c0_6 = arith.constant 0 : index
    %11 = vector.load %arg5[%c0_5, %c0_6] : memref<288x64xbf16, #tpu.memory_space<vmem>>, vector<288x64xbf16>
    %cst_7 = arith.constant dense<0.000000e+00> : vector<128x64xf32>
    %12 = tpu.matmul %10, %11, %cst_7 {dimension_numbers = #tpu.dot_dimension_numbers<[1], [0], [0], [1], [0, 0, 1, 1], [], []>} : vector<128x288xbf16>, vector<288x64xbf16>, vector<128x64xf32> -> vector<128x64xf32>
    %13 = arith.truncf %12 : vector<128x64xf32> to vector<128x64xbf16>
    %c0_8 = arith.constant 0 : index
    %c0_9 = arith.constant 0 : index
    %14 = vector.load %arg6[%c0_8, %c0_9] : memref<128x64xbf16, #tpu.memory_space<vmem>>, vector<128x64xbf16>
    tpu.vector_store %arg6[%c0_8, %c0_9], %13 {strides = array<i32>} : memref<128x64xbf16, #tpu.memory_space<vmem>>, vector<128x64xbf16>,
    %cst_10 = arith.constant dense<0.000000e+00> : vector<64xf32>
    %15 = vector.multi_reduction <add>, %12, %cst_10 [0] : vector<128x64xf32> to vector<64xf32>
    %16 = vector.shape_cast %15 : vector<64xf32> to vector<1x64xf32>
    %17 = arith.mulf %12, %12 : vector<128x64xf32>
    %cst_11 = arith.constant dense<0.000000e+00> : vector<64xf32>
    %18 = vector.multi_reduction <add>, %17, %cst_11 [0] : vector<128x64xf32> to vector<64xf32>
    %19 = vector.shape_cast %18 : vector<64xf32> to vector<1x64xf32>
    %c0_12 = arith.constant 0 : index
    %c0_13 = arith.constant 0 : index
    %20 = vector.load %arg7[%c0_12, %c0_13] : memref<1x64xf32, #tpu.memory_space<vmem>>, vector<1x64xf32>
    tpu.vector_store %arg7[%c0_12, %c0_13], %16 {strides = array<i32>} : memref<1x64xf32, #tpu.memory_space<vmem>>, vector<1x64xf32>,
    %c0_14 = arith.constant 0 : index
    %c0_15 = arith.constant 0 : index
    %21 = vector.load %arg8[%c0_14, %c0_15] : memref<1x64xf32, #tpu.memory_space<vmem>>, vector<1x64xf32>
    tpu.vector_store %arg8[%c0_14, %c0_15], %19 {strides = array<i32>} : memref<1x64xf32, #tpu.memory_space<vmem>>, vector<1x64xf32>,
    return
  }
  func.func @transform_0(%arg0: i32, %arg1: i32) -> (i32, i32) {
    %c0_i32 = arith.constant 0 : i32
    %c0_i32_0 = arith.constant 0 : i32
    return %arg1, %c0_i32 : i32, i32
  }
  func.func @transform_1(%arg0: i32, %arg1: i32) -> (i32, i32) {
    %c0_i32 = arith.constant 0 : i32
    %c0_i32_0 = arith.constant 0 : i32
    %c0_i32_1 = arith.constant 0 : i32
    return %c0_i32, %c0_i32_0 : i32, i32
  }
  func.func @transform_2(%arg0: i32, %arg1: i32) -> (i32, i32) {
    %c0_i32 = arith.constant 0 : i32
    %c0_i32_0 = arith.constant 0 : i32
    %c0_i32_1 = arith.constant 0 : i32
    return %c0_i32, %c0_i32_0 : i32, i32
  }
  func.func @transform_3(%arg0: i32, %arg1: i32) -> (i32, i32) {
    %c0_i32 = arith.constant 0 : i32
    %c0_i32_0 = arith.constant 0 : i32
    return %c0_i32, %arg0 : i32, i32
  }
  func.func @transform_4(%arg0: i32, %arg1: i32) -> (i32, i32) {
    %c0_i32 = arith.constant 0 : i32
    return %arg1, %arg0 : i32, i32
  }
  func.func @transform_5(%arg0: i32, %arg1: i32) -> (i32, i32) {
    %c0_i32 = arith.constant 0 : i32
    %c0_i32_0 = arith.constant 0 : i32
    return %c0_i32, %arg0 : i32, i32
  }
  func.func @transform_6(%arg0: i32, %arg1: i32) -> (i32, i32) {
    %c0_i32 = arith.constant 0 : i32
    %c0_i32_0 = arith.constant 0 : i32
    return %c0_i32, %arg0 : i32, i32
  }
}

module attributes {stable_mosaic.version = 11 : i64} {
  func.func @kernel(%arg0: i32, %arg1: i32, %arg2: memref<512x144xbf16, #tpu.memory_space<vmem>>, %arg3: memref<1x144xf32, #tpu.memory_space<vmem>>, %arg4: memref<1x144xf32, #tpu.memory_space<vmem>>, %arg5: memref<144x32xbf16, #tpu.memory_space<vmem>>, %arg6: memref<512x32xbf16, #tpu.memory_space<vmem>>, %arg7: memref<1x32xf32, #tpu.memory_space<vmem>>, %arg8: memref<1x32xf32, #tpu.memory_space<vmem>>) attributes {dimension_semantics = [#tpu.dimension_semantics<parallel>, #tpu.dimension_semantics<arbitrary>], iteration_bounds = array<i64: 1, 1>, scalar_prefetch = 0 : i64, scratch_operands = 0 : i64, tpu.core_type = #tpu.core_type<tc>, window_params = [{transform_indices = @transform_0, window_bounds = array<i64: 512, 144>}, {pipeline_mode = #tpu.pipeline_mode<synchronous>, transform_indices = @transform_1, window_bounds = array<i64: 1, 144>}, {pipeline_mode = #tpu.pipeline_mode<synchronous>, transform_indices = @transform_2, window_bounds = array<i64: 1, 144>}, {transform_indices = @transform_3, window_bounds = array<i64: 144, 32>}, {transform_indices = @transform_4, window_bounds = array<i64: 512, 32>}, {transform_indices = @transform_5, window_bounds = array<i64: 1, 32>}, {transform_indices = @transform_6, window_bounds = array<i64: 1, 32>}]} {
    %c0 = arith.constant 0 : index
    %c0_0 = arith.constant 0 : index
    %0 = vector.load %arg2[%c0, %c0_0] : memref<512x144xbf16, #tpu.memory_space<vmem>>, vector<512x144xbf16>
    %1 = arith.extf %0 : vector<512x144xbf16> to vector<512x144xf32>
    %c0_1 = arith.constant 0 : index
    %c0_2 = arith.constant 0 : index
    %2 = vector.load %arg3[%c0_1, %c0_2] : memref<1x144xf32, #tpu.memory_space<vmem>>, vector<1x144xf32>
    %3 = vector.broadcast %2 : vector<1x144xf32> to vector<512x144xf32>
    %4 = arith.mulf %1, %3 : vector<512x144xf32>
    %c0_3 = arith.constant 0 : index
    %c0_4 = arith.constant 0 : index
    %5 = vector.load %arg4[%c0_3, %c0_4] : memref<1x144xf32, #tpu.memory_space<vmem>>, vector<1x144xf32>
    %6 = vector.broadcast %5 : vector<1x144xf32> to vector<512x144xf32>
    %7 = arith.addf %4, %6 : vector<512x144xf32>
    %cst = arith.constant 0.000000e+00 : f32
    %8 = vector.broadcast %cst : f32 to vector<512x144xf32>
    %9 = arith.maximumf %7, %8 : vector<512x144xf32>
    %10 = arith.truncf %9 : vector<512x144xf32> to vector<512x144xbf16>
    %c0_5 = arith.constant 0 : index
    %c0_6 = arith.constant 0 : index
    %11 = vector.load %arg5[%c0_5, %c0_6] : memref<144x32xbf16, #tpu.memory_space<vmem>>, vector<144x32xbf16>
    %cst_7 = arith.constant dense<0.000000e+00> : vector<512x32xf32>
    %12 = tpu.matmul %10, %11, %cst_7 {dimension_numbers = #tpu.dot_dimension_numbers<[1], [0], [0], [1], [0, 0, 1, 1], [], []>} : vector<512x144xbf16>, vector<144x32xbf16>, vector<512x32xf32> -> vector<512x32xf32>
    %13 = arith.truncf %12 : vector<512x32xf32> to vector<512x32xbf16>
    %c0_8 = arith.constant 0 : index
    %c0_9 = arith.constant 0 : index
    %14 = vector.load %arg6[%c0_8, %c0_9] : memref<512x32xbf16, #tpu.memory_space<vmem>>, vector<512x32xbf16>
    tpu.vector_store %arg6[%c0_8, %c0_9], %13 {strides = array<i32>} : memref<512x32xbf16, #tpu.memory_space<vmem>>, vector<512x32xbf16>,
    %cst_10 = arith.constant dense<0.000000e+00> : vector<32xf32>
    %15 = vector.multi_reduction <add>, %12, %cst_10 [0] : vector<512x32xf32> to vector<32xf32>
    %16 = vector.shape_cast %15 : vector<32xf32> to vector<1x32xf32>
    %17 = arith.mulf %12, %12 : vector<512x32xf32>
    %cst_11 = arith.constant dense<0.000000e+00> : vector<32xf32>
    %18 = vector.multi_reduction <add>, %17, %cst_11 [0] : vector<512x32xf32> to vector<32xf32>
    %19 = vector.shape_cast %18 : vector<32xf32> to vector<1x32xf32>
    %c0_12 = arith.constant 0 : index
    %c0_13 = arith.constant 0 : index
    %20 = vector.load %arg7[%c0_12, %c0_13] : memref<1x32xf32, #tpu.memory_space<vmem>>, vector<1x32xf32>
    tpu.vector_store %arg7[%c0_12, %c0_13], %16 {strides = array<i32>} : memref<1x32xf32, #tpu.memory_space<vmem>>, vector<1x32xf32>,
    %c0_14 = arith.constant 0 : index
    %c0_15 = arith.constant 0 : index
    %21 = vector.load %arg8[%c0_14, %c0_15] : memref<1x32xf32, #tpu.memory_space<vmem>>, vector<1x32xf32>
    tpu.vector_store %arg8[%c0_14, %c0_15], %19 {strides = array<i32>} : memref<1x32xf32, #tpu.memory_space<vmem>>, vector<1x32xf32>,
    return
  }
  func.func @transform_0(%arg0: i32, %arg1: i32) -> (i32, i32) {
    %c0_i32 = arith.constant 0 : i32
    %c0_i32_0 = arith.constant 0 : i32
    return %arg1, %c0_i32 : i32, i32
  }
  func.func @transform_1(%arg0: i32, %arg1: i32) -> (i32, i32) {
    %c0_i32 = arith.constant 0 : i32
    %c0_i32_0 = arith.constant 0 : i32
    %c0_i32_1 = arith.constant 0 : i32
    return %c0_i32, %c0_i32_0 : i32, i32
  }
  func.func @transform_2(%arg0: i32, %arg1: i32) -> (i32, i32) {
    %c0_i32 = arith.constant 0 : i32
    %c0_i32_0 = arith.constant 0 : i32
    %c0_i32_1 = arith.constant 0 : i32
    return %c0_i32, %c0_i32_0 : i32, i32
  }
  func.func @transform_3(%arg0: i32, %arg1: i32) -> (i32, i32) {
    %c0_i32 = arith.constant 0 : i32
    %c0_i32_0 = arith.constant 0 : i32
    return %c0_i32, %arg0 : i32, i32
  }
  func.func @transform_4(%arg0: i32, %arg1: i32) -> (i32, i32) {
    %c0_i32 = arith.constant 0 : i32
    return %arg1, %arg0 : i32, i32
  }
  func.func @transform_5(%arg0: i32, %arg1: i32) -> (i32, i32) {
    %c0_i32 = arith.constant 0 : i32
    %c0_i32_0 = arith.constant 0 : i32
    return %c0_i32, %arg0 : i32, i32
  }
  func.func @transform_6(%arg0: i32, %arg1: i32) -> (i32, i32) {
    %c0_i32 = arith.constant 0 : i32
    %c0_i32_0 = arith.constant 0 : i32
    return %c0_i32, %arg0 : i32, i32
  }
}

module attributes {stable_mosaic.version = 11 : i64} {
  func.func @kernel(%arg0: i32, %arg1: i32, %arg2: memref<1024x72xbf16, #tpu.memory_space<vmem>>, %arg3: memref<1x72xf32, #tpu.memory_space<vmem>>, %arg4: memref<1x72xf32, #tpu.memory_space<vmem>>, %arg5: memref<72x12xbf16, #tpu.memory_space<vmem>>, %arg6: memref<1x12xf32, #tpu.memory_space<vmem>>, %arg7: memref<1024x12xf32, #tpu.memory_space<vmem>>) attributes {dimension_semantics = [#tpu.dimension_semantics<parallel>, #tpu.dimension_semantics<parallel>], iteration_bounds = array<i64: 1, 2>, scalar_prefetch = 0 : i64, scratch_operands = 0 : i64, tpu.core_type = #tpu.core_type<tc>, window_params = [{transform_indices = @transform_0, window_bounds = array<i64: 1024, 72>}, {pipeline_mode = #tpu.pipeline_mode<synchronous>, transform_indices = @transform_1, window_bounds = array<i64: 1, 72>}, {pipeline_mode = #tpu.pipeline_mode<synchronous>, transform_indices = @transform_2, window_bounds = array<i64: 1, 72>}, {transform_indices = @transform_3, window_bounds = array<i64: 72, 12>}, {transform_indices = @transform_4, window_bounds = array<i64: 1, 12>}, {transform_indices = @transform_5, window_bounds = array<i64: 1024, 12>}]} {
    %c0 = arith.constant 0 : index
    %c0_0 = arith.constant 0 : index
    %0 = vector.load %arg2[%c0, %c0_0] : memref<1024x72xbf16, #tpu.memory_space<vmem>>, vector<1024x72xbf16>
    %1 = arith.extf %0 : vector<1024x72xbf16> to vector<1024x72xf32>
    %c0_1 = arith.constant 0 : index
    %c0_2 = arith.constant 0 : index
    %2 = vector.load %arg3[%c0_1, %c0_2] : memref<1x72xf32, #tpu.memory_space<vmem>>, vector<1x72xf32>
    %3 = vector.broadcast %2 : vector<1x72xf32> to vector<1024x72xf32>
    %4 = arith.mulf %1, %3 : vector<1024x72xf32>
    %c0_3 = arith.constant 0 : index
    %c0_4 = arith.constant 0 : index
    %5 = vector.load %arg4[%c0_3, %c0_4] : memref<1x72xf32, #tpu.memory_space<vmem>>, vector<1x72xf32>
    %6 = vector.broadcast %5 : vector<1x72xf32> to vector<1024x72xf32>
    %7 = arith.addf %4, %6 : vector<1024x72xf32>
    %cst = arith.constant 0.000000e+00 : f32
    %8 = vector.broadcast %cst : f32 to vector<1024x72xf32>
    %9 = arith.maximumf %7, %8 : vector<1024x72xf32>
    %10 = arith.truncf %9 : vector<1024x72xf32> to vector<1024x72xbf16>
    %c0_5 = arith.constant 0 : index
    %c0_6 = arith.constant 0 : index
    %11 = vector.load %arg5[%c0_5, %c0_6] : memref<72x12xbf16, #tpu.memory_space<vmem>>, vector<72x12xbf16>
    %cst_7 = arith.constant dense<0.000000e+00> : vector<1024x12xf32>
    %12 = tpu.matmul %10, %11, %cst_7 {dimension_numbers = #tpu.dot_dimension_numbers<[1], [0], [0], [1], [0, 0, 1, 1], [], []>} : vector<1024x72xbf16>, vector<72x12xbf16>, vector<1024x12xf32> -> vector<1024x12xf32>
    %c0_8 = arith.constant 0 : index
    %c0_9 = arith.constant 0 : index
    %13 = vector.load %arg6[%c0_8, %c0_9] : memref<1x12xf32, #tpu.memory_space<vmem>>, vector<1x12xf32>
    %14 = vector.broadcast %13 : vector<1x12xf32> to vector<1024x12xf32>
    %15 = arith.addf %12, %14 : vector<1024x12xf32>
    %16 = math.tanh %15 : vector<1024x12xf32>
    %c0_10 = arith.constant 0 : index
    %c0_11 = arith.constant 0 : index
    %17 = vector.load %arg7[%c0_10, %c0_11] : memref<1024x12xf32, #tpu.memory_space<vmem>>, vector<1024x12xf32>
    tpu.vector_store %arg7[%c0_10, %c0_11], %16 {strides = array<i32>} : memref<1024x12xf32, #tpu.memory_space<vmem>>, vector<1024x12xf32>,
    return
  }
  func.func @transform_0(%arg0: i32, %arg1: i32) -> (i32, i32) {
    %c0_i32 = arith.constant 0 : i32
    %c0_i32_0 = arith.constant 0 : i32
    return %arg1, %c0_i32 : i32, i32
  }
  func.func @transform_1(%arg0: i32, %arg1: i32) -> (i32, i32) {
    %c0_i32 = arith.constant 0 : i32
    %c0_i32_0 = arith.constant 0 : i32
    %c0_i32_1 = arith.constant 0 : i32
    return %c0_i32, %c0_i32_0 : i32, i32
  }
  func.func @transform_2(%arg0: i32, %arg1: i32) -> (i32, i32) {
    %c0_i32 = arith.constant 0 : i32
    %c0_i32_0 = arith.constant 0 : i32
    %c0_i32_1 = arith.constant 0 : i32
    return %c0_i32, %c0_i32_0 : i32, i32
  }
  func.func @transform_3(%arg0: i32, %arg1: i32) -> (i32, i32) {
    %c0_i32 = arith.constant 0 : i32
    %c0_i32_0 = arith.constant 0 : i32
    return %c0_i32, %arg0 : i32, i32
  }
  func.func @transform_4(%arg0: i32, %arg1: i32) -> (i32, i32) {
    %c0_i32 = arith.constant 0 : i32
    %c0_i32_0 = arith.constant 0 : i32
    return %c0_i32, %arg0 : i32, i32
  }
  func.func @transform_5(%arg0: i32, %arg1: i32) -> (i32, i32) {
    %c0_i32 = arith.constant 0 : i32
    return %arg1, %arg0 : i32, i32
  }
}

</mosaic_0001>

<bundles_post_ra>
// kernel: tile.89
= control target key start
LH: loop header
LB: loop body
LE: loop exit
PB: predicated region body
PF: predicated region fallthrough
CT: control target
= control target key end

     0   :  { %vm7_vm0 = vcmask 23552   ;;  %s37_s8 = smov 3   ;;  %s38_s9 = smov 6   ;;  %vm13_vm1 = vcmask 97352   ;;  %vm19_vm2 = vcmask 72752   ;;  %vm25_vm3 = vcmask 48152   ;;  %s55_s0 = inlined_call_operand.vmem [shape: f32[4,3], index: 0, kind: input, shape index: {}]   ;;  %s56_s1 = inlined_call_operand.vmem [shape: f32[1,12], index: 1, kind: output, shape index: {}]  }
   0x1   :  { %v4_v0 = vld [vmem:[%s55_s0] sm:$0xf]  ;;  %s36_s0 = smov 9  }
   0x2   :  { %5 = vst [vmem:[#allocation1] sm:$0xf] %v4_v0 }
   0x9   :  { %v10_v1 = vld [vmem:[#allocation1 + $0x3] sm:$0x1]   ;;  %v22_v2 = vld [vmem:[#allocation1 + $0x1] sm:$0x1]   ;;  %v6_v3 = vld [vmem:[#allocation1] sm:$0x1]  }
   0xa   :  { %11 = vrot.lane.b32.xlu0 %v10_v1, %s36_s0  ;;  %23 = vrot.lane.b32.xlu1 %v22_v2, %s37_s8  ;;  %v16_v4 = vld [vmem:[#allocation1 + $0x2] sm:$0x1]   ;;  %8 = vst.msk [vmem:[#allocation0] sm:$0x1] %vm7_vm0, %v6_v3  }
   0xe   :  { %17 = vrot.lane.b32.xlu0 %v16_v4, %s38_s9 }
  0x7c   :  { %v12_v5 = vpop.permute.xlu0 %11   ;;  %v24_v6 = vpop.permute.xlu1 %23  }
  0x7d   :  { %14 = vst.msk [vmem:[#allocation0] sm:$0x1] %vm13_vm1, %v12_v5  }
  0x80   :  { %v18_v7 = vpop.permute.xlu0 %17  }
  0x81   :  { %20 = vst.msk [vmem:[#allocation0] sm:$0x1] %vm19_vm2, %v18_v7  }
  0x82   :  { %26 = vst.msk [vmem:[#allocation0] sm:$0x1] %vm25_vm3, %v24_v6  }
  0x89   :  { %v30_v8 = vld [vmem:[#allocation0] sm:$0x1] }
  0x8a   :  { %32 = vst [vmem:[%s56_s1] sm:$0x1] %v30_v8 }

// kernel: tile.86
= control target key start
LH: loop header
LB: loop body
LE: loop exit
PB: predicated region body
PF: predicated region fallthrough
CT: control target
= control target key end

     0   :  { %2 = vsyncpa [#allocation1], 0  ;;  %s44_s6 = smov [#allocation0]   ;;  %s70_s0 = inlined_call_operand.hbm [shape: f32[3], index: 0, kind: input, shape index: {}]   ;;  %s71_s1 = inlined_call_operand.vmem [shape: f32[4,3], index: 1, kind: output, shape index: {}]  }
   0x1   :  { %s9_s7 = sshll.u32 %s44_s6, 4  ;;  %s20_s10 = scalar_lea.hbm %s70_s0, 16  ;;  %s10_s7 = int_to_ptr.vmem [resolvable:$true] %s9_s7 }
   0x2   :  { %p21_p0 = scmp.ne.s32.totalorder %s70_s0, %s20_s10  ;;  %p24_p1 = scmp.lt.u32.totalorder %s20_s10, %s70_s0 }
   0x4   :  { %p26_p2 = pnand %p24_p1, %p21_p0 }
   0x6   :  { %29 = shalt.err (!%p26_p2)
}
   0x7   :  { %s30_s15 = scalar_lea.vmem %s10_s7, 16  ;;  %s34_s16 = scalar_lea.vmem %s10_s7, 32 }
   0x8   :  { %p31_p3 = scmp.ne.s32.totalorder %s10_s7, %s30_s15  ;;  %p35_p4 = scmp.lt.s32.totalorder %s10_s7, %s10_s7 }
   0x9   :  { %p36_p5 = scmp.lt.s32.totalorder %s34_s16, %s30_s15 }
   0xb   :  { %p37_p6 = por %p36_p5, %p35_p4 }
   0xd   :  { %p38_p7 = pnand %p37_p6, %p31_p3 }
   0xf   :  { %41 = shalt.err (!%p38_p7)
}
  0x10   :  { %12 = dma.hbm_to_vmem [thread:$0]  %s70_s0, 16, %s10_s7, [#allocation1]  }
  0x11   :  { %42 = dma.done.wait [#allocation1], 16  }
  0x12   :  { %43 = vsyncadd [#allocation1], 4294967280  ;;  %v16_v0 = vld [vmem:[#allocation0] ss:$0 sm:$0xff] }
  0x13   :  { %17 = vst [vmem:[%s71_s1] sm:$0xf] %v16_v0 }
  0x14   :  { %18 = vsyncpa [#allocation1], 1 }

// kernel: tile.52
= control target key start
LH: loop header
LB: loop body
LE: loop exit
PB: predicated region body
PF: predicated region fallthrough
CT: control target
= control target key end

     0   :  { %s28_s0 = inlined_call_operand.vmem [shape: f32[64], index: 0, kind: input, shape index: {}]   ;;  %s29_s1 = inlined_call_operand.vmem [shape: f32[9,64], index: 1, kind: output, shape index: {}]  }
   0x1   :  { %v4_v0 = vld [vmem:[%s28_s0] ss:$0 sm:$0xff] }
   0x2   :  { %5 = vst [vmem:[%s29_s1] sm:$0xff] %v4_v0  ;;  %8 = vst [vmem:[%s29_s1 + $0x8] sm:$0xff] %v4_v0 }

// kernel: tile.54
= control target key start
LH: loop header
LB: loop body
LE: loop exit
PB: predicated region body
PF: predicated region fallthrough
CT: control target
= control target key end

     0   :  { %vm3_vm0 = vcmask 523264   ;;  %s51_s8 = smov 64   ;;  %vm11_vm1 = vcmask 1048064   ;;  %s83_s0 = inlined_call_operand.vmem [shape: f32[9,64], index: 0, kind: input, shape index: {}]   ;;  %s84_s1 = inlined_call_operand.vmem [shape: f32[1,576], index: 1, kind: output, shape index: {}]  }
   0x1   :  { %v45_v0 = vld [vmem:[%s83_s0 + $0x1] ss:$2 sm:$0xf]   ;;  %v2_v1 = vld [vmem:[%s83_s0] ss:$2 sm:$0x1f]  }
   0x2   :  { %9 = vrot.lane.b32.xlu0 %v45_v0, %s51_s8  ;;  %4 = vst.msk [vmem:[#allocation0] ss:$8 sm:$0xf] %vm3_vm0, %v2_v1   ;;  %6 = vst.msk [vmem:[#allocation0 + $0x1c] sm:$0x10] %vm3_vm0, %v2_v1  }
   0x9   :  { %v37_v2 = vld [vmem:[#allocation0 + $0x20] sm:$0x1] }
   0xa   :  { %49 = vst [vmem:[%s84_s1 + $0x4] sm:$0x1] %v37_v2 }
  0x74   :  { %v10_v3 = vpop.permute.xlu0 %9  }
  0x75   :  { %12 = vst.msk [vmem:[#allocation0] ss:$8 sm:$0xf] %vm11_vm1, %v10_v3  }
  0x7c   :  { %v16_v4 = vld [vmem:[#allocation0] sm:$0x1]  ;;  %v20_v5 = vld [vmem:[#allocation0 + $0x8] sm:$0x1]  ;;  %v25_v6 = vld [vmem:[#allocation0 + $0x10] sm:$0x1] }
  0x7d   :  { %18 = vst [vmem:[%s84_s1] sm:$0x1] %v16_v4  ;;  %46 = vst [vmem:[%s84_s1 + $0x1] sm:$0x1] %v20_v5  ;;  %v31_v7 = vld [vmem:[#allocation0 + $0x18] sm:$0x1] }
  0x7e   :  { %47 = vst [vmem:[%s84_s1 + $0x2] sm:$0x1] %v25_v6  ;;  %48 = vst [vmem:[%s84_s1 + $0x3] sm:$0x1] %v31_v7 }

// kernel: generator_forward.5
= control target key start
LH: loop header
LB: loop body
LE: loop exit
PB: predicated region body
PF: predicated region fallthrough
CT: control target
= control target key end

     0   :  { %10 = vsyncpa [#allocation3], 0  ;;  %s1071_s0 = inlined_call_operand.vmem [shape: bf16[2,16], index: 0, kind: input, shape index: {}]   ;;  %s1072_s1 = inlined_call_operand.hbm [shape: bf16[16,1024], index: 1, kind: input, shape index: {}]   ;;  %s1073_s2 = inlined_call_operand.vmem [shape: bf16[2,1024], index: 2, kind: output, shape index: {0}]   ;;  %s1074_s3 = inlined_call_operand.vmem [shape: f32[1,1024], index: 3, kind: output, shape index: {1}]   ;;  %s1075_s4 = inlined_call_operand.vmem [shape: f32[1,1024], index: 4, kind: output, shape index: {2}]  }
   0x1   :  { %12 = vsyncpa [#allocation3 + $0x1], 0  ;;  %s906_s15 = smov 0   ;;  %s908_s16 = smov 0  }
   0x2   :  { %s910_s17 = smov 0   ;;  %s912_s18 = smov 0  }
   0x3   :  { %s914_s19 = smov 0   ;;  %s916_s20 = smov 0  }
   0x4 LB: > { %s702_s21 = sadd.s32 4294967295, %s873_s20   ;;  %s30_s22 = sadd.s32 1, %s869_s19  ;;  %s873_s20 = sphi %s916_s20, %s18_s20   ;;  %s869_s19 = sphi %s914_s19, %s1085_s19   ;;  %s865_s18 = sphi %s912_s18, %s1084_s18   ;;  %s861_s17 = sphi %s910_s17, %s1083_s17   ;;  %s857_s16 = sphi %s908_s16, %s1082_s16   ;;  %s853_s15 = sphi %s906_s15, %s1081_s15  }
   0x5   : > { %p32_p0 = scmp.ge.s32.totalorder %s30_s22, 2  ;;  %s63_s23 = sadd.s32 1, %s861_s17 }
   0x6   : > { %p70_p1 = scmp.ne.s32.totalorder %s861_s17, %s857_s16  ;;  %p71_p2 = scmp.eq.s32.totalorder %s873_s20, 0 }
   0x7   : > { %s1087_s22 = smov (%p32_p0, %s30_s22), 0  ;;  %p76_p4 = scmp.ne.s32.totalorder %s857_s16, %s853_s15 }
   0x8   : > { %p942_p3 = por %p71_p2, %p70_p1  ;;  %s60_s25 = ssub.s32 %s869_s19, %s1087_s22 }
   0x9   : > { %p77_p5 = scmp.eq.s32.totalorder %s702_s21, 0  ;;  %p61_p6 = scmp.eq.s32.totalorder %s60_s25, 0 }
   0xa   : > { %p733_p8 = scmp.lt.s32.totalorder %s873_s20, 2  ;;  %s186_s28 = sand.u32 1, %s861_s17  }
   0xb   : > { %p949_p7 = por %p77_p5, %p76_p4  ;;  %s726_s29 = sshll.u32 %s869_s19, 8 }
   0xc   : > { %s955_s27 = scalar_select %p61_p6, %s861_s17, %s63_s23  }
   0xd   : > { %s707_s30 = sshll.u32 %s186_s28, 5  ;;  %s962_s7 = scalar_lea.hbm %s1072_s1, %s726_s29 }
   0xe   : > { %s190_s8 = scalar_lea.vmem [#allocation2], %s707_s30  ;;  %p966_p9 = pnand %p733_p8, %p942_p3 }
   0xf   : > { %s197_s9 = sshll.u32 %s190_s8, 4  ;;  %s973_s11 = scalar_lea.sflag [#allocation3], %s186_s28  ;;  %s970_s9 = int_to_ptr.vmem [resolvable:$true] %s197_s9 }
  0x10   : > { %s793_s12 = scalar_lea.hbm %s962_s7, 512  ;;  %p795_p12 = pneg %p966_p9 }
  0x11   : > { %p794_p11 = scmp.ne.s32.totalorder %s962_s7, %s793_s12  ;;  %s798_s15 = scalar_lea.hbm %s1072_s1, 1024 }
  0x12   : > { %p799_p1 = scmp.lt.u32.totalorder %s962_s7, %s1072_s1  ;;  %p800_p2 = scmp.lt.u32.totalorder %s798_s15, %s793_s12 }
  0x13   : > { %p796_p13 = pnand %p795_p12, %p794_p11  ;;  %p802_p4 = scmp.lt.u32.totalorder %s793_s12, %s962_s7 }
  0x14   : > { %p801_p3 = por %p800_p2, %p799_p1 }
  0x15   : > { %p797_p0 = pneg %p796_p13 }
  0x16   : > { %p803_p5 = por %p802_p4, %p801_p3 }
  0x18   : > { %p804_p6 = pnand %p803_p5, %p797_p0 }
  0x1a   : > { %807 = shalt.err (!%p804_p6)
}
  0x1b   : > { %s808_s24 = scalar_lea.vmem %s970_s9, 512  ;;  %s875_s25 = smov [#allocation2]  }
  0x1c   : > { %p809_p8 = scmp.ne.s32.totalorder %s970_s9, %s808_s24  ;;  %s813_s28 = sshll.u32 %s875_s25, 4  ;;  %s814_s28 = int_to_ptr.vmem [resolvable:$false] %s813_s28 }
  0x1d   : > { %s815_s29 = scalar_lea.vmem %s814_s28, 1024  ;;  %p816_p10 = scmp.lt.s32.totalorder %s970_s9, %s814_s28 }
  0x1e   : > { %p811_p11 = pnand %p809_p8, %p795_p12  ;;  %p817_p1 = scmp.lt.s32.totalorder %s815_s29, %s808_s24 }
  0x20   : > { %p812_p13 = pneg %p811_p11  ;;  %p818_p2 = por %p817_p1, %p816_p10 }
  0x22   : > { %p819_p3 = pnand %p818_p2, %p812_p13 }
  0x24   : > { %822 = shalt.err (!%p819_p3)
}
  0x25   : > { %s876_s30 = smov 512   ;;  %s877_s5 = smov 256  }
  0x26   : > { %s878_s6 = smov 16   ;;  %p205_p12 = scmp.lt.s32.totalorder %s873_s20, 3 }
  0x27   : > { %732 = dma.hbm_to_vmem [thread:$0]  (!%p966_p9), %s962_s7, 512, %s970_s9, %s973_s11, %s876_s30, %s877_s5, %s878_s6  }
  0x28   : > { %p1079_p0 = scmp.ge.s32.totalorder %s873_s20, 1 }
  0x2a   : > { %p206_p4 = pnand %p1079_p0, %p205_p12 }
  0x2b   : > { %s211_s8 = sand.u32 (!%p206_p4), 1, %s857_s16  }
  0x2c   : > { %209 = sbr.rel (%p206_p4) target bundleno = 303 (0x12f), region = 28  ;;  %s711_s12 = sshll.u32 (!%p206_p4), %s211_s8, 5 }
  0x2d   : > { %s212_s13 = scalar_lea.sflag (!%p206_p4), [#allocation3], %s211_s8  ;;  %s215_s14 = scalar_lea.vmem (!%p206_p4), [#allocation2], %s711_s12 }
  0x33   : > { %848 = dma.done.wait (%p949_p7), %s212_s13, 512  }
  0x34   : > { %850 = vsyncadd (%p949_p7), %s212_s13, 4294966784  ;;  %v879_v0 = vmov 0   ;;  %v787_v1 = vld [vmem:[%s215_s14 + $0x4] ss:$16 sps:$4 sm:$0xff]   ;;  %v789_v2 = vld [vmem:[%s215_s14 + $0xc] ss:$16 sps:$4 sm:$0xff]   ;;  %v402_v8 = vlaneseq }
  0x35   : > { %339 = vmatprep.mubr.bf16.mxu0 %v879_v0  ;;  %380 = vmatprep.mubr.bf16.mxu1 %v879_v0  ;;  %v791_v3 = vld [vmem:[%s215_s14] ss:$16 sps:$4 sm:$0xff]   ;;  %v792_v4 = vld [vmem:[%s215_s14 + $0x8] ss:$16 sps:$4 sm:$0xff]   ;;  %vm303_vm0 = vcmask 130048   ;;  %s712_s26 = sshll.u32 %s865_s18, 2 }
  0x36   : > { %307 = vmatprep.subr.bf16.mxu0 %v787_v1  ;;  %348 = vmatprep.subr.bf16.mxu1 %v789_v2  ;;  %v278_v5 = vld [vmem:[%s1071_s0] sm:$0x1]  ;;  %v880_v6 = vmov 1966171168   ;;  %v403_v10 = vshrl.u32 %v402_v8, 7  ;;  %vm423_vm1 = vcmask 1041408  }
  0x37   : > { %308 = vmatpush1.bf16.msra.mxu0 %v791_v3  ;;  %349 = vmatpush1.bf16.msra.mxu1 %v792_v4  ;;  %v400_v7 = vunpack.c.l.s4 %v880_v6  ;;  %p1016_p7 = scmp.lt.s32.totalorder %s712_s26, 7  ;;  %vm515_vm2 = vcmp.lt.s32.totalorder %v402_v8, 512 }
  0x39   : > { %v401_v9 = vunpack.c.0.s8 %v400_v7  ;;  %s1089_s26 = smov (!%p1016_p7, %s712_s26), 7 }
  0x3a   : > { %719 = vmatmul.mubr.msk.bf16.vlgmr.msra.gmra.mrb[0].mxu0 %vm303_vm0, %v278_v5  ;;  %720 = vmatmul.mubr.msk.bf16.vlgmr.msra.gmra.mrb[0].mxu1 %vm303_vm0, %v278_v5  ;;  %s265_s15 = scalar_lea.vmem %s1073_s2, %s1089_s26  ;;  %s270_s24 = scalar_lea.vmem %s1074_s3, %s1089_s26 }
  0x3b   : > { %v1014_v13 = vsub.s32 %v401_v9, %v403_v10  ;;  %s275_s29 = scalar_lea.vmem %s1075_s4, %s1089_s26 }
 0x10d   : > { %v341_v11 = vpop.f32.mrb[0].mxu0  ;;  %v382_v12 = vpop.f32.mrb[0].mxu1 }
 0x10e   : > { %v424_v14 = vsel %vm423_vm1, %v341_v11, 0.0  ;;  %v452_v15 = vmul.f32 %v341_v11, %v341_v11  ;;  %v438_v16 = vsel %vm423_vm1, %v382_v12, 0.0  ;;  %v454_v17 = vmul.f32 %v382_v12, %v382_v12  ;;  %v343_v18 = vpop.f32.mrb[1].mxu0  ;;  %v384_v19 = vpop.f32.mrb[1].mxu1 }
 0x10f   : > { %v425_v20 = vrot.slane %v424_v14, 4  ;;  %v439_v21 = vrot.slane %v438_v16, 4  ;;  %v721_v22 = vpack.c.bf16 %v343_v18, %v341_v11  ;;  %v431_v23 = vsel %vm423_vm1, %v343_v18, 0.0  ;;  %v345_v24 = vpop.f32.mrb[2].mxu0  ;;  %v386_v25 = vpop.f32.mrb[2].mxu1 }
 0x110   : > { %v456_v26 = vsel %vm423_vm1, %v452_v15, 0.0  ;;  %v470_v27 = vsel %vm423_vm1, %v454_v17, 0.0  ;;  %v432_v28 = vrot.slane %v431_v23, 4  ;;  %v453_v29 = vmul.f32 %v343_v18, %v343_v18  ;;  %v346_v30 = vpop.f32.mrb[3].mxu0  ;;  %v387_v31 = vpop.f32.mrb[3].mxu1 }
 0x111   : > { %v426_v32 = vadd.f32 %v425_v20, %v424_v14  ;;  %v457_v33 = vrot.slane %v456_v26, 4  ;;  %v440_v34 = vadd.f32 %v439_v21, %v438_v16  ;;  %v471_v35 = vrot.slane %v470_v27, 4 }
 0x112   : > { %v405_v36 = vrot.slane %v721_v22, %v1014_v13  ;;  %v433_v37 = vadd.f32 %v432_v28, %v431_v23  ;;  %v463_v38 = vsel %vm423_vm1, %v453_v29, 0.0  ;;  %v722_v39 = vpack.c.bf16 %v384_v19, %v382_v12 }
 0x113   : > { %v427_v40 = vrot.slane %v426_v32, 2  ;;  %v458_v41 = vadd.f32 %v457_v33, %v456_v26  ;;  %v441_v42 = vrot.slane %v440_v34, 2  ;;  %v472_v43 = vadd.f32 %v471_v35, %v470_v27 }
 0x114   : > { %v434_v44 = vrot.slane %v433_v37, 2  ;;  %v464_v45 = vrot.slane %v463_v38, 4  ;;  %v412_v46 = vrot.slane %v722_v39, %v1014_v13  ;;  %v445_v47 = vsel %vm423_vm1, %v384_v19, 0.0 }
 0x115   : > { %v428_v48 = vadd.f32 %v427_v40, %v426_v32  ;;  %v459_v49 = vrot.slane %v458_v41, 2  ;;  %v442_v50 = vadd.f32 %v441_v42, %v440_v34  ;;  %v446_v54 = vrot.slane %v445_v47, 4 }
 0x116   : > { %v435_v51 = vadd.f32 %v434_v44, %v433_v37  ;;  %v465_v52 = vadd.f32 %v464_v45, %v463_v38  ;;  %v413_v53 = vcombine.low %v405_v36, %v412_v46  ;;  %v473_v57 = vrot.slane %v472_v43, 2 }
 0x117   : > { %v429_v55 = vrot.slane %v428_v48, 1  ;;  %v460_v56 = vadd.f32 %v459_v49, %v458_v41  ;;  %v447_v60 = vadd.f32 %v446_v54, %v445_v47  ;;  %v455_v61 = vmul.f32 %v384_v19, %v384_v19 }
 0x118   : > { %v436_v58 = vrot.slane %v435_v51, 1  ;;  %v466_v59 = vrot.slane %v465_v52, 2  ;;  %723 = vst.sshfl [vmem:[%s265_s15] sm:$0x55 pattern:$0x73625140] %v413_v53  ;;  %v443_v0 = vrot.slane %v442_v50, 1  ;;  %v474_v5 = vadd.f32 %v473_v57, %v472_v43 }
 0x119   : > { %v430_v62 = vadd.f32 %v429_v55, %v428_v48  ;;  %v461_v63 = vrot.slane %v460_v56, 1  ;;  %v448_v3 = vrot.slane %v447_v60, 2  ;;  %v477_v4 = vsel %vm423_vm1, %v455_v61, 0.0 }
 0x11a   : > { %v437_v1 = vadd.f32 %v436_v58, %v435_v51  ;;  %v467_v2 = vadd.f32 %v466_v59, %v465_v52  ;;  %v478_v6 = vrot.slane %v477_v4, 4  ;;  %v444_v14 = vadd.f32 %v443_v0, %v442_v50 }
 0x11b   : > { %v462_v7 = vadd.f32 %v461_v63, %v460_v56  ;;  %v449_v11 = vadd.f32 %v448_v3, %v447_v60  ;;  %v475_v17 = vrot.slane %v474_v5, 1 }
 0x11c   : > { %v468_v9 = vrot.slane %v467_v2, 1  ;;  %v488_v10 = vcombine.low %v430_v62, %v437_v1  ;;  %v479_v12 = vadd.f32 %v478_v6, %v477_v4 }
 0x11d   : > { %v450_v16 = vrot.slane %v449_v11, 1  ;;  %v476_v24 = vadd.f32 %v475_v17, %v474_v5 }
 0x11e   : > { %v469_v15 = vadd.f32 %v468_v9, %v467_v2  ;;  %v480_v18 = vrot.slane %v479_v12, 2  ;;  %v496_v22 = vrot.slane %v488_v10, %v1014_v13 }
 0x11f   : > { %v451_v20 = vadd.f32 %v450_v16, %v449_v11 }
 0x120   : > { %v522_v19 = vcombine.low %v462_v7, %v469_v15  ;;  %v481_v21 = vadd.f32 %v480_v18, %v479_v12 }
 0x121   : > { %v489_v23 = vcombine.low %v444_v14, %v451_v20 }
 0x122   : > { %v482_v25 = vrot.slane %v481_v21, 1  ;;  %v530_v29 = vrot.slane %v522_v19, %v1014_v13 }
 0x123   : > { %v503_v26 = vrot.slane %v489_v23, %v1014_v13 }
 0x124   : > { %v483_v27 = vadd.f32 %v482_v25, %v481_v21 }
 0x125   : > { %v504_v28 = vcombine.low %v496_v22, %v503_v26 }
 0x126   : > { %v523_v30 = vcombine.low %v476_v24, %v483_v27 }
 0x127   : > { %v511_v31 = vrot.slane %v504_v28, %v1014_v13 }
 0x128   : > { %v537_v32 = vrot.slane %v523_v30, %v1014_v13 }
 0x129   : > { %517 = vst.msk [vmem:[%s270_s24] sm:$0xf] %vm515_vm2, %v511_v31 }
 0x12a   : > { %v538_v33 = vcombine.low %v530_v29, %v537_v32 }
 0x12c   : > { %v545_v34 = vrot.slane %v538_v33, %v1014_v13 }
 0x12e   : > { %547 = vst.msk [vmem:[%s275_s29] sm:$0xf] %vm515_vm2, %v545_v34 }
 0x12f PF: > { %s18_s20 = sadd.s32 1, %s873_s20   ;;  %s1081_s15 = smov %s857_s16 }
 0x130   : > { %p15_p9 = scmp.ge.s32.totalorder %s18_s20, 4   ;;  %s1082_s16 = smov %s861_s17 }
 0x131   : > { %s1083_s17 = smov %s955_s27  ;;  %s1084_s18 = smov %s869_s19 }
 0x132   : > { %s1085_s19 = smov %s1087_s22  ;;  %17 = sbr.rel (!%p15_p9) target bundleno = 4 (0x4), region = 95 }
 0x139   :  { %606 = vsyncpa [#allocation3], 1 }
 0x13a   :  { %608 = vsyncpa [#allocation3 + $0x1], 1 }

// kernel: tile.62
= control target key start
LH: loop header
LB: loop body
LE: loop exit
PB: predicated region body
PF: predicated region fallthrough
CT: control target
= control target key end

     0   :  { %s28_s0 = inlined_call_operand.vmem [shape: f32[32], index: 0, kind: input, shape index: {}]   ;;  %s29_s1 = inlined_call_operand.vmem [shape: f32[9,32], index: 1, kind: output, shape index: {}]  }
   0x1   :  { %v4_v0 = vld [vmem:[%s28_s0] ss:$0 sm:$0xff] }
   0x2   :  { %5 = vst [vmem:[%s29_s1] sm:$0xff] %v4_v0  ;;  %8 = vst [vmem:[%s29_s1 + $0x8] sm:$0xff] %v4_v0 }

// kernel: tile.64
= control target key start
LH: loop header
LB: loop body
LE: loop exit
PB: predicated region body
PF: predicated region fallthrough
CT: control target
= control target key end

     0   :  { %s6_s6 = smov 3  ;;  %s13_s11 = smov 3  ;;  %vm3_vm0 = vcmask 261120   ;;  %vm10_vm1 = vcmask 1048320   ;;  %vm17_vm2 = vcmask 785920   ;;  %vm24_vm3 = vcmask 523520   ;;  %s86_s0 = inlined_call_operand.vmem [shape: f32[9,32], index: 0, kind: input, shape index: {}]   ;;  %s87_s1 = inlined_call_operand.vmem [shape: f32[1,288], index: 1, kind: output, shape index: {}]  }
   0x1   :  { %v2_v0 = vld [vmem:[%s86_s0] ss:$4 sm:$0x7]   ;;  %v44_v1 = vld [vmem:[%s86_s0 + $0x3] ss:$4 sm:%s6_s6]   ;;  %s52_s12 = smov 96  }
   0x2   :  { %8 = vrot.lane.b32.xlu0 %v44_v1, %s52_s12  ;;  %s20_s13 = smov 3  ;;  %4 = vst.msk [vmem:[#allocation0] ss:$8 sm:$0x7] %vm3_vm0, %v2_v0   ;;  %v45_v2 = vld [vmem:[%s86_s0 + $0x2] ss:$4 sm:%s13_s11]  }
   0x3   :  { %v46_v3 = vld [vmem:[%s86_s0 + $0x1] ss:$4 sm:%s20_s13]   ;;  %s53_s0 = smov 32   ;;  %s54_s18 = smov 64  }
   0x4   :  { %22 = vrot.lane.b32.xlu1 %v46_v3, %s53_s0 }
   0x6   :  { %15 = vrot.lane.b32.xlu0 %v45_v2, %s54_s18 }
   0x9   :  { %v38_v4 = vld [vmem:[#allocation0 + $0x10] sm:$0x1] }
   0xa   :  { %48 = vst [vmem:[%s87_s1 + $0x2] sm:$0x1] %v38_v4 }
  0x74   :  { %v9_v5 = vpop.permute.xlu0 %8  }
  0x75   :  { %11 = vst.msk [vmem:[#allocation0] ss:$8 sm:$0x3] %vm10_vm1, %v9_v5  }
  0x76   :  { %v23_v6 = vpop.permute.xlu1 %22  }
  0x78   :  { %v16_v7 = vpop.permute.xlu0 %15  }
  0x79   :  { %18 = vst.msk [vmem:[#allocation0] ss:$8 sm:$0x3] %vm17_vm2, %v16_v7  }
  0x7a   :  { %25 = vst.msk [vmem:[#allocation0] ss:$8 sm:$0x3] %vm24_vm3, %v23_v6  }
  0x81   :  { %v29_v8 = vld [vmem:[#allocation0] sm:$0x1]  ;;  %v33_v9 = vld [vmem:[#allocation0 + $0x8] sm:$0x1] }
  0x82   :  { %31 = vst [vmem:[%s87_s1] sm:$0x1] %v29_v8  ;;  %47 = vst [vmem:[%s87_s1 + $0x1] sm:$0x1] %v33_v9 }

// kernel: generator_forward.6
= control target key start
LH: loop header
LB: loop body
LE: loop exit
PB: predicated region body
PF: predicated region fallthrough
CT: control target
= control target key end

     0   :  { %12 = vsyncpa [#allocation3], 0  ;;  %s884_s21 = smov [#allocation2]   ;;  %s1031_s0 = inlined_call_operand.vmem [shape: bf16[32,576], index: 0, kind: input, shape index: {}]   ;;  %s1032_s1 = inlined_call_operand.vmem [shape: f32[1,576], index: 1, kind: input, shape index: {}]   ;;  %s1033_s2 = inlined_call_operand.vmem [shape: f32[1,576], index: 2, kind: input, shape index: {}]   ;;  %s1034_s3 = inlined_call_operand.hbm [shape: bf16[576,128], index: 3, kind: input, shape index: {}]   ;;  %s1035_s4 = inlined_call_operand.vmem [shape: bf16[32,128], index: 4, kind: output, shape index: {0}]   ;;  %s1036_s5 = inlined_call_operand.vmem [shape: f32[1,128], index: 5, kind: output, shape index: {1}]   ;;  %s1037_s6 = inlined_call_operand.vmem [shape: f32[1,128], index: 6, kind: output, shape index: {2}]  }
   0x1   :  { %s24_s22 = sshll.u32 %s884_s21, 4  ;;  %s860_s25 = scalar_lea.hbm %s1034_s3, 4608  ;;  %s25_s22 = int_to_ptr.vmem [resolvable:$true] %s24_s22 }
   0x2   :  { %p861_p0 = scmp.ne.s32.totalorder %s1034_s3, %s860_s25  ;;  %p864_p1 = scmp.lt.u32.totalorder %s860_s25, %s1034_s3 }
   0x4   :  { %p866_p2 = pnand %p864_p1, %p861_p0 }
   0x6   :  { %869 = shalt.err (!%p866_p2)
}
   0x7   :  { %s870_s30 = scalar_lea.vmem %s25_s22, 4608  ;;  %p875_p4 = scmp.lt.s32.totalorder %s25_s22, %s25_s22 }
   0x8   :  { %p871_p3 = scmp.ne.s32.totalorder %s25_s22, %s870_s30  ;;  %p876_p5 = scmp.lt.s32.totalorder %s870_s30, %s870_s30 }
   0xa   :  { %p877_p6 = por %p876_p5, %p875_p4 }
   0xc   :  { %p878_p7 = pnand %p877_p6, %p871_p3 }
   0xe   :  { %881 = shalt.err (!%p878_p7)
}
   0xf   :  { %s885_s7 = smov 64   ;;  %s886_s8 = smov 4  }
  0x10   :  { %30 = dma.hbm_to_vmem [thread:$0]  %s1034_s3, 4608, %s25_s22, [#allocation3], %s885_s7, %s885_s7, %s886_s8  }
  0x11   :  { %882 = dma.done.wait [#allocation3], 4608  }
  0x12   :  { %883 = vsyncadd [#allocation3], 4294962688  ;;  %v824_v0 = vld [vmem:[#allocation2 + $0x40] sm:$0xff]   ;;  %v828_v4 = vld [vmem:[#allocation2 + $0x48] sm:$0xff]   ;;  %v69_v22 = vlaneseq  ;;  %vm479_vm0 = vcmask 523264  }
  0x13   :  { %v825_v1 = vld [vmem:[#allocation2 + $0xc0] sm:$0xff]   ;;  %747 = vmatprep.subr.bf16.mxu0 %v824_v0  ;;  %v829_v5 = vld [vmem:[#allocation2 + $0xc8] sm:$0xff]   ;;  %v832_v8 = vld [vmem:[#allocation2 + $0x50] sm:$0xff]  }
  0x14   :  { %v826_v2 = vld [vmem:[#allocation2] sm:$0xff]   ;;  %775 = vmatprep.subr.bf16.mxu1 %v825_v1  ;;  %v830_v6 = vld [vmem:[#allocation2 + $0x8] sm:$0xff]   ;;  %v833_v9 = vld [vmem:[#allocation2 + $0xd0] sm:$0xff]   ;;  %v934_v27 = vshrl.u32 %v69_v22, 7 }
  0x15   :  { %v827_v3 = vld [vmem:[#allocation2 + $0x80] sm:$0xff]   ;;  %748 = vmatpush3.bf16.msra.mxu0 %v826_v2  ;;  %v831_v7 = vld [vmem:[#allocation2 + $0x88] sm:$0xff]   ;;  %v834_v10 = vld [vmem:[#allocation2 + $0x10] sm:$0xff]  }
  0x16   :  { %776 = vmatpush3.bf16.msra.mxu1 %v827_v3  ;;  %749 = vmatprep.subr.bf16.mxu0 %v828_v4  ;;  %v835_v11 = vld [vmem:[#allocation2 + $0x90] sm:$0xff]   ;;  %v836_v12 = vld [vmem:[#allocation2 + $0x58] sm:$0xff]   ;;  %v840_v16 = vld [vmem:[#allocation2 + $0x60] sm:$0xff]   ;;  %v75_v32 = vsub.s32 1, %v934_v27  ;;  %v83_v34 = vsub.s32 3, %v934_v27  ;;  %v71_v36 = vsub.s32 0, %v934_v27 }
  0x17   :  { %777 = vmatprep.subr.bf16.mxu1 %v829_v5  ;;  %v837_v13 = vld [vmem:[#allocation2 + $0xd8] sm:$0xff]   ;;  %v841_v17 = vld [vmem:[#allocation2 + $0xe0] sm:$0xff]   ;;  %v844_v20 = vld [vmem:[#allocation2 + $0x68] sm:$0xff]   ;;  %v79_v40 = vsub.s32 2, %v934_v27  ;;  %v87_v41 = vsub.s32 4, %v934_v27 }
  0x18   :  { %v838_v14 = vld [vmem:[#allocation2 + $0x18] sm:$0xff]   ;;  %v842_v18 = vld [vmem:[#allocation2 + $0x20] sm:$0xff]   ;;  %v845_v21 = vld [vmem:[#allocation2 + $0xe8] sm:$0xff]  }
  0x19   :  { %750 = vmatpush3.bf16.msra.mxu0 %v830_v6  ;;  %v839_v15 = vld [vmem:[#allocation2 + $0x98] sm:$0xff]   ;;  %v843_v19 = vld [vmem:[#allocation2 + $0xa0] sm:$0xff]   ;;  %v846_v23 = vld [vmem:[#allocation2 + $0x28] sm:$0xff]  }
  0x1a   :  { %778 = vmatpush3.bf16.msra.mxu1 %v831_v7  ;;  %751 = vmatprep.subr.bf16.mxu0 %v832_v8  ;;  %v847_v24 = vld [vmem:[#allocation2 + $0xa8] sm:$0xff]   ;;  %v848_v25 = vld [vmem:[#allocation2 + $0x70] sm:$0xff]   ;;  %v852_v30 = vld [vmem:[#allocation2 + $0x78] sm:$0xff]  }
  0x1b   :  { %779 = vmatprep.subr.bf16.mxu1 %v833_v9  ;;  %v849_v26 = vld [vmem:[#allocation2 + $0xf0] sm:$0xff]   ;;  %v853_v31 = vld [vmem:[#allocation2 + $0xf8] sm:$0xff]   ;;  %v38_v38 = vld [vmem:[%s1031_s0 + $0x14] sm:$0xff] }
  0x1c   :  { %v850_v28 = vld [vmem:[#allocation2 + $0x30] sm:$0xff]   ;;  %v854_v33 = vld [vmem:[#allocation2 + $0x38] sm:$0xff]   ;;  %v52_v44 = vunpack.c.l.bf16 %v38_v38  ;;  %v53_v45 = vunpack.c.h.bf16 %v38_v38  ;;  %v856_v53 = vld [vmem:[#allocation2 + $0x100] sm:$0xff]  }
  0x1d   :  { %752 = vmatpush3.bf16.msra.mxu0 %v834_v10  ;;  %v851_v29 = vld [vmem:[#allocation2 + $0xb0] sm:$0xff]   ;;  %v855_v35 = vld [vmem:[#allocation2 + $0xb8] sm:$0xff]  }
  0x1e   :  { %780 = vmatpush3.bf16.msra.mxu1 %v835_v11  ;;  %753 = vmatprep.subr.bf16.mxu0 %v836_v12  ;;  %v35_v37 = vld [vmem:[%s1031_s0] sm:$0xff]  ;;  %v36_v47 = vld [vmem:[%s1031_s0 + $0x8] sm:$0xff] }
  0x1f   :  { %781 = vmatprep.subr.bf16.mxu1 %v837_v13  ;;  %v948_v39 = vld [vmem:[%s1032_s1] sm:$0x1f]  ;;  %v47_v42 = vunpack.c.l.bf16 %v35_v37  ;;  %v48_v43 = vunpack.c.h.bf16 %v35_v37  ;;  %v49_v51 = vunpack.c.l.bf16 %v36_v47  ;;  %v50_v52 = vunpack.c.h.bf16 %v36_v47  ;;  %v41_v10 = vld [vmem:[%s1031_s0 + $0x28] sm:$0xff] }
  0x20   :  { %v955_v46 = vld [vmem:[%s1033_s2] sm:$0x1f]  ;;  %v76_v49 = vrot.slane %v948_v39, %v75_v32  ;;  %v84_v56 = vrot.slane %v948_v39, %v83_v34  ;;  %v72_v60 = vrot.slane %v948_v39, %v71_v36  ;;  %v80_v0 = vrot.slane %v948_v39, %v79_v40 }
  0x21   :  { %754 = vmatpush3.bf16.msra.mxu0 %v838_v14  ;;  %v39_v48 = vld [vmem:[%s1031_s0 + $0x1c] sm:$0xff]  ;;  %v965_v50 = vrot.slane %v955_v46, %v75_v32  ;;  %v969_v57 = vrot.slane %v955_v46, %v83_v34  ;;  %v973_v61 = vrot.slane %v955_v46, %v71_v36  ;;  %v977_v1 = vrot.slane %v955_v46, %v79_v40 }
  0x22   :  { %782 = vmatpush3.bf16.msra.mxu1 %v839_v15  ;;  %755 = vmatprep.subr.bf16.mxu0 %v840_v16  ;;  %v54_v54 = vunpack.c.l.bf16 %v39_v48  ;;  %v55_v55 = vunpack.c.h.bf16 %v39_v48  ;;  %v95_v58 = vmul.f32 %v76_v49, %v48_v43  ;;  %v100_v59 = vmul.f32 %v76_v49, %v53_v45  ;;  %v44_v15 = vld [vmem:[%s1031_s0 + $0x3c] sm:$0xff] }
  0x23   :  { %783 = vmatprep.subr.bf16.mxu1 %v841_v17  ;;  %v97_v62 = vmul.f32 %v84_v56, %v50_v52  ;;  %v94_v4 = vmul.f32 %v72_v60, %v47_v42  ;;  %v99_v5 = vmul.f32 %v72_v60, %v52_v44  ;;  %v96_v8 = vmul.f32 %v80_v0, %v49_v51  ;;  %v857_v32 = vld [vmem:[#allocation2 + $0x108] sm:$0xff]  }
  0x24   :  { %v102_v63 = vmul.f32 %v84_v56, %v55_v55  ;;  %v142_v2 = vadd.f32 %v965_v50, %v95_v58  ;;  %v147_v3 = vadd.f32 %v965_v50, %v100_v59  ;;  %v101_v9 = vmul.f32 %v80_v0, %v54_v54  ;;  %v37_v54 = vld [vmem:[%s1031_s0 + $0x10] ss:$20 sps:$4 sm:$0xff]  }
  0x25   :  { %756 = vmatpush3.bf16.msra.mxu0 %v842_v18  ;;  %v144_v6 = vadd.f32 %v969_v57, %v97_v62  ;;  %v141_v13 = vadd.f32 %v973_v61, %v94_v4  ;;  %v146_v14 = vadd.f32 %v973_v61, %v99_v5  ;;  %v143_v18 = vadd.f32 %v977_v1, %v96_v8  ;;  %v43_v5 = vld [vmem:[%s1031_s0 + $0x38] ss:$20 sps:$4 sm:$0xff]  }
  0x26   :  { %784 = vmatpush3.bf16.msra.mxu1 %v843_v19  ;;  %757 = vmatprep.subr.bf16.mxu0 %v844_v20  ;;  %v149_v7 = vadd.f32 %v969_v57, %v102_v63  ;;  %v162_v11 = vmax.f32 %v142_v2, 0.0  ;;  %v167_v12 = vmax.f32 %v147_v3, 0.0  ;;  %v148_v19 = vadd.f32 %v977_v1, %v101_v9  ;;  %v42_v20 = vld [vmem:[%s1031_s0 + $0x30] sm:$0xff] }
  0x27   :  { %785 = vmatprep.subr.bf16.mxu1 %v845_v21  ;;  %v164_v16 = vmax.f32 %v144_v6, 0.0  ;;  %v45_v21 = vld [vmem:[%s1031_s0 + $0x44] sm:$0xff]  ;;  %v60_v34 = vunpack.c.h.bf16 %v42_v20  ;;  %v57_v38 = vunpack.c.l.bf16 %v41_v10  ;;  %v62_v40 = vunpack.c.l.bf16 %v44_v15 }
  0x28   :  { %v169_v17 = vmax.f32 %v149_v7, 0.0  ;;  %v182_v22 = vpack.c.bf16 %v167_v12, %v162_v11  ;;  %v59_v45 = vunpack.c.l.bf16 %v42_v20  ;;  %v64_v52 = vunpack.c.l.bf16 %v45_v21 }
  0x29   :  { %758 = vmatpush3.bf16.msra.mxu0 %v846_v23  ;;  %v161_v23 = vmax.f32 %v141_v13, 0.0  ;;  %v107_v43 = vmul.f32 %v84_v56, %v60_v34  ;;  %v104_v48 = vmul.f32 %v72_v60, %v57_v38  ;;  %v109_v51 = vmul.f32 %v72_v60, %v62_v40  ;;  %v859_v13 = vld [vmem:[#allocation2 + $0x118] sm:$0xff]  }
  0x2a   :  { %786 = vmatpush3.bf16.msra.mxu1 %v847_v24  ;;  %759 = vmatprep.subr.bf16.mxu0 %v848_v25  ;;  %v166_v24 = vmax.f32 %v146_v14, 0.0  ;;  %v58_v25 = vunpack.c.h.bf16 %v41_v10  ;;  %v106_v59 = vmul.f32 %v80_v0, %v59_v45  ;;  %v111_v63 = vmul.f32 %v80_v0, %v64_v52 }
  0x2b   :  { %787 = vmatprep.subr.bf16.mxu1 %v849_v26  ;;  %v184_v26 = vpack.c.bf16 %v169_v17, %v164_v16  ;;  %518 = vmatprep.mubr.bf16.mxu0 %v182_v22  ;;  %v154_v55 = vadd.f32 %v969_v57, %v107_v43  ;;  %v51_v4 = vunpack.c.l.bf16 %v37_v54  ;;  %v88_v0 = vrot.slane %v948_v39, %v87_v41 }
  0x2c   :  { %v153_v3 = vadd.f32 %v977_v1, %v106_v59  ;;  %v158_v8 = vadd.f32 %v977_v1, %v111_v63  ;;  %v135_v14 = vrot.slane %v955_v46, %v87_v41  ;;  %v66_v17 = vunpack.c.h.bf16 %v43_v5 }
  0x2d   :  { %760 = vmatpush3.bf16.msra.mxu0 %v850_v28  ;;  %v163_v28 = vmax.f32 %v143_v18, 0.0  ;;  %567 = vmatprep.mubr.bf16.mxu1 %v184_v26  ;;  %v174_v60 = vmax.f32 %v154_v55, 0.0  ;;  %v98_v16 = vmul.f32 %v88_v0, %v51_v4 }
  0x2e   :  { %788 = vmatpush3.bf16.msra.mxu1 %v851_v29  ;;  %761 = vmatprep.subr.bf16.mxu0 %v852_v30  ;;  %v168_v29 = vmax.f32 %v148_v19, 0.0  ;;  %v63_v30 = vunpack.c.h.bf16 %v44_v15  ;;  %v173_v10 = vmax.f32 %v153_v3, 0.0  ;;  %v178_v12 = vmax.f32 %v158_v8, 0.0 }
  0x2f   :  { %789 = vmatprep.subr.bf16.mxu1 %v853_v31  ;;  %v181_v31 = vpack.c.bf16 %v166_v24, %v161_v23  ;;  %v61_v15 = vunpack.c.l.bf16 %v43_v5  ;;  %v145_v20 = vadd.f32 %v135_v14, %v98_v16  ;;  %v113_v39 = vmul.f32 %v88_v0, %v66_v17 }
  0x30   :  { %v183_v36 = vpack.c.bf16 %v168_v29, %v163_v28  ;;  %v110_v37 = vmul.f32 %v76_v49, %v63_v30  ;;  %v188_v18 = vpack.c.bf16 %v178_v12, %v173_v10 }
  0x31   :  { %762 = vmatpush3.bf16.msra.mxu0 %v854_v33  ;;  %v105_v33 = vmul.f32 %v76_v49, %v58_v25  ;;  %v108_v19 = vmul.f32 %v88_v0, %v61_v15  ;;  %v165_v23 = vmax.f32 %v145_v20, 0.0  ;;  %v160_v27 = vadd.f32 %v135_v14, %v113_v39 }
  0x32   :  { %790 = vmatpush3.bf16.msra.mxu1 %v855_v35  ;;  %809 = vmatprep.subr.bf16.mxu0 %v856_v53  ;;  %v65_v35 = vunpack.c.h.bf16 %v45_v21  ;;  %v157_v47 = vadd.f32 %v965_v50, %v110_v37 }
  0x33   :  { %v152_v42 = vadd.f32 %v965_v50, %v105_v33  ;;  %v156_v50 = vadd.f32 %v973_v61, %v109_v51  ;;  %v155_v22 = vadd.f32 %v135_v14, %v108_v19  ;;  %v180_v25 = vmax.f32 %v160_v27, 0.0 }
  0x34   :  { %519 = vmatmul.mubr.bf16.vlgmr.msra.gmra.mrb[0].mxu0 %v181_v31  ;;  %v112_v44 = vmul.f32 %v84_v56, %v65_v35  ;;  %v858_v56 = vld [vmem:[#allocation2 + $0x110] sm:$0xff]   ;;  %v177_v62 = vmax.f32 %v157_v47, 0.0 }
  0x35   :  { %568 = vmatmul.mubr.bf16.vlgmr.msra.gmra.mrb[0].mxu1 %v183_v36  ;;  %810 = vmatpush3.bf16.msra.mxu0 %v856_v53  ;;  %v172_v49 = vmax.f32 %v152_v42, 0.0  ;;  %v151_v53 = vadd.f32 %v973_v61, %v104_v48  ;;  %v176_v7 = vmax.f32 %v156_v50, 0.0  ;;  %v56_v61 = vunpack.c.h.bf16 %v37_v54 }
  0x36   :  { %811 = vmatprep.subr.bf16.mxu0 %v857_v32  ;;  %v159_v58 = vadd.f32 %v969_v57, %v112_v44  ;;  %v175_v41 = vmax.f32 %v155_v22, 0.0 }
  0x37   :  { %v187_v6 = vpack.c.bf16 %v177_v62, %v172_v49  ;;  %v171_v57 = vmax.f32 %v151_v53, 0.0  ;;  %v103_v1 = vmul.f32 %v88_v0, %v56_v61 }
  0x38   :  { %v179_v2 = vmax.f32 %v159_v58, 0.0  ;;  %v190_v26 = vpack.c.bf16 %v180_v25, %v175_v41 }
  0x39   :  { %812 = vmatpush3.bf16.msra.mxu0 %v857_v32  ;;  %526 = vmatprep.mubr.bf16.mxu0 %v187_v6  ;;  %v186_v11 = vpack.c.bf16 %v176_v7, %v171_v57  ;;  %v150_v21 = vadd.f32 %v135_v14, %v103_v1 }
  0x3a   :  { %v189_v9 = vpack.c.bf16 %v179_v2, %v174_v60  ;;  %813 = vmatprep.subr.bf16.mxu0 %v858_v56 }
  0x3b   :  { %v170_v24 = vmax.f32 %v150_v21, 0.0 }
  0x3c   :  { %575 = vmatprep.mubr.bf16.mxu1 %v189_v9  ;;  %527 = vmatmul.mubr.bf16.gmra.mrb[4].mxu0 %v186_v11 }
  0x3d   :  { %814 = vmatpush3.bf16.msra.mxu0 %v858_v56  ;;  %576 = vmatmul.mubr.bf16.gmra.mrb[4].mxu1 %v188_v18  ;;  %v185_v46 = vpack.c.bf16 %v170_v24, %v165_v23 }
  0x3e   :  { %815 = vmatprep.subr.bf16.mxu0 %v859_v13 }
  0x3f   :  { %817 = vmatprep.mubr.msk.bf16.mxu0 %vm479_vm0, %v185_v46 }
  0x41   :  { %816 = vmatpush3.bf16.msra.mxu0 %v859_v13 }
  0x44   :  { %818 = vmatmul.mubr.msk.bf16.vlgmr.msra.gmra.mrb[8].mxu0 %vm479_vm0, %v190_v26 }
 0x107   :  { %v763_v28 = vpop.f32.mrb[0].mxu0 }
 0x108   :  { %v791_v29 = vpop.f32.mrb[0].mxu1  ;;  %v764_v30 = vpop.f32.mrb[1].mxu0 }
 0x109   :  { %v765_v31 = vadd.f32 %v764_v30, %v763_v28  ;;  %v792_v32 = vpop.f32.mrb[1].mxu1  ;;  %v766_v33 = vpop.f32.mrb[2].mxu0 }
 0x10a   :  { %v793_v34 = vadd.f32 %v792_v32, %v791_v29  ;;  %v794_v35 = vpop.f32.mrb[2].mxu1  ;;  %v767_v36 = vpop.f32.mrb[3].mxu0 }
 0x10b   :  { %v768_v37 = vadd.f32 %v767_v36, %v766_v33  ;;  %v795_v38 = vpop.f32.mrb[3].mxu1 }
 0x10c   :  { %v796_v40 = vadd.f32 %v795_v38, %v794_v35  ;;  %v570_v42 = vadd.f32 %v793_v34, %v765_v31 }
 0x10e   :  { %v573_v43 = vadd.f32 %v796_v40, %v768_v37 }
 0x10f   :  { %v769_v44 = vpop.f32.mrb[4].mxu0 }
 0x110   :  { %v770_v45 = vpop.f32.mrb[5].mxu0  ;;  %v797_v47 = vpop.f32.mrb[4].mxu1 }
 0x111   :  { %v771_v48 = vadd.f32 %v770_v45, %v769_v44  ;;  %v772_v51 = vpop.f32.mrb[6].mxu0  ;;  %v798_v52 = vpop.f32.mrb[5].mxu1 }
 0x112   :  { %v773_v54 = vpop.f32.mrb[7].mxu0  ;;  %v799_v49 = vadd.f32 %v798_v52, %v797_v47  ;;  %v800_v55 = vpop.f32.mrb[6].mxu1 }
 0x113   :  { %v774_v58 = vadd.f32 %v773_v54, %v772_v51  ;;  %v801_v59 = vpop.f32.mrb[7].mxu1 }
 0x114   :  { %v802_v56 = vadd.f32 %v801_v59, %v800_v55  ;;  %v578_v62 = vadd.f32 %v799_v49, %v771_v48 }
 0x116   :  { %v581_v53 = vadd.f32 %v802_v56, %v774_v58 }
 0x117   :  { %v819_v50 = vpop.f32.mrb[8].mxu0 }
 0x118   :  { %v627_v63 = vadd.f32 %v819_v50, %v578_v62  ;;  %v618_v60 = vpop.f32.mrb[9].mxu0 }
 0x119   :  { %v619_v2 = vadd.f32 %v618_v60, %v570_v42  ;;  %v820_v3 = vpop.f32.mrb[10].mxu0 }
 0x11a   :  { %v630_v4 = vadd.f32 %v820_v3, %v581_v53  ;;  %v621_v5 = vpop.f32.mrb[11].mxu0  ;;  %v664_v61 = vmul.f32 %v627_v63, %v627_v63 }
 0x11b   :  { %v622_v6 = vadd.f32 %v621_v5, %v573_v43  ;;  %v662_v7 = vmul.f32 %v619_v2, %v619_v2 }
 0x11c   :  { %v744_v57 = vpack.c.bf16 %v630_v4, %v627_v63  ;;  %v665_v12 = vmul.f32 %v630_v4, %v630_v4 }
 0x11d   :  { %v739_v8 = vpack.c.bf16 %v622_v6, %v619_v2  ;;  %v653_v9 = vadd.f32 %v622_v6, %v619_v2  ;;  %v663_v10 = vmul.f32 %v622_v6, %v622_v6 }
 0x11e   :  { %746 = vst [vmem:[%s1035_s4 + $0x8] sm:$0xff] %v744_v57  }
 0x11f   :  { %740 = vst [vmem:[%s1035_s4] sm:$0xff] %v739_v8   ;;  %v654_v0 = vadd.f32 %v653_v9, %v627_v63  ;;  %v666_v11 = vadd.f32 %v663_v10, %v662_v7 }
 0x121   :  { %v655_v13 = vadd.f32 %v654_v0, %v630_v4  ;;  %v667_v14 = vadd.f32 %v666_v11, %v664_v61 }
 0x123   :  { %v656_v15 = vrot.slane %v655_v13, 4  ;;  %v668_v16 = vadd.f32 %v667_v14, %v665_v12 }
 0x125   :  { %v657_v1 = vadd.f32 %v656_v15, %v655_v13  ;;  %v669_v17 = vrot.slane %v668_v16, 4 }
 0x127   :  { %v658_v18 = vrot.slane %v657_v1, 2  ;;  %v670_v19 = vadd.f32 %v669_v17, %v668_v16 }
 0x129   :  { %v659_v20 = vadd.f32 %v658_v18, %v657_v1  ;;  %v671_v21 = vrot.slane %v670_v19, 2 }
 0x12b   :  { %v660_v39 = vrot.slane %v659_v20, 1  ;;  %v672_v22 = vadd.f32 %v671_v21, %v670_v19 }
 0x12d   :  { %v661_v23 = vadd.f32 %v660_v39, %v659_v20  ;;  %v673_v24 = vrot.slane %v672_v22, 1 }
 0x12f   :  { %v674_v27 = vadd.f32 %v673_v24, %v672_v22  ;;  %675 = vst [vmem:[%s1036_s5] sm:$0x1] %v661_v23 }
 0x131   :  { %676 = vst [vmem:[%s1037_s6] sm:$0x1] %v674_v27 }
 0x132   :  { %689 = vsyncpa [#allocation3], 1 }

// kernel: tile.72
= control target key start
LH: loop header
LB: loop body
LE: loop exit
PB: predicated region body
PF: predicated region fallthrough
CT: control target
= control target key end

     0   :  { %s28_s0 = inlined_call_operand.vmem [shape: f32[16], index: 0, kind: input, shape index: {}]   ;;  %s29_s1 = inlined_call_operand.vmem [shape: f32[9,16], index: 1, kind: output, shape index: {}]  }
   0x1   :  { %v4_v0 = vld [vmem:[%s28_s0] ss:$0 sm:$0xff] }
   0x2   :  { %5 = vst [vmem:[%s29_s1] sm:$0xff] %v4_v0  ;;  %8 = vst [vmem:[%s29_s1 + $0x8] sm:$0xff] %v4_v0 }

// kernel: tile.74
= control target key start
LH: loop header
LB: loop body
LE: loop exit
PB: predicated region body
PF: predicated region fallthrough
CT: control target
= control target key end

     0   :  { %s74_s10 = smov 112   ;;  %s75_s11 = smov 80   ;;  %vm4_vm0 = vcmask 130048   ;;  %vm10_vm1 = vcmask 1048448   ;;  %vm16_vm2 = vcmask 917248   ;;  %vm22_vm3 = vcmask 786048   ;;  %s121_s0 = inlined_call_operand.vmem [shape: f32[9,16], index: 0, kind: input, shape index: {}]   ;;  %s122_s1 = inlined_call_operand.vmem [shape: f32[1,144], index: 1, kind: output, shape index: {}]  }
   0x1   :  { %v59_v0 = vld [vmem:[%s121_s0 + $0x7] sm:$0x1]   ;;  %v61_v1 = vld [vmem:[%s121_s0 + $0x5] sm:$0x1]   ;;  %v60_v2 = vld [vmem:[%s121_s0 + $0x6] sm:$0x1]  }
   0x2   :  { %8 = vrot.lane.b32.xlu0 %v59_v0, %s74_s10  ;;  %20 = vrot.lane.b32.xlu1 %v61_v1, %s75_s11  ;;  %v62_v3 = vld [vmem:[%s121_s0 + $0x4] sm:$0x1]   ;;  %s2_s16 = smov 3  ;;  %s76_s19 = smov 96   ;;  %v63_v5 = vld [vmem:[%s121_s0 + $0x3] sm:$0x1]  }
   0x3   :  { %v3_v4 = vld [vmem:[%s121_s0] ss:$8 sm:%s2_s16]   ;;  %s77_s20 = smov 64   ;;  %v64_v6 = vld [vmem:[%s121_s0 + $0x2] sm:$0x1]   ;;  %s78_s25 = smov 48  }
   0x4   :  { %5 = vst.msk [vmem:[#allocation0] ss:$8 sm:$0x3] %vm4_vm0, %v3_v4   ;;  %s79_s26 = smov 32   ;;  %v65_v7 = vld [vmem:[%s121_s0 + $0x1] sm:$0x1]  }
   0x5   :  { %s80_s0 = smov 16   ;;  %vm28_vm4 = vcmask 654848   ;;  %vm34_vm5 = vcmask 523648   ;;  %vm40_vm6 = vcmask 392448   ;;  %vm46_vm7 = vcmask 261248  }
   0x6   :  { %14 = vrot.lane.b32.xlu0 %v60_v2, %s76_s19  ;;  %26 = vrot.lane.b32.xlu1 %v62_v3, %s77_s20 }
   0xa   :  { %32 = vrot.lane.b32.xlu0 %v63_v5, %s78_s25  ;;  %38 = vrot.lane.b32.xlu1 %v64_v6, %s79_s26 }
   0xb   :  { %v55_v8 = vld [vmem:[#allocation0 + $0x8] sm:$0x1] }
   0xc   :  { %66 = vst [vmem:[%s122_s1 + $0x1] sm:$0x1] %v55_v8 }
   0xe   :  { %44 = vrot.lane.b32.xlu0 %v65_v7, %s80_s0 }
  0x74   :  { %v9_v9 = vpop.permute.xlu0 %8   ;;  %v21_v10 = vpop.permute.xlu1 %20  }
  0x75   :  { %11 = vst.msk [vmem:[#allocation0] sm:$0x1] %vm10_vm1, %v9_v9  }
  0x78   :  { %v15_v11 = vpop.permute.xlu0 %14   ;;  %v27_v12 = vpop.permute.xlu1 %26  }
  0x79   :  { %17 = vst.msk [vmem:[#allocation0] sm:$0x1] %vm16_vm2, %v15_v11  }
  0x7a   :  { %23 = vst.msk [vmem:[#allocation0] sm:$0x1] %vm22_vm3, %v21_v10  }
  0x7b   :  { %29 = vst.msk [vmem:[#allocation0] sm:$0x1] %vm28_vm4, %v27_v12  }
  0x7c   :  { %v33_v13 = vpop.permute.xlu0 %32   ;;  %v39_v14 = vpop.permute.xlu1 %38  }
  0x7d   :  { %35 = vst.msk [vmem:[#allocation0] sm:$0x1] %vm34_vm5, %v33_v13  }
  0x7e   :  { %41 = vst.msk [vmem:[#allocation0] sm:$0x1] %vm40_vm6, %v39_v14  }
  0x80   :  { %v45_v15 = vpop.permute.xlu0 %44  }
  0x81   :  { %47 = vst.msk [vmem:[#allocation0] sm:$0x1] %vm46_vm7, %v45_v15  }
  0x88   :  { %v51_v16 = vld [vmem:[#allocation0] sm:$0x1] }
  0x89   :  { %53 = vst [vmem:[%s122_s1] sm:$0x1] %v51_v16 }

// kernel: generator_forward.7
= control target key start
LH: loop header
LB: loop body
LE: loop exit
PB: predicated region body
PF: predicated region fallthrough
CT: control target
= control target key end

     0   :  { %v103_v5 = vlaneseq  ;;  %vm447_vm0 = vcmask 261120   ;;  %vm730_vm1 = vcmask 519168   ;;  %vm747_vm2 = vcmask 523264   ;;  %s1448_s3 = inlined_call_operand.vmem [shape: bf16[288,64], index: 3, kind: input, shape index: {}]   ;;  %s1449_s0 = inlined_call_operand.vmem [shape: bf16[128,288], index: 0, kind: input, shape index: {}]   ;;  %s1450_s1 = inlined_call_operand.vmem [shape: f32[1,288], index: 1, kind: input, shape index: {}]   ;;  %s1451_s2 = inlined_call_operand.vmem [shape: f32[1,288], index: 2, kind: input, shape index: {}]   ;;  %s1452_s4 = inlined_call_operand.vmem [shape: bf16[128,64], index: 4, kind: output, shape index: {0}]   ;;  %s1453_s5 = inlined_call_operand.vmem [shape: f32[1,64], index: 5, kind: output, shape index: {1}]   ;;  %s1454_s6 = inlined_call_operand.vmem [shape: f32[1,64], index: 6, kind: output, shape index: {2}]  }
   0x1   :  { %v1021_v0 = vld [vmem:[%s1448_s3 + $0x40] sm:$0xff]   ;;  %v1023_v2 = vld [vmem:[%s1448_s3 + $0x48] sm:$0xff]   ;;  %v1025_v4 = vld [vmem:[%s1448_s3 + $0x50] sm:$0xff]   ;;  %vm838_vm3 = vcmask 516096  }
   0x2   :  { %v1022_v1 = vld [vmem:[%s1448_s3] sm:$0xff]   ;;  %911 = vmatprep.subr.bf16.mxu0 %v1021_v0  ;;  %1005 = vmatprep.subr.bf16.mxu1 %v1021_v0  ;;  %v1024_v3 = vld [vmem:[%s1448_s3 + $0x8] sm:$0xff]   ;;  %v1026_v6 = vld [vmem:[%s1448_s3 + $0x10] sm:$0xff]   ;;  %v104_v8 = vshrl.u32 %v103_v5, 7 }
   0x3   :  { %912 = vmatpush3.bf16.msra.mxu0 %v1022_v1  ;;  %1013 = vmatpush3.bf16.msra.mxu1 %v1022_v1  ;;  %v1027_v7 = vld [vmem:[%s1448_s3 + $0x58] sm:$0xff]   ;;  %v1029_v10 = vld [vmem:[%s1448_s3 + $0x60] sm:$0xff]   ;;  %v1031_v14 = vld [vmem:[%s1448_s3 + $0x68] sm:$0xff]  }
   0x4   :  { %913 = vmatprep.subr.bf16.mxu0 %v1023_v2  ;;  %1006 = vmatprep.subr.bf16.mxu1 %v1023_v2  ;;  %v1028_v9 = vld [vmem:[%s1448_s3 + $0x18] sm:$0xff]   ;;  %v109_v11 = vsub.s32 1, %v104_v8  ;;  %v1030_v12 = vld [vmem:[%s1448_s3 + $0x20] sm:$0xff]   ;;  %v113_v13 = vsub.s32 2, %v104_v8  ;;  %v23_v16 = vld [vmem:[%s1449_s0 + $0xc] sm:$0xff]  ;;  %v105_v18 = vsub.s32 0, %v104_v8 }
   0x5   :  { %v21_v15 = vld [vmem:[%s1449_s0] sm:$0xff]  ;;  %v56_v21 = vunpack.c.l.bf16 %v23_v16  ;;  %v57_v22 = vunpack.c.h.bf16 %v23_v16  ;;  %v45_v24 = vld [vmem:[%s1449_s0 + $0x90] sm:$0xff]  ;;  %v1032_v26 = vld [vmem:[%s1448_s3 + $0x28] sm:$0xff]  }
   0x6   :  { %v101_v17 = vld [vmem:[%s1450_s1] sm:$0x7]  ;;  %v53_v19 = vunpack.c.l.bf16 %v21_v15  ;;  %v54_v20 = vunpack.c.h.bf16 %v21_v15  ;;  %v1033_v31 = vld [vmem:[%s1448_s3 + $0x70] sm:$0xff]   ;;  %v89_v32 = vunpack.c.l.bf16 %v45_v24  ;;  %v90_v33 = vunpack.c.h.bf16 %v45_v24  ;;  %v1142_v36 = vld [vmem:[%s1449_s0 + $0x18] sm:$0xff] }
   0x7   :  { %914 = vmatpush3.bf16.msra.mxu0 %v1024_v3  ;;  %1014 = vmatpush3.bf16.msra.mxu1 %v1024_v3  ;;  %v166_v23 = vld [vmem:[%s1451_s2] sm:$0x7]  ;;  %v1128_v27 = vrot.slane %v101_v17, %v109_v11  ;;  %v1130_v28 = vrot.slane %v101_v17, %v113_v13  ;;  %v1147_v37 = vld [vmem:[%s1449_s0 + $0x24] sm:$0xff]  ;;  %v1151_v40 = vrot.slane %v101_v17, %v105_v18  ;;  %v60_v41 = vunpack.c.h.bf16 %v1142_v36  ;;  %v1034_v51 = vld [vmem:[%s1448_s3 + $0x30] sm:$0xff]  }
   0x8   :  { %915 = vmatprep.subr.bf16.mxu0 %v1025_v4  ;;  %1007 = vmatprep.subr.bf16.mxu1 %v1025_v4  ;;  %v47_v25 = vld [vmem:[%s1449_s0 + $0x9c] sm:$0xff]  ;;  %v1132_v29 = vrot.slane %v166_v23, %v109_v11  ;;  %v1134_v30 = vrot.slane %v166_v23, %v113_v13  ;;  %v1157_v42 = vld [vmem:[%s1449_s0 + $0xa8] sm:$0xff]  ;;  %v1161_v45 = vrot.slane %v166_v23, %v105_v18  ;;  %v63_v46 = vunpack.c.h.bf16 %v1147_v37  ;;  %v51_v1 = vld [vmem:[%s1449_s0 + $0xb4] sm:$0xff] }
   0x9   :  { %v92_v34 = vunpack.c.l.bf16 %v47_v25  ;;  %v93_v35 = vunpack.c.h.bf16 %v47_v25  ;;  %v119_v38 = vmul.f32 %v1128_v27, %v54_v20  ;;  %v122_v39 = vmul.f32 %v1128_v27, %v57_v22  ;;  %v1035_v56 = vld [vmem:[%s1448_s3 + $0x78] sm:$0xff]   ;;  %v29_v24 = vld [vmem:[%s1449_s0 + $0x30] sm:$0xff] }
   0xa   :  { %v155_v43 = vmul.f32 %v1128_v27, %v90_v33  ;;  %v118_v49 = vmul.f32 %v1151_v40, %v53_v19  ;;  %v121_v50 = vmul.f32 %v1151_v40, %v56_v21  ;;  %v154_v54 = vmul.f32 %v1151_v40, %v89_v32  ;;  %v31_v33 = vld [vmem:[%s1449_s0 + $0x3c] sm:$0xff] }
   0xb   :  { %916 = vmatpush3.bf16.msra.mxu0 %v1026_v6  ;;  %1015 = vmatpush3.bf16.msra.mxu1 %v1026_v6  ;;  %v158_v44 = vmul.f32 %v1128_v27, %v93_v35  ;;  %v184_v47 = vadd.f32 %v1132_v29, %v119_v38  ;;  %v187_v48 = vadd.f32 %v1132_v29, %v122_v39  ;;  %v96_v55 = vunpack.c.h.bf16 %v1157_v42  ;;  %v1036_v6 = vld [vmem:[%s1448_s3 + $0x38] sm:$0xff]   ;;  %v1038_v38 = vld [vmem:[%s1448_s3 + $0x88] sm:$0xff]  }
   0xc   :  { %917 = vmatprep.subr.bf16.mxu0 %v1027_v7  ;;  %1008 = vmatprep.subr.bf16.mxu1 %v1027_v7  ;;  %v220_v52 = vadd.f32 %v1132_v29, %v155_v43  ;;  %v183_v59 = vadd.f32 %v1161_v45, %v118_v49  ;;  %v186_v60 = vadd.f32 %v1161_v45, %v121_v50  ;;  %v59_v18 = vunpack.c.l.bf16 %v1142_v36  ;;  %v22_v39 = vld [vmem:[%s1449_s0 + $0x8] ss:$12 sps:$4 sm:$0xff]  }
   0xd   :  { %v223_v53 = vadd.f32 %v1132_v29, %v158_v44  ;;  %v232_v57 = vmax.f32 %v184_v47, 0.0  ;;  %v235_v58 = vmax.f32 %v187_v48, 0.0  ;;  %v157_v63 = vmul.f32 %v1151_v40, %v92_v34 }
   0xe   :  { %v268_v61 = vmax.f32 %v220_v52, 0.0  ;;  %v219_v0 = vadd.f32 %v1161_v45, %v154_v54  ;;  %v231_v3 = vmax.f32 %v183_v59, 0.0  ;;  %v234_v4 = vmax.f32 %v186_v60, 0.0 }
   0xf   :  { %918 = vmatpush3.bf16.msra.mxu0 %v1028_v9  ;;  %1016 = vmatpush3.bf16.msra.mxu1 %v1028_v9  ;;  %v271_v62 = vmax.f32 %v223_v53, 0.0  ;;  %v280_v2 = vpack.c.bf16 %v235_v58, %v232_v57  ;;  %v125_v5 = vmul.f32 %v1128_v27, %v60_v41  ;;  %v222_v8 = vadd.f32 %v1161_v45, %v157_v63  ;;  %v26_v58 = vld [vmem:[%s1449_s0 + $0x20] ss:$12 sps:$4 sm:$0xff]  }
  0x10   :  { %919 = vmatprep.subr.bf16.mxu0 %v1029_v10  ;;  %1009 = vmatprep.subr.bf16.mxu1 %v1029_v10  ;;  %v267_v9 = vmax.f32 %v219_v0, 0.0  ;;  %v128_v10 = vmul.f32 %v1128_v27, %v63_v46  ;;  %v279_v11 = vpack.c.bf16 %v234_v4, %v231_v3  ;;  %v161_v15 = vmul.f32 %v1128_v27, %v96_v55 }
  0x11   :  { %v298_v7 = vpack.c.bf16 %v271_v62, %v268_v61  ;;  %v190_v13 = vadd.f32 %v1132_v29, %v125_v5  ;;  %504 = vmatprep.mubr.bf16.mxu0 %v280_v2  ;;  %v270_v16 = vmax.f32 %v222_v8, 0.0  ;;  %v62_v19 = vunpack.c.l.bf16 %v1147_v37 }
  0x12   :  { %v193_v17 = vadd.f32 %v1132_v29, %v128_v10  ;;  %v226_v22 = vadd.f32 %v1132_v29, %v161_v15  ;;  %v95_v23 = vunpack.c.l.bf16 %v1157_v42  ;;  %v98_v36 = vunpack.c.l.bf16 %v51_v1 }
  0x13   :  { %920 = vmatpush3.bf16.msra.mxu0 %v1030_v12  ;;  %1017 = vmatpush3.bf16.msra.mxu1 %v1030_v12  ;;  %v1037_v12 = vld [vmem:[%s1448_s3 + $0x80] sm:$0xff]   ;;  %v238_v20 = vmax.f32 %v190_v13, 0.0  ;;  %v297_v25 = vpack.c.bf16 %v270_v16, %v267_v9  ;;  %v127_v32 = vmul.f32 %v1151_v40, %v62_v19  ;;  %v66_v44 = vunpack.c.h.bf16 %v29_v24 }
  0x14   :  { %921 = vmatprep.subr.bf16.mxu0 %v1031_v14  ;;  %1010 = vmatprep.subr.bf16.mxu1 %v1031_v14  ;;  %v99_v14 = vunpack.c.h.bf16 %v51_v1  ;;  %v274_v35 = vmax.f32 %v226_v22, 0.0  ;;  %v160_v37 = vmul.f32 %v1151_v40, %v95_v23  ;;  %v163_v47 = vmul.f32 %v1151_v40, %v98_v36 }
  0x15   :  { %552 = vmatprep.mubr.bf16.mxu1 %v298_v7  ;;  %v192_v43 = vadd.f32 %v1161_v45, %v127_v32  ;;  %v69_v49 = vunpack.c.h.bf16 %v31_v33  ;;  %v131_v52 = vmul.f32 %v1128_v27, %v66_v44  ;;  %v55_v53 = vunpack.c.l.bf16 %v22_v39  ;;  %v33_v7 = vld [vmem:[%s1449_s0 + $0x48] sm:$0xff] }
  0x16   :  { %v164_v21 = vmul.f32 %v1128_v27, %v99_v14  ;;  %v225_v48 = vadd.f32 %v1161_v45, %v160_v37  ;;  %v228_v55 = vadd.f32 %v1161_v45, %v163_v47  ;;  %v58_v61 = vunpack.c.h.bf16 %v22_v39 }
  0x17   :  { %922 = vmatpush3.bf16.msra.mxu0 %v1032_v26  ;;  %1018 = vmatpush3.bf16.msra.mxu1 %v1032_v26  ;;  %v241_v26 = vmax.f32 %v193_v17, 0.0  ;;  %v134_v57 = vmul.f32 %v1128_v27, %v69_v49  ;;  %v196_v60 = vadd.f32 %v1132_v29, %v131_v52  ;;  %v120_v62 = vmul.f32 %v1130_v28, %v55_v53  ;;  %v30_v17 = vld [vmem:[%s1449_s0 + $0x38] ss:$12 sps:$4 sm:$0xff]  }
  0x18   :  { %923 = vmatprep.subr.bf16.mxu0 %v1033_v31  ;;  %1011 = vmatprep.subr.bf16.mxu1 %v1033_v31  ;;  %v124_v31 = vmul.f32 %v1151_v40, %v59_v18  ;;  %v229_v34 = vadd.f32 %v1132_v29, %v164_v21  ;;  %v276_v63 = vmax.f32 %v228_v55, 0.0  ;;  %v65_v1 = vunpack.c.l.bf16 %v29_v24  ;;  %v37_v53 = vld [vmem:[%s1449_s0 + $0x60] sm:$0xff] }
  0x19   :  { %v283_v41 = vpack.c.bf16 %v241_v26, %v238_v20  ;;  %v199_v0 = vadd.f32 %v1132_v29, %v134_v57  ;;  %v68_v2 = vunpack.c.l.bf16 %v31_v33  ;;  %v244_v3 = vmax.f32 %v196_v60, 0.0 }
  0x1a   :  { %v189_v42 = vadd.f32 %v1161_v45, %v124_v31  ;;  %v277_v46 = vmax.f32 %v229_v34, 0.0  ;;  %v123_v4 = vmul.f32 %v1130_v28, %v58_v61  ;;  %v185_v5 = vadd.f32 %v1134_v30, %v120_v62 }
  0x1b   :  { %924 = vmatpush3.bf16.msra.mxu0 %v1034_v51  ;;  %1019 = vmatpush3.bf16.msra.mxu1 %v1034_v51  ;;  %v240_v51 = vmax.f32 %v192_v43, 0.0  ;;  %v247_v9 = vmax.f32 %v199_v0, 0.0  ;;  %v130_v10 = vmul.f32 %v1151_v40, %v65_v1  ;;  %v64_v15 = vunpack.c.h.bf16 %v26_v58 }
  0x1c   :  { %925 = vmatprep.subr.bf16.mxu0 %v1035_v56  ;;  %1012 = vmatprep.subr.bf16.mxu1 %v1035_v56  ;;  %v237_v50 = vmax.f32 %v189_v42, 0.0  ;;  %v301_v54 = vpack.c.bf16 %v277_v46, %v274_v35  ;;  %v273_v56 = vmax.f32 %v225_v48, 0.0  ;;  %v188_v13 = vadd.f32 %v1134_v30, %v123_v4 }
  0x1d   :  { %v233_v14 = vmax.f32 %v185_v5, 0.0  ;;  %v286_v18 = vpack.c.bf16 %v247_v9, %v244_v3  ;;  %v195_v19 = vadd.f32 %v1161_v45, %v130_v10  ;;  %v72_v21 = vunpack.c.h.bf16 %v33_v7 }
  0x1e   :  { %v282_v59 = vpack.c.bf16 %v240_v51, %v237_v50  ;;  %v300_v8 = vpack.c.bf16 %v276_v63, %v273_v56  ;;  %v236_v22 = vmax.f32 %v188_v13, 0.0  ;;  %v129_v23 = vmul.f32 %v1130_v28, %v64_v15  ;;  %v38_v63 = vld [vmem:[%s1449_s0 + $0x68] ss:$12 sps:$4 sm:$0xff]  }
  0x1f   :  { %926 = vmatpush3.bf16.msra.mxu0 %v1036_v6  ;;  %1020 = vmatpush3.bf16.msra.mxu1 %v1036_v6  ;;  %v61_v6 = vunpack.c.l.bf16 %v26_v58  ;;  %v243_v26 = vmax.f32 %v195_v19, 0.0  ;;  %v137_v32 = vmul.f32 %v1128_v27, %v72_v21  ;;  %v67_v33 = vunpack.c.l.bf16 %v30_v17  ;;  %v39_v58 = vld [vmem:[%s1449_s0 + $0x6c] sm:$0xff] }
  0x20   :  { %985 = vmatprep.subr.bf16.mxu1 %v1037_v12  ;;  %v281_v34 = vpack.c.bf16 %v236_v22, %v233_v14  ;;  %v194_v35 = vadd.f32 %v1134_v30, %v129_v23  ;;  %v70_v42 = vunpack.c.h.bf16 %v30_v17  ;;  %v71_v47 = vunpack.c.l.bf16 %v33_v7 }
  0x21   :  { %v126_v16 = vmul.f32 %v1130_v28, %v61_v6  ;;  %v132_v43 = vmul.f32 %v1130_v28, %v67_v33  ;;  %v78_v3 = vunpack.c.h.bf16 %v37_v53  ;;  %v81_v7 = vunpack.c.h.bf16 %v39_v58  ;;  %v41_v33 = vld [vmem:[%s1449_s0 + $0x78] sm:$0xff] }
  0x22   :  { %505 = vmatmul.mubr.bf16.vlgmr.msra.gmra.mrb[0].mxu0 %v279_v11  ;;  %553 = vmatmul.mubr.bf16.vlgmr.msra.gmra.mrb[0].mxu1 %v297_v25  ;;  %v133_v11 = vmul.f32 %v1151_v40, %v68_v2  ;;  %v242_v44 = vmax.f32 %v194_v35, 0.0  ;;  %v135_v50 = vmul.f32 %v1130_v28, %v70_v42  ;;  %v136_v56 = vmul.f32 %v1151_v40, %v71_v47 }
  0x23   :  { %986 = vmatpush3.bf16.msra.mxu1 %v1037_v12  ;;  %512 = vmatprep.mubr.bf16.mxu0 %v283_v41  ;;  %v35_v12 = vld [vmem:[%s1449_s0 + $0x54] sm:$0xff]  ;;  %v191_v24 = vadd.f32 %v1134_v30, %v126_v16  ;;  %v202_v41 = vadd.f32 %v1132_v29, %v137_v32  ;;  %v197_v51 = vadd.f32 %v1134_v30, %v132_v43  ;;  %v42_v16 = vld [vmem:[%s1449_s0 + $0x80] ss:$12 sps:$4 sm:$0xff]   ;;  %v82_v19 = vunpack.c.h.bf16 %v38_v63 }
  0x24   :  { %987 = vmatprep.subr.bf16.mxu1 %v1038_v38  ;;  %560 = vmatprep.mubr.bf16.mxu1 %v301_v54  ;;  %v198_v20 = vadd.f32 %v1161_v45, %v133_v11  ;;  %v75_v25 = vunpack.c.h.bf16 %v35_v12  ;;  %v74_v48 = vunpack.c.l.bf16 %v35_v12  ;;  %v201_v1 = vadd.f32 %v1161_v45, %v136_v56 }
  0x25   :  { %v239_v36 = vmax.f32 %v191_v24, 0.0  ;;  %v250_v49 = vmax.f32 %v202_v41, 0.0  ;;  %v245_v60 = vmax.f32 %v197_v51, 0.0  ;;  %v143_v10 = vmul.f32 %v1128_v27, %v78_v3 }
  0x26   :  { %v246_v31 = vmax.f32 %v198_v20, 0.0  ;;  %v140_v37 = vmul.f32 %v1128_v27, %v75_v25  ;;  %v139_v57 = vmul.f32 %v1151_v40, %v74_v48  ;;  %v79_v11 = vunpack.c.l.bf16 %v38_v63 }
  0x27   :  { %988 = vmatpush3.bf16.msra.mxu1 %v1038_v38  ;;  %v34_v38 = vld [vmem:[%s1449_s0 + $0x50] ss:$12 sps:$4 sm:$0xff]   ;;  %v284_v54 = vpack.c.bf16 %v242_v44, %v239_v36  ;;  %v146_v15 = vmul.f32 %v1128_v27, %v81_v7  ;;  %v77_v23 = vunpack.c.l.bf16 %v37_v53  ;;  %v80_v24 = vunpack.c.l.bf16 %v39_v58  ;;  %v46_v44 = vld [vmem:[%s1449_s0 + $0x98] ss:$12 sps:$4 sm:$0xff]  }
  0x28   :  { %v285_v39 = vpack.c.bf16 %v246_v31, %v243_v26  ;;  %v205_v46 = vadd.f32 %v1132_v29, %v140_v37  ;;  %v73_v52 = vunpack.c.l.bf16 %v34_v38  ;;  %v76_v61 = vunpack.c.h.bf16 %v34_v38  ;;  %v43_v38 = vld [vmem:[%s1449_s0 + $0x84] sm:$0xff] }
  0x29   :  { %v204_v2 = vadd.f32 %v1161_v45, %v139_v57  ;;  %v144_v20 = vmul.f32 %v1130_v28, %v79_v11  ;;  %v211_v22 = vadd.f32 %v1132_v29, %v146_v15  ;;  %v147_v26 = vmul.f32 %v1130_v28, %v82_v19 }
  0x2a   :  { %513 = vmatmul.mubr.bf16.gmra.mrb[4].mxu0 %v282_v59  ;;  %561 = vmatmul.mubr.bf16.gmra.mrb[4].mxu1 %v300_v8  ;;  %v253_v55 = vmax.f32 %v205_v46, 0.0  ;;  %v200_v59 = vadd.f32 %v1134_v30, %v135_v50  ;;  %v138_v62 = vmul.f32 %v1130_v28, %v73_v52  ;;  %v141_v5 = vmul.f32 %v1130_v28, %v76_v61 }
  0x2b   :  { %520 = vmatprep.mubr.bf16.mxu0 %v286_v18  ;;  %989 = vmatprep.mubr.msk.bf16.mxu1 %vm447_vm0, %v281_v34  ;;  %v249_v8 = vmax.f32 %v201_v1, 0.0  ;;  %v252_v9 = vmax.f32 %v204_v2, 0.0  ;;  %v208_v18 = vadd.f32 %v1132_v29, %v143_v10  ;;  %v209_v31 = vadd.f32 %v1134_v30, %v144_v20 }
  0x2c   :  { %v289_v0 = vpack.c.bf16 %v253_v55, %v250_v49  ;;  %v248_v4 = vmax.f32 %v200_v59, 0.0  ;;  %v203_v6 = vadd.f32 %v1134_v30, %v138_v62  ;;  %v206_v13 = vadd.f32 %v1134_v30, %v141_v5  ;;  %v50_v62 = vld [vmem:[%s1449_s0 + $0xb0] ss:$12 sps:$4 sm:$0xff]  }
  0x2d   :  { %v288_v17 = vpack.c.bf16 %v252_v9, %v249_v8  ;;  %v256_v25 = vmax.f32 %v208_v18, 0.0  ;;  %v85_v32 = vunpack.c.l.bf16 %v42_v16  ;;  %v259_v35 = vmax.f32 %v211_v22, 0.0 }
  0x2e   :  { %v287_v12 = vpack.c.bf16 %v248_v4, %v245_v60  ;;  %v251_v14 = vmax.f32 %v203_v6, 0.0  ;;  %v254_v21 = vmax.f32 %v206_v13, 0.0  ;;  %v142_v36 = vmul.f32 %v1151_v40, %v77_v23 }
  0x2f   :  { %v145_v37 = vmul.f32 %v1151_v40, %v80_v24  ;;  %v257_v41 = vmax.f32 %v209_v31, 0.0  ;;  %v88_v42 = vunpack.c.h.bf16 %v42_v16  ;;  %v150_v43 = vmul.f32 %v1130_v28, %v85_v32 }
  0x30   :  { %v290_v34 = vpack.c.bf16 %v254_v21, %v251_v14  ;;  %v292_v46 = vpack.c.bf16 %v259_v35, %v256_v25  ;;  %v207_v47 = vadd.f32 %v1161_v45, %v142_v36  ;;  %v84_v49 = vunpack.c.h.bf16 %v41_v33 }
  0x31   :  { %v210_v48 = vadd.f32 %v1161_v45, %v145_v37  ;;  %v153_v51 = vmul.f32 %v1130_v28, %v88_v42  ;;  %v215_v52 = vadd.f32 %v1134_v30, %v150_v43  ;;  %v87_v53 = vunpack.c.h.bf16 %v43_v38 }
  0x32   :  { %521 = vmatmul.mubr.bf16.gmra.mrb[8].mxu0 %v285_v39  ;;  %990 = vmatmul.mubr.msk.bf16.vlgmr.msra.gmra.mrb[8].mxu1 %vm447_vm0, %v284_v54  ;;  %v212_v39 = vadd.f32 %v1134_v30, %v147_v26  ;;  %v255_v54 = vmax.f32 %v207_v47, 0.0  ;;  %v149_v56 = vmul.f32 %v1128_v27, %v84_v49  ;;  %v91_v57 = vunpack.c.l.bf16 %v46_v44 }
  0x33   :  { %528 = vmatprep.mubr.bf16.mxu0 %v289_v0  ;;  %993 = vmatprep.mubr.msk.bf16.mxu1 %vm447_vm0, %v287_v12  ;;  %v258_v55 = vmax.f32 %v210_v48, 0.0  ;;  %v218_v59 = vadd.f32 %v1134_v30, %v153_v51  ;;  %v263_v60 = vmax.f32 %v215_v52, 0.0  ;;  %v152_v61 = vmul.f32 %v1128_v27, %v87_v53 }
  0x34   :  { %v260_v50 = vmax.f32 %v212_v39, 0.0  ;;  %v214_v0 = vadd.f32 %v1132_v29, %v149_v56  ;;  %v94_v1 = vunpack.c.h.bf16 %v46_v44  ;;  %v156_v2 = vmul.f32 %v1130_v28, %v91_v57 }
  0x35   :  { %v291_v63 = vpack.c.bf16 %v258_v55, %v255_v54  ;;  %v266_v3 = vmax.f32 %v218_v59, 0.0  ;;  %v217_v4 = vadd.f32 %v1132_v29, %v152_v61  ;;  %v83_v5 = vunpack.c.l.bf16 %v41_v33 }
  0x36   :  { %v293_v58 = vpack.c.bf16 %v260_v50, %v257_v41  ;;  %v86_v6 = vunpack.c.l.bf16 %v43_v38  ;;  %v262_v7 = vmax.f32 %v214_v0, 0.0  ;;  %v159_v27 = vmul.f32 %v1130_v28, %v94_v1 }
  0x37   :  { %v221_v8 = vadd.f32 %v1134_v30, %v156_v2  ;;  %v97_v9 = vunpack.c.l.bf16 %v50_v62  ;;  %v296_v10 = vpack.c.bf16 %v266_v3, %v263_v60  ;;  %v265_v11 = vmax.f32 %v217_v4, 0.0 }
  0x38   :  { %v148_v12 = vmul.f32 %v1151_v40, %v83_v5  ;;  %v151_v13 = vmul.f32 %v1151_v40, %v86_v6  ;;  %v224_v14 = vadd.f32 %v1134_v30, %v159_v27  ;;  %v100_v16 = vunpack.c.h.bf16 %v50_v62 }
  0x39   :  { %v269_v15 = vmax.f32 %v221_v8, 0.0  ;;  %v162_v29 = vmul.f32 %v1130_v28, %v97_v9 }
  0x3a   :  { %529 = vmatmul.mubr.bf16.gmra.mrb[12].mxu0 %v288_v17  ;;  %994 = vmatmul.mubr.msk.bf16.gmra.mrb[12].mxu1 %vm447_vm0, %v290_v34  ;;  %v295_v17 = vpack.c.bf16 %v265_v11, %v262_v7  ;;  %v213_v18 = vadd.f32 %v1161_v45, %v148_v12  ;;  %v216_v19 = vadd.f32 %v1161_v45, %v151_v13  ;;  %v272_v20 = vmax.f32 %v224_v14, 0.0 }
  0x3b   :  { %536 = vmatprep.mubr.bf16.mxu0 %v292_v46  ;;  %997 = vmatprep.mubr.msk.bf16.mxu1 %vm447_vm0, %v293_v58  ;;  %v165_v21 = vmul.f32 %v1130_v28, %v100_v16  ;;  %v227_v22 = vadd.f32 %v1134_v30, %v162_v29 }
  0x3c   :  { %v261_v40 = vmax.f32 %v213_v18, 0.0  ;;  %v264_v23 = vmax.f32 %v216_v19, 0.0  ;;  %v299_v24 = vpack.c.bf16 %v272_v20, %v269_v15 }
  0x3d   :  { %v230_v25 = vadd.f32 %v1134_v30, %v165_v21  ;;  %v275_v26 = vmax.f32 %v227_v22, 0.0 }
  0x3e   :  { %v294_v31 = vpack.c.bf16 %v264_v23, %v261_v40 }
  0x3f   :  { %v278_v32 = vmax.f32 %v230_v25, 0.0 }
  0x41   :  { %v302_v33 = vpack.c.bf16 %v278_v32, %v275_v26 }
  0x42   :  { %537 = vmatmul.mubr.bf16.gmra.mrb[16].mxu0 %v291_v63  ;;  %998 = vmatmul.mubr.msk.bf16.gmra.mrb[16].mxu1 %vm447_vm0, %v296_v10 }
  0x43   :  { %544 = vmatprep.mubr.bf16.mxu0 %v295_v17  ;;  %1001 = vmatprep.mubr.msk.bf16.mxu1 %vm447_vm0, %v299_v24 }
  0x4a   :  { %545 = vmatmul.mubr.bf16.gmra.mrb[20].mxu0 %v294_v31  ;;  %1002 = vmatmul.mubr.msk.bf16.gmra.mrb[20].mxu1 %vm447_vm0, %v302_v33 }
  0xf5   :  { %v927_v45 = vpop.f32.mrb[0].mxu0  ;;  %v963_v34 = vpop.f32.mrb[0].mxu1 }
  0xf6   :  { %v928_v28 = vpop.f32.mrb[1].mxu0  ;;  %v964_v35 = vpop.f32.mrb[1].mxu1 }
  0xf7   :  { %v929_v36 = vadd.f32 %v928_v28, %v927_v45  ;;  %v930_v37 = vpop.f32.mrb[2].mxu0  ;;  %v1334_v38 = vadd.f32 %v964_v35, %v963_v34  ;;  %v966_v39 = vpop.f32.mrb[2].mxu1 }
  0xf8   :  { %v931_v41 = vpop.f32.mrb[3].mxu0  ;;  %v967_v30 = vpop.f32.mrb[3].mxu1 }
  0xf9   :  { %v932_v42 = vadd.f32 %v931_v41, %v930_v37  ;;  %v1336_v43 = vadd.f32 %v967_v30, %v966_v39 }
  0xfd   :  { %v933_v44 = vpop.f32.mrb[4].mxu0  ;;  %v969_v46 = vpop.f32.mrb[4].mxu1 }
  0xfe   :  { %v934_v47 = vpop.f32.mrb[5].mxu0  ;;  %v970_v48 = vpop.f32.mrb[5].mxu1 }
  0xff   :  { %v935_v49 = vadd.f32 %v934_v47, %v933_v44  ;;  %v936_v50 = vpop.f32.mrb[6].mxu0  ;;  %v1338_v51 = vadd.f32 %v970_v48, %v969_v46  ;;  %v972_v52 = vpop.f32.mrb[6].mxu1 }
 0x100   :  { %v937_v53 = vpop.f32.mrb[7].mxu0  ;;  %v973_v54 = vpop.f32.mrb[7].mxu1 }
 0x101   :  { %v938_v55 = vadd.f32 %v937_v53, %v936_v50  ;;  %v1340_v56 = vadd.f32 %v973_v54, %v972_v52 }
 0x105   :  { %v939_v57 = vpop.f32.mrb[8].mxu0  ;;  %v991_v58 = vpop.f32.mrb[8].mxu1 }
 0x106   :  { %v940_v59 = vpop.f32.mrb[9].mxu0  ;;  %v612_v60 = vadd.f32 %v991_v58, %v935_v49  ;;  %v603_v62 = vpop.f32.mrb[9].mxu1 }
 0x107   :  { %v941_v61 = vadd.f32 %v940_v59, %v939_v57  ;;  %v942_v63 = vpop.f32.mrb[10].mxu0  ;;  %v604_v0 = vadd.f32 %v929_v36, %v603_v62  ;;  %v992_v1 = vpop.f32.mrb[10].mxu1 }
 0x108   :  { %v943_v2 = vpop.f32.mrb[11].mxu0  ;;  %v897_v3 = vpack.c.bf16 %v612_v60, %v612_v60  ;;  %v615_v4 = vadd.f32 %v992_v1, %v938_v55  ;;  %v606_v5 = vpop.f32.mrb[11].mxu1  ;;  %v787_v10 = vmul.f32 %v612_v60, %v612_v60  ;;  %v751_v21 = vsel %vm747_vm2, %v612_v60, 0.0 }
 0x109   :  { %v895_v6 = vpack.c.bf16 %v604_v0, %v604_v0  ;;  %v944_v7 = vadd.f32 %v943_v2, %v942_v63  ;;  %v785_v8 = vmul.f32 %v604_v0, %v604_v0  ;;  %v607_v9 = vadd.f32 %v932_v42, %v606_v5 }
 0x10a   :  { %733 = vst.msk [vmem:[%s1452_s4 + $0x8] sm:$0xf] %vm730_vm1, %v897_v3  ;;  %v898_v27 = vpack.c.bf16 %v615_v4, %v615_v4  ;;  %v748_v12 = vsel %vm747_vm2, %v604_v0, 0.0  ;;  %v788_v29 = vmul.f32 %v615_v4, %v615_v4  ;;  %v804_v45 = vsel %vm747_vm2, %v787_v10, 0.0 }
 0x10b   :  { %731 = vst.msk [vmem:[%s1452_s4] sm:$0xf] %vm730_vm1, %v895_v6  ;;  %v896_v13 = vpack.c.bf16 %v607_v9, %v607_v9  ;;  %v749_v14 = vsel %vm747_vm2, %v607_v9, 0.0  ;;  %v786_v15 = vmul.f32 %v607_v9, %v607_v9  ;;  %v801_v22 = vsel %vm747_vm2, %v785_v8, 0.0 }
 0x10c   :  { %734 = vst.msk [vmem:[%s1452_s4 + $0xc] sm:$0xf] %vm730_vm1, %v898_v27  ;;  %v750_v17 = vadd.f32 %v749_v14, %v748_v12  ;;  %v753_v35 = vsel %vm747_vm2, %v615_v4, 0.0  ;;  %v806_v36 = vsel %vm747_vm2, %v788_v29, 0.0 }
 0x10d   :  { %v945_v11 = vpop.f32.mrb[12].mxu0  ;;  %v995_v18 = vpop.f32.mrb[12].mxu1  ;;  %732 = vst.msk [vmem:[%s1452_s4 + $0x4] sm:$0xf] %vm730_vm1, %v896_v13  ;;  %v802_v40 = vsel %vm747_vm2, %v786_v15, 0.0 }
 0x10e   :  { %v946_v16 = vpop.f32.mrb[13].mxu0  ;;  %v619_v23 = vpop.f32.mrb[13].mxu1  ;;  %v752_v25 = vadd.f32 %v751_v21, %v750_v17  ;;  %v803_v26 = vadd.f32 %v802_v40, %v801_v22 }
 0x10f   :  { %v947_v19 = vadd.f32 %v946_v16, %v945_v11  ;;  %v948_v20 = vpop.f32.mrb[14].mxu0  ;;  %v620_v32 = vadd.f32 %v941_v61, %v619_v23  ;;  %v996_v33 = vpop.f32.mrb[14].mxu1 }
 0x110   :  { %v949_v24 = vpop.f32.mrb[15].mxu0  ;;  %v622_v28 = vpop.f32.mrb[15].mxu1  ;;  %v805_v37 = vadd.f32 %v804_v45, %v803_v26  ;;  %v754_v30 = vadd.f32 %v753_v35, %v752_v25 }
 0x111   :  { %v628_v31 = vadd.f32 %v995_v18, %v947_v19  ;;  %v950_v34 = vadd.f32 %v949_v24, %v948_v20  ;;  %v899_v41 = vpack.c.bf16 %v620_v32, %v620_v32  ;;  %v755_v42 = vsel %vm747_vm2, %v620_v32, 0.0 }
 0x112   :  { %v789_v44 = vmul.f32 %v620_v32, %v620_v32  ;;  %v807_v46 = vadd.f32 %v806_v36, %v805_v37  ;;  %v623_v48 = vadd.f32 %v944_v7, %v622_v28  ;;  %v756_v50 = vadd.f32 %v755_v42, %v754_v30 }
 0x113   :  { %v901_v39 = vpack.c.bf16 %v628_v31, %v628_v31  ;;  %v631_v47 = vadd.f32 %v996_v33, %v950_v34  ;;  %735 = vst.msk [vmem:[%s1452_s4 + $0x10] sm:$0xf] %vm730_vm1, %v899_v41  ;;  %v791_v54 = vmul.f32 %v628_v31, %v628_v31  ;;  %v759_v5 = vsel %vm747_vm2, %v628_v31, 0.0 }
 0x114   :  { %v808_v52 = vsel %vm747_vm2, %v789_v44, 0.0  ;;  %v900_v59 = vpack.c.bf16 %v623_v48, %v623_v48  ;;  %v757_v60 = vsel %vm747_vm2, %v623_v48, 0.0  ;;  %v790_v61 = vmul.f32 %v623_v48, %v623_v48 }
 0x115   :  { %737 = vst.msk [vmem:[%s1452_s4 + $0x18] sm:$0xf] %vm730_vm1, %v901_v39  ;;  %v951_v49 = vpop.f32.mrb[16].mxu0  ;;  %v809_v55 = vadd.f32 %v808_v52, %v807_v46  ;;  %v902_v57 = vpack.c.bf16 %v631_v47, %v631_v47  ;;  %v999_v63 = vpop.f32.mrb[16].mxu1  ;;  %v792_v1 = vmul.f32 %v631_v47, %v631_v47  ;;  %v758_v2 = vadd.f32 %v757_v60, %v756_v50 }
 0x116   :  { %v952_v53 = vpop.f32.mrb[17].mxu0  ;;  %v635_v4 = vpop.f32.mrb[17].mxu1  ;;  %736 = vst.msk [vmem:[%s1452_s4 + $0x14] sm:$0xf] %vm730_vm1, %v900_v59  ;;  %v810_v6 = vsel %vm747_vm2, %v790_v61, 0.0  ;;  %v812_v8 = vsel %vm747_vm2, %v791_v54, 0.0 }
 0x117   :  { %v954_v58 = vpop.f32.mrb[18].mxu0  ;;  %v953_v62 = vadd.f32 %v952_v53, %v951_v49  ;;  %738 = vst.msk [vmem:[%s1452_s4 + $0x1c] sm:$0xf] %vm730_vm1, %v902_v57  ;;  %v1000_v27 = vpop.f32.mrb[18].mxu1  ;;  %v761_v9 = vsel %vm747_vm2, %v631_v47, 0.0  ;;  %v760_v10 = vadd.f32 %v759_v5, %v758_v2  ;;  %v811_v11 = vadd.f32 %v810_v6, %v809_v55 }
 0x118   :  { %v955_v0 = vpop.f32.mrb[19].mxu0  ;;  %v638_v12 = vpop.f32.mrb[19].mxu1  ;;  %v814_v29 = vsel %vm747_vm2, %v792_v1, 0.0 }
 0x119   :  { %v956_v3 = vadd.f32 %v955_v0, %v954_v58  ;;  %v636_v7 = vadd.f32 %v953_v62, %v635_v4  ;;  %v813_v17 = vadd.f32 %v812_v8, %v811_v11  ;;  %v762_v18 = vadd.f32 %v761_v9, %v760_v10 }
 0x11b   :  { %v903_v13 = vpack.c.bf16 %v636_v7, %v636_v7  ;;  %v763_v14 = vsel %vm747_vm2, %v636_v7, 0.0  ;;  %v793_v15 = vmul.f32 %v636_v7, %v636_v7  ;;  %v639_v16 = vadd.f32 %v956_v3, %v638_v12 }
 0x11c   :  { %v764_v23 = vadd.f32 %v763_v14, %v762_v18  ;;  %v815_v24 = vadd.f32 %v814_v29, %v813_v17 }
 0x11d   :  { %739 = vst.msk [vmem:[%s1452_s4 + $0x20] sm:$0xf] %vm730_vm1, %v903_v13  ;;  %v816_v19 = vsel %vm747_vm2, %v793_v15, 0.0  ;;  %v904_v20 = vpack.c.bf16 %v639_v16, %v639_v16  ;;  %v765_v21 = vsel %vm747_vm2, %v639_v16, 0.0  ;;  %v794_v22 = vmul.f32 %v639_v16, %v639_v16  ;;  %v957_v40 = vpop.f32.mrb[20].mxu0  ;;  %v1003_v34 = vpop.f32.mrb[20].mxu1 }
 0x11e   :  { %v958_v25 = vpop.f32.mrb[21].mxu0  ;;  %v817_v33 = vadd.f32 %v816_v19, %v815_v24  ;;  %v766_v45 = vadd.f32 %v765_v21, %v764_v23  ;;  %v660_v35 = vadd.f32 %v1003_v34, %v1338_v51  ;;  %v651_v37 = vpop.f32.mrb[21].mxu1 }
 0x11f   :  { %740 = vst.msk [vmem:[%s1452_s4 + $0x24] sm:$0xf] %vm730_vm1, %v904_v20  ;;  %v818_v26 = vsel %vm747_vm2, %v794_v22, 0.0  ;;  %v959_v31 = vadd.f32 %v958_v25, %v957_v40  ;;  %v960_v32 = vpop.f32.mrb[22].mxu0  ;;  %v652_v30 = vadd.f32 %v1334_v38, %v651_v37  ;;  %v1004_v42 = vpop.f32.mrb[22].mxu1 }
 0x120   :  { %v961_v28 = vpop.f32.mrb[23].mxu0  ;;  %v819_v41 = vadd.f32 %v818_v26, %v817_v33  ;;  %v909_v44 = vpack.c.bf16 %v660_v35, %v660_v35  ;;  %v654_v47 = vpop.f32.mrb[23].mxu1  ;;  %v663_v38 = vadd.f32 %v1004_v42, %v1340_v56  ;;  %v799_v3 = vmul.f32 %v660_v35, %v660_v35 }
 0x121   :  { %v644_v36 = vadd.f32 %v999_v63, %v959_v31  ;;  %v962_v39 = vadd.f32 %v961_v28, %v960_v32  ;;  %v907_v50 = vpack.c.bf16 %v652_v30, %v652_v30  ;;  %v655_v54 = vadd.f32 %v1336_v43, %v654_v47 }
 0x122   :  { %745 = vst.msk [vmem:[%s1452_s4 + $0x38] sm:$0xf] %vm730_vm1, %v909_v44  ;;  %v910_v57 = vpack.c.bf16 %v663_v38, %v663_v38  ;;  %v797_v58 = vmul.f32 %v652_v30, %v652_v30  ;;  %v771_v63 = vsel %vm747_vm2, %v652_v30, 0.0  ;;  %v800_v8 = vmul.f32 %v663_v38, %v663_v38 }
 0x123   :  { %v905_v46 = vpack.c.bf16 %v644_v36, %v644_v36  ;;  %v767_v48 = vsel %vm747_vm2, %v644_v36, 0.0  ;;  %v795_v49 = vmul.f32 %v644_v36, %v644_v36  ;;  %743 = vst.msk [vmem:[%s1452_s4 + $0x30] sm:$0xf] %vm730_vm1, %v907_v50  ;;  %v647_v53 = vadd.f32 %v1000_v27, %v962_v39 }
 0x124   :  { %v768_v51 = vadd.f32 %v767_v48, %v766_v45  ;;  %746 = vst.msk [vmem:[%s1452_s4 + $0x3c] sm:$0xf] %vm730_vm1, %v910_v57  ;;  %v908_v62 = vpack.c.bf16 %v655_v54, %v655_v54  ;;  %v798_v0 = vmul.f32 %v655_v54, %v655_v54  ;;  %v824_v4 = vsel %vm747_vm2, %v797_v58, 0.0 }
 0x125   :  { %741 = vst.msk [vmem:[%s1452_s4 + $0x28] sm:$0xf] %vm730_vm1, %v905_v46  ;;  %v820_v52 = vsel %vm747_vm2, %v795_v49, 0.0  ;;  %v906_v59 = vpack.c.bf16 %v647_v53, %v647_v53  ;;  %v769_v60 = vsel %vm747_vm2, %v647_v53, 0.0  ;;  %v796_v61 = vmul.f32 %v647_v53, %v647_v53 }
 0x126   :  { %v821_v55 = vadd.f32 %v820_v52, %v819_v41  ;;  %v770_v56 = vadd.f32 %v769_v60, %v768_v51  ;;  %744 = vst.msk [vmem:[%s1452_s4 + $0x34] sm:$0xf] %vm730_vm1, %v908_v62  ;;  %v773_v5 = vsel %vm747_vm2, %v655_v54, 0.0  ;;  %v775_v27 = vsel %vm747_vm2, %v660_v35, 0.0 }
 0x127   :  { %742 = vst.msk [vmem:[%s1452_s4 + $0x2c] sm:$0xf] %vm730_vm1, %v906_v59  ;;  %v822_v43 = vsel %vm747_vm2, %v796_v61, 0.0  ;;  %v826_v9 = vsel %vm747_vm2, %v798_v0, 0.0  ;;  %v828_v12 = vsel %vm747_vm2, %v799_v3, 0.0  ;;  %v777_v13 = vsel %vm747_vm2, %v663_v38, 0.0 }
 0x128   :  { %v823_v1 = vadd.f32 %v822_v43, %v821_v55  ;;  %v772_v2 = vadd.f32 %v771_v63, %v770_v56  ;;  %v830_v16 = vsel %vm747_vm2, %v800_v8, 0.0 }
 0x12a   :  { %v774_v6 = vadd.f32 %v773_v5, %v772_v2  ;;  %v825_v7 = vadd.f32 %v824_v4, %v823_v1 }
 0x12c   :  { %v776_v10 = vadd.f32 %v775_v27, %v774_v6  ;;  %v827_v11 = vadd.f32 %v826_v9, %v825_v7 }
 0x12e   :  { %v778_v14 = vadd.f32 %v777_v13, %v776_v10  ;;  %v829_v15 = vadd.f32 %v828_v12, %v827_v11 }
 0x130   :  { %v779_v29 = vrot.slane %v778_v14, 4  ;;  %v831_v17 = vadd.f32 %v830_v16, %v829_v15 }
 0x132   :  { %v780_v18 = vadd.f32 %v779_v29, %v778_v14  ;;  %v832_v19 = vrot.slane %v831_v17, 4 }
 0x134   :  { %v781_v20 = vrot.slane %v780_v18, 2  ;;  %v833_v21 = vadd.f32 %v832_v19, %v831_v17 }
 0x136   :  { %v782_v22 = vadd.f32 %v781_v20, %v780_v18  ;;  %v834_v40 = vrot.slane %v833_v21, 2 }
 0x138   :  { %v783_v23 = vrot.slane %v782_v22, 1  ;;  %v835_v24 = vadd.f32 %v834_v40, %v833_v21 }
 0x13a   :  { %v784_v25 = vadd.f32 %v783_v23, %v782_v22  ;;  %v836_v26 = vrot.slane %v835_v24, 1 }
 0x13c   :  { %v837_v31 = vadd.f32 %v836_v26, %v835_v24  ;;  %839 = vst.msk [vmem:[%s1453_s5] sm:$0x1] %vm838_vm3, %v784_v25 }
 0x13e   :  { %840 = vst.msk [vmem:[%s1454_s6] sm:$0x1] %vm838_vm3, %v837_v31 }

// kernel: tile.82
= control target key start
LH: loop header
LB: loop body
LE: loop exit
PB: predicated region body
PF: predicated region fallthrough
CT: control target
= control target key end

     0   :  { %s28_s0 = inlined_call_operand.vmem [shape: f32[8], index: 0, kind: input, shape index: {}]   ;;  %s29_s1 = inlined_call_operand.vmem [shape: f32[9,8], index: 1, kind: output, shape index: {}]  }
   0x1   :  { %v4_v0 = vld [vmem:[%s28_s0] ss:$0 sm:$0xff] }
   0x2   :  { %5 = vst [vmem:[%s29_s1] sm:$0xff] %v4_v0  ;;  %8 = vst [vmem:[%s29_s1 + $0x8] sm:$0xff] %v4_v0 }

// kernel: tile.88
= control target key start
LH: loop header
LB: loop body
LE: loop exit
PB: predicated region body
PF: predicated region fallthrough
CT: control target
= control target key end

     0   :  { %s75_s10 = smov 64   ;;  %s76_s11 = smov 48   ;;  %vm3_vm0 = vcmask 64512   ;;  %vm9_vm1 = vcmask 589312   ;;  %vm15_vm2 = vcmask 523712   ;;  %vm21_vm3 = vcmask 458112   ;;  %s123_s0 = inlined_call_operand.vmem [shape: f32[9,8], index: 0, kind: input, shape index: {}]   ;;  %s124_s1 = inlined_call_operand.vmem [shape: f32[1,72], index: 1, kind: output, shape index: {}]  }
   0x1   :  { %v59_v0 = vld [vmem:[%s123_s0 + $0x8] sm:$0x1]   ;;  %v61_v1 = vld [vmem:[%s123_s0 + $0x6] sm:$0x1]   ;;  %v60_v2 = vld [vmem:[%s123_s0 + $0x7] sm:$0x1]  }
   0x2   :  { %7 = vrot.lane.b32.xlu0 %v59_v0, %s75_s10  ;;  %19 = vrot.lane.b32.xlu1 %v61_v1, %s76_s11  ;;  %v62_v3 = vld [vmem:[%s123_s0 + $0x5] sm:$0x1]   ;;  %v2_v4 = vld [vmem:[%s123_s0] sm:$0x1]   ;;  %s77_s18 = smov 56   ;;  %s78_s19 = smov 40  }
   0x3   :  { %4 = vst.msk [vmem:[#allocation0] sm:$0x1] %vm3_vm0, %v2_v4   ;;  %v63_v5 = vld [vmem:[%s123_s0 + $0x4] sm:$0x1]   ;;  %v64_v6 = vld [vmem:[%s123_s0 + $0x3] sm:$0x1]  }
   0x4   :  { %s79_s24 = smov 32   ;;  %s80_s25 = smov 24   ;;  %v65_v7 = vld [vmem:[%s123_s0 + $0x2] sm:$0x1]   ;;  %v66_v8 = vld [vmem:[%s123_s0 + $0x1] sm:$0x1]  }
   0x5   :  { %s81_s0 = smov 16   ;;  %s82_s30 = smov 8   ;;  %vm27_vm4 = vcmask 392512   ;;  %vm33_vm5 = vcmask 326912   ;;  %vm39_vm6 = vcmask 261312   ;;  %vm45_vm7 = vcmask 195712  }
   0x6   :  { %13 = vrot.lane.b32.xlu0 %v60_v2, %s77_s18  ;;  %25 = vrot.lane.b32.xlu1 %v62_v3, %s78_s19  ;;  %vm51_vm8 = vcmask 130112  }
   0xa   :  { %31 = vrot.lane.b32.xlu0 %v63_v5, %s79_s24  ;;  %37 = vrot.lane.b32.xlu1 %v64_v6, %s80_s25 }
   0xe   :  { %43 = vrot.lane.b32.xlu0 %v65_v7, %s81_s0  ;;  %49 = vrot.lane.b32.xlu1 %v66_v8, %s82_s30 }
  0x74   :  { %v8_v9 = vpop.permute.xlu0 %7   ;;  %v20_v10 = vpop.permute.xlu1 %19  }
  0x75   :  { %10 = vst.msk [vmem:[#allocation0] sm:$0x1] %vm9_vm1, %v8_v9  }
  0x78   :  { %v14_v11 = vpop.permute.xlu0 %13   ;;  %v26_v12 = vpop.permute.xlu1 %25  }
  0x79   :  { %16 = vst.msk [vmem:[#allocation0] sm:$0x1] %vm15_vm2, %v14_v11  }
  0x7a   :  { %22 = vst.msk [vmem:[#allocation0] sm:$0x1] %vm21_vm3, %v20_v10  }
  0x7b   :  { %28 = vst.msk [vmem:[#allocation0] sm:$0x1] %vm27_vm4, %v26_v12  }
  0x7c   :  { %v32_v13 = vpop.permute.xlu0 %31   ;;  %v38_v14 = vpop.permute.xlu1 %37  }
  0x7d   :  { %34 = vst.msk [vmem:[#allocation0] sm:$0x1] %vm33_vm5, %v32_v13  }
  0x7e   :  { %40 = vst.msk [vmem:[#allocation0] sm:$0x1] %vm39_vm6, %v38_v14  }
  0x80   :  { %v44_v15 = vpop.permute.xlu0 %43   ;;  %v50_v16 = vpop.permute.xlu1 %49  }
  0x81   :  { %46 = vst.msk [vmem:[#allocation0] sm:$0x1] %vm45_vm7, %v44_v15  }
  0x82   :  { %52 = vst.msk [vmem:[#allocation0] sm:$0x1] %vm51_vm8, %v50_v16  }
  0x89   :  { %v56_v17 = vld [vmem:[#allocation0] sm:$0x1] }
  0x8a   :  { %58 = vst [vmem:[%s124_s1] sm:$0x1] %v56_v17 }

// kernel: generator_forward.8
= control target key start
LH: loop header
LB: loop body
LE: loop exit
PB: predicated region body
PF: predicated region fallthrough
CT: control target
= control target key end

     0   :  { %v215_v0 = vlaneseq  ;;  %v2007_v1 = vmov 0   ;;  %vm757_vm0 = vcmask 130048   ;;  %vm1399_vm1 = vcmask 257024   ;;  %s3309_s3 = inlined_call_operand.vmem [shape: bf16[144,32], index: 3, kind: input, shape index: {}]   ;;  %s3310_s0 = inlined_call_operand.vmem [shape: bf16[512,144], index: 0, kind: input, shape index: {}]   ;;  %s3311_s1 = inlined_call_operand.vmem [shape: f32[1,144], index: 1, kind: input, shape index: {}]   ;;  %s3312_s2 = inlined_call_operand.vmem [shape: f32[1,144], index: 2, kind: input, shape index: {}]   ;;  %s3313_s4 = inlined_call_operand.vmem [shape: bf16[512,32], index: 4, kind: output, shape index: {0}]   ;;  %s3314_s5 = inlined_call_operand.vmem [shape: f32[1,32], index: 5, kind: output, shape index: {1}]   ;;  %s3315_s6 = inlined_call_operand.vmem [shape: f32[1,32], index: 6, kind: output, shape index: {2}]  }
   0x1   :  { %854 = vmatprep.subr.bf16.mxu0 %v2007_v1  ;;  %v1998_v2 = vld [vmem:[%s3309_s3] sm:$0xff]   ;;  %1979 = vmatprep.subr.bf16.mxu1 %v2007_v1  ;;  %v1999_v3 = vld [vmem:[%s3309_s3 + $0x8] sm:$0xff]   ;;  %v2000_v5 = vld [vmem:[%s3309_s3 + $0x10] sm:$0xff]   ;;  %vm1464_vm2 = vcmask 261120   ;;  %vm1795_vm3 = vcmask 253952  }
   0x2   :  { %855 = vmatpush1.bf16.msra.mxu0 %v1998_v2  ;;  %1988 = vmatpush1.bf16.msra.mxu1 %v1998_v2  ;;  %v216_v4 = vshrl.u32 %v215_v0, 7  ;;  %v2001_v8 = vld [vmem:[%s3309_s3 + $0x18] sm:$0xff]   ;;  %v21_v9 = vld [vmem:[%s3310_s0] sm:$0xff]  ;;  %v22_v10 = vld [vmem:[%s3310_s0 + $0x8] sm:$0xff] }
   0x3   :  { %856 = vmatprep.subr.bf16.mxu0 %v2007_v1  ;;  %1980 = vmatprep.subr.bf16.mxu1 %v2007_v1  ;;  %v213_v11 = vld [vmem:[%s3311_s1] sm:$0x3]  ;;  %v85_v12 = vunpack.c.l.bf16 %v21_v9  ;;  %v86_v13 = vunpack.c.h.bf16 %v21_v9  ;;  %v87_v14 = vunpack.c.l.bf16 %v22_v10  ;;  %v88_v15 = vunpack.c.h.bf16 %v22_v10  ;;  %v23_v17 = vld [vmem:[%s3310_s0 + $0x10] sm:$0xff]  ;;  %v24_v18 = vld [vmem:[%s3310_s0 + $0x18] sm:$0xff] }
   0x4   :  { %v217_v6 = vsub.s32 0, %v216_v4  ;;  %v221_v7 = vsub.s32 1, %v216_v4  ;;  %v353_v16 = vld [vmem:[%s3312_s2] sm:$0x3]  ;;  %v90_v22 = vunpack.c.h.bf16 %v23_v17  ;;  %v92_v23 = vunpack.c.h.bf16 %v24_v18  ;;  %v2003_v40 = vld [vmem:[%s3309_s3 + $0x28] sm:$0xff]   ;;  %v2004_v52 = vld [vmem:[%s3309_s3 + $0x30] sm:$0xff]  }
   0x5   :  { %v89_v24 = vunpack.c.l.bf16 %v23_v17  ;;  %v91_v25 = vunpack.c.l.bf16 %v24_v18  ;;  %v2002_v28 = vld [vmem:[%s3309_s3 + $0x20] sm:$0xff]   ;;  %v26_v44 = vld [vmem:[%s3310_s0 + $0x28] sm:$0xff]  ;;  %v27_v58 = vld [vmem:[%s3310_s0 + $0x30] sm:$0xff] }
   0x6   :  { %857 = vmatpush1.bf16.msra.mxu0 %v1999_v3  ;;  %1989 = vmatpush1.bf16.msra.mxu1 %v1999_v3  ;;  %v2080_v19 = vrot.slane %v213_v11, %v217_v6  ;;  %v2082_v20 = vrot.slane %v213_v11, %v221_v7  ;;  %v2084_v21 = vrot.slane %v353_v16, %v221_v7  ;;  %v25_v43 = vld [vmem:[%s3310_s0 + $0x20] sm:$0xff]  ;;  %v96_v51 = vunpack.c.h.bf16 %v26_v44  ;;  %v28_v59 = vld [vmem:[%s3310_s0 + $0x38] sm:$0xff]  ;;  %v30_v3 = vld [vmem:[%s3310_s0 + $0x48] sm:$0xff] }
   0x7   :  { %858 = vmatprep.subr.bf16.mxu0 %v2007_v1  ;;  %1981 = vmatprep.subr.bf16.mxu1 %v2007_v1  ;;  %v2092_v29 = vrot.slane %v353_v16, %v217_v6  ;;  %v94_v50 = vunpack.c.h.bf16 %v25_v43  ;;  %v93_v57 = vunpack.c.l.bf16 %v25_v43  ;;  %v95_v62 = vunpack.c.l.bf16 %v26_v44  ;;  %v29_v2 = vld [vmem:[%s3310_s0 + $0x40] sm:$0xff]  ;;  %v2005_v4 = vld [vmem:[%s3309_s3 + $0x38] sm:$0xff]  }
   0x8   :  { %v226_v26 = vmul.f32 %v2082_v20, %v86_v13  ;;  %v228_v27 = vmul.f32 %v2082_v20, %v88_v15  ;;  %v225_v30 = vmul.f32 %v2080_v19, %v85_v12  ;;  %v227_v31 = vmul.f32 %v2080_v19, %v87_v14  ;;  %v31_v12 = vld [vmem:[%s3310_s0 + $0x50] sm:$0xff]  ;;  %v32_v13 = vld [vmem:[%s3310_s0 + $0x58] sm:$0xff] }
   0x9   :  { %v230_v34 = vmul.f32 %v2082_v20, %v90_v22  ;;  %v232_v35 = vmul.f32 %v2082_v20, %v92_v23  ;;  %v229_v36 = vmul.f32 %v2080_v19, %v89_v24  ;;  %v231_v37 = vmul.f32 %v2080_v19, %v91_v25  ;;  %v2006_v25 = vld [vmem:[%s3309_s3 + $0x40] sm:$0xff]  }
   0xa   :  { %859 = vmatpush1.bf16.msra.mxu0 %v2000_v5  ;;  %1990 = vmatpush1.bf16.msra.mxu1 %v2000_v5  ;;  %v366_v32 = vadd.f32 %v2084_v21, %v226_v26  ;;  %v368_v33 = vadd.f32 %v2084_v21, %v228_v27  ;;  %v365_v41 = vadd.f32 %v2092_v29, %v225_v30  ;;  %v98_v6 = vunpack.c.h.bf16 %v27_v58 }
   0xb   :  { %860 = vmatprep.subr.bf16.mxu0 %v2007_v1  ;;  %1982 = vmatprep.subr.bf16.mxu1 %v2007_v1  ;;  %v367_v42 = vadd.f32 %v2092_v29, %v227_v31  ;;  %v370_v46 = vadd.f32 %v2084_v21, %v230_v34  ;;  %v372_v47 = vadd.f32 %v2084_v21, %v232_v35  ;;  %v100_v7 = vunpack.c.h.bf16 %v28_v59 }
   0xc   :  { %v494_v38 = vmax.f32 %v366_v32, 0.0  ;;  %v496_v39 = vmax.f32 %v368_v33, 0.0  ;;  %v369_v48 = vadd.f32 %v2092_v29, %v229_v36  ;;  %v371_v49 = vadd.f32 %v2092_v29, %v231_v37 }
   0xd   :  { %v493_v53 = vmax.f32 %v365_v41, 0.0  ;;  %v495_v54 = vmax.f32 %v367_v42, 0.0  ;;  %v498_v55 = vmax.f32 %v370_v46, 0.0  ;;  %v500_v56 = vmax.f32 %v372_v47, 0.0 }
   0xe   :  { %861 = vmatpush1.bf16.msra.mxu0 %v2001_v8  ;;  %1991 = vmatpush1.bf16.msra.mxu1 %v2001_v8  ;;  %v622_v45 = vpack.c.bf16 %v496_v39, %v494_v38  ;;  %v497_v60 = vmax.f32 %v369_v48, 0.0  ;;  %v499_v61 = vmax.f32 %v371_v49, 0.0  ;;  %v234_v63 = vmul.f32 %v2082_v20, %v94_v50 }
   0xf   :  { %862 = vmatprep.subr.bf16.mxu0 %v2007_v1  ;;  %1983 = vmatprep.subr.bf16.mxu1 %v2007_v1  ;;  %v236_v0 = vmul.f32 %v2082_v20, %v96_v51  ;;  %v621_v5 = vpack.c.bf16 %v495_v54, %v493_v53  ;;  %v624_v8 = vpack.c.bf16 %v500_v56, %v498_v55  ;;  %v97_v10 = vunpack.c.l.bf16 %v27_v58  ;;  %v33_v51 = vld [vmem:[%s3310_s0 + $0x60] sm:$0xff] }
  0x10   :  { %1819 = vmatprep.mubr.msk.bf16.mxu0 %vm757_vm0, %v622_v45  ;;  %v233_v9 = vmul.f32 %v2080_v19, %v93_v57  ;;  %v99_v11 = vunpack.c.l.bf16 %v28_v59  ;;  %v2152_v14 = vpack.c.bf16 %v499_v61, %v497_v60  ;;  %v235_v15 = vmul.f32 %v2080_v19, %v95_v62  ;;  %v34_v59 = vld [vmem:[%s3310_s0 + $0x68] sm:$0xff] }
  0x11   :  { %v102_v16 = vunpack.c.h.bf16 %v29_v2  ;;  %v104_v17 = vunpack.c.h.bf16 %v30_v3  ;;  %v374_v18 = vadd.f32 %v2084_v21, %v234_v63  ;;  %v376_v22 = vadd.f32 %v2084_v21, %v236_v0 }
  0x12   :  { %863 = vmatpush1.bf16.msra.mxu0 %v2002_v28  ;;  %1992 = vmatpush1.bf16.msra.mxu1 %v2002_v28  ;;  %v101_v23 = vunpack.c.l.bf16 %v29_v2  ;;  %v103_v24 = vunpack.c.l.bf16 %v30_v3  ;;  %v238_v26 = vmul.f32 %v2082_v20, %v98_v6  ;;  %v240_v27 = vmul.f32 %v2082_v20, %v100_v7 }
  0x13   :  { %864 = vmatprep.subr.bf16.mxu0 %v2007_v1  ;;  %1984 = vmatprep.subr.bf16.mxu1 %v2007_v1  ;;  %v106_v28 = vunpack.c.h.bf16 %v31_v12  ;;  %v108_v30 = vunpack.c.h.bf16 %v32_v13  ;;  %v373_v31 = vadd.f32 %v2092_v29, %v233_v9  ;;  %v237_v32 = vmul.f32 %v2080_v19, %v97_v10  ;;  %v53_v10 = vld [vmem:[%s3310_s0 + $0x100] sm:$0xff] }
  0x14   :  { %v239_v33 = vmul.f32 %v2080_v19, %v99_v11  ;;  %v105_v34 = vunpack.c.l.bf16 %v31_v12  ;;  %v242_v35 = vmul.f32 %v2082_v20, %v102_v16  ;;  %v244_v36 = vmul.f32 %v2082_v20, %v104_v17  ;;  %v36_v16 = vld [vmem:[%s3310_s0 + $0x78] sm:$0xff] }
  0x15   :  { %v241_v37 = vmul.f32 %v2080_v19, %v101_v23  ;;  %v107_v38 = vunpack.c.l.bf16 %v32_v13  ;;  %v375_v39 = vadd.f32 %v2092_v29, %v235_v15  ;;  %v246_v41 = vmul.f32 %v2082_v20, %v106_v28  ;;  %v35_v15 = vld [vmem:[%s3310_s0 + $0x70] sm:$0xff] }
  0x16   :  { %865 = vmatpush1.bf16.msra.mxu0 %v2003_v40  ;;  %1993 = vmatpush1.bf16.msra.mxu1 %v2003_v40  ;;  %v243_v40 = vmul.f32 %v2080_v19, %v103_v24  ;;  %v248_v42 = vmul.f32 %v2082_v20, %v108_v30  ;;  %v502_v43 = vmax.f32 %v374_v18, 0.0  ;;  %v504_v44 = vmax.f32 %v376_v22, 0.0 }
  0x17   :  { %866 = vmatprep.subr.bf16.mxu0 %v2007_v1  ;;  %1985 = vmatprep.subr.bf16.mxu1 %v2007_v1  ;;  %v378_v45 = vadd.f32 %v2084_v21, %v238_v26  ;;  %v380_v46 = vadd.f32 %v2084_v21, %v240_v27  ;;  %v377_v47 = vadd.f32 %v2092_v29, %v237_v32  ;;  %v503_v55 = vmax.f32 %v375_v39, 0.0  ;;  %v54_v27 = vld [vmem:[%s3310_s0 + $0x108] sm:$0xff] }
  0x18   :  { %v379_v48 = vadd.f32 %v2092_v29, %v239_v33  ;;  %v245_v49 = vmul.f32 %v2080_v19, %v105_v34  ;;  %v247_v50 = vmul.f32 %v2080_v19, %v107_v38  ;;  %v384_v53 = vadd.f32 %v2084_v21, %v244_v36 }
  0x19   :  { %v381_v54 = vadd.f32 %v2092_v29, %v241_v37  ;;  %v383_v56 = vadd.f32 %v2092_v29, %v243_v40  ;;  %v386_v57 = vadd.f32 %v2084_v21, %v246_v41  ;;  %v388_v58 = vadd.f32 %v2084_v21, %v248_v42 }
  0x1a   :  { %867 = vmatpush1.bf16.msra.mxu0 %v2004_v52  ;;  %1994 = vmatpush1.bf16.msra.mxu1 %v2004_v52  ;;  %v382_v52 = vadd.f32 %v2084_v21, %v242_v35  ;;  %v626_v60 = vpack.c.bf16 %v504_v44, %v502_v43  ;;  %v506_v61 = vmax.f32 %v378_v45, 0.0  ;;  %v508_v62 = vmax.f32 %v380_v46, 0.0 }
  0x1b   :  { %868 = vmatprep.subr.bf16.mxu0 %v2007_v1  ;;  %1986 = vmatprep.subr.bf16.mxu1 %v2007_v1  ;;  %v110_v63 = vunpack.c.h.bf16 %v33_v51  ;;  %v505_v0 = vmax.f32 %v377_v47, 0.0  ;;  %v507_v2 = vmax.f32 %v379_v48, 0.0  ;;  %v385_v3 = vadd.f32 %v2092_v29, %v245_v49 }
  0x1c   :  { %v512_v6 = vmax.f32 %v384_v53, 0.0  ;;  %v509_v7 = vmax.f32 %v381_v54, 0.0  ;;  %v112_v9 = vunpack.c.h.bf16 %v34_v59  ;;  %v511_v11 = vmax.f32 %v383_v56, 0.0  ;;  %v55_v56 = vld [vmem:[%s3310_s0 + $0x110] sm:$0xff] }
  0x1d   :  { %v516_v12 = vmax.f32 %v388_v58, 0.0  ;;  %v109_v13 = vunpack.c.l.bf16 %v33_v51  ;;  %v628_v18 = vpack.c.bf16 %v508_v62, %v506_v61  ;;  %v250_v22 = vmul.f32 %v2082_v20, %v110_v63 }
  0x1e   :  { %869 = vmatpush1.bf16.msra.mxu0 %v2005_v4  ;;  %1995 = vmatpush1.bf16.msra.mxu1 %v2005_v4  ;;  %v387_v4 = vadd.f32 %v2092_v29, %v247_v50  ;;  %v111_v23 = vunpack.c.l.bf16 %v34_v59  ;;  %v2206_v24 = vpack.c.bf16 %v507_v2, %v505_v0  ;;  %v149_v28 = vunpack.c.l.bf16 %v53_v10 }
  0x1f   :  { %870 = vmatprep.subr.bf16.mxu0 %v2007_v1  ;;  %1987 = vmatprep.subr.bf16.mxu1 %v2007_v1  ;;  %v501_v1 = vmax.f32 %v373_v31, 0.0  ;;  %v252_v31 = vmul.f32 %v2082_v20, %v112_v9  ;;  %v114_v32 = vunpack.c.h.bf16 %v35_v15  ;;  %v116_v33 = vunpack.c.h.bf16 %v36_v16 }
  0x20   :  { %v515_v26 = vmax.f32 %v387_v4, 0.0  ;;  %v2215_v34 = vpack.c.bf16 %v511_v11, %v509_v7  ;;  %v249_v36 = vmul.f32 %v2080_v19, %v109_v13  ;;  %v150_v37 = vunpack.c.h.bf16 %v53_v10 }
  0x21   :  { %v625_v17 = vpack.c.bf16 %v503_v55, %v501_v1  ;;  %v390_v38 = vadd.f32 %v2084_v21, %v250_v22  ;;  %v251_v39 = vmul.f32 %v2080_v19, %v111_v23  ;;  %v113_v40 = vunpack.c.l.bf16 %v35_v15 }
  0x22   :  { %871 = vmatpush1.bf16.msra.mxu0 %v2006_v25  ;;  %1996 = vmatpush1.bf16.msra.mxu1 %v2006_v25  ;;  %v513_v25 = vmax.f32 %v385_v3, 0.0  ;;  %v151_v41 = vunpack.c.l.bf16 %v54_v27  ;;  %v152_v43 = vunpack.c.h.bf16 %v54_v27  ;;  %v289_v44 = vmul.f32 %v2080_v19, %v149_v28  ;;  %v37_v3 = vld [vmem:[%s3310_s0 + $0x80] sm:$0xff] }
  0x23   :  { %v392_v45 = vadd.f32 %v2084_v21, %v252_v31  ;;  %v254_v46 = vmul.f32 %v2082_v20, %v114_v32  ;;  %v256_v47 = vmul.f32 %v2082_v20, %v116_v33  ;;  %v389_v49 = vadd.f32 %v2092_v29, %v249_v36  ;;  %v39_v32 = vld [vmem:[%s3310_s0 + $0x90] sm:$0xff] }
  0x24   :  { %v2223_v42 = vpack.c.bf16 %v515_v26, %v513_v25  ;;  %v291_v48 = vmul.f32 %v2080_v19, %v151_v41  ;;  %v292_v50 = vmul.f32 %v2082_v20, %v152_v43  ;;  %v429_v1 = vadd.f32 %v2092_v29, %v289_v44  ;;  %v40_v44 = vld [vmem:[%s3310_s0 + $0x98] sm:$0xff] }
  0x25   :  { %887 = vmatmul.mubr.bf16.vlgmr.msra.gmra.mrb[0].mxu0 %v621_v5  ;;  %v510_v5 = vmax.f32 %v382_v52, 0.0  ;;  %v391_v52 = vadd.f32 %v2092_v29, %v251_v39  ;;  %v115_v53 = vunpack.c.l.bf16 %v36_v16  ;;  %v253_v54 = vmul.f32 %v2080_v19, %v113_v40  ;;  %v57_v39 = vld [vmem:[%s3310_s0 + $0x120] sm:$0xff] }
  0x26   :  { %1820 = vmatprep.mubr.msk.bf16.mxu0 %vm757_vm0, %v624_v8  ;;  %v514_v8 = vmax.f32 %v386_v57, 0.0  ;;  %v431_v55 = vadd.f32 %v2092_v29, %v291_v48  ;;  %v56_v57 = vld [vmem:[%s3310_s0 + $0x118] sm:$0xff]  ;;  %v518_v58 = vmax.f32 %v390_v38, 0.0  ;;  %v432_v59 = vadd.f32 %v2084_v21, %v292_v50 }
  0x27   :  { %v2211_v30 = vpack.c.bf16 %v512_v6, %v510_v5  ;;  %v557_v61 = vmax.f32 %v429_v1, 0.0  ;;  %v520_v62 = vmax.f32 %v392_v45, 0.0  ;;  %v394_v63 = vadd.f32 %v2084_v21, %v254_v46 }
  0x28   :  { %v2217_v35 = vpack.c.bf16 %v516_v12, %v514_v8  ;;  %v396_v0 = vadd.f32 %v2084_v21, %v256_v47  ;;  %v559_v2 = vmax.f32 %v431_v55, 0.0  ;;  %v517_v4 = vmax.f32 %v389_v49, 0.0  ;;  %v38_v12 = vld [vmem:[%s3310_s0 + $0x88] sm:$0xff] }
  0x29   :  { %v560_v5 = vmax.f32 %v432_v59, 0.0  ;;  %v154_v6 = vunpack.c.h.bf16 %v55_v56  ;;  %v156_v7 = vunpack.c.h.bf16 %v56_v57  ;;  %v519_v9 = vmax.f32 %v391_v52, 0.0  ;;  %v58_v49 = vld [vmem:[%s3310_s0 + $0x128] sm:$0xff] }
  0x2a   :  { %v255_v10 = vmul.f32 %v2080_v19, %v115_v53  ;;  %v2253_v11 = vadd.f32 %v2092_v29, %v253_v54  ;;  %v653_v8 = vpack.c.bf16 %v559_v2, %v557_v61  ;;  %v118_v15 = vunpack.c.h.bf16 %v37_v3 }
  0x2b   :  { %v294_v16 = vmul.f32 %v2082_v20, %v154_v6  ;;  %v2260_v22 = vpack.c.bf16 %v520_v62, %v518_v58  ;;  %v153_v23 = vunpack.c.l.bf16 %v55_v56  ;;  %v155_v25 = vunpack.c.l.bf16 %v56_v57 }
  0x2c   :  { %v524_v26 = vmax.f32 %v396_v0, 0.0  ;;  %v120_v27 = vunpack.c.h.bf16 %v38_v12  ;;  %v2268_v33 = vpack.c.bf16 %v519_v9, %v517_v4  ;;  %v117_v36 = vunpack.c.l.bf16 %v37_v3 }
  0x2d   :  { %895 = vmatmul.mubr.bf16.gmra.mrb[4].mxu0 %v2152_v14  ;;  %v290_v14 = vmul.f32 %v2082_v20, %v150_v37  ;;  %v434_v28 = vadd.f32 %v2084_v21, %v294_v16  ;;  %v293_v37 = vmul.f32 %v2080_v19, %v153_v23  ;;  %v295_v38 = vmul.f32 %v2080_v19, %v155_v25 }
  0x2e   :  { %1821 = vmatprep.mubr.msk.bf16.mxu0 %vm757_vm0, %v626_v60  ;;  %v2276_v40 = vadd.f32 %v2092_v29, %v255_v10  ;;  %v258_v41 = vmul.f32 %v2082_v20, %v118_v15  ;;  %v119_v45 = vunpack.c.l.bf16 %v38_v12  ;;  %v122_v48 = vunpack.c.h.bf16 %v39_v32 }
  0x2f   :  { %v430_v51 = vadd.f32 %v2084_v21, %v290_v14  ;;  %v562_v43 = vmax.f32 %v434_v28, 0.0  ;;  %v433_v46 = vadd.f32 %v2092_v29, %v293_v37  ;;  %v435_v47 = vadd.f32 %v2092_v29, %v295_v38  ;;  %v60_v28 = vld [vmem:[%s3310_s0 + $0x138] sm:$0xff] }
  0x30   :  { %v521_v50 = vmax.f32 %v2253_v11, 0.0  ;;  %v158_v52 = vunpack.c.h.bf16 %v57_v39  ;;  %v257_v53 = vmul.f32 %v2080_v19, %v117_v36  ;;  %v124_v56 = vunpack.c.h.bf16 %v40_v44 }
  0x31   :  { %v558_v60 = vmax.f32 %v430_v51, 0.0  ;;  %v260_v51 = vmul.f32 %v2082_v20, %v120_v27  ;;  %v561_v54 = vmax.f32 %v433_v46, 0.0  ;;  %v563_v55 = vmax.f32 %v435_v47, 0.0 }
  0x32   :  { %v398_v58 = vadd.f32 %v2084_v21, %v258_v41  ;;  %v298_v59 = vmul.f32 %v2082_v20, %v158_v52  ;;  %v262_v62 = vmul.f32 %v2082_v20, %v122_v48  ;;  %v159_v3 = vunpack.c.l.bf16 %v58_v49 }
  0x33   :  { %v654_v13 = vpack.c.bf16 %v560_v5, %v558_v60  ;;  %v259_v60 = vmul.f32 %v2080_v19, %v119_v45  ;;  %v655_v61 = vpack.c.bf16 %v563_v55, %v561_v54  ;;  %v400_v4 = vadd.f32 %v2084_v21, %v260_v51 }
  0x34   :  { %v438_v2 = vadd.f32 %v2084_v21, %v298_v59  ;;  %v397_v5 = vadd.f32 %v2092_v29, %v257_v53  ;;  %v264_v6 = vmul.f32 %v2082_v20, %v124_v56  ;;  %v123_v9 = vunpack.c.l.bf16 %v40_v44 }
  0x35   :  { %903 = vmatmul.mubr.bf16.gmra.mrb[8].mxu0 %v625_v17  ;;  %v296_v17 = vmul.f32 %v2082_v20, %v156_v7  ;;  %1835 = vmatprep.mubr.msk.bf16.mxu1 %vm757_vm0, %v654_v13  ;;  %v299_v12 = vmul.f32 %v2080_v19, %v159_v3  ;;  %v59_v13 = vld [vmem:[%s3310_s0 + $0x130] sm:$0xff]  ;;  %v523_v15 = vmax.f32 %v2276_v40, 0.0  ;;  %v399_v16 = vadd.f32 %v2092_v29, %v259_v60 }
  0x36   :  { %1822 = vmatprep.mubr.msk.bf16.mxu0 %vm757_vm0, %v628_v18  ;;  %v522_v18 = vmax.f32 %v394_v63, 0.0  ;;  %1015 = vmatmul.mubr.bf16.vlgmr.msra.gmra.mrb[0].mxu1 %v653_v8  ;;  %v121_v63 = vunpack.c.l.bf16 %v39_v32  ;;  %v566_v8 = vmax.f32 %v438_v2, 0.0  ;;  %v526_v23 = vmax.f32 %v398_v58, 0.0 }
  0x37   :  { %v436_v31 = vadd.f32 %v2084_v21, %v296_v17  ;;  %v402_v17 = vadd.f32 %v2084_v21, %v262_v62  ;;  %v439_v27 = vadd.f32 %v2092_v29, %v299_v12  ;;  %v404_v32 = vadd.f32 %v2084_v21, %v264_v6  ;;  %v61_v62 = vld [vmem:[%s3310_s0 + $0x140] sm:$0xff]  ;;  %v62_v6 = vld [vmem:[%s3310_s0 + $0x148] sm:$0xff] }
  0x38   :  { %v2293_v57 = vpack.c.bf16 %v524_v26, %v522_v18  ;;  %v261_v25 = vmul.f32 %v2080_v19, %v121_v63  ;;  %v162_v37 = vunpack.c.h.bf16 %v59_v13  ;;  %v525_v38 = vmax.f32 %v397_v5, 0.0  ;;  %v44_v5 = vld [vmem:[%s3310_s0 + $0xb8] sm:$0xff] }
  0x39   :  { %v564_v14 = vmax.f32 %v436_v31, 0.0  ;;  %v528_v31 = vmax.f32 %v400_v4, 0.0  ;;  %v567_v41 = vmax.f32 %v439_v27, 0.0  ;;  %v164_v44 = vunpack.c.h.bf16 %v60_v28 }
  0x3a   :  { %v302_v45 = vmul.f32 %v2082_v20, %v162_v37  ;;  %v2333_v46 = vadd.f32 %v2092_v29, %v261_v25  ;;  %v532_v51 = vmax.f32 %v404_v32, 0.0  ;;  %v163_v53 = vunpack.c.l.bf16 %v60_v28 }
  0x3b   :  { %v656_v1 = vpack.c.bf16 %v564_v14, %v562_v43  ;;  %v527_v43 = vmax.f32 %v399_v16, 0.0  ;;  %v530_v14 = vmax.f32 %v402_v17, 0.0  ;;  %v2340_v54 = vpack.c.bf16 %v523_v15, %v521_v50 }
  0x3c   :  { %v442_v52 = vadd.f32 %v2084_v21, %v302_v45  ;;  %v529_v50 = vmax.f32 %v2333_v46, 0.0  ;;  %v132_v17 = vunpack.c.h.bf16 %v44_v5  ;;  %v165_v28 = vunpack.c.l.bf16 %v61_v62 }
  0x3d   :  { %911 = vmatmul.mubr.bf16.gmra.mrb[12].mxu0 %v2206_v24  ;;  %1836 = vmatprep.mubr.msk.bf16.mxu1 %vm757_vm0, %v656_v1  ;;  %v160_v24 = vunpack.c.h.bf16 %v58_v49  ;;  %v161_v49 = vunpack.c.l.bf16 %v59_v13  ;;  %v304_v1 = vmul.f32 %v2082_v20, %v164_v44  ;;  %v2352_v11 = vpack.c.bf16 %v527_v43, %v525_v38  ;;  %v63_v44 = vld [vmem:[%s3310_s0 + $0x150] sm:$0xff] }
  0x3e   :  { %1823 = vmatprep.mubr.msk.bf16.mxu0 %vm757_vm0, %v2211_v30  ;;  %v157_v30 = vunpack.c.l.bf16 %v57_v39  ;;  %1023 = vmatmul.mubr.bf16.gmra.mrb[4].mxu1 %v655_v61  ;;  %v263_v39 = vmul.f32 %v2080_v19, %v123_v9  ;;  %v570_v60 = vmax.f32 %v442_v52, 0.0  ;;  %v303_v61 = vmul.f32 %v2080_v19, %v163_v53  ;;  %v64_v52 = vld [vmem:[%s3310_s0 + $0x158] sm:$0xff] }
  0x3f   :  { %v300_v0 = vmul.f32 %v2082_v20, %v160_v24  ;;  %v301_v58 = vmul.f32 %v2080_v19, %v161_v49  ;;  %v2344_v24 = vpack.c.bf16 %v528_v31, %v526_v23  ;;  %v444_v59 = vadd.f32 %v2084_v21, %v304_v1 }
  0x40   :  { %v297_v7 = vmul.f32 %v2080_v19, %v157_v30  ;;  %v403_v55 = vadd.f32 %v2092_v29, %v263_v39  ;;  %v2362_v2 = vpack.c.bf16 %v532_v51, %v530_v14  ;;  %v131_v31 = vunpack.c.l.bf16 %v44_v5 }
  0x41   :  { %v440_v10 = vadd.f32 %v2084_v21, %v300_v0  ;;  %v441_v63 = vadd.f32 %v2092_v29, %v301_v58  ;;  %v43_v0 = vld [vmem:[%s3310_s0 + $0xb0] sm:$0xff]  ;;  %v572_v4 = vmax.f32 %v444_v59, 0.0  ;;  %v170_v58 = vunpack.c.h.bf16 %v63_v44 }
  0x42   :  { %v437_v18 = vadd.f32 %v2092_v29, %v297_v7  ;;  %v531_v7 = vmax.f32 %v403_v55, 0.0  ;;  %v130_v15 = vunpack.c.h.bf16 %v43_v0  ;;  %v129_v27 = vunpack.c.l.bf16 %v43_v0 }
  0x43   :  { %v568_v26 = vmax.f32 %v440_v10, 0.0  ;;  %v569_v10 = vmax.f32 %v441_v63, 0.0  ;;  %v660_v12 = vpack.c.bf16 %v572_v4, %v570_v60  ;;  %v271_v49 = vmul.f32 %v2080_v19, %v131_v31 }
  0x44   :  { %v565_v36 = vmax.f32 %v437_v18, 0.0  ;;  %v168_v18 = vunpack.c.h.bf16 %v62_v6  ;;  %v270_v39 = vmul.f32 %v2082_v20, %v130_v15  ;;  %v2393_v45 = vpack.c.bf16 %v531_v7, %v529_v50  ;;  %v46_v50 = vld [vmem:[%s3310_s0 + $0xc8] sm:$0xff] }
  0x45   :  { %919 = vmatmul.mubr.bf16.gmra.mrb[16].mxu0 %v2215_v34  ;;  %v41_v34 = vld [vmem:[%s3310_s0 + $0xa0] sm:$0xff]  ;;  %v658_v40 = vpack.c.bf16 %v568_v26, %v566_v8  ;;  %v166_v8 = vunpack.c.h.bf16 %v61_v62  ;;  %v172_v0 = vunpack.c.h.bf16 %v64_v52  ;;  %v411_v4 = vadd.f32 %v2092_v29, %v271_v49 }
  0x46   :  { %1824 = vmatprep.mubr.msk.bf16.mxu0 %vm757_vm0, %v2217_v35  ;;  %v42_v35 = vld [vmem:[%s3310_s0 + $0xa8] sm:$0xff]  ;;  %v657_v47 = vpack.c.bf16 %v567_v41, %v565_v36  ;;  %v126_v48 = vunpack.c.h.bf16 %v41_v34  ;;  %v125_v3 = vunpack.c.l.bf16 %v41_v34  ;;  %v308_v32 = vmul.f32 %v2082_v20, %v168_v18 }
  0x47   :  { %1837 = vmatprep.mubr.msk.bf16.mxu1 %vm757_vm0, %v658_v40  ;;  %v128_v56 = vunpack.c.h.bf16 %v42_v35  ;;  %v306_v23 = vmul.f32 %v2082_v20, %v166_v8  ;;  %v167_v34 = vunpack.c.l.bf16 %v62_v6  ;;  %v305_v40 = vmul.f32 %v2080_v19, %v165_v28 }
  0x48   :  { %1031 = vmatmul.mubr.bf16.gmra.mrb[8].mxu1 %v657_v47  ;;  %v266_v30 = vmul.f32 %v2082_v20, %v126_v48  ;;  %v265_v25 = vmul.f32 %v2080_v19, %v125_v3  ;;  %v272_v41 = vmul.f32 %v2082_v20, %v132_v17  ;;  %v448_v43 = vadd.f32 %v2084_v21, %v308_v32 }
  0x49   :  { %v268_v9 = vmul.f32 %v2082_v20, %v128_v56  ;;  %1838 = vmatprep.mubr.msk.bf16.mxu1 %vm757_vm0, %v660_v12  ;;  %v446_v36 = vadd.f32 %v2084_v21, %v306_v23  ;;  %v445_v47 = vadd.f32 %v2092_v29, %v305_v40  ;;  %v45_v56 = vld [vmem:[%s3310_s0 + $0xc0] sm:$0xff]  ;;  %v410_v59 = vadd.f32 %v2084_v21, %v270_v39  ;;  %v47_v40 = vld [vmem:[%s3310_s0 + $0xd0] sm:$0xff] }
  0x4a   :  { %v2373_v16 = vadd.f32 %v2084_v21, %v266_v30  ;;  %v405_v46 = vadd.f32 %v2092_v29, %v265_v25  ;;  %v576_v51 = vmax.f32 %v448_v43, 0.0  ;;  %v412_v60 = vadd.f32 %v2084_v21, %v272_v41  ;;  %v65_v25 = vld [vmem:[%s3310_s0 + $0x160] sm:$0xff] }
  0x4b   :  { %v408_v37 = vadd.f32 %v2084_v21, %v268_v9  ;;  %v574_v14 = vmax.f32 %v446_v36, 0.0  ;;  %v573_v55 = vmax.f32 %v445_v47, 0.0  ;;  %v310_v3 = vmul.f32 %v2082_v20, %v170_v58 }
  0x4c   :  { %v534_v48 = vmax.f32 %v2373_v16, 0.0  ;;  %v533_v30 = vmax.f32 %v405_v46, 0.0  ;;  %v134_v5 = vunpack.c.h.bf16 %v45_v56  ;;  %v169_v6 = vunpack.c.l.bf16 %v63_v44  ;;  %v48_v46 = vld [vmem:[%s3310_s0 + $0xd8] sm:$0xff] }
  0x4d   :  { %927 = vmatmul.mubr.bf16.gmra.mrb[20].mxu0 %v2223_v42  ;;  %v443_v42 = vadd.f32 %v2092_v29, %v303_v61  ;;  %v662_v61 = vpack.c.bf16 %v576_v51, %v574_v14  ;;  %v136_v7 = vunpack.c.h.bf16 %v46_v50  ;;  %v312_v9 = vmul.f32 %v2082_v20, %v172_v0 }
  0x4e   :  { %1825 = vmatprep.mubr.msk.bf16.mxu0 %vm757_vm0, %v2260_v22  ;;  %v127_v22 = vunpack.c.l.bf16 %v42_v35  ;;  %v307_v35 = vmul.f32 %v2080_v19, %v167_v34  ;;  %v171_v8 = vunpack.c.l.bf16 %v64_v52  ;;  %v538_v12 = vmax.f32 %v410_v59, 0.0  ;;  %v66_v34 = vld [vmem:[%s3310_s0 + $0x168] sm:$0xff] }
  0x4f   :  { %v571_v13 = vmax.f32 %v443_v42, 0.0  ;;  %v309_v15 = vmul.f32 %v2080_v19, %v169_v6  ;;  %v133_v16 = vunpack.c.l.bf16 %v45_v56  ;;  %v452_v17 = vadd.f32 %v2084_v21, %v312_v9 }
  0x50   :  { %v267_v38 = vmul.f32 %v2080_v19, %v127_v22  ;;  %v447_v1 = vadd.f32 %v2092_v29, %v307_v35  ;;  %v311_v23 = vmul.f32 %v2080_v19, %v171_v8  ;;  %v174_v41 = vunpack.c.h.bf16 %v65_v25 }
  0x51   :  { %v659_v26 = vpack.c.bf16 %v571_v13, %v569_v10  ;;  %v450_v10 = vadd.f32 %v2084_v21, %v310_v3  ;;  %v540_v13 = vmax.f32 %v412_v60, 0.0  ;;  %v449_v28 = vadd.f32 %v2092_v29, %v309_v15 }
  0x52   :  { %v407_v53 = vadd.f32 %v2092_v29, %v267_v38  ;;  %v575_v62 = vmax.f32 %v447_v1, 0.0  ;;  %v580_v32 = vmax.f32 %v452_v17, 0.0  ;;  %v451_v36 = vadd.f32 %v2092_v29, %v311_v23 }
  0x53   :  { %1039 = vmatmul.mubr.bf16.gmra.mrb[12].mxu1 %v659_v26  ;;  %v578_v18 = vmax.f32 %v450_v10, 0.0  ;;  %v539_v26 = vmax.f32 %v411_v4, 0.0  ;;  %v2439_v38 = vpack.c.bf16 %v540_v13, %v538_v12  ;;  %v577_v39 = vmax.f32 %v449_v28, 0.0  ;;  %v68_v10 = vld [vmem:[%s3310_s0 + $0x178] sm:$0xff] }
  0x54   :  { %1839 = vmatprep.mubr.msk.bf16.mxu1 %vm757_vm0, %v662_v61  ;;  %v661_v42 = vpack.c.bf16 %v575_v62, %v573_v55  ;;  %v535_v22 = vmax.f32 %v407_v53, 0.0  ;;  %v135_v43 = vunpack.c.l.bf16 %v46_v50  ;;  %v273_v14 = vmul.f32 %v2080_v19, %v133_v16 }
  0x55   :  { %935 = vmatmul.mubr.bf16.gmra.mrb[24].mxu0 %v2268_v33  ;;  %v269_v33 = vmul.f32 %v2080_v19, %v129_v27  ;;  %v274_v27 = vmul.f32 %v2082_v20, %v134_v5  ;;  %v664_v35 = vpack.c.bf16 %v580_v32, %v578_v18  ;;  %v579_v44 = vmax.f32 %v451_v36, 0.0  ;;  %v50_v18 = vld [vmem:[%s3310_s0 + $0xe8] sm:$0xff] }
  0x56   :  { %1826 = vmatprep.mubr.msk.bf16.mxu0 %vm757_vm0, %v2293_v57  ;;  %v536_v57 = vmax.f32 %v408_v37, 0.0  ;;  %v2437_v37 = vpack.c.bf16 %v535_v22, %v533_v30  ;;  %v314_v49 = vmul.f32 %v2082_v20, %v174_v41  ;;  %v138_v52 = vunpack.c.h.bf16 %v47_v40 }
  0x57   :  { %v409_v63 = vadd.f32 %v2092_v29, %v269_v33  ;;  %v414_v47 = vadd.f32 %v2084_v21, %v274_v27  ;;  %v663_v1 = vpack.c.bf16 %v579_v44, %v577_v39  ;;  %v140_v53 = vunpack.c.h.bf16 %v48_v46 }
  0x58   :  { %v2430_v31 = vpack.c.bf16 %v536_v57, %v534_v48  ;;  %v176_v48 = vunpack.c.h.bf16 %v66_v34  ;;  %v173_v57 = vunpack.c.l.bf16 %v65_v25  ;;  %v454_v56 = vadd.f32 %v2084_v21, %v314_v49 }
  0x59   :  { %v175_v58 = vunpack.c.l.bf16 %v66_v34  ;;  %v275_v59 = vmul.f32 %v2080_v19, %v135_v43  ;;  %v413_v60 = vadd.f32 %v2092_v29, %v273_v14  ;;  %v137_v62 = vunpack.c.l.bf16 %v47_v40 }
  0x5a   :  { %v316_v55 = vmul.f32 %v2082_v20, %v176_v48  ;;  %v313_v61 = vmul.f32 %v2080_v19, %v173_v57  ;;  %v542_v0 = vmax.f32 %v414_v47, 0.0  ;;  %v280_v5 = vmul.f32 %v2082_v20, %v140_v53  ;;  %v69_v48 = vld [vmem:[%s3310_s0 + $0x180] sm:$0xff] }
  0x5b   :  { %1047 = vmatmul.mubr.bf16.gmra.mrb[16].mxu1 %v661_v42  ;;  %v315_v30 = vmul.f32 %v2080_v19, %v175_v58  ;;  %v49_v42 = vld [vmem:[%s3310_s0 + $0xe0] sm:$0xff]  ;;  %v139_v6 = vunpack.c.l.bf16 %v48_v46  ;;  %v415_v8 = vadd.f32 %v2092_v29, %v275_v59  ;;  %v541_v22 = vmax.f32 %v413_v60, 0.0  ;;  %v70_v58 = vld [vmem:[%s3310_s0 + $0x188] sm:$0xff] }
  0x5c   :  { %1840 = vmatprep.mubr.msk.bf16.mxu1 %vm757_vm0, %v664_v35  ;;  %v456_v50 = vadd.f32 %v2084_v21, %v316_v55  ;;  %v453_v4 = vadd.f32 %v2092_v29, %v313_v61  ;;  %v277_v15 = vmul.f32 %v2080_v19, %v137_v62  ;;  %v142_v23 = vunpack.c.h.bf16 %v49_v42 }
  0x5d   :  { %943 = vmatmul.mubr.bf16.gmra.mrb[28].mxu0 %v2340_v54  ;;  %v537_v54 = vmax.f32 %v409_v63, 0.0  ;;  %v67_v63 = vld [vmem:[%s3310_s0 + $0x170] sm:$0xff]  ;;  %v455_v9 = vadd.f32 %v2092_v29, %v315_v30  ;;  %v420_v28 = vadd.f32 %v2084_v21, %v280_v5  ;;  %v144_v34 = vunpack.c.h.bf16 %v50_v18 }
  0x5e   :  { %1827 = vmatprep.mubr.msk.bf16.mxu0 %vm757_vm0, %v2344_v24  ;;  %v276_v24 = vmul.f32 %v2082_v20, %v136_v7  ;;  %v584_v7 = vmax.f32 %v456_v50, 0.0  ;;  %v581_v12 = vmax.f32 %v453_v4, 0.0  ;;  %v178_v13 = vunpack.c.h.bf16 %v67_v63  ;;  %v71_v5 = vld [vmem:[%s3310_s0 + $0x190] sm:$0xff] }
  0x5f   :  { %v2448_v33 = vpack.c.bf16 %v539_v26, %v537_v54  ;;  %v583_v17 = vmax.f32 %v455_v9, 0.0  ;;  %v180_v26 = vunpack.c.h.bf16 %v68_v10  ;;  %v177_v36 = vunpack.c.l.bf16 %v67_v63 }
  0x60   :  { %v416_v51 = vadd.f32 %v2084_v21, %v276_v24  ;;  %v318_v27 = vmul.f32 %v2082_v20, %v178_v13  ;;  %v279_v24 = vmul.f32 %v2080_v19, %v139_v6  ;;  %v179_v41 = vunpack.c.l.bf16 %v68_v10  ;;  %v72_v10 = vld [vmem:[%s3310_s0 + $0x198] sm:$0xff] }
  0x61   :  { %v665_v32 = vpack.c.bf16 %v583_v17, %v581_v12  ;;  %v320_v39 = vmul.f32 %v2082_v20, %v180_v26  ;;  %v543_v43 = vmax.f32 %v415_v8, 0.0  ;;  %v282_v14 = vmul.f32 %v2082_v20, %v142_v23 }
  0x62   :  { %v544_v3 = vmax.f32 %v416_v51, 0.0  ;;  %v458_v40 = vadd.f32 %v2084_v21, %v318_v27  ;;  %v317_v35 = vmul.f32 %v2080_v19, %v177_v36  ;;  %v141_v44 = vunpack.c.l.bf16 %v49_v42 }
  0x63   :  { %1055 = vmatmul.mubr.bf16.gmra.mrb[20].mxu1 %v663_v1  ;;  %v460_v46 = vadd.f32 %v2084_v21, %v320_v39  ;;  %v548_v51 = vmax.f32 %v420_v28, 0.0  ;;  %v2505_v1 = vadd.f32 %v2092_v29, %v279_v24  ;;  %v284_v57 = vmul.f32 %v2082_v20, %v144_v34  ;;  %v73_v28 = vld [vmem:[%s3310_s0 + $0x1a0] sm:$0xff] }
  0x64   :  { %v2482_v25 = vpack.c.bf16 %v544_v3, %v542_v0  ;;  %v586_v47 = vmax.f32 %v458_v40, 0.0  ;;  %v143_v53 = vunpack.c.l.bf16 %v50_v18  ;;  %v2513_v59 = vpack.c.bf16 %v543_v43, %v541_v22 }
  0x65   :  { %951 = vmatmul.mubr.bf16.gmra.mrb[32].mxu0 %v2352_v11  ;;  %v582_v11 = vmax.f32 %v454_v56, 0.0  ;;  %v588_v55 = vmax.f32 %v460_v46, 0.0  ;;  %v2516_v60 = vadd.f32 %v2084_v21, %v282_v14  ;;  %v182_v62 = vunpack.c.h.bf16 %v69_v48  ;;  %v74_v14 = vld [vmem:[%s3310_s0 + $0x1a8] sm:$0xff] }
  0x66   :  { %1828 = vmatprep.mubr.msk.bf16.mxu0 %vm757_vm0, %v2362_v2  ;;  %v278_v2 = vmul.f32 %v2082_v20, %v138_v52  ;;  %v457_v52 = vadd.f32 %v2092_v29, %v317_v35  ;;  %v547_v3 = vmax.f32 %v2505_v1, 0.0  ;;  %v184_v4 = vunpack.c.h.bf16 %v70_v58 }
  0x67   :  { %v666_v16 = vpack.c.bf16 %v584_v7, %v582_v11  ;;  %v281_v11 = vmul.f32 %v2080_v19, %v141_v44  ;;  %v668_v30 = vpack.c.bf16 %v588_v55, %v586_v47  ;;  %v322_v42 = vmul.f32 %v2082_v20, %v182_v62 }
  0x68   :  { %v418_v54 = vadd.f32 %v2084_v21, %v278_v2  ;;  %v585_v61 = vmax.f32 %v457_v52, 0.0  ;;  %v2527_v2 = vld [vmem:[%s3310_s0 + $0xf0] sm:$0xff]  ;;  %v2539_v6 = vmul.f32 %v2080_v19, %v143_v53  ;;  %v181_v9 = vunpack.c.l.bf16 %v69_v48 }
  0x69   :  { %1841 = vmatprep.mubr.msk.bf16.mxu1 %vm757_vm0, %v666_v16  ;;  %v550_v8 = vmax.f32 %v2516_v60, 0.0  ;;  %v324_v22 = vmul.f32 %v2082_v20, %v184_v4  ;;  %v462_v12 = vadd.f32 %v2084_v21, %v322_v42  ;;  %v183_v13 = vunpack.c.l.bf16 %v70_v58  ;;  %v80_v60 = vld [vmem:[%s3310_s0 + $0x1d8] sm:$0xff] }
  0x6a   :  { %v546_v49 = vmax.f32 %v418_v54, 0.0  ;;  %v146_v16 = vunpack.c.h.bf16 %v2527_v2  ;;  %v321_v17 = vmul.f32 %v2080_v19, %v181_v9  ;;  %v186_v18 = vunpack.c.h.bf16 %v71_v5 }
  0x6b   :  { %1063 = vmatmul.mubr.bf16.gmra.mrb[24].mxu1 %v665_v32  ;;  %v464_v23 = vadd.f32 %v2084_v21, %v324_v22  ;;  %v590_v54 = vmax.f32 %v462_v12, 0.0  ;;  %v323_v26 = vmul.f32 %v2080_v19, %v183_v13  ;;  %v188_v27 = vunpack.c.h.bf16 %v72_v10 }
  0x6c   :  { %v2521_v0 = vpack.c.bf16 %v548_v51, %v546_v49  ;;  %1842 = vmatprep.mubr.msk.bf16.mxu1 %vm757_vm0, %v668_v30  ;;  %v461_v32 = vadd.f32 %v2092_v29, %v321_v17  ;;  %v326_v36 = vmul.f32 %v2082_v20, %v186_v18  ;;  %v185_v34 = vunpack.c.l.bf16 %v71_v5  ;;  %v2596_v17 = vld [vmem:[%s3310_s0 + $0x1c0] sm:$0xff] }
  0x6d   :  { %959 = vmatmul.mubr.bf16.gmra.mrb[36].mxu0 %v2393_v45  ;;  %v2495_v45 = vadd.f32 %v2092_v29, %v277_v15  ;;  %v2554_v15 = vadd.f32 %v2092_v29, %v281_v11  ;;  %v592_v39 = vmax.f32 %v464_v23, 0.0  ;;  %v463_v40 = vadd.f32 %v2092_v29, %v323_v26 }
  0x6e   :  { %1829 = vmatprep.mubr.msk.bf16.mxu0 %vm757_vm0, %v2430_v31  ;;  %v319_v31 = vmul.f32 %v2080_v19, %v179_v41  ;;  %v328_v41 = vmul.f32 %v2082_v20, %v188_v27  ;;  %v187_v43 = vunpack.c.l.bf16 %v72_v10  ;;  %v589_v35 = vmax.f32 %v461_v32, 0.0 }
  0x6f   :  { %v545_v50 = vmax.f32 %v2495_v45, 0.0  ;;  %v466_v44 = vadd.f32 %v2084_v21, %v326_v36  ;;  %v325_v46 = vmul.f32 %v2080_v19, %v185_v34  ;;  %v190_v47 = vunpack.c.h.bf16 %v73_v28  ;;  %v78_v34 = vld [vmem:[%s3310_s0 + $0x1c8] sm:$0xff] }
  0x70   :  { %v459_v56 = vadd.f32 %v2092_v29, %v319_v31  ;;  %v670_v31 = vpack.c.bf16 %v592_v39, %v590_v54  ;;  %v591_v48 = vmax.f32 %v463_v40, 0.0  ;;  %v468_v49 = vadd.f32 %v2084_v21, %v328_v41 }
  0x71   :  { %v327_v51 = vmul.f32 %v2080_v19, %v187_v43  ;;  %v594_v52 = vmax.f32 %v466_v44, 0.0  ;;  %v192_v53 = vunpack.c.h.bf16 %v74_v14  ;;  %v330_v55 = vmul.f32 %v2082_v20, %v190_v47 }
  0x72   :  { %v587_v63 = vmax.f32 %v459_v56, 0.0  ;;  %v75_v56 = vld [vmem:[%s3310_s0 + $0x1b0] sm:$0xff]  ;;  %v596_v58 = vmax.f32 %v468_v49, 0.0  ;;  %v189_v62 = vunpack.c.l.bf16 %v73_v28  ;;  %v191_v4 = vunpack.c.l.bf16 %v74_v14 }
  0x73   :  { %v332_v30 = vmul.f32 %v2082_v20, %v192_v53  ;;  %v194_v9 = vunpack.c.h.bf16 %v75_v56  ;;  %v286_v18 = vmul.f32 %v2082_v20, %v146_v16  ;;  %v193_v36 = vunpack.c.l.bf16 %v75_v56 }
  0x74   :  { %v667_v7 = vpack.c.bf16 %v587_v63, %v585_v61  ;;  %v467_v61 = vadd.f32 %v2092_v29, %v327_v51  ;;  %v470_v63 = vadd.f32 %v2084_v21, %v330_v55  ;;  %v672_v42 = vpack.c.bf16 %v596_v58, %v594_v52 }
  0x75   :  { %967 = vmatmul.mubr.bf16.gmra.mrb[40].mxu0 %v2437_v37  ;;  %v2536_v37 = vadd.f32 %v2084_v21, %v284_v57  ;;  %v465_v57 = vadd.f32 %v2092_v29, %v325_v46  ;;  %v472_v10 = vadd.f32 %v2084_v21, %v332_v30  ;;  %v331_v12 = vmul.f32 %v2080_v19, %v191_v4 }
  0x76   :  { %1830 = vmatprep.mubr.msk.bf16.mxu0 %vm757_vm0, %v2439_v38  ;;  %v2549_v38 = vld [vmem:[%s3310_s0 + $0xf8] sm:$0xff]  ;;  %1071 = vmatmul.mubr.bf16.gmra.mrb[28].mxu1 %v667_v7  ;;  %v595_v5 = vmax.f32 %v467_v61, 0.0  ;;  %v329_v7 = vmul.f32 %v2080_v19, %v189_v62  ;;  %v598_v22 = vmax.f32 %v470_v63, 0.0  ;;  %v334_v26 = vmul.f32 %v2082_v20, %v194_v9 }
  0x77   :  { %v148_v24 = vunpack.c.h.bf16 %v2549_v38  ;;  %1843 = vmatprep.mubr.msk.bf16.mxu1 %vm757_vm0, %v670_v31  ;;  %v593_v11 = vmax.f32 %v465_v57, 0.0  ;;  %v600_v27 = vmax.f32 %v472_v10, 0.0  ;;  %v471_v28 = vadd.f32 %v2092_v29, %v331_v12 }
  0x78   :  { %v469_v54 = vadd.f32 %v2092_v29, %v329_v7  ;;  %v552_v16 = vmax.f32 %v2536_v37, 0.0  ;;  %v198_v40 = vunpack.c.h.bf16 %v2596_v17  ;;  %v423_v41 = vadd.f32 %v2092_v29, %v2539_v6 }
  0x79   :  { %v288_v23 = vmul.f32 %v2082_v20, %v148_v24  ;;  %v671_v24 = vpack.c.bf16 %v595_v5, %v593_v11  ;;  %v674_v43 = vpack.c.bf16 %v600_v27, %v598_v22  ;;  %v474_v14 = vadd.f32 %v2084_v21, %v334_v26  ;;  %v82_v26 = vld [vmem:[%s3310_s0 + $0x1e8] sm:$0xff] }
  0x7a   :  { %v426_v44 = vadd.f32 %v2084_v21, %v286_v18  ;;  %v147_v37 = vunpack.c.l.bf16 %v2549_v38  ;;  %v200_v46 = vunpack.c.h.bf16 %v78_v34  ;;  %v597_v31 = vmax.f32 %v469_v54, 0.0  ;;  %v81_v54 = vld [vmem:[%s3310_s0 + $0x1e0] sm:$0xff] }
  0x7b   :  { %v428_v47 = vadd.f32 %v2084_v21, %v288_v23  ;;  %v647_v6 = vpack.c.bf16 %v547_v3, %v545_v50  ;;  %v338_v51 = vmul.f32 %v2082_v20, %v198_v40  ;;  %v602_v38 = vmax.f32 %v474_v14, 0.0  ;;  %v79_v3 = vld [vmem:[%s3310_s0 + $0x1d0] sm:$0xff] }
  0x7c   :  { %v340_v57 = vmul.f32 %v2082_v20, %v200_v46  ;;  %v549_v53 = vmax.f32 %v2554_v15, 0.0  ;;  %v551_v45 = vmax.f32 %v423_v41, 0.0  ;;  %v287_v50 = vmul.f32 %v2080_v19, %v147_v37 }
  0x7d   :  { %975 = vmatmul.mubr.bf16.gmra.mrb[44].mxu0 %v2448_v33  ;;  %v669_v33 = vpack.c.bf16 %v591_v48, %v589_v35  ;;  %v599_v48 = vmax.f32 %v471_v28, 0.0  ;;  %v556_v55 = vmax.f32 %v428_v47, 0.0  ;;  %v478_v58 = vadd.f32 %v2084_v21, %v338_v51 }
  0x7e   :  { %1831 = vmatprep.mubr.msk.bf16.mxu0 %vm757_vm0, %v2482_v25  ;;  %v76_v25 = vld [vmem:[%s3310_s0 + $0x1b8] sm:$0xff]  ;;  %v197_v61 = vunpack.c.l.bf16 %v2596_v17  ;;  %v199_v62 = vunpack.c.l.bf16 %v78_v34  ;;  %v480_v11 = vadd.f32 %v2084_v21, %v340_v57  ;;  %v202_v30 = vunpack.c.h.bf16 %v79_v3 }
  0x7f   :  { %1079 = vmatmul.mubr.bf16.gmra.mrb[32].mxu1 %v669_v33  ;;  %v196_v13 = vunpack.c.h.bf16 %v76_v25  ;;  %v195_v39 = vunpack.c.l.bf16 %v76_v25  ;;  %v673_v56 = vpack.c.bf16 %v599_v48, %v597_v31  ;;  %v204_v63 = vunpack.c.h.bf16 %v80_v60 }
  0x80   :  { %1844 = vmatprep.mubr.msk.bf16.mxu1 %vm757_vm0, %v672_v42  ;;  %v649_v4 = vpack.c.bf16 %v551_v45, %v549_v53  ;;  %v427_v7 = vadd.f32 %v2092_v29, %v287_v50  ;;  %v337_v22 = vmul.f32 %v2080_v19, %v197_v61  ;;  %v339_v12 = vmul.f32 %v2080_v19, %v199_v62 }
  0x81   :  { %v336_v32 = vmul.f32 %v2082_v20, %v196_v13  ;;  %v335_v49 = vmul.f32 %v2080_v19, %v195_v39  ;;  %v606_v13 = vmax.f32 %v478_v58, 0.0  ;;  %v608_v17 = vmax.f32 %v480_v11, 0.0 }
  0x82   :  { %v342_v18 = vmul.f32 %v2082_v20, %v202_v30  ;;  %v344_v23 = vmul.f32 %v2082_v20, %v204_v63  ;;  %v555_v28 = vmax.f32 %v427_v7, 0.0  ;;  %v206_v39 = vunpack.c.h.bf16 %v81_v54 }
  0x83   :  { %v476_v35 = vadd.f32 %v2084_v21, %v336_v32  ;;  %v475_v15 = vadd.f32 %v2092_v29, %v335_v49  ;;  %v201_v32 = vunpack.c.l.bf16 %v79_v3  ;;  %v678_v40 = vpack.c.bf16 %v608_v17, %v606_v13  ;;  %v84_v49 = vld [vmem:[%s3310_s0 + $0x1f8] sm:$0xff] }
  0x84   :  { %v482_v41 = vadd.f32 %v2084_v21, %v342_v18  ;;  %v208_v14 = vunpack.c.h.bf16 %v82_v26  ;;  %v346_v47 = vmul.f32 %v2082_v20, %v206_v39  ;;  %v205_v57 = vunpack.c.l.bf16 %v81_v54 }
  0x85   :  { %983 = vmatmul.mubr.bf16.gmra.mrb[48].mxu0 %v2513_v59  ;;  %v145_v59 = vunpack.c.l.bf16 %v2527_v2  ;;  %v650_v2 = vpack.c.bf16 %v552_v16, %v550_v8  ;;  %v604_v52 = vmax.f32 %v476_v35, 0.0  ;;  %v554_v8 = vmax.f32 %v426_v44, 0.0 }
  0x86   :  { %1832 = vmatprep.mubr.msk.bf16.mxu0 %vm757_vm0, %v2521_v0  ;;  %v333_v0 = vmul.f32 %v2080_v19, %v193_v36  ;;  %v603_v10 = vmax.f32 %v475_v15, 0.0  ;;  %v203_v36 = vunpack.c.l.bf16 %v80_v60  ;;  %v477_v16 = vadd.f32 %v2092_v29, %v337_v22 }
  0x87   :  { %1087 = vmatmul.mubr.bf16.gmra.mrb[36].mxu1 %v671_v24  ;;  %v285_v1 = vmul.f32 %v2080_v19, %v145_v59  ;;  %v676_v25 = vpack.c.bf16 %v604_v52, %v602_v38  ;;  %v652_v42 = vpack.c.bf16 %v556_v55, %v554_v8  ;;  %v479_v24 = vadd.f32 %v2092_v29, %v339_v12 }
  0x88   :  { %1845 = vmatprep.mubr.msk.bf16.mxu1 %vm757_vm0, %v674_v43  ;;  %v473_v33 = vadd.f32 %v2092_v29, %v333_v0  ;;  %v484_v43 = vadd.f32 %v2084_v21, %v344_v23  ;;  %v341_v35 = vmul.f32 %v2080_v19, %v201_v32  ;;  %v343_v44 = vmul.f32 %v2080_v19, %v203_v36 }
  0x89   :  { %v425_v5 = vadd.f32 %v2092_v29, %v285_v1  ;;  %v605_v37 = vmax.f32 %v477_v16, 0.0  ;;  %v607_v46 = vmax.f32 %v479_v24, 0.0  ;;  %v610_v31 = vmax.f32 %v482_v41, 0.0 }
  0x8a   :  { %v601_v9 = vmax.f32 %v473_v33, 0.0  ;;  %v612_v48 = vmax.f32 %v484_v43, 0.0  ;;  %v348_v0 = vmul.f32 %v2082_v20, %v208_v14  ;;  %v481_v51 = vadd.f32 %v2092_v29, %v341_v35 }
  0x8b   :  { %v553_v27 = vmax.f32 %v425_v5, 0.0  ;;  %v677_v38 = vpack.c.bf16 %v607_v46, %v605_v37  ;;  %v486_v52 = vadd.f32 %v2084_v21, %v346_v47  ;;  %v207_v53 = vunpack.c.l.bf16 %v82_v26 }
  0x8c   :  { %v675_v34 = vpack.c.bf16 %v603_v10, %v601_v9  ;;  %v680_v45 = vpack.c.bf16 %v612_v48, %v610_v31  ;;  %v488_v1 = vadd.f32 %v2084_v21, %v348_v0  ;;  %v212_v3 = vunpack.c.h.bf16 %v84_v49 }
  0x8d   :  { %991 = vmatmul.mubr.bf16.gmra.mrb[52].mxu0 %v647_v6  ;;  %v651_v59 = vpack.c.bf16 %v555_v28, %v553_v27  ;;  %v83_v6 = vld [vmem:[%s3310_s0 + $0x1f0] sm:$0xff]  ;;  %v609_v60 = vmax.f32 %v481_v51, 0.0  ;;  %v345_v55 = vmul.f32 %v2080_v19, %v205_v57  ;;  %v614_v33 = vmax.f32 %v486_v52, 0.0 }
  0x8e   :  { %1833 = vmatprep.mubr.msk.bf16.mxu0 %vm757_vm0, %v650_v2  ;;  %v483_v2 = vadd.f32 %v2092_v29, %v343_v44  ;;  %v210_v50 = vunpack.c.h.bf16 %v83_v6  ;;  %v616_v15 = vmax.f32 %v488_v1, 0.0  ;;  %v352_v61 = vmul.f32 %v2082_v20, %v212_v3 }
  0x8f   :  { %1095 = vmatmul.mubr.bf16.gmra.mrb[40].mxu1 %v673_v56  ;;  %v347_v56 = vmul.f32 %v2080_v19, %v207_v53  ;;  %v209_v30 = vunpack.c.l.bf16 %v83_v6  ;;  %v211_v63 = vunpack.c.l.bf16 %v84_v49 }
  0x90   :  { %1846 = vmatprep.mubr.msk.bf16.mxu1 %vm757_vm0, %v676_v25  ;;  %v611_v8 = vmax.f32 %v483_v2, 0.0  ;;  %v350_v58 = vmul.f32 %v2082_v20, %v210_v50  ;;  %v485_v25 = vadd.f32 %v2092_v29, %v345_v55  ;;  %v492_v5 = vadd.f32 %v2084_v21, %v352_v61 }
  0x91   :  { %v487_v11 = vadd.f32 %v2092_v29, %v347_v56  ;;  %v349_v10 = vmul.f32 %v2080_v19, %v209_v30  ;;  %v351_v22 = vmul.f32 %v2080_v19, %v211_v63 }
  0x92   :  { %v679_v62 = vpack.c.bf16 %v611_v8, %v609_v60  ;;  %v613_v7 = vmax.f32 %v485_v25, 0.0  ;;  %v620_v12 = vmax.f32 %v492_v5, 0.0 }
  0x93   :  { %v615_v9 = vmax.f32 %v487_v11, 0.0  ;;  %v489_v17 = vadd.f32 %v2092_v29, %v349_v10  ;;  %v491_v18 = vadd.f32 %v2092_v29, %v351_v22 }
  0x95   :  { %999 = vmatmul.mubr.bf16.gmra.mrb[56].mxu0 %v649_v4  ;;  %v682_v4 = vpack.c.bf16 %v616_v15, %v614_v33  ;;  %v681_v13 = vpack.c.bf16 %v615_v9, %v613_v7  ;;  %v617_v54 = vmax.f32 %v489_v17, 0.0 }
  0x96   :  { %1834 = vmatprep.mubr.msk.bf16.mxu0 %vm757_vm0, %v652_v42  ;;  %v490_v42 = vadd.f32 %v2084_v21, %v350_v58  ;;  %v619_v21 = vmax.f32 %v491_v18, 0.0 }
  0x97   :  { %1103 = vmatmul.mubr.bf16.gmra.mrb[44].mxu1 %v675_v34 }
  0x98   :  { %1847 = vmatprep.mubr.msk.bf16.mxu1 %vm757_vm0, %v678_v40  ;;  %v618_v20 = vmax.f32 %v490_v42, 0.0  ;;  %v683_v26 = vpack.c.bf16 %v619_v21, %v617_v54 }
  0x9a   :  { %v684_v23 = vpack.c.bf16 %v620_v12, %v618_v20 }
  0x9d   :  { %1007 = vmatmul.mubr.bf16.gmra.mrb[60].mxu0 %v651_v59 }
  0x9f   :  { %1111 = vmatmul.mubr.bf16.gmra.mrb[48].mxu1 %v677_v38 }
  0xa0   :  { %1848 = vmatprep.mubr.msk.bf16.mxu1 %vm757_vm0, %v680_v45 }
  0xa7   :  { %1119 = vmatmul.mubr.bf16.gmra.mrb[52].mxu1 %v679_v62 }
  0xa8   :  { %1849 = vmatprep.mubr.msk.bf16.mxu1 %vm757_vm0, %v682_v4 }
  0xaf   :  { %1127 = vmatmul.mubr.bf16.gmra.mrb[56].mxu1 %v681_v13 }
  0xb0   :  { %1850 = vmatprep.mubr.msk.bf16.mxu1 %vm757_vm0, %v684_v23 }
  0xb7   :  { %1135 = vmatmul.mubr.bf16.gmra.mrb[60].mxu1 %v683_v26 }
  0xf8   :  { %v888_v27 = vpop.f32.mrb[0].mxu0 }
  0xf9   :  { %v1915_v19 = vpack.c.bf16 %v888_v27, %v888_v27  ;;  %v1598_v28 = vmul.f32 %v888_v27, %v888_v27  ;;  %v890_v32 = vpop.f32.mrb[1].mxu0  ;;  %v1465_v29 = vsel %vm1464_vm2, %v888_v27, 0.0 }
  0xfa   :  { %v891_v36 = vpop.f32.mrb[2].mxu0 }
  0xfb   :  { %1400 = vst.msk [vmem:[%s3313_s4] sm:$0xf] %vm1399_vm1, %v1915_v19  ;;  %v1916_v34 = vpack.c.bf16 %v891_v36, %v891_v36  ;;  %v1466_v16 = vsel %vm1464_vm2, %v891_v36, 0.0  ;;  %v1599_v24 = vmul.f32 %v891_v36, %v891_v36  ;;  %v893_v39 = vpop.f32.mrb[3].mxu0  ;;  %v1662_v41 = vsel %vm1464_vm2, %v1598_v28, 0.0 }
  0xfc   :  { %v1467_v40 = vadd.f32 %v1466_v16, %v1465_v29 }
  0xfd   :  { %1401 = vst.msk [vmem:[%s3313_s4 + $0x4] sm:$0xf] %vm1399_vm1, %v1916_v34  ;;  %v1663_v43 = vsel %vm1464_vm2, %v1599_v24, 0.0 }
  0xfe   :  { %v1664_v14 = vadd.f32 %v1663_v43, %v1662_v41 }
 0x100   :  { %v896_v35 = vpop.f32.mrb[4].mxu0 }
 0x101   :  { %v1917_v44 = vpack.c.bf16 %v896_v35, %v896_v35  ;;  %v1468_v59 = vsel %vm1464_vm2, %v896_v35, 0.0  ;;  %v1600_v37 = vmul.f32 %v896_v35, %v896_v35  ;;  %v898_v46 = vpop.f32.mrb[5].mxu0 }
 0x102   :  { %v1469_v47 = vadd.f32 %v1468_v59, %v1467_v40  ;;  %v899_v31 = vpop.f32.mrb[6].mxu0 }
 0x103   :  { %1402 = vst.msk [vmem:[%s3313_s4 + $0x8] sm:$0xf] %vm1399_vm1, %v1917_v44  ;;  %v1665_v48 = vsel %vm1464_vm2, %v1600_v37, 0.0  ;;  %v1918_v0 = vpack.c.bf16 %v899_v31, %v899_v31  ;;  %v1470_v6 = vsel %vm1464_vm2, %v899_v31, 0.0  ;;  %v1601_v49 = vmul.f32 %v899_v31, %v899_v31  ;;  %v901_v51 = vpop.f32.mrb[7].mxu0 }
 0x104   :  { %v1666_v2 = vadd.f32 %v1665_v48, %v1664_v14  ;;  %v1471_v38 = vadd.f32 %v1470_v6, %v1469_v47 }
 0x105   :  { %1403 = vst.msk [vmem:[%s3313_s4 + $0xc] sm:$0xf] %vm1399_vm1, %v1918_v0  ;;  %v1667_v52 = vsel %vm1464_vm2, %v1601_v49, 0.0 }
 0x106   :  { %v1668_v57 = vadd.f32 %v1667_v52, %v1666_v2 }
 0x108   :  { %v904_v53 = vpop.f32.mrb[8].mxu0 }
 0x109   :  { %v1919_v45 = vpack.c.bf16 %v904_v53, %v904_v53  ;;  %v1472_v1 = vsel %vm1464_vm2, %v904_v53, 0.0  ;;  %v1602_v50 = vmul.f32 %v904_v53, %v904_v53  ;;  %v906_v3 = vpop.f32.mrb[9].mxu0  ;;  %v2731_v11 = vpop.f32.mrb[0].mxu1 }
 0x10a   :  { %v1473_v60 = vadd.f32 %v1472_v1, %v1471_v38  ;;  %v907_v8 = vpop.f32.mrb[10].mxu0  ;;  %v1947_v63 = vpack.c.bf16 %v2731_v11, %v2731_v11  ;;  %v1018_v4 = vpop.f32.mrb[1].mxu1 }
 0x10b   :  { %1404 = vst.msk [vmem:[%s3313_s4 + $0x10] sm:$0xf] %vm1399_vm1, %v1919_v45  ;;  %v1669_v55 = vsel %vm1464_vm2, %v1602_v50, 0.0  ;;  %v1920_v56 = vpack.c.bf16 %v907_v8, %v907_v8  ;;  %v1474_v33 = vsel %vm1464_vm2, %v907_v8, 0.0  ;;  %v1603_v15 = vmul.f32 %v907_v8, %v907_v8  ;;  %v909_v58 = vpop.f32.mrb[11].mxu0  ;;  %v2735_v42 = vpop.f32.mrb[2].mxu1 }
 0x10c   :  { %v1670_v61 = vadd.f32 %v1669_v55, %v1668_v57  ;;  %v1475_v62 = vadd.f32 %v1474_v33, %v1473_v60  ;;  %1432 = vst.msk [vmem:[%s3313_s4 + $0x80] sm:$0xf] %vm1399_vm1, %v1947_v63  ;;  %v1948_v7 = vpack.c.bf16 %v2735_v42, %v2735_v42  ;;  %v1021_v9 = vpop.f32.mrb[3].mxu1 }
 0x10d   :  { %1405 = vst.msk [vmem:[%s3313_s4 + $0x14] sm:$0xf] %vm1399_vm1, %v1920_v56  ;;  %v1671_v25 = vsel %vm1464_vm2, %v1603_v15, 0.0 }
 0x10e   :  { %v1672_v30 = vadd.f32 %v1671_v25, %v1670_v61  ;;  %1433 = vst.msk [vmem:[%s3313_s4 + $0x84] sm:$0xf] %vm1399_vm1, %v1948_v7 }
 0x110   :  { %v912_v5 = vpop.f32.mrb[12].mxu0 }
 0x111   :  { %v1921_v10 = vpack.c.bf16 %v912_v5, %v912_v5  ;;  %v1476_v22 = vsel %vm1464_vm2, %v912_v5, 0.0  ;;  %v1604_v20 = vmul.f32 %v912_v5, %v912_v5  ;;  %v914_v12 = vpop.f32.mrb[13].mxu0  ;;  %v2759_v32 = vpop.f32.mrb[4].mxu1 }
 0x112   :  { %v1477_v13 = vadd.f32 %v1476_v22, %v1475_v62  ;;  %v915_v17 = vpop.f32.mrb[14].mxu0  ;;  %v1949_v29 = vpack.c.bf16 %v2759_v32, %v2759_v32  ;;  %v1026_v34 = vpop.f32.mrb[5].mxu1 }
 0x113   :  { %1406 = vst.msk [vmem:[%s3313_s4 + $0x18] sm:$0xf] %vm1399_vm1, %v1921_v10  ;;  %v1673_v18 = vsel %vm1464_vm2, %v1604_v20, 0.0  ;;  %v1922_v23 = vpack.c.bf16 %v915_v17, %v915_v17  ;;  %v1478_v54 = vsel %vm1464_vm2, %v915_v17, 0.0  ;;  %v1605_v21 = vmul.f32 %v915_v17, %v915_v17  ;;  %v917_v26 = vpop.f32.mrb[15].mxu0  ;;  %v2763_v16 = vpop.f32.mrb[6].mxu1 }
 0x114   :  { %v1674_v27 = vadd.f32 %v1673_v18, %v1672_v30  ;;  %v1479_v19 = vadd.f32 %v1478_v54, %v1477_v13  ;;  %1434 = vst.msk [vmem:[%s3313_s4 + $0x88] sm:$0xf] %vm1399_vm1, %v1949_v29  ;;  %v1950_v39 = vpack.c.bf16 %v2763_v16, %v2763_v16  ;;  %v1029_v40 = vpop.f32.mrb[7].mxu1 }
 0x115   :  { %1407 = vst.msk [vmem:[%s3313_s4 + $0x1c] sm:$0xf] %vm1399_vm1, %v1922_v23  ;;  %v1675_v28 = vsel %vm1464_vm2, %v1605_v21, 0.0 }
 0x116   :  { %v1676_v36 = vadd.f32 %v1675_v28, %v1674_v27  ;;  %1435 = vst.msk [vmem:[%s3313_s4 + $0x8c] sm:$0xf] %vm1399_vm1, %v1950_v39 }
 0x118   :  { %v920_v24 = vpop.f32.mrb[16].mxu0 }
 0x119   :  { %v1923_v41 = vpack.c.bf16 %v920_v24, %v920_v24  ;;  %v1480_v43 = vsel %vm1464_vm2, %v920_v24, 0.0  ;;  %v1606_v14 = vmul.f32 %v920_v24, %v920_v24  ;;  %v922_v35 = vpop.f32.mrb[17].mxu0 }
 0x11a   :  { %v1481_v44 = vadd.f32 %v1480_v43, %v1479_v19  ;;  %v923_v59 = vpop.f32.mrb[18].mxu0 }
 0x11b   :  { %1408 = vst.msk [vmem:[%s3313_s4 + $0x20] sm:$0xf] %vm1399_vm1, %v1923_v41  ;;  %v1677_v37 = vsel %vm1464_vm2, %v1606_v14, 0.0  ;;  %v1924_v46 = vpack.c.bf16 %v923_v59, %v923_v59  ;;  %v1482_v47 = vsel %vm1464_vm2, %v923_v59, 0.0  ;;  %v1607_v31 = vmul.f32 %v923_v59, %v923_v59  ;;  %v925_v48 = vpop.f32.mrb[19].mxu0  ;;  %v2787_v2 = vpop.f32.mrb[8].mxu1 }
 0x11c   :  { %v1678_v0 = vadd.f32 %v1677_v37, %v1676_v36  ;;  %v1483_v6 = vadd.f32 %v1482_v47, %v1481_v44  ;;  %v1951_v38 = vpack.c.bf16 %v2787_v2, %v2787_v2  ;;  %v1034_v52 = vpop.f32.mrb[9].mxu1 }
 0x11d   :  { %1409 = vst.msk [vmem:[%s3313_s4 + $0x24] sm:$0xf] %vm1399_vm1, %v1924_v46  ;;  %v1679_v49 = vsel %vm1464_vm2, %v1607_v31, 0.0  ;;  %v2791_v53 = vpop.f32.mrb[10].mxu1 }
 0x11e   :  { %v1680_v51 = vadd.f32 %v1679_v49, %v1678_v0  ;;  %1436 = vst.msk [vmem:[%s3313_s4 + $0x90] sm:$0xf] %vm1399_vm1, %v1951_v38  ;;  %v1037_v60 = vpop.f32.mrb[11].mxu1  ;;  %v1952_v56 = vpack.c.bf16 %v2791_v53, %v2791_v53 }
 0x120   :  { %v928_v57 = vpop.f32.mrb[20].mxu0  ;;  %1437 = vst.msk [vmem:[%s3313_s4 + $0x94] sm:$0xf] %vm1399_vm1, %v1952_v56 }
 0x121   :  { %v1925_v45 = vpack.c.bf16 %v928_v57, %v928_v57  ;;  %v1484_v1 = vsel %vm1464_vm2, %v928_v57, 0.0  ;;  %v1608_v50 = vmul.f32 %v928_v57, %v928_v57  ;;  %v930_v3 = vpop.f32.mrb[21].mxu0 }
 0x122   :  { %v1485_v8 = vadd.f32 %v1484_v1, %v1483_v6  ;;  %v931_v55 = vpop.f32.mrb[22].mxu0 }
 0x123   :  { %1410 = vst.msk [vmem:[%s3313_s4 + $0x28] sm:$0xf] %vm1399_vm1, %v1925_v45  ;;  %v1681_v33 = vsel %vm1464_vm2, %v1608_v50, 0.0  ;;  %v1926_v15 = vpack.c.bf16 %v931_v55, %v931_v55  ;;  %v1486_v58 = vsel %vm1464_vm2, %v931_v55, 0.0  ;;  %v1609_v61 = vmul.f32 %v931_v55, %v931_v55  ;;  %v933_v62 = vpop.f32.mrb[23].mxu0 }
 0x124   :  { %v1682_v25 = vadd.f32 %v1681_v33, %v1680_v51  ;;  %v1487_v30 = vadd.f32 %v1486_v58, %v1485_v8 }
 0x125   :  { %1411 = vst.msk [vmem:[%s3313_s4 + $0x2c] sm:$0xf] %vm1399_vm1, %v1926_v15  ;;  %v1683_v63 = vsel %vm1464_vm2, %v1609_v61, 0.0 }
 0x126   :  { %v1684_v4 = vadd.f32 %v1683_v63, %v1682_v25  ;;  %v2815_v5 = vpop.f32.mrb[12].mxu1 }
 0x127   :  { %v1953_v9 = vpack.c.bf16 %v2815_v5, %v2815_v5  ;;  %v1042_v10 = vpop.f32.mrb[13].mxu1 }
 0x128   :  { %v936_v7 = vpop.f32.mrb[24].mxu0  ;;  %v2820_v17 = vpop.f32.mrb[14].mxu1 }
 0x129   :  { %v1927_v22 = vpack.c.bf16 %v936_v7, %v936_v7  ;;  %v1488_v20 = vsel %vm1464_vm2, %v936_v7, 0.0  ;;  %v1610_v12 = vmul.f32 %v936_v7, %v936_v7  ;;  %v938_v13 = vpop.f32.mrb[25].mxu0  ;;  %1438 = vst.msk [vmem:[%s3313_s4 + $0x98] sm:$0xf] %vm1399_vm1, %v1953_v9  ;;  %v1954_v54 = vpack.c.bf16 %v2820_v17, %v2820_v17  ;;  %v1045_v21 = vpop.f32.mrb[15].mxu1 }
 0x12a   :  { %v1489_v18 = vadd.f32 %v1488_v20, %v1487_v30  ;;  %v939_v23 = vpop.f32.mrb[26].mxu0 }
 0x12b   :  { %1412 = vst.msk [vmem:[%s3313_s4 + $0x30] sm:$0xf] %vm1399_vm1, %v1927_v22  ;;  %v1685_v26 = vsel %vm1464_vm2, %v1610_v12, 0.0  ;;  %v1928_v27 = vpack.c.bf16 %v939_v23, %v939_v23  ;;  %v1490_v19 = vsel %vm1464_vm2, %v939_v23, 0.0  ;;  %v1611_v28 = vmul.f32 %v939_v23, %v939_v23  ;;  %v941_v36 = vpop.f32.mrb[27].mxu0 }
 0x12c   :  { %v1686_v29 = vadd.f32 %v1685_v26, %v1684_v4  ;;  %v1491_v34 = vadd.f32 %v1490_v19, %v1489_v18  ;;  %1439 = vst.msk [vmem:[%s3313_s4 + $0x9c] sm:$0xf] %vm1399_vm1, %v1954_v54 }
 0x12d   :  { %1413 = vst.msk [vmem:[%s3313_s4 + $0x34] sm:$0xf] %vm1399_vm1, %v1928_v27  ;;  %v1687_v24 = vsel %vm1464_vm2, %v1611_v28, 0.0 }
 0x12e   :  { %v1688_v39 = vadd.f32 %v1687_v24, %v1686_v29  ;;  %v2843_v41 = vpop.f32.mrb[16].mxu1 }
 0x12f   :  { %v1955_v59 = vpack.c.bf16 %v2843_v41, %v2843_v41  ;;  %v1050_v37 = vpop.f32.mrb[17].mxu1 }
 0x130   :  { %v944_v40 = vpop.f32.mrb[28].mxu0  ;;  %v2848_v31 = vpop.f32.mrb[18].mxu1 }
 0x131   :  { %v1929_v43 = vpack.c.bf16 %v944_v40, %v944_v40  ;;  %v1492_v14 = vsel %vm1464_vm2, %v944_v40, 0.0  ;;  %v1612_v35 = vmul.f32 %v944_v40, %v944_v40  ;;  %v946_v44 = vpop.f32.mrb[29].mxu0  ;;  %1440 = vst.msk [vmem:[%s3313_s4 + $0xa0] sm:$0xf] %vm1399_vm1, %v1955_v59  ;;  %v1053_v38 = vpop.f32.mrb[19].mxu1  ;;  %v1956_v45 = vpack.c.bf16 %v2848_v31, %v2848_v31 }
 0x132   :  { %v1493_v46 = vadd.f32 %v1492_v14, %v1491_v34  ;;  %v947_v47 = vpop.f32.mrb[30].mxu0 }
 0x133   :  { %1414 = vst.msk [vmem:[%s3313_s4 + $0x38] sm:$0xf] %vm1399_vm1, %v1929_v43  ;;  %v1689_v48 = vsel %vm1464_vm2, %v1612_v35, 0.0  ;;  %v1930_v0 = vpack.c.bf16 %v947_v47, %v947_v47  ;;  %v1494_v6 = vsel %vm1464_vm2, %v947_v47, 0.0  ;;  %v1613_v49 = vmul.f32 %v947_v47, %v947_v47  ;;  %v949_v51 = vpop.f32.mrb[31].mxu0 }
 0x134   :  { %v1690_v52 = vadd.f32 %v1689_v48, %v1688_v39  ;;  %v1495_v57 = vadd.f32 %v1494_v6, %v1493_v46  ;;  %1441 = vst.msk [vmem:[%s3313_s4 + $0xa4] sm:$0xf] %vm1399_vm1, %v1956_v45 }
 0x135   :  { %1415 = vst.msk [vmem:[%s3313_s4 + $0x3c] sm:$0xf] %vm1399_vm1, %v1930_v0  ;;  %v1691_v1 = vsel %vm1464_vm2, %v1613_v49, 0.0 }
 0x136   :  { %v1692_v50 = vadd.f32 %v1691_v1, %v1690_v52  ;;  %v2872_v33 = vpop.f32.mrb[20].mxu1 }
 0x137   :  { %v1957_v61 = vpack.c.bf16 %v2872_v33, %v2872_v33  ;;  %v1058_v62 = vpop.f32.mrb[21].mxu1 }
 0x138   :  { %v952_v3 = vpop.f32.mrb[32].mxu0  ;;  %v2882_v9 = vpop.f32.mrb[22].mxu1 }
 0x139   :  { %v1931_v60 = vpack.c.bf16 %v952_v3, %v952_v3  ;;  %v1496_v8 = vsel %vm1464_vm2, %v952_v3, 0.0  ;;  %v1614_v55 = vmul.f32 %v952_v3, %v952_v3  ;;  %v954_v56 = vpop.f32.mrb[33].mxu0  ;;  %1442 = vst.msk [vmem:[%s3313_s4 + $0xa8] sm:$0xf] %vm1399_vm1, %v1957_v61  ;;  %v1958_v20 = vpack.c.bf16 %v2882_v9, %v2882_v9  ;;  %v1061_v12 = vpop.f32.mrb[23].mxu1 }
 0x13a   :  { %v1497_v15 = vadd.f32 %v1496_v8, %v1495_v57  ;;  %v955_v58 = vpop.f32.mrb[34].mxu0 }
 0x13b   :  { %1416 = vst.msk [vmem:[%s3313_s4 + $0x40] sm:$0xf] %vm1399_vm1, %v1931_v60  ;;  %v1693_v25 = vsel %vm1464_vm2, %v1614_v55, 0.0  ;;  %v1932_v30 = vpack.c.bf16 %v955_v58, %v955_v58  ;;  %v1498_v63 = vsel %vm1464_vm2, %v955_v58, 0.0  ;;  %v1615_v4 = vmul.f32 %v955_v58, %v955_v58  ;;  %v957_v7 = vpop.f32.mrb[35].mxu0 }
 0x13c   :  { %v1694_v10 = vadd.f32 %v1693_v25, %v1692_v50  ;;  %v1499_v22 = vadd.f32 %v1498_v63, %v1497_v15  ;;  %1443 = vst.msk [vmem:[%s3313_s4 + $0xac] sm:$0xf] %vm1399_vm1, %v1958_v20 }
 0x13d   :  { %1417 = vst.msk [vmem:[%s3313_s4 + $0x44] sm:$0xf] %vm1399_vm1, %v1932_v30  ;;  %v1695_v13 = vsel %vm1464_vm2, %v1615_v4, 0.0 }
 0x13e   :  { %v1696_v18 = vadd.f32 %v1695_v13, %v1694_v10  ;;  %v2900_v36 = vpop.f32.mrb[24].mxu1 }
 0x13f   :  { %v1066_v43 = vpop.f32.mrb[25].mxu1  ;;  %v1959_v44 = vpack.c.bf16 %v2900_v36, %v2900_v36 }
 0x140   :  { %v960_v23 = vpop.f32.mrb[36].mxu0  ;;  %v2910_v59 = vpop.f32.mrb[26].mxu1 }
 0x141   :  { %v1933_v54 = vpack.c.bf16 %v960_v23, %v960_v23  ;;  %v1500_v21 = vsel %vm1464_vm2, %v960_v23, 0.0  ;;  %v1616_v26 = vmul.f32 %v960_v23, %v960_v23  ;;  %v962_v27 = vpop.f32.mrb[37].mxu0  ;;  %v1960_v46 = vpack.c.bf16 %v2910_v59, %v2910_v59  ;;  %v1069_v47 = vpop.f32.mrb[27].mxu1  ;;  %1444 = vst.msk [vmem:[%s3313_s4 + $0xb0] sm:$0xf] %vm1399_vm1, %v1959_v44 }
 0x142   :  { %v1501_v19 = vadd.f32 %v1500_v21, %v1499_v22  ;;  %v963_v28 = vpop.f32.mrb[38].mxu0 }
 0x143   :  { %1418 = vst.msk [vmem:[%s3313_s4 + $0x48] sm:$0xf] %vm1399_vm1, %v1933_v54  ;;  %v1697_v29 = vsel %vm1464_vm2, %v1616_v26, 0.0  ;;  %v1934_v34 = vpack.c.bf16 %v963_v28, %v963_v28  ;;  %v1502_v24 = vsel %vm1464_vm2, %v963_v28, 0.0  ;;  %v1617_v39 = vmul.f32 %v963_v28, %v963_v28  ;;  %v965_v40 = vpop.f32.mrb[39].mxu0 }
 0x144   :  { %v1698_v14 = vadd.f32 %v1697_v29, %v1696_v18  ;;  %v1503_v35 = vadd.f32 %v1502_v24, %v1501_v19  ;;  %1445 = vst.msk [vmem:[%s3313_s4 + $0xb4] sm:$0xf] %vm1399_vm1, %v1960_v46 }
 0x145   :  { %1419 = vst.msk [vmem:[%s3313_s4 + $0x4c] sm:$0xf] %vm1399_vm1, %v1934_v34  ;;  %v1699_v37 = vsel %vm1464_vm2, %v1617_v39, 0.0 }
 0x146   :  { %v1700_v48 = vadd.f32 %v1699_v37, %v1698_v14 }
 0x148   :  { %v968_v0 = vpop.f32.mrb[40].mxu0 }
 0x149   :  { %v1935_v6 = vpack.c.bf16 %v968_v0, %v968_v0  ;;  %v1504_v49 = vsel %vm1464_vm2, %v968_v0, 0.0  ;;  %v1618_v51 = vmul.f32 %v968_v0, %v968_v0  ;;  %v970_v38 = vpop.f32.mrb[41].mxu0  ;;  %v2934_v8 = vpop.f32.mrb[28].mxu1 }
 0x14a   :  { %v1505_v52 = vadd.f32 %v1504_v49, %v1503_v35  ;;  %v971_v57 = vpop.f32.mrb[42].mxu0  ;;  %v1961_v15 = vpack.c.bf16 %v2934_v8, %v2934_v8  ;;  %v1074_v58 = vpop.f32.mrb[29].mxu1 }
 0x14b   :  { %1420 = vst.msk [vmem:[%s3313_s4 + $0x50] sm:$0xf] %vm1399_vm1, %v1935_v6  ;;  %v1701_v45 = vsel %vm1464_vm2, %v1618_v51, 0.0  ;;  %v1936_v1 = vpack.c.bf16 %v971_v57, %v971_v57  ;;  %v1506_v50 = vsel %vm1464_vm2, %v971_v57, 0.0  ;;  %v1619_v3 = vmul.f32 %v971_v57, %v971_v57  ;;  %v973_v60 = vpop.f32.mrb[43].mxu0  ;;  %v2943_v62 = vpop.f32.mrb[30].mxu1 }
 0x14c   :  { %v1702_v55 = vadd.f32 %v1701_v45, %v1700_v48  ;;  %v1507_v56 = vadd.f32 %v1506_v50, %v1505_v52  ;;  %1446 = vst.msk [vmem:[%s3313_s4 + $0xb8] sm:$0xf] %vm1399_vm1, %v1961_v15  ;;  %v1962_v30 = vpack.c.bf16 %v2943_v62, %v2943_v62  ;;  %v1077_v63 = vpop.f32.mrb[31].mxu1 }
 0x14d   :  { %1421 = vst.msk [vmem:[%s3313_s4 + $0x54] sm:$0xf] %vm1399_vm1, %v1936_v1  ;;  %v1703_v61 = vsel %vm1464_vm2, %v1619_v3, 0.0 }
 0x14e   :  { %v1704_v25 = vadd.f32 %v1703_v61, %v1702_v55  ;;  %1447 = vst.msk [vmem:[%s3313_s4 + $0xbc] sm:$0xf] %vm1399_vm1, %v1962_v30 }
 0x150   :  { %v976_v4 = vpop.f32.mrb[44].mxu0 }
 0x151   :  { %v1937_v7 = vpack.c.bf16 %v976_v4, %v976_v4  ;;  %v1508_v10 = vsel %vm1464_vm2, %v976_v4, 0.0  ;;  %v1620_v22 = vmul.f32 %v976_v4, %v976_v4  ;;  %v978_v20 = vpop.f32.mrb[45].mxu0 }
 0x152   :  { %v1509_v12 = vadd.f32 %v1508_v10, %v1507_v56  ;;  %v979_v13 = vpop.f32.mrb[46].mxu0  ;;  %v2962_v28 = vpop.f32.mrb[32].mxu1 }
 0x153   :  { %1422 = vst.msk [vmem:[%s3313_s4 + $0x58] sm:$0xf] %vm1399_vm1, %v1937_v7  ;;  %v1705_v18 = vsel %vm1464_vm2, %v1620_v22, 0.0  ;;  %v1938_v23 = vpack.c.bf16 %v979_v13, %v979_v13  ;;  %v1510_v54 = vsel %vm1464_vm2, %v979_v13, 0.0  ;;  %v1621_v21 = vmul.f32 %v979_v13, %v979_v13  ;;  %v981_v26 = vpop.f32.mrb[47].mxu0  ;;  %v1082_v24 = vpop.f32.mrb[33].mxu1 }
 0x154   :  { %v1706_v27 = vadd.f32 %v1705_v18, %v1704_v25  ;;  %v1511_v19 = vadd.f32 %v1510_v54, %v1509_v12  ;;  %v1963_v34 = vpack.c.bf16 %v2962_v28, %v2962_v28  ;;  %v2971_v40 = vpop.f32.mrb[34].mxu1 }
 0x155   :  { %1423 = vst.msk [vmem:[%s3313_s4 + $0x5c] sm:$0xf] %vm1399_vm1, %v1938_v23  ;;  %v1707_v29 = vsel %vm1464_vm2, %v1621_v21, 0.0  ;;  %v1964_v43 = vpack.c.bf16 %v2971_v40, %v2971_v40  ;;  %v1085_v14 = vpop.f32.mrb[35].mxu1 }
 0x156   :  { %v1708_v39 = vadd.f32 %v1707_v29, %v1706_v27  ;;  %1448 = vst.msk [vmem:[%s3313_s4 + $0xc0] sm:$0xf] %vm1399_vm1, %v1963_v34 }
 0x157   :  { %1449 = vst.msk [vmem:[%s3313_s4 + $0xc4] sm:$0xf] %vm1399_vm1, %v1964_v43 }
 0x158   :  { %v984_v35 = vpop.f32.mrb[48].mxu0 }
 0x159   :  { %v1939_v44 = vpack.c.bf16 %v984_v35, %v984_v35  ;;  %v1512_v37 = vsel %vm1464_vm2, %v984_v35, 0.0  ;;  %v1622_v46 = vmul.f32 %v984_v35, %v984_v35  ;;  %v986_v47 = vpop.f32.mrb[49].mxu0 }
 0x15a   :  { %v1513_v48 = vadd.f32 %v1512_v37, %v1511_v19  ;;  %v987_v0 = vpop.f32.mrb[50].mxu0  ;;  %v2990_v1 = vpop.f32.mrb[36].mxu1 }
 0x15b   :  { %1424 = vst.msk [vmem:[%s3313_s4 + $0x60] sm:$0xf] %vm1399_vm1, %v1939_v44  ;;  %v1709_v6 = vsel %vm1464_vm2, %v1622_v46, 0.0  ;;  %v1940_v49 = vpack.c.bf16 %v987_v0, %v987_v0  ;;  %v1514_v51 = vsel %vm1464_vm2, %v987_v0, 0.0  ;;  %v1623_v38 = vmul.f32 %v987_v0, %v987_v0  ;;  %v989_v52 = vpop.f32.mrb[51].mxu0  ;;  %v1090_v60 = vpop.f32.mrb[37].mxu1 }
 0x15c   :  { %v1710_v57 = vadd.f32 %v1709_v6, %v1708_v39  ;;  %v1515_v45 = vadd.f32 %v1514_v51, %v1513_v48  ;;  %v1965_v3 = vpack.c.bf16 %v2990_v1, %v2990_v1  ;;  %v2999_v56 = vpop.f32.mrb[38].mxu1 }
 0x15d   :  { %1425 = vst.msk [vmem:[%s3313_s4 + $0x64] sm:$0xf] %vm1399_vm1, %v1940_v49  ;;  %v1711_v50 = vsel %vm1464_vm2, %v1623_v38, 0.0  ;;  %v1966_v15 = vpack.c.bf16 %v2999_v56, %v2999_v56  ;;  %v1093_v58 = vpop.f32.mrb[39].mxu1 }
 0x15e   :  { %v1712_v55 = vadd.f32 %v1711_v50, %v1710_v57  ;;  %1450 = vst.msk [vmem:[%s3313_s4 + $0xc8] sm:$0xf] %vm1399_vm1, %v1965_v3 }
 0x15f   :  { %1451 = vst.msk [vmem:[%s3313_s4 + $0xcc] sm:$0xf] %vm1399_vm1, %v1966_v15 }
 0x160   :  { %v992_v61 = vpop.f32.mrb[52].mxu0 }
 0x161   :  { %v1941_v25 = vpack.c.bf16 %v992_v61, %v992_v61  ;;  %v1516_v30 = vsel %vm1464_vm2, %v992_v61, 0.0  ;;  %v1624_v63 = vmul.f32 %v992_v61, %v992_v61  ;;  %v994_v4 = vpop.f32.mrb[53].mxu0 }
 0x162   :  { %v1517_v7 = vadd.f32 %v1516_v30, %v1515_v45  ;;  %v995_v10 = vpop.f32.mrb[54].mxu0  ;;  %v3018_v21 = vpop.f32.mrb[40].mxu1 }
 0x163   :  { %1426 = vst.msk [vmem:[%s3313_s4 + $0x68] sm:$0xf] %vm1399_vm1, %v1941_v25  ;;  %v1713_v22 = vsel %vm1464_vm2, %v1624_v63, 0.0  ;;  %v1942_v20 = vpack.c.bf16 %v995_v10, %v995_v10  ;;  %v1518_v12 = vsel %vm1464_vm2, %v995_v10, 0.0  ;;  %v1625_v13 = vmul.f32 %v995_v10, %v995_v10  ;;  %v997_v18 = vpop.f32.mrb[55].mxu0  ;;  %v1098_v19 = vpop.f32.mrb[41].mxu1 }
 0x164   :  { %v1714_v23 = vadd.f32 %v1713_v22, %v1712_v55  ;;  %v1519_v54 = vadd.f32 %v1518_v12, %v1517_v7  ;;  %v1967_v27 = vpack.c.bf16 %v3018_v21, %v3018_v21  ;;  %v3027_v34 = vpop.f32.mrb[42].mxu1  ;;  %v1630_v7 = vmul.f32 %v2731_v11, %v2731_v11 }
 0x165   :  { %1427 = vst.msk [vmem:[%s3313_s4 + $0x6c] sm:$0xf] %vm1399_vm1, %v1942_v20  ;;  %v1715_v26 = vsel %vm1464_vm2, %v1625_v13, 0.0  ;;  %v1968_v24 = vpack.c.bf16 %v3027_v34, %v3027_v34  ;;  %v1101_v39 = vpop.f32.mrb[43].mxu1  ;;  %v1528_v19 = vsel %vm1464_vm2, %v2731_v11, 0.0 }
 0x166   :  { %v1716_v29 = vadd.f32 %v1715_v26, %v1714_v23  ;;  %1452 = vst.msk [vmem:[%s3313_s4 + $0xd0] sm:$0xf] %vm1399_vm1, %v1967_v27  ;;  %v1725_v11 = vsel %vm1464_vm2, %v1630_v7, 0.0 }
 0x167   :  { %1453 = vst.msk [vmem:[%s3313_s4 + $0xd4] sm:$0xf] %vm1399_vm1, %v1968_v24 }
 0x168   :  { %v1000_v43 = vpop.f32.mrb[56].mxu0 }
 0x169   :  { %v1943_v14 = vpack.c.bf16 %v1000_v43, %v1000_v43  ;;  %v1520_v35 = vsel %vm1464_vm2, %v1000_v43, 0.0  ;;  %v1626_v44 = vmul.f32 %v1000_v43, %v1000_v43  ;;  %v1002_v37 = vpop.f32.mrb[57].mxu0 }
 0x16a   :  { %v1521_v46 = vadd.f32 %v1520_v35, %v1519_v54  ;;  %v1003_v47 = vpop.f32.mrb[58].mxu0  ;;  %v3046_v57 = vpop.f32.mrb[44].mxu1  ;;  %v1530_v37 = vsel %vm1464_vm2, %v2735_v42, 0.0 }
 0x16b   :  { %1428 = vst.msk [vmem:[%s3313_s4 + $0x70] sm:$0xf] %vm1399_vm1, %v1943_v14  ;;  %v1717_v48 = vsel %vm1464_vm2, %v1626_v44, 0.0  ;;  %v1944_v0 = vpack.c.bf16 %v1003_v47, %v1003_v47  ;;  %v1522_v6 = vsel %vm1464_vm2, %v1003_v47, 0.0  ;;  %v1627_v49 = vmul.f32 %v1003_v47, %v1003_v47  ;;  %v1005_v51 = vpop.f32.mrb[59].mxu0  ;;  %v1106_v3 = vpop.f32.mrb[45].mxu1 }
 0x16c   :  { %v1718_v38 = vadd.f32 %v1717_v48, %v1716_v29  ;;  %v1523_v52 = vadd.f32 %v1522_v6, %v1521_v46  ;;  %v1969_v50 = vpack.c.bf16 %v3046_v57, %v3046_v57  ;;  %v3055_v55 = vpop.f32.mrb[46].mxu1  ;;  %v1631_v29 = vmul.f32 %v2735_v42, %v2735_v42 }
 0x16d   :  { %1429 = vst.msk [vmem:[%s3313_s4 + $0x74] sm:$0xf] %vm1399_vm1, %v1944_v0  ;;  %v1719_v45 = vsel %vm1464_vm2, %v1627_v49, 0.0  ;;  %v1970_v15 = vpack.c.bf16 %v3055_v55, %v3055_v55  ;;  %v1109_v58 = vpop.f32.mrb[47].mxu1  ;;  %v1632_v46 = vmul.f32 %v2759_v32, %v2759_v32  ;;  %v1532_v51 = vsel %vm1464_vm2, %v2759_v32, 0.0 }
 0x16e   :  { %v1720_v60 = vadd.f32 %v1719_v45, %v1718_v38  ;;  %1454 = vst.msk [vmem:[%s3313_s4 + $0xd8] sm:$0xf] %vm1399_vm1, %v1969_v50  ;;  %v1727_v49 = vsel %vm1464_vm2, %v1631_v29, 0.0  ;;  %v1633_v42 = vmul.f32 %v2763_v16, %v2763_v16  ;;  %v1534_v50 = vsel %vm1464_vm2, %v2763_v16, 0.0 }
 0x16f   :  { %1455 = vst.msk [vmem:[%s3313_s4 + $0xdc] sm:$0xf] %vm1399_vm1, %v1970_v15  ;;  %v1729_v45 = vsel %vm1464_vm2, %v1632_v46, 0.0  ;;  %v1634_v3 = vmul.f32 %v2787_v2, %v2787_v2 }
 0x170   :  { %v1008_v61 = vpop.f32.mrb[60].mxu0  ;;  %v1731_v58 = vsel %vm1464_vm2, %v1633_v42, 0.0 }
 0x171   :  { %v1945_v25 = vpack.c.bf16 %v1008_v61, %v1008_v61  ;;  %v1524_v30 = vsel %vm1464_vm2, %v1008_v61, 0.0  ;;  %v1628_v63 = vmul.f32 %v1008_v61, %v1008_v61  ;;  %v1010_v4 = vpop.f32.mrb[61].mxu0  ;;  %v1536_v61 = vsel %vm1464_vm2, %v2787_v2, 0.0 }
 0x172   :  { %v1525_v10 = vadd.f32 %v1524_v30, %v1523_v52  ;;  %v1011_v22 = vpop.f32.mrb[62].mxu0  ;;  %v3076_v27 = vpop.f32.mrb[48].mxu1 }
 0x173   :  { %1430 = vst.msk [vmem:[%s3313_s4 + $0x78] sm:$0xf] %vm1399_vm1, %v1945_v25  ;;  %v1721_v20 = vsel %vm1464_vm2, %v1628_v63, 0.0  ;;  %v1946_v12 = vpack.c.bf16 %v1011_v22, %v1011_v22  ;;  %v1526_v13 = vsel %vm1464_vm2, %v1011_v22, 0.0  ;;  %v1629_v18 = vmul.f32 %v1011_v22, %v1011_v22  ;;  %v1013_v23 = vpop.f32.mrb[63].mxu0  ;;  %v1114_v43 = vpop.f32.mrb[49].mxu1 }
 0x174   :  { %v1722_v54 = vadd.f32 %v1721_v20, %v1720_v60  ;;  %v1527_v26 = vadd.f32 %v1526_v13, %v1525_v10  ;;  %v1971_v39 = vpack.c.bf16 %v3076_v27, %v3076_v27  ;;  %v3089_v44 = vpop.f32.mrb[50].mxu1  ;;  %v1635_v25 = vmul.f32 %v2791_v53, %v2791_v53 }
 0x175   :  { %1431 = vst.msk [vmem:[%s3313_s4 + $0x7c] sm:$0xf] %vm1399_vm1, %v1946_v12  ;;  %v1723_v24 = vsel %vm1464_vm2, %v1629_v18, 0.0  ;;  %v1972_v47 = vpack.c.bf16 %v3089_v44, %v3089_v44  ;;  %v1117_v48 = vpop.f32.mrb[51].mxu1  ;;  %v1733_v10 = vsel %vm1464_vm2, %v1634_v3, 0.0  ;;  %v1538_v22 = vsel %vm1464_vm2, %v2791_v53, 0.0 }
 0x176   :  { %v1529_v14 = vadd.f32 %v1528_v19, %v1527_v26  ;;  %v1724_v35 = vadd.f32 %v1723_v24, %v1722_v54  ;;  %1456 = vst.msk [vmem:[%s3313_s4 + $0xe0] sm:$0xf] %vm1399_vm1, %v1971_v39  ;;  %v1636_v20 = vmul.f32 %v2815_v5, %v2815_v5  ;;  %v1735_v23 = vsel %vm1464_vm2, %v1635_v25, 0.0 }
 0x177   :  { %1457 = vst.msk [vmem:[%s3313_s4 + $0xe4] sm:$0xf] %vm1399_vm1, %v1972_v47  ;;  %v1540_v54 = vsel %vm1464_vm2, %v2815_v5, 0.0  ;;  %v1637_v53 = vmul.f32 %v2820_v17, %v2820_v17  ;;  %v1542_v24 = vsel %vm1464_vm2, %v2820_v17, 0.0  ;;  %v1638_v39 = vmul.f32 %v2843_v41, %v2843_v41 }
 0x178   :  { %v1531_v0 = vadd.f32 %v1530_v37, %v1529_v14  ;;  %v1726_v6 = vadd.f32 %v1725_v11, %v1724_v35  ;;  %v1737_v29 = vsel %vm1464_vm2, %v1636_v20, 0.0  ;;  %v1544_v11 = vsel %vm1464_vm2, %v2843_v41, 0.0 }
 0x179   :  { %v1739_v35 = vsel %vm1464_vm2, %v1637_v53, 0.0  ;;  %v1639_v37 = vmul.f32 %v2848_v31, %v2848_v31 }
 0x17a   :  { %v1533_v38 = vadd.f32 %v1532_v51, %v1531_v0  ;;  %v1728_v52 = vadd.f32 %v1727_v49, %v1726_v6  ;;  %v3116_v15 = vpop.f32.mrb[52].mxu1  ;;  %v1741_v6 = vsel %vm1464_vm2, %v1638_v39, 0.0  ;;  %v1546_v49 = vsel %vm1464_vm2, %v2848_v31, 0.0 }
 0x17b   :  { %v1973_v30 = vpack.c.bf16 %v3116_v15, %v3116_v15  ;;  %v1122_v63 = vpop.f32.mrb[53].mxu1  ;;  %v1640_v51 = vmul.f32 %v2872_v33, %v2872_v33  ;;  %v1641_v31 = vmul.f32 %v2882_v9, %v2882_v9 }
 0x17c   :  { %v1535_v60 = vadd.f32 %v1534_v50, %v1533_v38  ;;  %v1730_v32 = vadd.f32 %v1729_v45, %v1728_v52  ;;  %v3125_v7 = vpop.f32.mrb[54].mxu1  ;;  %v1743_v45 = vsel %vm1464_vm2, %v1639_v37, 0.0  ;;  %v1548_v50 = vsel %vm1464_vm2, %v2872_v33, 0.0 }
 0x17d   :  { %1458 = vst.msk [vmem:[%s3313_s4 + $0xe8] sm:$0xf] %vm1399_vm1, %v1973_v30  ;;  %v1974_v2 = vpack.c.bf16 %v3125_v7, %v3125_v7  ;;  %v1125_v12 = vpop.f32.mrb[55].mxu1  ;;  %v1747_v63 = vsel %vm1464_vm2, %v1641_v31, 0.0  ;;  %v1560_v37 = vsel %vm1464_vm2, %v2962_v28, 0.0 }
 0x17e   :  { %v1537_v16 = vadd.f32 %v1536_v61, %v1535_v60  ;;  %v1732_v4 = vadd.f32 %v1731_v58, %v1730_v32  ;;  %v1745_v32 = vsel %vm1464_vm2, %v1640_v51, 0.0  ;;  %v1550_v58 = vsel %vm1464_vm2, %v2882_v9, 0.0 }
 0x17f   :  { %1459 = vst.msk [vmem:[%s3313_s4 + $0xec] sm:$0xf] %vm1399_vm1, %v1974_v2  ;;  %v1642_v61 = vmul.f32 %v2900_v36, %v2900_v36 }
 0x180   :  { %v1539_v13 = vadd.f32 %v1538_v22, %v1537_v16  ;;  %v1734_v18 = vadd.f32 %v1733_v10, %v1732_v4  ;;  %v1552_v16 = vsel %vm1464_vm2, %v2900_v36, 0.0  ;;  %v1643_v4 = vmul.f32 %v2910_v59, %v2910_v59 }
 0x181   :  { %v1749_v12 = vsel %vm1464_vm2, %v1642_v61, 0.0 }
 0x182   :  { %v1541_v26 = vadd.f32 %v1540_v54, %v1539_v13  ;;  %v1736_v19 = vadd.f32 %v1735_v23, %v1734_v18  ;;  %v3152_v14 = vpop.f32.mrb[56].mxu1  ;;  %v1554_v13 = vsel %vm1464_vm2, %v2910_v59, 0.0  ;;  %v1644_v18 = vmul.f32 %v2934_v8, %v2934_v8 }
 0x183   :  { %v1975_v46 = vpack.c.bf16 %v3152_v14, %v3152_v14  ;;  %v1130_v47 = vpop.f32.mrb[57].mxu1  ;;  %v1645_v59 = vmul.f32 %v2943_v62, %v2943_v62 }
 0x184   :  { %v1543_v43 = vadd.f32 %v1542_v24, %v1541_v26  ;;  %v1738_v5 = vadd.f32 %v1737_v29, %v1736_v19  ;;  %v3161_v0 = vpop.f32.mrb[58].mxu1  ;;  %v1751_v26 = vsel %vm1464_vm2, %v1643_v4, 0.0  ;;  %v1556_v19 = vsel %vm1464_vm2, %v2934_v8, 0.0 }
 0x185   :  { %1460 = vst.msk [vmem:[%s3313_s4 + $0xf0] sm:$0xf] %vm1399_vm1, %v1975_v46  ;;  %v1976_v41 = vpack.c.bf16 %v3161_v0, %v3161_v0  ;;  %v1133_v42 = vpop.f32.mrb[59].mxu1  ;;  %v1753_v39 = vsel %vm1464_vm2, %v1644_v18, 0.0  ;;  %v1647_v46 = vmul.f32 %v2971_v40, %v2971_v40 }
 0x186   :  { %v1740_v17 = vadd.f32 %v1739_v35, %v1738_v5  ;;  %v1545_v48 = vadd.f32 %v1544_v11, %v1543_v43  ;;  %v1558_v43 = vsel %vm1464_vm2, %v2943_v62, 0.0  ;;  %v1646_v5 = vmul.f32 %v2962_v28, %v2962_v28 }
 0x187   :  { %1461 = vst.msk [vmem:[%s3313_s4 + $0xf4] sm:$0xf] %vm1399_vm1, %v1976_v41  ;;  %v1755_v11 = vsel %vm1464_vm2, %v1645_v59, 0.0  ;;  %v1562_v62 = vsel %vm1464_vm2, %v2971_v40, 0.0  ;;  %v1759_v41 = vsel %vm1464_vm2, %v1647_v46, 0.0  ;;  %v1564_v28 = vsel %vm1464_vm2, %v2990_v1, 0.0 }
 0x188   :  { %v1547_v38 = vadd.f32 %v1546_v49, %v1545_v48  ;;  %v1742_v52 = vadd.f32 %v1741_v6, %v1740_v17  ;;  %v1757_v48 = vsel %vm1464_vm2, %v1646_v5, 0.0  ;;  %v1648_v6 = vmul.f32 %v2990_v1, %v2990_v1 }
 0x189   :  { %v1649_v42 = vmul.f32 %v2999_v56, %v2999_v56  ;;  %v1566_v40 = vsel %vm1464_vm2, %v2999_v56, 0.0  ;;  %v1568_v1 = vsel %vm1464_vm2, %v3018_v21, 0.0  ;;  %v1570_v56 = vsel %vm1464_vm2, %v3027_v34, 0.0 }
 0x18a   :  { %v1549_v3 = vadd.f32 %v1548_v50, %v1547_v38  ;;  %v1744_v60 = vadd.f32 %v1743_v45, %v1742_v52  ;;  %v3188_v30 = vpop.f32.mrb[60].mxu1  ;;  %v1761_v45 = vsel %vm1464_vm2, %v1648_v6, 0.0  ;;  %v1650_v50 = vmul.f32 %v3018_v21, %v3018_v21 }
 0x18b   :  { %v1977_v10 = vpack.c.bf16 %v3188_v30, %v3188_v30  ;;  %v1138_v22 = vpop.f32.mrb[61].mxu1  ;;  %v1572_v21 = vsel %vm1464_vm2, %v3046_v57, 0.0  ;;  %v1586_v6 = vsel %vm1464_vm2, %v3161_v0, 0.0 }
 0x18c   :  { %v1551_v25 = vadd.f32 %v1550_v58, %v1549_v3  ;;  %v1746_v33 = vadd.f32 %v1745_v32, %v1744_v60  ;;  %v3197_v2 = vpop.f32.mrb[62].mxu1  ;;  %v1763_v60 = vsel %vm1464_vm2, %v1649_v42, 0.0  ;;  %v1651_v32 = vmul.f32 %v3027_v34, %v3027_v34 }
 0x18d   :  { %1462 = vst.msk [vmem:[%s3313_s4 + $0xf8] sm:$0xf] %vm1399_vm1, %v1977_v10  ;;  %v1978_v36 = vpack.c.bf16 %v3197_v2, %v3197_v2  ;;  %v1141_v23 = vpop.f32.mrb[63].mxu1  ;;  %v1653_v10 = vmul.f32 %v3055_v55, %v3055_v55  ;;  %v1574_v34 = vsel %vm1464_vm2, %v3055_v55, 0.0  ;;  %v1578_v55 = vsel %vm1464_vm2, %v3089_v44, 0.0 }
 0x18e   :  { %v1553_v9 = vadd.f32 %v1552_v16, %v1551_v25  ;;  %v1748_v20 = vadd.f32 %v1747_v63, %v1746_v33  ;;  %v1765_v25 = vsel %vm1464_vm2, %v1650_v50, 0.0  ;;  %v1652_v33 = vmul.f32 %v3046_v57, %v3046_v57 }
 0x18f   :  { %1463 = vst.msk [vmem:[%s3313_s4 + $0xfc] sm:$0xf] %vm1399_vm1, %v1978_v36  ;;  %v1767_v4 = vsel %vm1464_vm2, %v1651_v32, 0.0  ;;  %v1771_v36 = vsel %vm1464_vm2, %v1653_v10, 0.0  ;;  %v1576_v57 = vsel %vm1464_vm2, %v3076_v27, 0.0  ;;  %v1655_v23 = vmul.f32 %v3089_v44, %v3089_v44 }
 0x190   :  { %v1555_v54 = vadd.f32 %v1554_v13, %v1553_v9  ;;  %v1750_v53 = vadd.f32 %v1749_v12, %v1748_v20  ;;  %v1769_v20 = vsel %vm1464_vm2, %v1652_v33, 0.0  ;;  %v1654_v12 = vmul.f32 %v3076_v27, %v3076_v27 }
 0x191   :  { %v1580_v27 = vsel %vm1464_vm2, %v3116_v15, 0.0  ;;  %v1582_v44 = vsel %vm1464_vm2, %v3125_v7, 0.0  ;;  %v1661_v42 = vmul.f32 %v3197_v2, %v3197_v2 }
 0x192   :  { %v1557_v29 = vadd.f32 %v1556_v19, %v1555_v54  ;;  %v1752_v24 = vadd.f32 %v1751_v26, %v1750_v53  ;;  %v1773_v26 = vsel %vm1464_vm2, %v1654_v12, 0.0  ;;  %v1656_v19 = vmul.f32 %v3116_v15, %v3116_v15 }
 0x193   :  { %v1584_v15 = vsel %vm1464_vm2, %v3152_v14, 0.0 }
 0x194   :  { %v1559_v35 = vadd.f32 %v1558_v43, %v1557_v29  ;;  %v1754_v8 = vadd.f32 %v1753_v39, %v1752_v24  ;;  %v1775_v24 = vsel %vm1464_vm2, %v1655_v23, 0.0  ;;  %v1657_v39 = vmul.f32 %v3125_v7, %v3125_v7 }
 0x196   :  { %v1561_v47 = vadd.f32 %v1560_v37, %v1559_v35  ;;  %v1756_v17 = vadd.f32 %v1755_v11, %v1754_v8  ;;  %v1777_v35 = vsel %vm1464_vm2, %v1656_v19, 0.0  ;;  %v1658_v8 = vmul.f32 %v3152_v14, %v3152_v14 }
 0x197   :  { %v1779_v46 = vsel %vm1464_vm2, %v1657_v39, 0.0 }
 0x198   :  { %v1758_v49 = vadd.f32 %v1757_v48, %v1756_v17  ;;  %v1563_v51 = vadd.f32 %v1562_v62, %v1561_v47  ;;  %v1659_v47 = vmul.f32 %v3161_v0, %v3161_v0  ;;  %v1660_v17 = vmul.f32 %v3188_v30, %v3188_v30 }
 0x199   :  { %v1781_v7 = vsel %vm1464_vm2, %v1658_v8, 0.0  ;;  %v1787_v0 = vsel %vm1464_vm2, %v1661_v42, 0.0 }
 0x19a   :  { %v1760_v38 = vadd.f32 %v1759_v41, %v1758_v49  ;;  %v1565_v52 = vadd.f32 %v1564_v28, %v1563_v51  ;;  %v1588_v49 = vsel %vm1464_vm2, %v3188_v30, 0.0  ;;  %v1783_v14 = vsel %vm1464_vm2, %v1659_v47, 0.0 }
 0x19b   :  { %v1785_v28 = vsel %vm1464_vm2, %v1660_v17, 0.0 }
 0x19c   :  { %v1762_v31 = vadd.f32 %v1761_v45, %v1760_v38  ;;  %v1567_v3 = vadd.f32 %v1566_v40, %v1565_v52  ;;  %v1590_v45 = vsel %vm1464_vm2, %v3197_v2, 0.0 }
 0x19e   :  { %v1764_v58 = vadd.f32 %v1763_v60, %v1762_v31  ;;  %v1569_v61 = vadd.f32 %v1568_v1, %v1567_v3 }
 0x1a0   :  { %v1766_v63 = vadd.f32 %v1765_v25, %v1764_v58  ;;  %v1571_v16 = vadd.f32 %v1570_v56, %v1569_v61 }
 0x1a2   :  { %v1768_v22 = vadd.f32 %v1767_v4, %v1766_v63  ;;  %v1573_v9 = vadd.f32 %v1572_v21, %v1571_v16 }
 0x1a4   :  { %v1770_v13 = vadd.f32 %v1769_v20, %v1768_v22  ;;  %v1575_v18 = vadd.f32 %v1574_v34, %v1573_v9 }
 0x1a6   :  { %v1772_v54 = vadd.f32 %v1771_v36, %v1770_v13  ;;  %v1577_v53 = vadd.f32 %v1576_v57, %v1575_v18 }
 0x1a8   :  { %v1774_v59 = vadd.f32 %v1773_v26, %v1772_v54  ;;  %v1579_v29 = vadd.f32 %v1578_v55, %v1577_v53 }
 0x1aa   :  { %v1776_v43 = vadd.f32 %v1775_v24, %v1774_v59  ;;  %v1581_v5 = vadd.f32 %v1580_v27, %v1579_v29 }
 0x1ac   :  { %v1778_v11 = vadd.f32 %v1777_v35, %v1776_v43  ;;  %v1583_v37 = vadd.f32 %v1582_v44, %v1581_v5 }
 0x1ae   :  { %v1780_v48 = vadd.f32 %v1779_v46, %v1778_v11  ;;  %v1585_v62 = vadd.f32 %v1584_v15, %v1583_v37 }
 0x1b0   :  { %v1782_v51 = vadd.f32 %v1781_v7, %v1780_v48  ;;  %v1587_v41 = vadd.f32 %v1586_v6, %v1585_v62 }
 0x1b2   :  { %v1784_v38 = vadd.f32 %v1783_v14, %v1782_v51  ;;  %v1589_v52 = vadd.f32 %v1588_v49, %v1587_v41 }
 0x1b4   :  { %v1786_v40 = vadd.f32 %v1785_v28, %v1784_v38  ;;  %v1591_v50 = vadd.f32 %v1590_v45, %v1589_v52 }
 0x1b6   :  { %v1592_v31 = vrot.slane %v1591_v50, 4  ;;  %v1788_v30 = vadd.f32 %v1787_v0, %v1786_v40 }
 0x1b8   :  { %v1593_v3 = vadd.f32 %v1592_v31, %v1591_v50  ;;  %v1789_v60 = vrot.slane %v1788_v30, 4 }
 0x1ba   :  { %v1594_v1 = vrot.slane %v1593_v3, 2  ;;  %v1790_v32 = vadd.f32 %v1789_v60, %v1788_v30 }
 0x1bc   :  { %v1595_v58 = vadd.f32 %v1594_v1, %v1593_v3  ;;  %v1791_v61 = vrot.slane %v1790_v32, 2 }
 0x1be   :  { %v1596_v25 = vrot.slane %v1595_v58, 1  ;;  %v1792_v56 = vadd.f32 %v1791_v61, %v1790_v32 }
 0x1c0   :  { %v1597_v33 = vadd.f32 %v1596_v25, %v1595_v58  ;;  %v1793_v63 = vrot.slane %v1792_v56, 1 }
 0x1c2   :  { %v1794_v16 = vadd.f32 %v1793_v63, %v1792_v56  ;;  %1796 = vst.msk [vmem:[%s3314_s5] sm:$0x1] %vm1795_vm3, %v1597_v33 }
 0x1c4   :  { %1797 = vst.msk [vmem:[%s3315_s6] sm:$0x1] %vm1795_vm3, %v1794_v16 }

// kernel: generator_forward.9
= control target key start
LH: loop header
LB: loop body
LE: loop exit
PB: predicated region body
PF: predicated region fallthrough
CT: control target
= control target key end

     0   :  { %s3107_s18 = smov 0   ;;  %s3109_s19 = smov 0   ;;  %s3964_s0 = inlined_call_operand.vmem [shape: bf16[2048,72], index: 0, kind: input, shape index: {}]   ;;  %s3965_s1 = inlined_call_operand.vmem [shape: f32[1,72], index: 1, kind: input, shape index: {}]   ;;  %s3966_s2 = inlined_call_operand.vmem [shape: f32[1,72], index: 2, kind: input, shape index: {}]   ;;  %s3967_s3 = inlined_call_operand.vmem [shape: bf16[72,12], index: 3, kind: input, shape index: {}]   ;;  %s3968_s4 = inlined_call_operand.vmem [shape: f32[1,12], index: 4, kind: input, shape index: {}]   ;;  %s3969_s5 = inlined_call_operand.vmem [shape: f32[2048,12], index: 5, kind: output, shape index: {}]  }
   0x1   :  { %s3111_s20 = smov 0  }
   0x2 LB: > { %s24_s21 = sadd.s32 1, %s3071_s19  ;;  %p2148_p0 = scmp.ge.s32.totalorder %s3075_s20, 1  ;;  %s3075_s20 = sphi %s3111_s20, %s15_s20   ;;  %s3071_s19 = sphi %s3109_s19, %s3971_s19   ;;  %s3067_s18 = sphi %s3107_s18, %s3970_s18  }
   0x3   : > { %p25_p1 = scmp.ge.s32.totalorder %s24_s21, 2  ;;  %p219_p2 = scmp.lt.s32.totalorder %s3075_s20, 3 }
   0x5   : > { %s3973_s21 = smov (%p25_p1, %s24_s21), 0  ;;  %p220_p3 = pnand %p2148_p0, %p219_p2 }
   0x6   : > { %v2789_v0 = vld [vmem:[%s3967_s3] sm:$0xff] (!%p220_p3)   ;;  %v2790_v1 = vld [vmem:[%s3967_s3 + $0x8] sm:$0xff] (!%p220_p3)   ;;  %s2149_s26 = sshll.u32 (!%p220_p3), %s3067_s18, 7  ;;  %v2791_v2 = vld [vmem:[%s3967_s3 + $0x10] sm:$0xff] (!%p220_p3)   ;;  %vm1234_vm0 = vcmask (!%p220_p3), 1043456   ;;  %vm1041_vm1 = vcmask (!%p220_p3), 588800  }
   0x7   : > { %223 = sbr.rel (%p220_p3) target bundleno = 398 (0x18e), region = 40  ;;  %2615 = vmatprep.subr.bf16.mxu0 (!%p220_p3), %v2789_v0  ;;  %2753 = vmatprep.subr.bf16.mxu1 (!%p220_p3), %v2789_v0  ;;  %p258_p4 = scmp.lt.s32.totalorder (!%p220_p3), %s2149_s26, 255  ;;  %v2793_v3 = vld [vmem:[%s3967_s3 + $0x20] ss:$0 sps:$4 sm:$0xff] (!%p220_p3)   ;;  %v2792_v4 = vld [vmem:[%s3967_s3 + $0x18] sm:$0xff] (!%p220_p3)   ;;  %vm1911_vm2 = vcmask (!%p220_p3), 97280  }
   0x8   : > { %2616 = vmatpush3.bf16.msra.mxu0 (!%p220_p3), %v2789_v0  ;;  %2758 = vmatpush3.bf16.msra.mxu1 (!%p220_p3), %v2789_v0  ;;  %v3151_v5 = vld [vmem:[%s3965_s1] ss:$0 sm:$0xff] (!%p220_p3)  ;;  %v1236_v6 = vsel (!%p220_p3), %vm1234_vm0, %v2793_v3, 0 }
   0x9   : > { %2617 = vmatprep.subr.bf16.mxu0 (!%p220_p3), %v2790_v1  ;;  %2754 = vmatprep.subr.bf16.mxu1 (!%p220_p3), %v2790_v1  ;;  %v3162_v16 = vld [vmem:[%s3966_s2] ss:$0 sm:$0xff] (!%p220_p3) }
   0xc   : > { %2618 = vmatpush3.bf16.msra.mxu0 (!%p220_p3), %v2790_v1  ;;  %2759 = vmatpush3.bf16.msra.mxu1 (!%p220_p3), %v2790_v1 }
   0xd   : > { %2619 = vmatprep.subr.bf16.mxu0 (!%p220_p3), %v2791_v2  ;;  %2755 = vmatprep.subr.bf16.mxu1 (!%p220_p3), %v2791_v2 }
   0xe   : > { %s3975_s26 = smov (!%p258_p4, %s2149_s26), 255 }
   0xf   : > { %s2150_s6 = sshll.u32 %s3975_s26, 2  ;;  %s2152_s25 = sshll.u32 %s3975_s26, 3 }
  0x10   : > { %s3146_s11 = scalar_lea.vmem %s3964_s0, %s2150_s6  ;;  %2620 = vmatpush3.bf16.msra.mxu0 %v2791_v2  ;;  %2760 = vmatpush3.bf16.msra.mxu1 %v2791_v2  ;;  %s3574_s29 = scalar_lea.vmem %s3969_s5, %s2152_s25 }
  0x11   : > { %v2228_v7 = vld [vmem:[%s3146_s11] sm:$0xff]   ;;  %v2483_v9 = vld [vmem:[%s3146_s11 + $0x8] sm:$0xff]   ;;  %v2484_v15 = vld [vmem:[%s3146_s11 + $0x10] sm:$0xff]   ;;  %2621 = vmatprep.subr.bf16.mxu0 %v2792_v4  ;;  %2756 = vmatprep.subr.bf16.mxu1 %v2792_v4 }
  0x12   : > { %v2514_v8 = vld [vmem:[%s3146_s11 + $0x100] sm:$0xff]   ;;  %v2229_v10 = vunpack.c.l.bf16 %v2228_v7  ;;  %v2230_v11 = vunpack.c.h.bf16 %v2228_v7  ;;  %v2515_v14 = vld [vmem:[%s3146_s11 + $0x108] sm:$0xff]   ;;  %v2233_v17 = vunpack.c.l.bf16 %v2483_v9  ;;  %v2234_v18 = vunpack.c.h.bf16 %v2483_v9  ;;  %v2516_v41 = vld [vmem:[%s3146_s11 + $0x110] sm:$0xff]  }
  0x13   : > { %v2357_v12 = vunpack.c.l.bf16 %v2514_v8  ;;  %v2358_v13 = vunpack.c.h.bf16 %v2514_v8  ;;  %v2361_v19 = vunpack.c.l.bf16 %v2515_v14  ;;  %v2362_v20 = vunpack.c.h.bf16 %v2515_v14  ;;  %v2485_v46 = vld [vmem:[%s3146_s11 + $0x18] sm:$0xff]   ;;  %v2486_v0 = vld [vmem:[%s3146_s11 + $0x20] sm:$0xff]  }
  0x14   : > { %v543_v21 = vmul.f32 %v2229_v10, %v3151_v5  ;;  %v544_v22 = vmul.f32 %v2230_v11, %v3151_v5  ;;  %v2237_v24 = vunpack.c.l.bf16 %v2484_v15  ;;  %v545_v26 = vmul.f32 %v2233_v17, %v3151_v5  ;;  %2622 = vmatpush3.bf16.msra.mxu0 %v2792_v4  ;;  %2761 = vmatpush3.bf16.msra.mxu1 %v2792_v4  ;;  %v2517_v51 = vld [vmem:[%s3146_s11 + $0x118] sm:$0xff]   ;;  %v2518_v14 = vld [vmem:[%s3146_s11 + $0x120] sm:$0xff]  }
  0x15   : > { %v607_v23 = vmul.f32 %v2357_v12, %v3151_v5  ;;  %v608_v25 = vmul.f32 %v2358_v13, %v3151_v5  ;;  %v546_v27 = vmul.f32 %v2234_v18, %v3151_v5  ;;  %v2238_v28 = vunpack.c.h.bf16 %v2484_v15  ;;  %2763 = vmatprep.subr.msk.bf16.mxu0 %vm1234_vm0, %v2793_v3  ;;  %2764 = vmatprep.subr.msk.bf16.mxu1 %vm1234_vm0, %v2793_v3 }
  0x16   : > { %v678_v29 = vadd.f32 %v3162_v16, %v543_v21  ;;  %v679_v30 = vadd.f32 %v3162_v16, %v544_v22  ;;  %v609_v32 = vmul.f32 %v2361_v19, %v3151_v5  ;;  %v680_v34 = vadd.f32 %v3162_v16, %v545_v26 }
  0x17   : > { %v742_v31 = vadd.f32 %v3162_v16, %v607_v23  ;;  %v743_v33 = vadd.f32 %v3162_v16, %v608_v25  ;;  %v681_v35 = vadd.f32 %v3162_v16, %v546_v27  ;;  %v610_v36 = vmul.f32 %v2362_v20, %v3151_v5 }
  0x18   : > { %v806_v37 = vmax.f32 %v678_v29, 0.0  ;;  %v807_v38 = vmax.f32 %v679_v30, 0.0  ;;  %v744_v40 = vadd.f32 %v3162_v16, %v609_v32  ;;  %v808_v43 = vmax.f32 %v680_v34, 0.0  ;;  %2624 = vmatpush3.bf16.msra.mxu0 %v1236_v6  ;;  %2762 = vmatpush3.bf16.msra.mxu1 %v1236_v6 }
  0x19   : > { %v870_v39 = vmax.f32 %v742_v31, 0.0  ;;  %v871_v42 = vmax.f32 %v743_v33, 0.0  ;;  %v809_v44 = vmax.f32 %v681_v35, 0.0  ;;  %v745_v45 = vadd.f32 %v3162_v16, %v610_v36  ;;  %v2519_v33 = vld [vmem:[%s3146_s11 + $0x128] sm:$0xff]  }
  0x1a   : > { %v934_v47 = vpack.c.bf16 %v807_v38, %v806_v37  ;;  %v872_v48 = vmax.f32 %v744_v40, 0.0  ;;  %v547_v49 = vmul.f32 %v2237_v24, %v3151_v5  ;;  %v548_v50 = vmul.f32 %v2238_v28, %v3151_v5  ;;  %v2487_v24 = vld [vmem:[%s3146_s11 + $0x28] sm:$0xff]  }
  0x1b   : > { %v966_v52 = vpack.c.bf16 %v871_v42, %v870_v39  ;;  %v935_v53 = vpack.c.bf16 %v809_v44, %v808_v43  ;;  %v873_v54 = vmax.f32 %v745_v45, 0.0  ;;  %v2365_v55 = vunpack.c.l.bf16 %v2516_v41  ;;  %v2488_v42 = vld [vmem:[%s3146_s11 + $0x30] sm:$0xff]  }
  0x1c   : > { %v682_v56 = vadd.f32 %v3162_v16, %v547_v49  ;;  %v683_v57 = vadd.f32 %v3162_v16, %v548_v50  ;;  %v2366_v58 = vunpack.c.h.bf16 %v2516_v41  ;;  %v2241_v59 = vunpack.c.l.bf16 %v2485_v46  ;;  %2625 = vmatprep.mubr.msk.bf16.mxu0 %vm1041_vm1, %v934_v47 }
  0x1d   : > { %2689 = vmatprep.mubr.msk.bf16.mxu1 %vm1041_vm1, %v966_v52  ;;  %v967_v60 = vpack.c.bf16 %v873_v54, %v872_v48  ;;  %v611_v61 = vmul.f32 %v2365_v55, %v3151_v5  ;;  %v2242_v62 = vunpack.c.h.bf16 %v2485_v46  ;;  %v2369_v63 = vunpack.c.l.bf16 %v2517_v51  ;;  %2626 = vmatmul.mubr.msk.bf16.vlgmr.msra.gmra.mrb[0].mxu0 %vm1041_vm1, %v935_v53  ;;  %v2520_v55 = vld [vmem:[%s3146_s11 + $0x130] sm:$0xff]  }
  0x1e   : > { %v810_v1 = vmax.f32 %v682_v56, 0.0  ;;  %v811_v2 = vmax.f32 %v683_v57, 0.0  ;;  %v612_v3 = vmul.f32 %v2366_v58, %v3151_v5  ;;  %v549_v4 = vmul.f32 %v2241_v59, %v3151_v5 }
  0x1f   : > { %2690 = vmatmul.mubr.msk.bf16.vlgmr.msra.gmra.mrb[0].mxu1 %vm1041_vm1, %v967_v60  ;;  %v746_v6 = vadd.f32 %v3162_v16, %v611_v61  ;;  %v550_v7 = vmul.f32 %v2242_v62, %v3151_v5  ;;  %v2370_v8 = vunpack.c.h.bf16 %v2517_v51  ;;  %v613_v9 = vmul.f32 %v2369_v63, %v3151_v5 }
  0x20   : > { %v936_v10 = vpack.c.bf16 %v811_v2, %v810_v1  ;;  %v747_v11 = vadd.f32 %v3162_v16, %v612_v3  ;;  %v684_v12 = vadd.f32 %v3162_v16, %v549_v4  ;;  %v2245_v13 = vunpack.c.l.bf16 %v2486_v0 }
  0x21   : > { %v874_v15 = vmax.f32 %v746_v6, 0.0  ;;  %v685_v17 = vadd.f32 %v3162_v16, %v550_v7  ;;  %v614_v18 = vmul.f32 %v2370_v8, %v3151_v5  ;;  %v748_v19 = vadd.f32 %v3162_v16, %v613_v9 }
  0x22   : > { %2629 = vmatprep.mubr.msk.bf16.mxu0 %vm1041_vm1, %v936_v10  ;;  %v875_v20 = vmax.f32 %v747_v11, 0.0  ;;  %v812_v21 = vmax.f32 %v684_v12, 0.0  ;;  %v2246_v22 = vunpack.c.h.bf16 %v2486_v0  ;;  %v551_v23 = vmul.f32 %v2245_v13, %v3151_v5  ;;  %v2489_v0 = vld [vmem:[%s3146_s11 + $0x38] sm:$0xff]  }
  0x23   : > { %v813_v25 = vmax.f32 %v685_v17, 0.0  ;;  %v749_v26 = vadd.f32 %v3162_v16, %v614_v18  ;;  %v876_v27 = vmax.f32 %v748_v19, 0.0  ;;  %v2373_v28 = vunpack.c.l.bf16 %v2518_v14  ;;  %v2521_v10 = vld [vmem:[%s3146_s11 + $0x138] sm:$0xff]  }
  0x24   : > { %v968_v29 = vpack.c.bf16 %v875_v20, %v874_v15  ;;  %v552_v30 = vmul.f32 %v2246_v22, %v3151_v5  ;;  %v686_v31 = vadd.f32 %v3162_v16, %v551_v23  ;;  %v2374_v32 = vunpack.c.h.bf16 %v2518_v14  ;;  %v2490_v20 = vld [vmem:[%s3146_s11 + $0x40] sm:$0xff]  }
  0x25   : > { %v937_v34 = vpack.c.bf16 %v813_v25, %v812_v21  ;;  %v877_v35 = vmax.f32 %v749_v26, 0.0  ;;  %v615_v36 = vmul.f32 %v2373_v28, %v3151_v5  ;;  %v2249_v37 = vunpack.c.l.bf16 %v2487_v24 }
  0x26   : > { %2693 = vmatprep.mubr.msk.bf16.mxu1 %vm1041_vm1, %v968_v29  ;;  %v687_v38 = vadd.f32 %v3162_v16, %v552_v30  ;;  %v814_v39 = vmax.f32 %v686_v31, 0.0  ;;  %v616_v40 = vmul.f32 %v2374_v32, %v3151_v5  ;;  %v2250_v41 = vunpack.c.h.bf16 %v2487_v24 }
  0x27   : > { %2630 = vmatmul.mubr.msk.bf16.gmra.mrb[4].mxu0 %vm1041_vm1, %v937_v34  ;;  %v969_v43 = vpack.c.bf16 %v877_v35, %v876_v27  ;;  %v750_v44 = vadd.f32 %v3162_v16, %v615_v36  ;;  %v553_v45 = vmul.f32 %v2249_v37, %v3151_v5  ;;  %v2377_v46 = vunpack.c.l.bf16 %v2519_v33 }
  0x28   : > { %v815_v47 = vmax.f32 %v687_v38, 0.0  ;;  %v751_v48 = vadd.f32 %v3162_v16, %v616_v40  ;;  %v554_v49 = vmul.f32 %v2250_v41, %v3151_v5  ;;  %v2378_v50 = vunpack.c.h.bf16 %v2519_v33  ;;  %v2522_v33 = vld [vmem:[%s3146_s11 + $0x140] sm:$0xff]  }
  0x29   : > { %2694 = vmatmul.mubr.msk.bf16.gmra.mrb[4].mxu1 %vm1041_vm1, %v969_v43  ;;  %v878_v51 = vmax.f32 %v750_v44, 0.0  ;;  %v688_v52 = vadd.f32 %v3162_v16, %v553_v45  ;;  %v617_v53 = vmul.f32 %v2377_v46, %v3151_v5  ;;  %v2253_v54 = vunpack.c.l.bf16 %v2488_v42 }
  0x2a   : > { %v938_v56 = vpack.c.bf16 %v815_v47, %v814_v39  ;;  %v879_v57 = vmax.f32 %v751_v48, 0.0  ;;  %v689_v58 = vadd.f32 %v3162_v16, %v554_v49  ;;  %v618_v59 = vmul.f32 %v2378_v50, %v3151_v5 }
  0x2b   : > { %v816_v60 = vmax.f32 %v688_v52, 0.0  ;;  %v752_v61 = vadd.f32 %v3162_v16, %v617_v53  ;;  %v2254_v62 = vunpack.c.h.bf16 %v2488_v42  ;;  %v555_v63 = vmul.f32 %v2253_v54, %v3151_v5  ;;  %v2491_v42 = vld [vmem:[%s3146_s11 + $0x48] sm:$0xff]  }
  0x2c   : > { %2633 = vmatprep.mubr.msk.bf16.mxu0 %vm1041_vm1, %v938_v56  ;;  %v970_v1 = vpack.c.bf16 %v879_v57, %v878_v51  ;;  %v817_v2 = vmax.f32 %v689_v58, 0.0  ;;  %v753_v3 = vadd.f32 %v3162_v16, %v618_v59  ;;  %v2381_v4 = vunpack.c.l.bf16 %v2520_v55  ;;  %v2523_v51 = vld [vmem:[%s3146_s11 + $0x148] sm:$0xff]  }
  0x2d   : > { %v880_v6 = vmax.f32 %v752_v61, 0.0  ;;  %v556_v7 = vmul.f32 %v2254_v62, %v3151_v5  ;;  %v690_v8 = vadd.f32 %v3162_v16, %v555_v63  ;;  %v2382_v9 = vunpack.c.h.bf16 %v2520_v55 }
  0x2e   : > { %2697 = vmatprep.mubr.msk.bf16.mxu1 %vm1041_vm1, %v970_v1  ;;  %v939_v11 = vpack.c.bf16 %v817_v2, %v816_v60  ;;  %v881_v12 = vmax.f32 %v753_v3, 0.0  ;;  %v619_v13 = vmul.f32 %v2381_v4, %v3151_v5  ;;  %v2257_v14 = vunpack.c.l.bf16 %v2489_v0  ;;  %v2492_v60 = vld [vmem:[%s3146_s11 + $0x50] sm:$0xff]  }
  0x2f   : > { %v691_v15 = vadd.f32 %v3162_v16, %v556_v7  ;;  %v818_v17 = vmax.f32 %v690_v8, 0.0  ;;  %v620_v18 = vmul.f32 %v2382_v9, %v3151_v5  ;;  %v2258_v19 = vunpack.c.h.bf16 %v2489_v0 }
  0x30   : > { %2634 = vmatmul.mubr.msk.bf16.gmra.mrb[8].mxu0 %vm1041_vm1, %v939_v11  ;;  %v971_v21 = vpack.c.bf16 %v881_v12, %v880_v6  ;;  %v754_v22 = vadd.f32 %v3162_v16, %v619_v13  ;;  %v557_v23 = vmul.f32 %v2257_v14, %v3151_v5  ;;  %v2385_v24 = vunpack.c.l.bf16 %v2521_v10 }
  0x31   : > { %v819_v25 = vmax.f32 %v691_v15, 0.0  ;;  %v755_v26 = vadd.f32 %v3162_v16, %v620_v18  ;;  %v558_v27 = vmul.f32 %v2258_v19, %v3151_v5  ;;  %v2386_v28 = vunpack.c.h.bf16 %v2521_v10  ;;  %v2524_v10 = vld [vmem:[%s3146_s11 + $0x150] sm:$0xff]  }
  0x32   : > { %2698 = vmatmul.mubr.msk.bf16.gmra.mrb[8].mxu1 %vm1041_vm1, %v971_v21  ;;  %v882_v29 = vmax.f32 %v754_v22, 0.0  ;;  %v692_v30 = vadd.f32 %v3162_v16, %v557_v23  ;;  %v621_v31 = vmul.f32 %v2385_v24, %v3151_v5  ;;  %v2261_v32 = vunpack.c.l.bf16 %v2490_v20 }
  0x33   : > { %v940_v34 = vpack.c.bf16 %v819_v25, %v818_v17  ;;  %v883_v35 = vmax.f32 %v755_v26, 0.0  ;;  %v693_v36 = vadd.f32 %v3162_v16, %v558_v27  ;;  %v622_v37 = vmul.f32 %v2386_v28, %v3151_v5 }
  0x34   : > { %v820_v38 = vmax.f32 %v692_v30, 0.0  ;;  %v756_v39 = vadd.f32 %v3162_v16, %v621_v31  ;;  %v2262_v40 = vunpack.c.h.bf16 %v2490_v20  ;;  %v559_v41 = vmul.f32 %v2261_v32, %v3151_v5  ;;  %v2493_v20 = vld [vmem:[%s3146_s11 + $0x58] sm:$0xff]  }
  0x35   : > { %2637 = vmatprep.mubr.msk.bf16.mxu0 %vm1041_vm1, %v940_v34  ;;  %v972_v43 = vpack.c.bf16 %v883_v35, %v882_v29  ;;  %v821_v44 = vmax.f32 %v693_v36, 0.0  ;;  %v757_v45 = vadd.f32 %v3162_v16, %v622_v37  ;;  %v2389_v46 = vunpack.c.l.bf16 %v2522_v33  ;;  %v2525_v29 = vld [vmem:[%s3146_s11 + $0x158] sm:$0xff]  }
  0x36   : > { %v884_v47 = vmax.f32 %v756_v39, 0.0  ;;  %v560_v48 = vmul.f32 %v2262_v40, %v3151_v5  ;;  %v694_v49 = vadd.f32 %v3162_v16, %v559_v41  ;;  %v2390_v50 = vunpack.c.h.bf16 %v2522_v33 }
  0x37   : > { %2701 = vmatprep.mubr.msk.bf16.mxu1 %vm1041_vm1, %v972_v43  ;;  %v941_v52 = vpack.c.bf16 %v821_v44, %v820_v38  ;;  %v885_v53 = vmax.f32 %v757_v45, 0.0  ;;  %v623_v54 = vmul.f32 %v2389_v46, %v3151_v5  ;;  %v2265_v55 = vunpack.c.l.bf16 %v2491_v42  ;;  %v2494_v38 = vld [vmem:[%s3146_s11 + $0x60] sm:$0xff]  }
  0x38   : > { %v695_v56 = vadd.f32 %v3162_v16, %v560_v48  ;;  %v822_v57 = vmax.f32 %v694_v49, 0.0  ;;  %v624_v58 = vmul.f32 %v2390_v50, %v3151_v5  ;;  %v2266_v59 = vunpack.c.h.bf16 %v2491_v42 }
  0x39   : > { %2638 = vmatmul.mubr.msk.bf16.gmra.mrb[12].mxu0 %vm1041_vm1, %v941_v52  ;;  %v973_v61 = vpack.c.bf16 %v885_v53, %v884_v47  ;;  %v758_v62 = vadd.f32 %v3162_v16, %v623_v54  ;;  %v561_v63 = vmul.f32 %v2265_v55, %v3151_v5  ;;  %v2393_v0 = vunpack.c.l.bf16 %v2523_v51 }
  0x3a   : > { %v823_v1 = vmax.f32 %v695_v56, 0.0  ;;  %v759_v2 = vadd.f32 %v3162_v16, %v624_v58  ;;  %v562_v3 = vmul.f32 %v2266_v59, %v3151_v5  ;;  %v2394_v4 = vunpack.c.h.bf16 %v2523_v51  ;;  %v2526_v51 = vld [vmem:[%s3146_s11 + $0x160] sm:$0xff]  }
  0x3b   : > { %2702 = vmatmul.mubr.msk.bf16.gmra.mrb[12].mxu1 %vm1041_vm1, %v973_v61  ;;  %v886_v6 = vmax.f32 %v758_v62, 0.0  ;;  %v696_v7 = vadd.f32 %v3162_v16, %v561_v63  ;;  %v625_v8 = vmul.f32 %v2393_v0, %v3151_v5  ;;  %v2269_v9 = vunpack.c.l.bf16 %v2492_v60 }
  0x3c   : > { %v942_v11 = vpack.c.bf16 %v823_v1, %v822_v57  ;;  %v887_v12 = vmax.f32 %v759_v2, 0.0  ;;  %v697_v13 = vadd.f32 %v3162_v16, %v562_v3  ;;  %v626_v14 = vmul.f32 %v2394_v4, %v3151_v5 }
  0x3d   : > { %v824_v15 = vmax.f32 %v696_v7, 0.0  ;;  %v760_v17 = vadd.f32 %v3162_v16, %v625_v8  ;;  %v2270_v18 = vunpack.c.h.bf16 %v2492_v60  ;;  %v563_v19 = vmul.f32 %v2269_v9, %v3151_v5  ;;  %v2495_v60 = vld [vmem:[%s3146_s11 + $0x68] sm:$0xff]  }
  0x3e   : > { %2641 = vmatprep.mubr.msk.bf16.mxu0 %vm1041_vm1, %v942_v11  ;;  %v974_v21 = vpack.c.bf16 %v887_v12, %v886_v6  ;;  %v825_v22 = vmax.f32 %v697_v13, 0.0  ;;  %v761_v23 = vadd.f32 %v3162_v16, %v626_v14  ;;  %v2397_v24 = vunpack.c.l.bf16 %v2524_v10  ;;  %v2527_v6 = vld [vmem:[%s3146_s11 + $0x168] sm:$0xff]  }
  0x3f   : > { %v888_v25 = vmax.f32 %v760_v17, 0.0  ;;  %v564_v26 = vmul.f32 %v2270_v18, %v3151_v5  ;;  %v698_v27 = vadd.f32 %v3162_v16, %v563_v19  ;;  %v2398_v28 = vunpack.c.h.bf16 %v2524_v10 }
  0x40   : > { %2705 = vmatprep.mubr.msk.bf16.mxu1 %vm1041_vm1, %v974_v21  ;;  %v943_v30 = vpack.c.bf16 %v825_v22, %v824_v15  ;;  %v889_v31 = vmax.f32 %v761_v23, 0.0  ;;  %v627_v32 = vmul.f32 %v2397_v24, %v3151_v5  ;;  %v2273_v33 = vunpack.c.l.bf16 %v2493_v20  ;;  %v2496_v15 = vld [vmem:[%s3146_s11 + $0x70] sm:$0xff]  }
  0x41   : > { %v699_v34 = vadd.f32 %v3162_v16, %v564_v26  ;;  %v826_v35 = vmax.f32 %v698_v27, 0.0  ;;  %v628_v36 = vmul.f32 %v2398_v28, %v3151_v5  ;;  %v2274_v37 = vunpack.c.h.bf16 %v2493_v20 }
  0x42   : > { %2642 = vmatmul.mubr.msk.bf16.gmra.mrb[16].mxu0 %vm1041_vm1, %v943_v30  ;;  %v975_v39 = vpack.c.bf16 %v889_v31, %v888_v25  ;;  %v762_v40 = vadd.f32 %v3162_v16, %v627_v32  ;;  %v565_v41 = vmul.f32 %v2273_v33, %v3151_v5  ;;  %v2401_v42 = vunpack.c.l.bf16 %v2525_v29 }
  0x43   : > { %v827_v43 = vmax.f32 %v699_v34, 0.0  ;;  %v763_v44 = vadd.f32 %v3162_v16, %v628_v36  ;;  %v566_v45 = vmul.f32 %v2274_v37, %v3151_v5  ;;  %v2402_v46 = vunpack.c.h.bf16 %v2525_v29  ;;  %v2528_v29 = vld [vmem:[%s3146_s11 + $0x170] sm:$0xff]  }
  0x44   : > { %2706 = vmatmul.mubr.msk.bf16.gmra.mrb[16].mxu1 %vm1041_vm1, %v975_v39  ;;  %v890_v47 = vmax.f32 %v762_v40, 0.0  ;;  %v700_v48 = vadd.f32 %v3162_v16, %v565_v41  ;;  %v629_v49 = vmul.f32 %v2401_v42, %v3151_v5  ;;  %v2277_v50 = vunpack.c.l.bf16 %v2494_v38 }
  0x45   : > { %v944_v52 = vpack.c.bf16 %v827_v43, %v826_v35  ;;  %v891_v53 = vmax.f32 %v763_v44, 0.0  ;;  %v701_v54 = vadd.f32 %v3162_v16, %v566_v45  ;;  %v630_v55 = vmul.f32 %v2402_v46, %v3151_v5 }
  0x46   : > { %v828_v56 = vmax.f32 %v700_v48, 0.0  ;;  %v764_v57 = vadd.f32 %v3162_v16, %v629_v49  ;;  %v2278_v58 = vunpack.c.h.bf16 %v2494_v38  ;;  %v567_v59 = vmul.f32 %v2277_v50, %v3151_v5  ;;  %v2497_v38 = vld [vmem:[%s3146_s11 + $0x78] sm:$0xff]  }
  0x47   : > { %2645 = vmatprep.mubr.msk.bf16.mxu0 %vm1041_vm1, %v944_v52  ;;  %v976_v61 = vpack.c.bf16 %v891_v53, %v890_v47  ;;  %v829_v62 = vmax.f32 %v701_v54, 0.0  ;;  %v765_v63 = vadd.f32 %v3162_v16, %v630_v55  ;;  %v2405_v0 = vunpack.c.l.bf16 %v2526_v51  ;;  %v2529_v47 = vld [vmem:[%s3146_s11 + $0x178] sm:$0xff]  }
  0x48   : > { %v892_v1 = vmax.f32 %v764_v57, 0.0  ;;  %v568_v2 = vmul.f32 %v2278_v58, %v3151_v5  ;;  %v702_v3 = vadd.f32 %v3162_v16, %v567_v59  ;;  %v2406_v4 = vunpack.c.h.bf16 %v2526_v51 }
  0x49   : > { %2709 = vmatprep.mubr.msk.bf16.mxu1 %vm1041_vm1, %v976_v61  ;;  %v945_v7 = vpack.c.bf16 %v829_v62, %v828_v56  ;;  %v893_v8 = vmax.f32 %v765_v63, 0.0  ;;  %v631_v9 = vmul.f32 %v2405_v0, %v3151_v5  ;;  %v2281_v10 = vunpack.c.l.bf16 %v2495_v60  ;;  %v2498_v56 = vld [vmem:[%s3146_s11 + $0x80] sm:$0xff]  }
  0x4a   : > { %v703_v11 = vadd.f32 %v3162_v16, %v568_v2  ;;  %v830_v12 = vmax.f32 %v702_v3, 0.0  ;;  %v632_v13 = vmul.f32 %v2406_v4, %v3151_v5  ;;  %v2282_v14 = vunpack.c.h.bf16 %v2495_v60 }
  0x4b   : > { %2646 = vmatmul.mubr.msk.bf16.gmra.mrb[20].mxu0 %vm1041_vm1, %v945_v7  ;;  %v977_v17 = vpack.c.bf16 %v893_v8, %v892_v1  ;;  %v766_v18 = vadd.f32 %v3162_v16, %v631_v9  ;;  %v569_v19 = vmul.f32 %v2281_v10, %v3151_v5  ;;  %v2409_v20 = vunpack.c.l.bf16 %v2527_v6 }
  0x4c   : > { %v831_v21 = vmax.f32 %v703_v11, 0.0  ;;  %v767_v22 = vadd.f32 %v3162_v16, %v632_v13  ;;  %v570_v23 = vmul.f32 %v2282_v14, %v3151_v5  ;;  %v2410_v24 = vunpack.c.h.bf16 %v2527_v6  ;;  %v2530_v6 = vld [vmem:[%s3146_s11 + $0x180] sm:$0xff]  }
  0x4d   : > { %2710 = vmatmul.mubr.msk.bf16.gmra.mrb[20].mxu1 %vm1041_vm1, %v977_v17  ;;  %v894_v25 = vmax.f32 %v766_v18, 0.0  ;;  %v704_v26 = vadd.f32 %v3162_v16, %v569_v19  ;;  %v633_v27 = vmul.f32 %v2409_v20, %v3151_v5  ;;  %v2285_v28 = vunpack.c.l.bf16 %v2496_v15 }
  0x4e   : > { %v946_v30 = vpack.c.bf16 %v831_v21, %v830_v12  ;;  %v895_v31 = vmax.f32 %v767_v22, 0.0  ;;  %v705_v32 = vadd.f32 %v3162_v16, %v570_v23  ;;  %v634_v33 = vmul.f32 %v2410_v24, %v3151_v5 }
  0x4f   : > { %v832_v34 = vmax.f32 %v704_v26, 0.0  ;;  %v768_v35 = vadd.f32 %v3162_v16, %v633_v27  ;;  %v2286_v36 = vunpack.c.h.bf16 %v2496_v15  ;;  %v571_v37 = vmul.f32 %v2285_v28, %v3151_v5  ;;  %v2499_v15 = vld [vmem:[%s3146_s11 + $0x88] sm:$0xff]  }
  0x50   : > { %2649 = vmatprep.mubr.msk.bf16.mxu0 %vm1041_vm1, %v946_v30  ;;  %v978_v39 = vpack.c.bf16 %v895_v31, %v894_v25  ;;  %v833_v40 = vmax.f32 %v705_v32, 0.0  ;;  %v769_v41 = vadd.f32 %v3162_v16, %v634_v33  ;;  %v2413_v42 = vunpack.c.l.bf16 %v2528_v29  ;;  %v2531_v25 = vld [vmem:[%s3146_s11 + $0x188] sm:$0xff]  }
  0x51   : > { %v896_v43 = vmax.f32 %v768_v35, 0.0  ;;  %v572_v44 = vmul.f32 %v2286_v36, %v3151_v5  ;;  %v706_v45 = vadd.f32 %v3162_v16, %v571_v37  ;;  %v2414_v46 = vunpack.c.h.bf16 %v2528_v29 }
  0x52   : > { %2713 = vmatprep.mubr.msk.bf16.mxu1 %vm1041_vm1, %v978_v39  ;;  %v947_v48 = vpack.c.bf16 %v833_v40, %v832_v34  ;;  %v897_v49 = vmax.f32 %v769_v41, 0.0  ;;  %v635_v50 = vmul.f32 %v2413_v42, %v3151_v5  ;;  %v2289_v51 = vunpack.c.l.bf16 %v2497_v38  ;;  %v2500_v34 = vld [vmem:[%s3146_s11 + $0x90] sm:$0xff]  }
  0x53   : > { %v707_v52 = vadd.f32 %v3162_v16, %v572_v44  ;;  %v834_v53 = vmax.f32 %v706_v45, 0.0  ;;  %v636_v54 = vmul.f32 %v2414_v46, %v3151_v5  ;;  %v2290_v55 = vunpack.c.h.bf16 %v2497_v38 }
  0x54   : > { %2650 = vmatmul.mubr.msk.bf16.gmra.mrb[24].mxu0 %vm1041_vm1, %v947_v48  ;;  %v979_v57 = vpack.c.bf16 %v897_v49, %v896_v43  ;;  %v770_v58 = vadd.f32 %v3162_v16, %v635_v50  ;;  %v573_v59 = vmul.f32 %v2289_v51, %v3151_v5  ;;  %v2417_v60 = vunpack.c.l.bf16 %v2529_v47 }
  0x55   : > { %v835_v61 = vmax.f32 %v707_v52, 0.0  ;;  %v771_v62 = vadd.f32 %v3162_v16, %v636_v54  ;;  %v574_v63 = vmul.f32 %v2290_v55, %v3151_v5  ;;  %v2418_v0 = vunpack.c.h.bf16 %v2529_v47  ;;  %v2532_v47 = vld [vmem:[%s3146_s11 + $0x190] sm:$0xff]  }
  0x56   : > { %2714 = vmatmul.mubr.msk.bf16.gmra.mrb[24].mxu1 %vm1041_vm1, %v979_v57  ;;  %v898_v1 = vmax.f32 %v770_v58, 0.0  ;;  %v708_v2 = vadd.f32 %v3162_v16, %v573_v59  ;;  %v637_v3 = vmul.f32 %v2417_v60, %v3151_v5  ;;  %v2293_v4 = vunpack.c.l.bf16 %v2498_v56 }
  0x57   : > { %v948_v7 = vpack.c.bf16 %v835_v61, %v834_v53  ;;  %v899_v8 = vmax.f32 %v771_v62, 0.0  ;;  %v709_v9 = vadd.f32 %v3162_v16, %v574_v63  ;;  %v638_v10 = vmul.f32 %v2418_v0, %v3151_v5 }
  0x58   : > { %v836_v11 = vmax.f32 %v708_v2, 0.0  ;;  %v772_v12 = vadd.f32 %v3162_v16, %v637_v3  ;;  %v2294_v13 = vunpack.c.h.bf16 %v2498_v56  ;;  %v575_v14 = vmul.f32 %v2293_v4, %v3151_v5  ;;  %v2501_v56 = vld [vmem:[%s3146_s11 + $0x98] sm:$0xff]  }
  0x59   : > { %2653 = vmatprep.mubr.msk.bf16.mxu0 %vm1041_vm1, %v948_v7  ;;  %v980_v17 = vpack.c.bf16 %v899_v8, %v898_v1  ;;  %v837_v18 = vmax.f32 %v709_v9, 0.0  ;;  %v773_v19 = vadd.f32 %v3162_v16, %v638_v10  ;;  %v2421_v20 = vunpack.c.l.bf16 %v2530_v6  ;;  %v2533_v1 = vld [vmem:[%s3146_s11 + $0x198] sm:$0xff]  }
  0x5a   : > { %v900_v21 = vmax.f32 %v772_v12, 0.0  ;;  %v576_v22 = vmul.f32 %v2294_v13, %v3151_v5  ;;  %v710_v23 = vadd.f32 %v3162_v16, %v575_v14  ;;  %v2422_v24 = vunpack.c.h.bf16 %v2530_v6 }
  0x5b   : > { %2717 = vmatprep.mubr.msk.bf16.mxu1 %vm1041_vm1, %v980_v17  ;;  %v949_v26 = vpack.c.bf16 %v837_v18, %v836_v11  ;;  %v901_v27 = vmax.f32 %v773_v19, 0.0  ;;  %v639_v28 = vmul.f32 %v2421_v20, %v3151_v5  ;;  %v2297_v29 = vunpack.c.l.bf16 %v2499_v15  ;;  %v2502_v11 = vld [vmem:[%s3146_s11 + $0xa0] sm:$0xff]  }
  0x5c   : > { %v711_v30 = vadd.f32 %v3162_v16, %v576_v22  ;;  %v838_v31 = vmax.f32 %v710_v23, 0.0  ;;  %v640_v32 = vmul.f32 %v2422_v24, %v3151_v5  ;;  %v2298_v33 = vunpack.c.h.bf16 %v2499_v15 }
  0x5d   : > { %2654 = vmatmul.mubr.msk.bf16.gmra.mrb[28].mxu0 %vm1041_vm1, %v949_v26  ;;  %v981_v35 = vpack.c.bf16 %v901_v27, %v900_v21  ;;  %v774_v36 = vadd.f32 %v3162_v16, %v639_v28  ;;  %v577_v37 = vmul.f32 %v2297_v29, %v3151_v5  ;;  %v2425_v38 = vunpack.c.l.bf16 %v2531_v25 }
  0x5e   : > { %v839_v39 = vmax.f32 %v711_v30, 0.0  ;;  %v775_v40 = vadd.f32 %v3162_v16, %v640_v32  ;;  %v578_v41 = vmul.f32 %v2298_v33, %v3151_v5  ;;  %v2426_v42 = vunpack.c.h.bf16 %v2531_v25  ;;  %v2534_v25 = vld [vmem:[%s3146_s11 + $0x1a0] sm:$0xff]  }
  0x5f   : > { %2718 = vmatmul.mubr.msk.bf16.gmra.mrb[28].mxu1 %vm1041_vm1, %v981_v35  ;;  %v902_v43 = vmax.f32 %v774_v36, 0.0  ;;  %v712_v44 = vadd.f32 %v3162_v16, %v577_v37  ;;  %v641_v45 = vmul.f32 %v2425_v38, %v3151_v5  ;;  %v2301_v46 = vunpack.c.l.bf16 %v2500_v34 }
  0x60   : > { %v950_v48 = vpack.c.bf16 %v839_v39, %v838_v31  ;;  %v903_v49 = vmax.f32 %v775_v40, 0.0  ;;  %v713_v50 = vadd.f32 %v3162_v16, %v578_v41  ;;  %v642_v51 = vmul.f32 %v2426_v42, %v3151_v5 }
  0x61   : > { %v840_v52 = vmax.f32 %v712_v44, 0.0  ;;  %v776_v53 = vadd.f32 %v3162_v16, %v641_v45  ;;  %v2302_v54 = vunpack.c.h.bf16 %v2500_v34  ;;  %v579_v55 = vmul.f32 %v2301_v46, %v3151_v5  ;;  %v2503_v34 = vld [vmem:[%s3146_s11 + $0xa8] sm:$0xff]  }
  0x62   : > { %2657 = vmatprep.mubr.msk.bf16.mxu0 %vm1041_vm1, %v950_v48  ;;  %v982_v57 = vpack.c.bf16 %v903_v49, %v902_v43  ;;  %v841_v58 = vmax.f32 %v713_v50, 0.0  ;;  %v777_v59 = vadd.f32 %v3162_v16, %v642_v51  ;;  %v2429_v60 = vunpack.c.l.bf16 %v2532_v47  ;;  %v2535_v43 = vld [vmem:[%s3146_s11 + $0x1a8] sm:$0xff]  }
  0x63   : > { %v904_v61 = vmax.f32 %v776_v53, 0.0  ;;  %v580_v62 = vmul.f32 %v2302_v54, %v3151_v5  ;;  %v714_v63 = vadd.f32 %v3162_v16, %v579_v55  ;;  %v2430_v0 = vunpack.c.h.bf16 %v2532_v47 }
  0x64   : > { %2721 = vmatprep.mubr.msk.bf16.mxu1 %vm1041_vm1, %v982_v57  ;;  %v951_v2 = vpack.c.bf16 %v841_v58, %v840_v52  ;;  %v905_v3 = vmax.f32 %v777_v59, 0.0  ;;  %v643_v4 = vmul.f32 %v2429_v60, %v3151_v5  ;;  %v2305_v6 = vunpack.c.l.bf16 %v2501_v56  ;;  %v2504_v52 = vld [vmem:[%s3146_s11 + $0xb0] sm:$0xff]  }
  0x65   : > { %v715_v7 = vadd.f32 %v3162_v16, %v580_v62  ;;  %v842_v8 = vmax.f32 %v714_v63, 0.0  ;;  %v644_v9 = vmul.f32 %v2430_v0, %v3151_v5  ;;  %v2306_v10 = vunpack.c.h.bf16 %v2501_v56 }
  0x66   : > { %2658 = vmatmul.mubr.msk.bf16.gmra.mrb[32].mxu0 %vm1041_vm1, %v951_v2  ;;  %v983_v12 = vpack.c.bf16 %v905_v3, %v904_v61  ;;  %v778_v13 = vadd.f32 %v3162_v16, %v643_v4  ;;  %v581_v14 = vmul.f32 %v2305_v6, %v3151_v5  ;;  %v2433_v15 = vunpack.c.l.bf16 %v2533_v1 }
  0x67   : > { %v843_v17 = vmax.f32 %v715_v7, 0.0  ;;  %v779_v18 = vadd.f32 %v3162_v16, %v644_v9  ;;  %v582_v19 = vmul.f32 %v2306_v10, %v3151_v5  ;;  %v2434_v20 = vunpack.c.h.bf16 %v2533_v1  ;;  %v2536_v1 = vld [vmem:[%s3146_s11 + $0x1b0] sm:$0xff]  }
  0x68   : > { %2722 = vmatmul.mubr.msk.bf16.gmra.mrb[32].mxu1 %vm1041_vm1, %v983_v12  ;;  %v906_v21 = vmax.f32 %v778_v13, 0.0  ;;  %v716_v22 = vadd.f32 %v3162_v16, %v581_v14  ;;  %v645_v23 = vmul.f32 %v2433_v15, %v3151_v5  ;;  %v2309_v24 = vunpack.c.l.bf16 %v2502_v11 }
  0x69   : > { %v952_v26 = vpack.c.bf16 %v843_v17, %v842_v8  ;;  %v907_v27 = vmax.f32 %v779_v18, 0.0  ;;  %v717_v28 = vadd.f32 %v3162_v16, %v582_v19  ;;  %v646_v29 = vmul.f32 %v2434_v20, %v3151_v5 }
  0x6a   : > { %v844_v30 = vmax.f32 %v716_v22, 0.0  ;;  %v780_v31 = vadd.f32 %v3162_v16, %v645_v23  ;;  %v2310_v32 = vunpack.c.h.bf16 %v2502_v11  ;;  %v583_v33 = vmul.f32 %v2309_v24, %v3151_v5  ;;  %v2505_v11 = vld [vmem:[%s3146_s11 + $0xb8] sm:$0xff]  }
  0x6b   : > { %2661 = vmatprep.mubr.msk.bf16.mxu0 %vm1041_vm1, %v952_v26  ;;  %v984_v35 = vpack.c.bf16 %v907_v27, %v906_v21  ;;  %v845_v36 = vmax.f32 %v717_v28, 0.0  ;;  %v781_v37 = vadd.f32 %v3162_v16, %v646_v29  ;;  %v2437_v38 = vunpack.c.l.bf16 %v2534_v25  ;;  %v2537_v21 = vld [vmem:[%s3146_s11 + $0x1b8] sm:$0xff]   ;;  %v3435_v28 = vld [vmem:[%s3965_s1] ss:$0 sm:$0xff] }
  0x6c   : > { %v908_v39 = vmax.f32 %v780_v31, 0.0  ;;  %v584_v40 = vmul.f32 %v2310_v32, %v3151_v5  ;;  %v718_v41 = vadd.f32 %v3162_v16, %v583_v33  ;;  %v2438_v42 = vunpack.c.h.bf16 %v2534_v25  ;;  %v2506_v31 = vld [vmem:[%s3146_s11 + $0xc0] sm:$0xff]  }
  0x6d   : > { %2725 = vmatprep.mubr.msk.bf16.mxu1 %vm1041_vm1, %v984_v35  ;;  %v953_v44 = vpack.c.bf16 %v845_v36, %v844_v30  ;;  %v909_v45 = vmax.f32 %v781_v37, 0.0  ;;  %v647_v46 = vmul.f32 %v2437_v38, %v3151_v5  ;;  %v2313_v47 = vunpack.c.l.bf16 %v2503_v34 }
  0x6e   : > { %v719_v48 = vadd.f32 %v3162_v16, %v584_v40  ;;  %v846_v49 = vmax.f32 %v718_v41, 0.0  ;;  %v648_v50 = vmul.f32 %v2438_v42, %v3151_v5  ;;  %v2314_v51 = vunpack.c.h.bf16 %v2503_v34  ;;  %v3448_v40 = vld [vmem:[%s3966_s2] ss:$0 sm:$0xff] }
  0x6f   : > { %2662 = vmatmul.mubr.msk.bf16.gmra.mrb[36].mxu0 %vm1041_vm1, %v953_v44  ;;  %v985_v53 = vpack.c.bf16 %v909_v45, %v908_v39  ;;  %v782_v54 = vadd.f32 %v3162_v16, %v647_v46  ;;  %v585_v55 = vmul.f32 %v2313_v47, %v3151_v5  ;;  %v2441_v56 = vunpack.c.l.bf16 %v2535_v43  ;;  %v2538_v44 = vld [vmem:[%s3146_s11 + $0x1c0] sm:$0xff]  }
  0x70   : > { %v847_v57 = vmax.f32 %v719_v48, 0.0  ;;  %v783_v58 = vadd.f32 %v3162_v16, %v648_v50  ;;  %v586_v59 = vmul.f32 %v2314_v51, %v3151_v5  ;;  %v2442_v60 = vunpack.c.h.bf16 %v2535_v43 }
  0x71   : > { %2726 = vmatmul.mubr.msk.bf16.gmra.mrb[36].mxu1 %vm1041_vm1, %v985_v53  ;;  %v910_v61 = vmax.f32 %v782_v54, 0.0  ;;  %v720_v62 = vadd.f32 %v3162_v16, %v585_v55  ;;  %v649_v63 = vmul.f32 %v2441_v56, %v3151_v5  ;;  %v2317_v0 = vunpack.c.l.bf16 %v2504_v52 }
  0x72   : > { %v954_v2 = vpack.c.bf16 %v847_v57, %v846_v49  ;;  %v911_v3 = vmax.f32 %v783_v58, 0.0  ;;  %v721_v4 = vadd.f32 %v3162_v16, %v586_v59  ;;  %v650_v6 = vmul.f32 %v2442_v60, %v3151_v5 }
  0x73   : > { %v848_v7 = vmax.f32 %v720_v62, 0.0  ;;  %v784_v8 = vadd.f32 %v3162_v16, %v649_v63  ;;  %v2318_v9 = vunpack.c.h.bf16 %v2504_v52  ;;  %v587_v10 = vmul.f32 %v2317_v0, %v3151_v5  ;;  %v2507_v52 = vld [vmem:[%s3146_s11 + $0xc8] sm:$0xff]  }
  0x74   : > { %2665 = vmatprep.mubr.msk.bf16.mxu0 %vm1041_vm1, %v954_v2  ;;  %v986_v12 = vpack.c.bf16 %v911_v3, %v910_v61  ;;  %v849_v13 = vmax.f32 %v721_v4, 0.0  ;;  %v785_v14 = vadd.f32 %v3162_v16, %v650_v6  ;;  %v2445_v15 = vunpack.c.l.bf16 %v2536_v1  ;;  %v2539_v61 = vld [vmem:[%s3146_s11 + $0x1c8] sm:$0xff]  }
  0x75   : > { %v912_v17 = vmax.f32 %v784_v8, 0.0  ;;  %v588_v18 = vmul.f32 %v2318_v9, %v3151_v5  ;;  %v722_v19 = vadd.f32 %v3162_v16, %v587_v10  ;;  %v2446_v20 = vunpack.c.h.bf16 %v2536_v1 }
  0x76   : > { %2729 = vmatprep.mubr.msk.bf16.mxu1 %vm1041_vm1, %v986_v12  ;;  %v955_v22 = vpack.c.bf16 %v849_v13, %v848_v7  ;;  %v913_v23 = vmax.f32 %v785_v14, 0.0  ;;  %v651_v24 = vmul.f32 %v2445_v15, %v3151_v5  ;;  %v2321_v25 = vunpack.c.l.bf16 %v2505_v11  ;;  %v2508_v7 = vld [vmem:[%s3146_s11 + $0xd0] sm:$0xff]  }
  0x77   : > { %v723_v26 = vadd.f32 %v3162_v16, %v588_v18  ;;  %v850_v27 = vmax.f32 %v722_v19, 0.0  ;;  %v652_v29 = vmul.f32 %v3435_v28, %v2446_v20  ;;  %v2322_v30 = vunpack.c.h.bf16 %v2505_v11 }
  0x78   : > { %2666 = vmatmul.mubr.msk.bf16.gmra.mrb[40].mxu0 %vm1041_vm1, %v955_v22  ;;  %v987_v32 = vpack.c.bf16 %v913_v23, %v912_v17  ;;  %v786_v33 = vadd.f32 %v3162_v16, %v651_v24  ;;  %v589_v5 = vmul.f32 %v3435_v28, %v2321_v25  ;;  %v2449_v34 = vunpack.c.l.bf16 %v2537_v21 }
  0x79   : > { %v851_v35 = vmax.f32 %v723_v26, 0.0  ;;  %v787_v36 = vadd.f32 %v3162_v16, %v652_v29  ;;  %v590_v37 = vmul.f32 %v3435_v28, %v2322_v30  ;;  %v2450_v38 = vunpack.c.h.bf16 %v2537_v21  ;;  %v2540_v21 = vld [vmem:[%s3146_s11 + $0x1d0] sm:$0xff]  }
  0x7a   : > { %2730 = vmatmul.mubr.msk.bf16.gmra.mrb[40].mxu1 %vm1041_vm1, %v987_v32  ;;  %v914_v39 = vmax.f32 %v786_v33, 0.0  ;;  %v724_v41 = vadd.f32 %v3448_v40, %v589_v5  ;;  %v653_v42 = vmul.f32 %v3435_v28, %v2449_v34  ;;  %v2325_v43 = vunpack.c.l.bf16 %v2506_v31 }
  0x7b   : > { %v956_v45 = vpack.c.bf16 %v851_v35, %v850_v27  ;;  %v915_v16 = vmax.f32 %v787_v36, 0.0  ;;  %v725_v46 = vadd.f32 %v3448_v40, %v590_v37  ;;  %v654_v47 = vmul.f32 %v3435_v28, %v2450_v38 }
  0x7c   : > { %v852_v48 = vmax.f32 %v724_v41, 0.0  ;;  %v788_v49 = vadd.f32 %v3448_v40, %v653_v42  ;;  %v2326_v50 = vunpack.c.h.bf16 %v2506_v31  ;;  %v591_v51 = vmul.f32 %v3435_v28, %v2325_v43  ;;  %v2509_v31 = vld [vmem:[%s3146_s11 + $0xd8] sm:$0xff]  }
  0x7d   : > { %2669 = vmatprep.mubr.msk.bf16.mxu0 %vm1041_vm1, %v956_v45  ;;  %v988_v53 = vpack.c.bf16 %v915_v16, %v914_v39  ;;  %v853_v54 = vmax.f32 %v725_v46, 0.0  ;;  %v789_v55 = vadd.f32 %v3448_v40, %v654_v47  ;;  %v2453_v56 = vunpack.c.l.bf16 %v2538_v44  ;;  %v2541_v39 = vld [vmem:[%s3146_s11 + $0x1d8] sm:$0xff]  }
  0x7e   : > { %v916_v57 = vmax.f32 %v788_v49, 0.0  ;;  %v592_v58 = vmul.f32 %v3435_v28, %v2326_v50  ;;  %v726_v59 = vadd.f32 %v3448_v40, %v591_v51  ;;  %v2454_v60 = vunpack.c.h.bf16 %v2538_v44 }
  0x7f   : > { %2733 = vmatprep.mubr.msk.bf16.mxu1 %vm1041_vm1, %v988_v53  ;;  %v957_v62 = vpack.c.bf16 %v853_v54, %v852_v48  ;;  %v917_v63 = vmax.f32 %v789_v55, 0.0  ;;  %v655_v0 = vmul.f32 %v3435_v28, %v2453_v56  ;;  %v2329_v1 = vunpack.c.l.bf16 %v2507_v52  ;;  %v2510_v48 = vld [vmem:[%s3146_s11 + $0xe0] sm:$0xff]  }
  0x80   : > { %v727_v2 = vadd.f32 %v3448_v40, %v592_v58  ;;  %v854_v3 = vmax.f32 %v726_v59, 0.0  ;;  %v656_v4 = vmul.f32 %v3435_v28, %v2454_v60  ;;  %v2330_v6 = vunpack.c.h.bf16 %v2507_v52 }
  0x81   : > { %2670 = vmatmul.mubr.msk.bf16.gmra.mrb[44].mxu0 %vm1041_vm1, %v957_v62  ;;  %v989_v8 = vpack.c.bf16 %v917_v63, %v916_v57  ;;  %v790_v9 = vadd.f32 %v3448_v40, %v655_v0  ;;  %v593_v10 = vmul.f32 %v3435_v28, %v2329_v1  ;;  %v2457_v11 = vunpack.c.l.bf16 %v2539_v61 }
  0x82   : > { %v855_v12 = vmax.f32 %v727_v2, 0.0  ;;  %v791_v13 = vadd.f32 %v3448_v40, %v656_v4  ;;  %v594_v14 = vmul.f32 %v3435_v28, %v2330_v6  ;;  %v2458_v15 = vunpack.c.h.bf16 %v2539_v61  ;;  %v2542_v61 = vld [vmem:[%s3146_s11 + $0x1e0] sm:$0xff]  }
  0x83   : > { %2734 = vmatmul.mubr.msk.bf16.gmra.mrb[44].mxu1 %vm1041_vm1, %v989_v8  ;;  %v918_v17 = vmax.f32 %v790_v9, 0.0  ;;  %v728_v18 = vadd.f32 %v3448_v40, %v593_v10  ;;  %v657_v19 = vmul.f32 %v3435_v28, %v2457_v11  ;;  %v2333_v20 = vunpack.c.l.bf16 %v2508_v7 }
  0x84   : > { %v958_v22 = vpack.c.bf16 %v855_v12, %v854_v3  ;;  %v919_v23 = vmax.f32 %v791_v13, 0.0  ;;  %v729_v24 = vadd.f32 %v3448_v40, %v594_v14  ;;  %v658_v25 = vmul.f32 %v3435_v28, %v2458_v15 }
  0x85   : > { %v856_v26 = vmax.f32 %v728_v18, 0.0  ;;  %v792_v27 = vadd.f32 %v3448_v40, %v657_v19  ;;  %v2334_v29 = vunpack.c.h.bf16 %v2508_v7  ;;  %v595_v30 = vmul.f32 %v3435_v28, %v2333_v20  ;;  %v2511_v7 = vld [vmem:[%s3146_s11 + $0xe8] sm:$0xff]  }
  0x86   : > { %2673 = vmatprep.mubr.msk.bf16.mxu0 %vm1041_vm1, %v958_v22  ;;  %v990_v32 = vpack.c.bf16 %v919_v23, %v918_v17  ;;  %v857_v33 = vmax.f32 %v729_v24, 0.0  ;;  %v793_v5 = vadd.f32 %v3448_v40, %v658_v25  ;;  %v2461_v34 = vunpack.c.l.bf16 %v2540_v21  ;;  %v2543_v17 = vld [vmem:[%s3146_s11 + $0x1e8] sm:$0xff]  }
  0x87   : > { %v920_v35 = vmax.f32 %v792_v27, 0.0  ;;  %v596_v36 = vmul.f32 %v3435_v28, %v2334_v29  ;;  %v730_v37 = vadd.f32 %v3448_v40, %v595_v30  ;;  %v2462_v38 = vunpack.c.h.bf16 %v2540_v21 }
  0x88   : > { %2737 = vmatprep.mubr.msk.bf16.mxu1 %vm1041_vm1, %v990_v32  ;;  %v959_v41 = vpack.c.bf16 %v857_v33, %v856_v26  ;;  %v921_v42 = vmax.f32 %v793_v5, 0.0  ;;  %v659_v43 = vmul.f32 %v3435_v28, %v2461_v34  ;;  %v2337_v44 = vunpack.c.l.bf16 %v2509_v31  ;;  %v2512_v26 = vld [vmem:[%s3146_s11 + $0xf0] sm:$0xff]  }
  0x89   : > { %v731_v45 = vadd.f32 %v3448_v40, %v596_v36  ;;  %v858_v16 = vmax.f32 %v730_v37, 0.0  ;;  %v660_v46 = vmul.f32 %v3435_v28, %v2462_v38  ;;  %v2338_v47 = vunpack.c.h.bf16 %v2509_v31 }
  0x8a   : > { %2674 = vmatmul.mubr.msk.bf16.gmra.mrb[48].mxu0 %vm1041_vm1, %v959_v41  ;;  %v991_v49 = vpack.c.bf16 %v921_v42, %v920_v35  ;;  %v794_v50 = vadd.f32 %v3448_v40, %v659_v43  ;;  %v597_v51 = vmul.f32 %v3435_v28, %v2337_v44  ;;  %v2465_v52 = vunpack.c.l.bf16 %v2541_v39 }
  0x8b   : > { %v859_v53 = vmax.f32 %v731_v45, 0.0  ;;  %v795_v54 = vadd.f32 %v3448_v40, %v660_v46  ;;  %v598_v55 = vmul.f32 %v3435_v28, %v2338_v47  ;;  %v2466_v56 = vunpack.c.h.bf16 %v2541_v39  ;;  %v2544_v39 = vld [vmem:[%s3146_s11 + $0x1f0] sm:$0xff]  }
  0x8c   : > { %2738 = vmatmul.mubr.msk.bf16.gmra.mrb[48].mxu1 %vm1041_vm1, %v991_v49  ;;  %v922_v57 = vmax.f32 %v794_v50, 0.0  ;;  %v732_v58 = vadd.f32 %v3448_v40, %v597_v51  ;;  %v661_v59 = vmul.f32 %v3435_v28, %v2465_v52  ;;  %v2341_v60 = vunpack.c.l.bf16 %v2510_v48 }
  0x8d   : > { %v960_v62 = vpack.c.bf16 %v859_v53, %v858_v16  ;;  %v923_v63 = vmax.f32 %v795_v54, 0.0  ;;  %v733_v0 = vadd.f32 %v3448_v40, %v598_v55  ;;  %v662_v1 = vmul.f32 %v3435_v28, %v2466_v56 }
  0x8e   : > { %v860_v2 = vmax.f32 %v732_v58, 0.0  ;;  %v796_v3 = vadd.f32 %v3448_v40, %v661_v59  ;;  %v2342_v4 = vunpack.c.h.bf16 %v2510_v48  ;;  %v599_v6 = vmul.f32 %v3435_v28, %v2341_v60  ;;  %v2513_v48 = vld [vmem:[%s3146_s11 + $0xf8] sm:$0xff]  }
  0x8f   : > { %2677 = vmatprep.mubr.msk.bf16.mxu0 %vm1041_vm1, %v960_v62  ;;  %v992_v8 = vpack.c.bf16 %v923_v63, %v922_v57  ;;  %v861_v9 = vmax.f32 %v733_v0, 0.0  ;;  %v797_v10 = vadd.f32 %v3448_v40, %v662_v1  ;;  %v2469_v11 = vunpack.c.l.bf16 %v2542_v61  ;;  %v2545_v57 = vld [vmem:[%s3146_s11 + $0x1f8] sm:$0xff]  }
  0x90   : > { %v924_v12 = vmax.f32 %v796_v3, 0.0  ;;  %v600_v13 = vmul.f32 %v3435_v28, %v2342_v4  ;;  %v734_v14 = vadd.f32 %v3448_v40, %v599_v6  ;;  %v2470_v15 = vunpack.c.h.bf16 %v2542_v61 }
  0x91   : > { %2741 = vmatprep.mubr.msk.bf16.mxu1 %vm1041_vm1, %v992_v8  ;;  %v961_v18 = vpack.c.bf16 %v861_v9, %v860_v2  ;;  %v925_v19 = vmax.f32 %v797_v10, 0.0  ;;  %v663_v20 = vmul.f32 %v3435_v28, %v2469_v11  ;;  %v2345_v21 = vunpack.c.l.bf16 %v2511_v7 }
  0x92   : > { %v735_v22 = vadd.f32 %v3448_v40, %v600_v13  ;;  %v862_v23 = vmax.f32 %v734_v14, 0.0  ;;  %v664_v24 = vmul.f32 %v3435_v28, %v2470_v15  ;;  %v2346_v25 = vunpack.c.h.bf16 %v2511_v7 }
  0x93   : > { %2678 = vmatmul.mubr.msk.bf16.gmra.mrb[52].mxu0 %vm1041_vm1, %v961_v18  ;;  %v993_v27 = vpack.c.bf16 %v925_v19, %v924_v12  ;;  %v798_v29 = vadd.f32 %v3448_v40, %v663_v20  ;;  %v601_v30 = vmul.f32 %v3435_v28, %v2345_v21  ;;  %v2473_v31 = vunpack.c.l.bf16 %v2543_v17 }
  0x94   : > { %v863_v32 = vmax.f32 %v735_v22, 0.0  ;;  %v799_v33 = vadd.f32 %v3448_v40, %v664_v24  ;;  %v602_v5 = vmul.f32 %v3435_v28, %v2346_v25  ;;  %v2474_v34 = vunpack.c.h.bf16 %v2543_v17 }
  0x95   : > { %2742 = vmatmul.mubr.msk.bf16.gmra.mrb[52].mxu1 %vm1041_vm1, %v993_v27  ;;  %v926_v35 = vmax.f32 %v798_v29, 0.0  ;;  %v736_v36 = vadd.f32 %v3448_v40, %v601_v30  ;;  %v665_v37 = vmul.f32 %v3435_v28, %v2473_v31  ;;  %v2349_v38 = vunpack.c.l.bf16 %v2512_v26 }
  0x96   : > { %v962_v41 = vpack.c.bf16 %v863_v32, %v862_v23  ;;  %v927_v42 = vmax.f32 %v799_v33, 0.0  ;;  %v737_v43 = vadd.f32 %v3448_v40, %v602_v5  ;;  %v666_v44 = vmul.f32 %v3435_v28, %v2474_v34 }
  0x97   : > { %v864_v45 = vmax.f32 %v736_v36, 0.0  ;;  %v800_v16 = vadd.f32 %v3448_v40, %v665_v37  ;;  %v2350_v46 = vunpack.c.h.bf16 %v2512_v26  ;;  %v603_v47 = vmul.f32 %v3435_v28, %v2349_v38 }
  0x98   : > { %2681 = vmatprep.mubr.msk.bf16.mxu0 %vm1041_vm1, %v962_v41  ;;  %v994_v49 = vpack.c.bf16 %v927_v42, %v926_v35  ;;  %v865_v50 = vmax.f32 %v737_v43, 0.0  ;;  %v801_v51 = vadd.f32 %v3448_v40, %v666_v44  ;;  %v2477_v52 = vunpack.c.l.bf16 %v2544_v39 }
  0x99   : > { %v928_v53 = vmax.f32 %v800_v16, 0.0  ;;  %v604_v54 = vmul.f32 %v3435_v28, %v2350_v46  ;;  %v738_v55 = vadd.f32 %v3448_v40, %v603_v47  ;;  %v2478_v56 = vunpack.c.h.bf16 %v2544_v39 }
  0x9a   : > { %2745 = vmatprep.mubr.msk.bf16.mxu1 %vm1041_vm1, %v994_v49  ;;  %v963_v58 = vpack.c.bf16 %v865_v50, %v864_v45  ;;  %v929_v59 = vmax.f32 %v801_v51, 0.0  ;;  %v667_v60 = vmul.f32 %v3435_v28, %v2477_v52  ;;  %v2353_v61 = vunpack.c.l.bf16 %v2513_v48 }
  0x9b   : > { %v739_v62 = vadd.f32 %v3448_v40, %v604_v54  ;;  %v866_v63 = vmax.f32 %v738_v55, 0.0  ;;  %v668_v0 = vmul.f32 %v3435_v28, %v2478_v56  ;;  %v2354_v1 = vunpack.c.h.bf16 %v2513_v48 }
  0x9c   : > { %2682 = vmatmul.mubr.msk.bf16.gmra.mrb[56].mxu0 %vm1041_vm1, %v963_v58  ;;  %v995_v2 = vpack.c.bf16 %v929_v59, %v928_v53  ;;  %v802_v3 = vadd.f32 %v3448_v40, %v667_v60  ;;  %v605_v4 = vmul.f32 %v3435_v28, %v2353_v61  ;;  %v2481_v6 = vunpack.c.l.bf16 %v2545_v57 }
  0x9d   : > { %v867_v7 = vmax.f32 %v739_v62, 0.0  ;;  %v803_v8 = vadd.f32 %v3448_v40, %v668_v0  ;;  %v606_v9 = vmul.f32 %v3435_v28, %v2354_v1  ;;  %v2482_v10 = vunpack.c.h.bf16 %v2545_v57 }
  0x9e   : > { %2746 = vmatmul.mubr.msk.bf16.gmra.mrb[56].mxu1 %vm1041_vm1, %v995_v2  ;;  %v930_v11 = vmax.f32 %v802_v3, 0.0  ;;  %v740_v12 = vadd.f32 %v3448_v40, %v605_v4  ;;  %v669_v13 = vmul.f32 %v3435_v28, %v2481_v6 }
  0x9f   : > { %v964_v14 = vpack.c.bf16 %v867_v7, %v866_v63  ;;  %v931_v15 = vmax.f32 %v803_v8, 0.0  ;;  %v741_v17 = vadd.f32 %v3448_v40, %v606_v9  ;;  %v670_v18 = vmul.f32 %v3435_v28, %v2482_v10  ;;  %v3558_v28 = vld [vmem:[%s3968_s4] ss:$0 sm:$0xff] }
  0xa0   : > { %v868_v19 = vmax.f32 %v740_v12, 0.0  ;;  %v804_v20 = vadd.f32 %v3448_v40, %v669_v13 }
  0xa1   : > { %2685 = vmatprep.mubr.msk.bf16.mxu0 %vm1041_vm1, %v964_v14  ;;  %v996_v21 = vpack.c.bf16 %v931_v15, %v930_v11  ;;  %v869_v22 = vmax.f32 %v741_v17, 0.0  ;;  %v805_v23 = vadd.f32 %v3448_v40, %v670_v18 }
  0xa2   : > { %v932_v24 = vmax.f32 %v804_v20, 0.0 }
  0xa3   : > { %2749 = vmatprep.mubr.msk.bf16.mxu1 %vm1041_vm1, %v996_v21  ;;  %v965_v25 = vpack.c.bf16 %v869_v22, %v868_v19  ;;  %v933_v26 = vmax.f32 %v805_v23, 0.0 }
  0xa5   : > { %2686 = vmatmul.mubr.msk.bf16.gmra.mrb[60].mxu0 %vm1041_vm1, %v965_v25  ;;  %v997_v27 = vpack.c.bf16 %v933_v26, %v932_v24 }
  0xa7   : > { %2750 = vmatmul.mubr.msk.bf16.gmra.mrb[60].mxu1 %vm1041_vm1, %v997_v27 }
  0xf0   : > { %v2627_v29 = vpop.f32.mrb[0].mxu0 }
  0xf1   : > { %v1281_v31 = vadd.f32 %v2627_v29, %v3558_v28  ;;  %v1272_v32 = vpop.f32.mrb[1].mxu0 }
  0xf2   : > { %v2691_v30 = vpop.f32.mrb[0].mxu1  ;;  %v1273_v5 = vadd.f32 %v3558_v28, %v1272_v32  ;;  %v2628_v35 = vpop.f32.mrb[2].mxu0 }
  0xf3   : > { %v1537_v40 = vadd.f32 %v2691_v30, %v3558_v28  ;;  %v1528_v33 = vpop.f32.mrb[1].mxu1  ;;  %2794 = vtanh.f32 %v1281_v31  ;;  %v1284_v37 = vadd.f32 %v2628_v35, %v3558_v28  ;;  %v1275_v38 = vpop.f32.mrb[3].mxu0 }
  0xf4   : > { %v1529_v34 = vadd.f32 %v3558_v28, %v1528_v33  ;;  %v2692_v36 = vpop.f32.mrb[2].mxu1  ;;  %v1276_v42 = vadd.f32 %v3558_v28, %v1275_v38 }
  0xf5   : > { %v1531_v39 = vpop.f32.mrb[3].mxu1  ;;  %2796 = vtanh.f32 %v1537_v40  ;;  %v1540_v41 = vadd.f32 %v2692_v36, %v3558_v28 }
  0xf6   : > { %2798 = vtanh.f32 %v1273_v5  ;;  %v1532_v43 = vadd.f32 %v3558_v28, %v1531_v39 }
  0xf7   : > { %2800 = vtanh.f32 %v1529_v34 }
  0xf8   : > { %2802 = vtanh.f32 %v1284_v37 }
  0xf9   : > { %2804 = vtanh.f32 %v1540_v41 }
  0xfa   : > { %v2631_v44 = vpop.f32.mrb[4].mxu0  ;;  %2806 = vtanh.f32 %v1276_v42 }
  0xfb   : > { %v1297_v45 = vadd.f32 %v2631_v44, %v3558_v28  ;;  %v1288_v16 = vpop.f32.mrb[5].mxu0  ;;  %2808 = vtanh.f32 %v1532_v43 }
  0xfc   : > { %v2695_v46 = vpop.f32.mrb[4].mxu1  ;;  %v1289_v47 = vadd.f32 %v3558_v28, %v1288_v16  ;;  %v2632_v48 = vpop.f32.mrb[6].mxu0 }
  0xfd   : > { %2810 = vtanh.f32 %v1297_v45  ;;  %v1553_v49 = vadd.f32 %v2695_v46, %v3558_v28  ;;  %v1544_v50 = vpop.f32.mrb[5].mxu1  ;;  %v1300_v51 = vadd.f32 %v2632_v48, %v3558_v28  ;;  %v1291_v52 = vpop.f32.mrb[7].mxu0 }
  0xfe   : > { %2812 = vtanh.f32 %v1289_v47  ;;  %v1545_v53 = vadd.f32 %v3558_v28, %v1544_v50  ;;  %v2696_v54 = vpop.f32.mrb[6].mxu1  ;;  %v2795_v55 = vpop.eup %2794  ;;  %v1292_v57 = vadd.f32 %v3558_v28, %v1291_v52 }
  0xff   : > { %2814 = vtanh.f32 %v1553_v49  ;;  %v1556_v56 = vadd.f32 %v2696_v54, %v3558_v28  ;;  %v1547_v58 = vpop.f32.mrb[7].mxu1  ;;  %v2797_v59 = vpop.eup %2796  ;;  %1914 = vst.msk [vmem:[%s3574_s29 + $0x10] sm:$0xff] %vm1911_vm2, %v2795_v55 }
 0x100   : > { %2816 = vtanh.f32 %v1545_v53  ;;  %v1548_v60 = vadd.f32 %v3558_v28, %v1547_v58  ;;  %v2799_v61 = vpop.eup %2798  ;;  %1978 = vst.msk [vmem:[%s3574_s29 + $0x210] sm:$0xff] %vm1911_vm2, %v2797_v59 }
 0x101   : > { %2818 = vtanh.f32 %v1300_v51  ;;  %v2801_v62 = vpop.eup %2800  ;;  %1912 = vst.msk [vmem:[%s3574_s29] sm:$0xff] %vm1911_vm2, %v2799_v61 }
 0x102   : > { %2820 = vtanh.f32 %v1556_v56  ;;  %v2803_v63 = vpop.eup %2802  ;;  %1976 = vst.msk [vmem:[%s3574_s29 + $0x200] sm:$0xff] %vm1911_vm2, %v2801_v62 }
 0x103   : > { %2822 = vtanh.f32 %v1292_v57  ;;  %v2635_v0 = vpop.f32.mrb[8].mxu0  ;;  %v2805_v1 = vpop.eup %2804  ;;  %1915 = vst.msk [vmem:[%s3574_s29 + $0x18] sm:$0xff] %vm1911_vm2, %v2803_v63 }
 0x104   : > { %2824 = vtanh.f32 %v1548_v60  ;;  %v1313_v2 = vadd.f32 %v2635_v0, %v3558_v28  ;;  %v1304_v3 = vpop.f32.mrb[9].mxu0  ;;  %v2807_v4 = vpop.eup %2806  ;;  %1979 = vst.msk [vmem:[%s3574_s29 + $0x218] sm:$0xff] %vm1911_vm2, %v2805_v1 }
 0x105   : > { %v2699_v6 = vpop.f32.mrb[8].mxu1  ;;  %v1305_v7 = vadd.f32 %v3558_v28, %v1304_v3  ;;  %v2636_v8 = vpop.f32.mrb[10].mxu0  ;;  %1913 = vst.msk [vmem:[%s3574_s29 + $0x8] sm:$0xff] %vm1911_vm2, %v2807_v4 }
 0x106   : > { %v2809_v9 = vpop.eup %2808  ;;  %2826 = vtanh.f32 %v1313_v2  ;;  %v1569_v10 = vadd.f32 %v2699_v6, %v3558_v28  ;;  %v1560_v11 = vpop.f32.mrb[9].mxu1  ;;  %v1316_v12 = vadd.f32 %v2636_v8, %v3558_v28 }
 0x107   : > { %v1307_v13 = vpop.f32.mrb[11].mxu0  ;;  %v2811_v14 = vpop.eup %2810  ;;  %1977 = vst.msk [vmem:[%s3574_s29 + $0x208] sm:$0xff] %vm1911_vm2, %v2809_v9  ;;  %2828 = vtanh.f32 %v1305_v7  ;;  %v1561_v15 = vadd.f32 %v3558_v28, %v1560_v11 }
 0x108   : > { %v2700_v17 = vpop.f32.mrb[10].mxu1  ;;  %v2813_v18 = vpop.eup %2812  ;;  %1918 = vst.msk [vmem:[%s3574_s29 + $0x30] sm:$0xff] %vm1911_vm2, %v2811_v14  ;;  %2830 = vtanh.f32 %v1569_v10  ;;  %v1308_v20 = vadd.f32 %v3558_v28, %v1307_v13 }
 0x109   : > { %v1572_v19 = vadd.f32 %v2700_v17, %v3558_v28  ;;  %v1563_v21 = vpop.f32.mrb[11].mxu1  ;;  %v2815_v22 = vpop.eup %2814  ;;  %1916 = vst.msk [vmem:[%s3574_s29 + $0x20] sm:$0xff] %vm1911_vm2, %v2813_v18  ;;  %2832 = vtanh.f32 %v1561_v15 }
 0x10a   : > { %v1564_v23 = vadd.f32 %v3558_v28, %v1563_v21  ;;  %v2817_v24 = vpop.eup %2816  ;;  %1982 = vst.msk [vmem:[%s3574_s29 + $0x230] sm:$0xff] %vm1911_vm2, %v2815_v22  ;;  %2834 = vtanh.f32 %v1316_v12 }
 0x10b   : > { %v2819_v25 = vpop.eup %2818  ;;  %1980 = vst.msk [vmem:[%s3574_s29 + $0x220] sm:$0xff] %vm1911_vm2, %v2817_v24  ;;  %2836 = vtanh.f32 %v1572_v19 }
 0x10c   : > { %v2821_v26 = vpop.eup %2820  ;;  %1919 = vst.msk [vmem:[%s3574_s29 + $0x38] sm:$0xff] %vm1911_vm2, %v2819_v25  ;;  %2838 = vtanh.f32 %v1308_v20  ;;  %v2639_v27 = vpop.f32.mrb[12].mxu0 }
 0x10d   : > { %v2823_v29 = vpop.eup %2822  ;;  %1983 = vst.msk [vmem:[%s3574_s29 + $0x238] sm:$0xff] %vm1911_vm2, %v2821_v26  ;;  %2840 = vtanh.f32 %v1564_v23  ;;  %v1329_v30 = vadd.f32 %v2639_v27, %v3558_v28  ;;  %v1320_v31 = vpop.f32.mrb[13].mxu0 }
 0x10e   : > { %v2825_v40 = vpop.eup %2824  ;;  %1917 = vst.msk [vmem:[%s3574_s29 + $0x28] sm:$0xff] %vm1911_vm2, %v2823_v29  ;;  %v2703_v32 = vpop.f32.mrb[12].mxu1  ;;  %v1321_v33 = vadd.f32 %v3558_v28, %v1320_v31 }
 0x10f   : > { %v2640_v5 = vpop.f32.mrb[14].mxu0  ;;  %1981 = vst.msk [vmem:[%s3574_s29 + $0x228] sm:$0xff] %vm1911_vm2, %v2825_v40  ;;  %2842 = vtanh.f32 %v1329_v30  ;;  %v1585_v34 = vadd.f32 %v2703_v32, %v3558_v28  ;;  %v1576_v35 = vpop.f32.mrb[13].mxu1 }
 0x110   : > { %v1332_v36 = vadd.f32 %v2640_v5, %v3558_v28  ;;  %v1323_v37 = vpop.f32.mrb[15].mxu0  ;;  %v2827_v38 = vpop.eup %2826  ;;  %2844 = vtanh.f32 %v1321_v33  ;;  %v1577_v39 = vadd.f32 %v3558_v28, %v1576_v35 }
 0x111   : > { %v2704_v41 = vpop.f32.mrb[14].mxu1  ;;  %v2829_v42 = vpop.eup %2828  ;;  %1922 = vst.msk [vmem:[%s3574_s29 + $0x50] sm:$0xff] %vm1911_vm2, %v2827_v38  ;;  %2846 = vtanh.f32 %v1585_v34  ;;  %v1324_v44 = vadd.f32 %v3558_v28, %v1323_v37 }
 0x112   : > { %v1588_v43 = vadd.f32 %v2704_v41, %v3558_v28  ;;  %v1579_v45 = vpop.f32.mrb[15].mxu1  ;;  %v2831_v16 = vpop.eup %2830  ;;  %1920 = vst.msk [vmem:[%s3574_s29 + $0x40] sm:$0xff] %vm1911_vm2, %v2829_v42  ;;  %2848 = vtanh.f32 %v1577_v39 }
 0x113   : > { %v1580_v46 = vadd.f32 %v3558_v28, %v1579_v45  ;;  %v2833_v47 = vpop.eup %2832  ;;  %1986 = vst.msk [vmem:[%s3574_s29 + $0x250] sm:$0xff] %vm1911_vm2, %v2831_v16  ;;  %2850 = vtanh.f32 %v1332_v36 }
 0x114   : > { %v2835_v48 = vpop.eup %2834  ;;  %1984 = vst.msk [vmem:[%s3574_s29 + $0x240] sm:$0xff] %vm1911_vm2, %v2833_v47  ;;  %2852 = vtanh.f32 %v1588_v43 }
 0x115   : > { %v2837_v49 = vpop.eup %2836  ;;  %1923 = vst.msk [vmem:[%s3574_s29 + $0x58] sm:$0xff] %vm1911_vm2, %v2835_v48  ;;  %2854 = vtanh.f32 %v1324_v44  ;;  %v2643_v50 = vpop.f32.mrb[16].mxu0 }
 0x116   : > { %v2839_v51 = vpop.eup %2838  ;;  %1987 = vst.msk [vmem:[%s3574_s29 + $0x258] sm:$0xff] %vm1911_vm2, %v2837_v49  ;;  %2856 = vtanh.f32 %v1580_v46  ;;  %v1345_v52 = vadd.f32 %v2643_v50, %v3558_v28  ;;  %v1336_v53 = vpop.f32.mrb[17].mxu0 }
 0x117   : > { %v2841_v54 = vpop.eup %2840  ;;  %1921 = vst.msk [vmem:[%s3574_s29 + $0x48] sm:$0xff] %vm1911_vm2, %v2839_v51  ;;  %v2707_v55 = vpop.f32.mrb[16].mxu1  ;;  %v1337_v56 = vadd.f32 %v3558_v28, %v1336_v53 }
 0x118   : > { %v2644_v57 = vpop.f32.mrb[18].mxu0  ;;  %1985 = vst.msk [vmem:[%s3574_s29 + $0x248] sm:$0xff] %vm1911_vm2, %v2841_v54  ;;  %2858 = vtanh.f32 %v1345_v52  ;;  %v1601_v58 = vadd.f32 %v2707_v55, %v3558_v28  ;;  %v1592_v59 = vpop.f32.mrb[17].mxu1 }
 0x119   : > { %v1348_v60 = vadd.f32 %v2644_v57, %v3558_v28  ;;  %v1339_v61 = vpop.f32.mrb[19].mxu0  ;;  %v2843_v62 = vpop.eup %2842  ;;  %2860 = vtanh.f32 %v1337_v56  ;;  %v1593_v63 = vadd.f32 %v3558_v28, %v1592_v59 }
 0x11a   : > { %v2708_v0 = vpop.f32.mrb[18].mxu1  ;;  %v2845_v1 = vpop.eup %2844  ;;  %1926 = vst.msk [vmem:[%s3574_s29 + $0x70] sm:$0xff] %vm1911_vm2, %v2843_v62  ;;  %2862 = vtanh.f32 %v1601_v58  ;;  %v1340_v3 = vadd.f32 %v3558_v28, %v1339_v61 }
 0x11b   : > { %v1604_v2 = vadd.f32 %v2708_v0, %v3558_v28  ;;  %v1595_v4 = vpop.f32.mrb[19].mxu1  ;;  %v2847_v6 = vpop.eup %2846  ;;  %1924 = vst.msk [vmem:[%s3574_s29 + $0x60] sm:$0xff] %vm1911_vm2, %v2845_v1  ;;  %2864 = vtanh.f32 %v1593_v63 }
 0x11c   : > { %v1596_v7 = vadd.f32 %v3558_v28, %v1595_v4  ;;  %v2849_v8 = vpop.eup %2848  ;;  %1990 = vst.msk [vmem:[%s3574_s29 + $0x270] sm:$0xff] %vm1911_vm2, %v2847_v6  ;;  %2866 = vtanh.f32 %v1348_v60 }
 0x11d   : > { %v2851_v9 = vpop.eup %2850  ;;  %1988 = vst.msk [vmem:[%s3574_s29 + $0x260] sm:$0xff] %vm1911_vm2, %v2849_v8  ;;  %2868 = vtanh.f32 %v1604_v2 }
 0x11e   : > { %v2853_v10 = vpop.eup %2852  ;;  %1927 = vst.msk [vmem:[%s3574_s29 + $0x78] sm:$0xff] %vm1911_vm2, %v2851_v9  ;;  %2870 = vtanh.f32 %v1340_v3  ;;  %v2647_v11 = vpop.f32.mrb[20].mxu0 }
 0x11f   : > { %v2855_v12 = vpop.eup %2854  ;;  %1991 = vst.msk [vmem:[%s3574_s29 + $0x278] sm:$0xff] %vm1911_vm2, %v2853_v10  ;;  %2872 = vtanh.f32 %v1596_v7  ;;  %v1361_v13 = vadd.f32 %v2647_v11, %v3558_v28  ;;  %v1352_v14 = vpop.f32.mrb[21].mxu0 }
 0x120   : > { %v2857_v15 = vpop.eup %2856  ;;  %1925 = vst.msk [vmem:[%s3574_s29 + $0x68] sm:$0xff] %vm1911_vm2, %v2855_v12  ;;  %v2711_v17 = vpop.f32.mrb[20].mxu1  ;;  %v1353_v18 = vadd.f32 %v3558_v28, %v1352_v14 }
 0x121   : > { %v2648_v19 = vpop.f32.mrb[22].mxu0  ;;  %1989 = vst.msk [vmem:[%s3574_s29 + $0x268] sm:$0xff] %vm1911_vm2, %v2857_v15  ;;  %2874 = vtanh.f32 %v1361_v13  ;;  %v1617_v20 = vadd.f32 %v2711_v17, %v3558_v28  ;;  %v1608_v21 = vpop.f32.mrb[21].mxu1 }
 0x122   : > { %v1364_v22 = vadd.f32 %v2648_v19, %v3558_v28  ;;  %v1355_v23 = vpop.f32.mrb[23].mxu0  ;;  %v2859_v24 = vpop.eup %2858  ;;  %2876 = vtanh.f32 %v1353_v18  ;;  %v1609_v25 = vadd.f32 %v3558_v28, %v1608_v21 }
 0x123   : > { %v2712_v26 = vpop.f32.mrb[22].mxu1  ;;  %v2861_v27 = vpop.eup %2860  ;;  %1930 = vst.msk [vmem:[%s3574_s29 + $0x90] sm:$0xff] %vm1911_vm2, %v2859_v24  ;;  %2878 = vtanh.f32 %v1617_v20  ;;  %v1356_v30 = vadd.f32 %v3558_v28, %v1355_v23 }
 0x124   : > { %v1620_v29 = vadd.f32 %v2712_v26, %v3558_v28  ;;  %v1611_v31 = vpop.f32.mrb[23].mxu1  ;;  %v2863_v40 = vpop.eup %2862  ;;  %1928 = vst.msk [vmem:[%s3574_s29 + $0x80] sm:$0xff] %vm1911_vm2, %v2861_v27  ;;  %2880 = vtanh.f32 %v1609_v25 }
 0x125   : > { %v1612_v32 = vadd.f32 %v3558_v28, %v1611_v31  ;;  %v2865_v33 = vpop.eup %2864  ;;  %1994 = vst.msk [vmem:[%s3574_s29 + $0x290] sm:$0xff] %vm1911_vm2, %v2863_v40  ;;  %2882 = vtanh.f32 %v1364_v22 }
 0x126   : > { %v2867_v5 = vpop.eup %2866  ;;  %1992 = vst.msk [vmem:[%s3574_s29 + $0x280] sm:$0xff] %vm1911_vm2, %v2865_v33  ;;  %2884 = vtanh.f32 %v1620_v29 }
 0x127   : > { %v2869_v34 = vpop.eup %2868  ;;  %1931 = vst.msk [vmem:[%s3574_s29 + $0x98] sm:$0xff] %vm1911_vm2, %v2867_v5  ;;  %2886 = vtanh.f32 %v1356_v30  ;;  %v2651_v35 = vpop.f32.mrb[24].mxu0 }
 0x128   : > { %v2871_v36 = vpop.eup %2870  ;;  %1995 = vst.msk [vmem:[%s3574_s29 + $0x298] sm:$0xff] %vm1911_vm2, %v2869_v34  ;;  %2888 = vtanh.f32 %v1612_v32  ;;  %v1377_v37 = vadd.f32 %v2651_v35, %v3558_v28  ;;  %v1368_v38 = vpop.f32.mrb[25].mxu0 }
 0x129   : > { %v2873_v39 = vpop.eup %2872  ;;  %1929 = vst.msk [vmem:[%s3574_s29 + $0x88] sm:$0xff] %vm1911_vm2, %v2871_v36  ;;  %v2715_v41 = vpop.f32.mrb[24].mxu1  ;;  %v1369_v42 = vadd.f32 %v3558_v28, %v1368_v38 }
 0x12a   : > { %v2652_v43 = vpop.f32.mrb[26].mxu0  ;;  %1993 = vst.msk [vmem:[%s3574_s29 + $0x288] sm:$0xff] %vm1911_vm2, %v2873_v39  ;;  %2890 = vtanh.f32 %v1377_v37  ;;  %v1633_v44 = vadd.f32 %v2715_v41, %v3558_v28  ;;  %v1624_v45 = vpop.f32.mrb[25].mxu1 }
 0x12b   : > { %v1380_v16 = vadd.f32 %v2652_v43, %v3558_v28  ;;  %v1371_v46 = vpop.f32.mrb[27].mxu0  ;;  %v2875_v47 = vpop.eup %2874  ;;  %2892 = vtanh.f32 %v1369_v42  ;;  %v1625_v48 = vadd.f32 %v3558_v28, %v1624_v45 }
 0x12c   : > { %v2716_v49 = vpop.f32.mrb[26].mxu1  ;;  %v2877_v50 = vpop.eup %2876  ;;  %1934 = vst.msk [vmem:[%s3574_s29 + $0xb0] sm:$0xff] %vm1911_vm2, %v2875_v47  ;;  %2894 = vtanh.f32 %v1633_v44  ;;  %v1372_v52 = vadd.f32 %v3558_v28, %v1371_v46 }
 0x12d   : > { %v1636_v51 = vadd.f32 %v2716_v49, %v3558_v28  ;;  %v1627_v53 = vpop.f32.mrb[27].mxu1  ;;  %v2879_v54 = vpop.eup %2878  ;;  %1932 = vst.msk [vmem:[%s3574_s29 + $0xa0] sm:$0xff] %vm1911_vm2, %v2877_v50  ;;  %2896 = vtanh.f32 %v1625_v48 }
 0x12e   : > { %v1628_v55 = vadd.f32 %v3558_v28, %v1627_v53  ;;  %v2881_v56 = vpop.eup %2880  ;;  %1998 = vst.msk [vmem:[%s3574_s29 + $0x2b0] sm:$0xff] %vm1911_vm2, %v2879_v54  ;;  %2898 = vtanh.f32 %v1380_v16 }
 0x12f   : > { %v2883_v57 = vpop.eup %2882  ;;  %1996 = vst.msk [vmem:[%s3574_s29 + $0x2a0] sm:$0xff] %vm1911_vm2, %v2881_v56  ;;  %2900 = vtanh.f32 %v1636_v51 }
 0x130   : > { %v2885_v58 = vpop.eup %2884  ;;  %1935 = vst.msk [vmem:[%s3574_s29 + $0xb8] sm:$0xff] %vm1911_vm2, %v2883_v57  ;;  %2902 = vtanh.f32 %v1372_v52  ;;  %v2655_v59 = vpop.f32.mrb[28].mxu0 }
 0x131   : > { %v2887_v60 = vpop.eup %2886  ;;  %1999 = vst.msk [vmem:[%s3574_s29 + $0x2b8] sm:$0xff] %vm1911_vm2, %v2885_v58  ;;  %2904 = vtanh.f32 %v1628_v55  ;;  %v1393_v61 = vadd.f32 %v2655_v59, %v3558_v28  ;;  %v1384_v62 = vpop.f32.mrb[29].mxu0 }
 0x132   : > { %v2889_v63 = vpop.eup %2888  ;;  %1933 = vst.msk [vmem:[%s3574_s29 + $0xa8] sm:$0xff] %vm1911_vm2, %v2887_v60  ;;  %v2719_v0 = vpop.f32.mrb[28].mxu1  ;;  %v1385_v1 = vadd.f32 %v3558_v28, %v1384_v62 }
 0x133   : > { %v2656_v2 = vpop.f32.mrb[30].mxu0  ;;  %1997 = vst.msk [vmem:[%s3574_s29 + $0x2a8] sm:$0xff] %vm1911_vm2, %v2889_v63  ;;  %2906 = vtanh.f32 %v1393_v61  ;;  %v1649_v3 = vadd.f32 %v2719_v0, %v3558_v28  ;;  %v1640_v4 = vpop.f32.mrb[29].mxu1 }
 0x134   : > { %v1396_v6 = vadd.f32 %v2656_v2, %v3558_v28  ;;  %v1387_v7 = vpop.f32.mrb[31].mxu0  ;;  %v2891_v8 = vpop.eup %2890  ;;  %2908 = vtanh.f32 %v1385_v1  ;;  %v1641_v9 = vadd.f32 %v3558_v28, %v1640_v4 }
 0x135   : > { %v2720_v10 = vpop.f32.mrb[30].mxu1  ;;  %v2893_v11 = vpop.eup %2892  ;;  %1938 = vst.msk [vmem:[%s3574_s29 + $0xd0] sm:$0xff] %vm1911_vm2, %v2891_v8  ;;  %2910 = vtanh.f32 %v1649_v3  ;;  %v1388_v13 = vadd.f32 %v3558_v28, %v1387_v7 }
 0x136   : > { %v1652_v12 = vadd.f32 %v2720_v10, %v3558_v28  ;;  %v1643_v14 = vpop.f32.mrb[31].mxu1  ;;  %v2895_v15 = vpop.eup %2894  ;;  %1936 = vst.msk [vmem:[%s3574_s29 + $0xc0] sm:$0xff] %vm1911_vm2, %v2893_v11  ;;  %2912 = vtanh.f32 %v1641_v9 }
 0x137   : > { %v1644_v17 = vadd.f32 %v3558_v28, %v1643_v14  ;;  %v2897_v18 = vpop.eup %2896  ;;  %2002 = vst.msk [vmem:[%s3574_s29 + $0x2d0] sm:$0xff] %vm1911_vm2, %v2895_v15  ;;  %2914 = vtanh.f32 %v1396_v6 }
 0x138   : > { %v2899_v19 = vpop.eup %2898  ;;  %2000 = vst.msk [vmem:[%s3574_s29 + $0x2c0] sm:$0xff] %vm1911_vm2, %v2897_v18  ;;  %2916 = vtanh.f32 %v1652_v12 }
 0x139   : > { %v2901_v20 = vpop.eup %2900  ;;  %1939 = vst.msk [vmem:[%s3574_s29 + $0xd8] sm:$0xff] %vm1911_vm2, %v2899_v19  ;;  %2918 = vtanh.f32 %v1388_v13  ;;  %v2659_v21 = vpop.f32.mrb[32].mxu0 }
 0x13a   : > { %v2903_v22 = vpop.eup %2902  ;;  %2003 = vst.msk [vmem:[%s3574_s29 + $0x2d8] sm:$0xff] %vm1911_vm2, %v2901_v20  ;;  %2920 = vtanh.f32 %v1644_v17  ;;  %v1409_v23 = vadd.f32 %v2659_v21, %v3558_v28  ;;  %v1400_v24 = vpop.f32.mrb[33].mxu0 }
 0x13b   : > { %v2905_v25 = vpop.eup %2904  ;;  %1937 = vst.msk [vmem:[%s3574_s29 + $0xc8] sm:$0xff] %vm1911_vm2, %v2903_v22  ;;  %v2723_v26 = vpop.f32.mrb[32].mxu1  ;;  %v1401_v27 = vadd.f32 %v3558_v28, %v1400_v24 }
 0x13c   : > { %v2660_v29 = vpop.f32.mrb[34].mxu0  ;;  %2001 = vst.msk [vmem:[%s3574_s29 + $0x2c8] sm:$0xff] %vm1911_vm2, %v2905_v25  ;;  %2922 = vtanh.f32 %v1409_v23  ;;  %v1665_v30 = vadd.f32 %v2723_v26, %v3558_v28  ;;  %v1656_v31 = vpop.f32.mrb[33].mxu1 }
 0x13d   : > { %v1412_v40 = vadd.f32 %v2660_v29, %v3558_v28  ;;  %v1403_v32 = vpop.f32.mrb[35].mxu0  ;;  %v2907_v33 = vpop.eup %2906  ;;  %2924 = vtanh.f32 %v1401_v27  ;;  %v1657_v5 = vadd.f32 %v3558_v28, %v1656_v31 }
 0x13e   : > { %v2724_v34 = vpop.f32.mrb[34].mxu1  ;;  %v2909_v35 = vpop.eup %2908  ;;  %1942 = vst.msk [vmem:[%s3574_s29 + $0xf0] sm:$0xff] %vm1911_vm2, %v2907_v33  ;;  %2926 = vtanh.f32 %v1665_v30  ;;  %v1404_v37 = vadd.f32 %v3558_v28, %v1403_v32 }
 0x13f   : > { %v1668_v36 = vadd.f32 %v2724_v34, %v3558_v28  ;;  %v1659_v38 = vpop.f32.mrb[35].mxu1  ;;  %v2911_v39 = vpop.eup %2910  ;;  %1940 = vst.msk [vmem:[%s3574_s29 + $0xe0] sm:$0xff] %vm1911_vm2, %v2909_v35  ;;  %2928 = vtanh.f32 %v1657_v5 }
 0x140   : > { %v1660_v41 = vadd.f32 %v3558_v28, %v1659_v38  ;;  %v2913_v42 = vpop.eup %2912  ;;  %2006 = vst.msk [vmem:[%s3574_s29 + $0x2f0] sm:$0xff] %vm1911_vm2, %v2911_v39  ;;  %2930 = vtanh.f32 %v1412_v40 }
 0x141   : > { %v2915_v43 = vpop.eup %2914  ;;  %2004 = vst.msk [vmem:[%s3574_s29 + $0x2e0] sm:$0xff] %vm1911_vm2, %v2913_v42  ;;  %2932 = vtanh.f32 %v1668_v36 }
 0x142   : > { %v2917_v44 = vpop.eup %2916  ;;  %1943 = vst.msk [vmem:[%s3574_s29 + $0xf8] sm:$0xff] %vm1911_vm2, %v2915_v43  ;;  %2934 = vtanh.f32 %v1404_v37  ;;  %v2663_v45 = vpop.f32.mrb[36].mxu0 }
 0x143   : > { %v2919_v16 = vpop.eup %2918  ;;  %2007 = vst.msk [vmem:[%s3574_s29 + $0x2f8] sm:$0xff] %vm1911_vm2, %v2917_v44  ;;  %2936 = vtanh.f32 %v1660_v41  ;;  %v1425_v46 = vadd.f32 %v2663_v45, %v3558_v28  ;;  %v1416_v47 = vpop.f32.mrb[37].mxu0 }
 0x144   : > { %v2921_v48 = vpop.eup %2920  ;;  %1941 = vst.msk [vmem:[%s3574_s29 + $0xe8] sm:$0xff] %vm1911_vm2, %v2919_v16  ;;  %v2727_v49 = vpop.f32.mrb[36].mxu1  ;;  %v1417_v50 = vadd.f32 %v3558_v28, %v1416_v47 }
 0x145   : > { %v2664_v51 = vpop.f32.mrb[38].mxu0  ;;  %2005 = vst.msk [vmem:[%s3574_s29 + $0x2e8] sm:$0xff] %vm1911_vm2, %v2921_v48  ;;  %2938 = vtanh.f32 %v1425_v46  ;;  %v1681_v52 = vadd.f32 %v2727_v49, %v3558_v28  ;;  %v1672_v53 = vpop.f32.mrb[37].mxu1 }
 0x146   : > { %v1428_v54 = vadd.f32 %v2664_v51, %v3558_v28  ;;  %v1419_v55 = vpop.f32.mrb[39].mxu0  ;;  %v2923_v56 = vpop.eup %2922  ;;  %2940 = vtanh.f32 %v1417_v50  ;;  %v1673_v57 = vadd.f32 %v3558_v28, %v1672_v53 }
 0x147   : > { %v2728_v58 = vpop.f32.mrb[38].mxu1  ;;  %v2925_v59 = vpop.eup %2924  ;;  %1946 = vst.msk [vmem:[%s3574_s29 + $0x110] sm:$0xff] %vm1911_vm2, %v2923_v56  ;;  %2942 = vtanh.f32 %v1681_v52  ;;  %v1420_v61 = vadd.f32 %v3558_v28, %v1419_v55 }
 0x148   : > { %v1684_v60 = vadd.f32 %v2728_v58, %v3558_v28  ;;  %v1675_v62 = vpop.f32.mrb[39].mxu1  ;;  %v2927_v63 = vpop.eup %2926  ;;  %1944 = vst.msk [vmem:[%s3574_s29 + $0x100] sm:$0xff] %vm1911_vm2, %v2925_v59  ;;  %2944 = vtanh.f32 %v1673_v57 }
 0x149   : > { %v1676_v0 = vadd.f32 %v3558_v28, %v1675_v62  ;;  %v2929_v1 = vpop.eup %2928  ;;  %2010 = vst.msk [vmem:[%s3574_s29 + $0x310] sm:$0xff] %vm1911_vm2, %v2927_v63  ;;  %2946 = vtanh.f32 %v1428_v54 }
 0x14a   : > { %v2931_v2 = vpop.eup %2930  ;;  %2008 = vst.msk [vmem:[%s3574_s29 + $0x300] sm:$0xff] %vm1911_vm2, %v2929_v1  ;;  %2948 = vtanh.f32 %v1684_v60 }
 0x14b   : > { %v2933_v3 = vpop.eup %2932  ;;  %1947 = vst.msk [vmem:[%s3574_s29 + $0x118] sm:$0xff] %vm1911_vm2, %v2931_v2  ;;  %2950 = vtanh.f32 %v1420_v61  ;;  %v2667_v4 = vpop.f32.mrb[40].mxu0 }
 0x14c   : > { %v2935_v6 = vpop.eup %2934  ;;  %2011 = vst.msk [vmem:[%s3574_s29 + $0x318] sm:$0xff] %vm1911_vm2, %v2933_v3  ;;  %2952 = vtanh.f32 %v1676_v0  ;;  %v1441_v7 = vadd.f32 %v2667_v4, %v3558_v28  ;;  %v1432_v8 = vpop.f32.mrb[41].mxu0 }
 0x14d   : > { %v2937_v9 = vpop.eup %2936  ;;  %1945 = vst.msk [vmem:[%s3574_s29 + $0x108] sm:$0xff] %vm1911_vm2, %v2935_v6  ;;  %v2731_v10 = vpop.f32.mrb[40].mxu1  ;;  %v1433_v11 = vadd.f32 %v3558_v28, %v1432_v8 }
 0x14e   : > { %v2668_v12 = vpop.f32.mrb[42].mxu0  ;;  %2009 = vst.msk [vmem:[%s3574_s29 + $0x308] sm:$0xff] %vm1911_vm2, %v2937_v9  ;;  %2954 = vtanh.f32 %v1441_v7  ;;  %v1697_v13 = vadd.f32 %v2731_v10, %v3558_v28  ;;  %v1688_v14 = vpop.f32.mrb[41].mxu1 }
 0x14f   : > { %v1444_v15 = vadd.f32 %v2668_v12, %v3558_v28  ;;  %v1435_v17 = vpop.f32.mrb[43].mxu0  ;;  %v2939_v18 = vpop.eup %2938  ;;  %2956 = vtanh.f32 %v1433_v11  ;;  %v1689_v19 = vadd.f32 %v3558_v28, %v1688_v14 }
 0x150   : > { %v2732_v20 = vpop.f32.mrb[42].mxu1  ;;  %v2941_v21 = vpop.eup %2940  ;;  %1950 = vst.msk [vmem:[%s3574_s29 + $0x130] sm:$0xff] %vm1911_vm2, %v2939_v18  ;;  %2958 = vtanh.f32 %v1697_v13  ;;  %v1436_v23 = vadd.f32 %v3558_v28, %v1435_v17 }
 0x151   : > { %v1700_v22 = vadd.f32 %v2732_v20, %v3558_v28  ;;  %v1691_v24 = vpop.f32.mrb[43].mxu1  ;;  %v2943_v25 = vpop.eup %2942  ;;  %1948 = vst.msk [vmem:[%s3574_s29 + $0x120] sm:$0xff] %vm1911_vm2, %v2941_v21  ;;  %2960 = vtanh.f32 %v1689_v19 }
 0x152   : > { %v1692_v26 = vadd.f32 %v3558_v28, %v1691_v24  ;;  %v2945_v27 = vpop.eup %2944  ;;  %2014 = vst.msk [vmem:[%s3574_s29 + $0x330] sm:$0xff] %vm1911_vm2, %v2943_v25  ;;  %2962 = vtanh.f32 %v1444_v15 }
 0x153   : > { %v2947_v29 = vpop.eup %2946  ;;  %2012 = vst.msk [vmem:[%s3574_s29 + $0x320] sm:$0xff] %vm1911_vm2, %v2945_v27  ;;  %2964 = vtanh.f32 %v1700_v22 }
 0x154   : > { %v2949_v30 = vpop.eup %2948  ;;  %1951 = vst.msk [vmem:[%s3574_s29 + $0x138] sm:$0xff] %vm1911_vm2, %v2947_v29  ;;  %2966 = vtanh.f32 %v1436_v23  ;;  %v2671_v31 = vpop.f32.mrb[44].mxu0  ;;  %v3867_v23 = vld [vmem:[%s3968_s4] ss:$0 sm:$0xff] }
 0x155   : > { %v2951_v40 = vpop.eup %2950  ;;  %2015 = vst.msk [vmem:[%s3574_s29 + $0x338] sm:$0xff] %vm1911_vm2, %v2949_v30  ;;  %2968 = vtanh.f32 %v1692_v26  ;;  %v1457_v32 = vadd.f32 %v2671_v31, %v3558_v28  ;;  %v1448_v33 = vpop.f32.mrb[45].mxu0 }
 0x156   : > { %v2953_v5 = vpop.eup %2952  ;;  %1949 = vst.msk [vmem:[%s3574_s29 + $0x128] sm:$0xff] %vm1911_vm2, %v2951_v40  ;;  %v2735_v34 = vpop.f32.mrb[44].mxu1  ;;  %v1449_v35 = vadd.f32 %v3558_v28, %v1448_v33 }
 0x157   : > { %v2672_v36 = vpop.f32.mrb[46].mxu0  ;;  %2013 = vst.msk [vmem:[%s3574_s29 + $0x328] sm:$0xff] %vm1911_vm2, %v2953_v5  ;;  %2970 = vtanh.f32 %v1457_v32  ;;  %v1713_v37 = vadd.f32 %v2735_v34, %v3558_v28  ;;  %v1704_v38 = vpop.f32.mrb[45].mxu1 }
 0x158   : > { %v1460_v39 = vadd.f32 %v2672_v36, %v3558_v28  ;;  %v1451_v41 = vpop.f32.mrb[47].mxu0  ;;  %v2955_v42 = vpop.eup %2954  ;;  %2972 = vtanh.f32 %v1449_v35  ;;  %v1705_v43 = vadd.f32 %v3558_v28, %v1704_v38 }
 0x159   : > { %v2736_v44 = vpop.f32.mrb[46].mxu1  ;;  %v2957_v45 = vpop.eup %2956  ;;  %1954 = vst.msk [vmem:[%s3574_s29 + $0x150] sm:$0xff] %vm1911_vm2, %v2955_v42  ;;  %2974 = vtanh.f32 %v1713_v37  ;;  %v1452_v46 = vadd.f32 %v3558_v28, %v1451_v41 }
 0x15a   : > { %v1716_v16 = vadd.f32 %v2736_v44, %v3558_v28  ;;  %v1707_v47 = vpop.f32.mrb[47].mxu1  ;;  %v2959_v48 = vpop.eup %2958  ;;  %1952 = vst.msk [vmem:[%s3574_s29 + $0x140] sm:$0xff] %vm1911_vm2, %v2957_v45  ;;  %2976 = vtanh.f32 %v1705_v43 }
 0x15b   : > { %v1708_v49 = vadd.f32 %v3558_v28, %v1707_v47  ;;  %v2961_v50 = vpop.eup %2960  ;;  %2018 = vst.msk [vmem:[%s3574_s29 + $0x350] sm:$0xff] %vm1911_vm2, %v2959_v48  ;;  %2978 = vtanh.f32 %v1460_v39 }
 0x15c   : > { %v2963_v51 = vpop.eup %2962  ;;  %2016 = vst.msk [vmem:[%s3574_s29 + $0x340] sm:$0xff] %vm1911_vm2, %v2961_v50  ;;  %2980 = vtanh.f32 %v1716_v16 }
 0x15d   : > { %v2965_v52 = vpop.eup %2964  ;;  %1955 = vst.msk [vmem:[%s3574_s29 + $0x158] sm:$0xff] %vm1911_vm2, %v2963_v51  ;;  %2982 = vtanh.f32 %v1452_v46  ;;  %v2675_v53 = vpop.f32.mrb[48].mxu0 }
 0x15e   : > { %v2967_v54 = vpop.eup %2966  ;;  %2019 = vst.msk [vmem:[%s3574_s29 + $0x358] sm:$0xff] %vm1911_vm2, %v2965_v52  ;;  %2984 = vtanh.f32 %v1708_v49  ;;  %v1473_v55 = vadd.f32 %v2675_v53, %v3558_v28  ;;  %v1464_v56 = vpop.f32.mrb[49].mxu0 }
 0x15f   : > { %v2969_v57 = vpop.eup %2968  ;;  %1953 = vst.msk [vmem:[%s3574_s29 + $0x148] sm:$0xff] %vm1911_vm2, %v2967_v54  ;;  %v2739_v58 = vpop.f32.mrb[48].mxu1  ;;  %v1465_v59 = vadd.f32 %v3558_v28, %v1464_v56 }
 0x160   : > { %v2676_v60 = vpop.f32.mrb[50].mxu0  ;;  %2017 = vst.msk [vmem:[%s3574_s29 + $0x348] sm:$0xff] %vm1911_vm2, %v2969_v57  ;;  %2986 = vtanh.f32 %v1473_v55  ;;  %v1729_v61 = vadd.f32 %v2739_v58, %v3558_v28  ;;  %v1720_v62 = vpop.f32.mrb[49].mxu1 }
 0x161   : > { %v1476_v63 = vadd.f32 %v2676_v60, %v3558_v28  ;;  %v1467_v0 = vpop.f32.mrb[51].mxu0  ;;  %v2971_v1 = vpop.eup %2970  ;;  %2988 = vtanh.f32 %v1465_v59  ;;  %v1721_v2 = vadd.f32 %v3558_v28, %v1720_v62 }
 0x162   : > { %v2740_v3 = vpop.f32.mrb[50].mxu1  ;;  %v2973_v4 = vpop.eup %2972  ;;  %1958 = vst.msk [vmem:[%s3574_s29 + $0x170] sm:$0xff] %vm1911_vm2, %v2971_v1  ;;  %2990 = vtanh.f32 %v1729_v61  ;;  %v1468_v7 = vadd.f32 %v3558_v28, %v1467_v0 }
 0x163   : > { %v1732_v6 = vadd.f32 %v2740_v3, %v3558_v28  ;;  %v1723_v8 = vpop.f32.mrb[51].mxu1  ;;  %v2975_v9 = vpop.eup %2974  ;;  %1956 = vst.msk [vmem:[%s3574_s29 + $0x160] sm:$0xff] %vm1911_vm2, %v2973_v4  ;;  %2992 = vtanh.f32 %v1721_v2 }
 0x164   : > { %v1724_v10 = vadd.f32 %v3558_v28, %v1723_v8  ;;  %v2977_v11 = vpop.eup %2976  ;;  %2022 = vst.msk [vmem:[%s3574_s29 + $0x370] sm:$0xff] %vm1911_vm2, %v2975_v9  ;;  %2994 = vtanh.f32 %v1476_v63 }
 0x165   : > { %v2979_v12 = vpop.eup %2978  ;;  %2020 = vst.msk [vmem:[%s3574_s29 + $0x360] sm:$0xff] %vm1911_vm2, %v2977_v11  ;;  %2996 = vtanh.f32 %v1732_v6 }
 0x166   : > { %v2981_v13 = vpop.eup %2980  ;;  %1959 = vst.msk [vmem:[%s3574_s29 + $0x178] sm:$0xff] %vm1911_vm2, %v2979_v12  ;;  %2998 = vtanh.f32 %v1468_v7  ;;  %v2679_v14 = vpop.f32.mrb[52].mxu0 }
 0x167   : > { %v2983_v15 = vpop.eup %2982  ;;  %2023 = vst.msk [vmem:[%s3574_s29 + $0x378] sm:$0xff] %vm1911_vm2, %v2981_v13  ;;  %3000 = vtanh.f32 %v1724_v10  ;;  %v1489_v17 = vadd.f32 %v2679_v14, %v3558_v28  ;;  %v1480_v18 = vpop.f32.mrb[53].mxu0 }
 0x168   : > { %v2985_v19 = vpop.eup %2984  ;;  %1957 = vst.msk [vmem:[%s3574_s29 + $0x168] sm:$0xff] %vm1911_vm2, %v2983_v15  ;;  %v2743_v20 = vpop.f32.mrb[52].mxu1  ;;  %v1481_v21 = vadd.f32 %v3558_v28, %v1480_v18 }
 0x169   : > { %v2680_v22 = vpop.f32.mrb[54].mxu0  ;;  %2021 = vst.msk [vmem:[%s3574_s29 + $0x368] sm:$0xff] %vm1911_vm2, %v2985_v19  ;;  %3002 = vtanh.f32 %v1489_v17  ;;  %v1745_v24 = vadd.f32 %v3867_v23, %v2743_v20  ;;  %v1736_v25 = vpop.f32.mrb[53].mxu1 }
 0x16a   : > { %v1492_v26 = vadd.f32 %v3867_v23, %v2680_v22  ;;  %v1483_v27 = vpop.f32.mrb[55].mxu0  ;;  %v2987_v29 = vpop.eup %2986  ;;  %3004 = vtanh.f32 %v1481_v21  ;;  %v1737_v28 = vadd.f32 %v3867_v23, %v1736_v25 }
 0x16b   : > { %v2744_v30 = vpop.f32.mrb[54].mxu1  ;;  %v2989_v31 = vpop.eup %2988  ;;  %1962 = vst.msk [vmem:[%s3574_s29 + $0x190] sm:$0xff] %vm1911_vm2, %v2987_v29  ;;  %3006 = vtanh.f32 %v1745_v24  ;;  %v1484_v32 = vadd.f32 %v3867_v23, %v1483_v27 }
 0x16c   : > { %v1748_v40 = vadd.f32 %v3867_v23, %v2744_v30  ;;  %v1739_v33 = vpop.f32.mrb[55].mxu1  ;;  %v2991_v5 = vpop.eup %2990  ;;  %1960 = vst.msk [vmem:[%s3574_s29 + $0x180] sm:$0xff] %vm1911_vm2, %v2989_v31  ;;  %3008 = vtanh.f32 %v1737_v28 }
 0x16d   : > { %v1740_v34 = vadd.f32 %v3867_v23, %v1739_v33  ;;  %v2993_v35 = vpop.eup %2992  ;;  %2026 = vst.msk [vmem:[%s3574_s29 + $0x390] sm:$0xff] %vm1911_vm2, %v2991_v5  ;;  %3010 = vtanh.f32 %v1492_v26 }
 0x16e   : > { %v2995_v36 = vpop.eup %2994  ;;  %2024 = vst.msk [vmem:[%s3574_s29 + $0x380] sm:$0xff] %vm1911_vm2, %v2993_v35  ;;  %3012 = vtanh.f32 %v1748_v40 }
 0x16f   : > { %v2997_v37 = vpop.eup %2996  ;;  %1963 = vst.msk [vmem:[%s3574_s29 + $0x198] sm:$0xff] %vm1911_vm2, %v2995_v36  ;;  %3014 = vtanh.f32 %v1484_v32  ;;  %v2683_v38 = vpop.f32.mrb[56].mxu0 }
 0x170   : > { %v2999_v39 = vpop.eup %2998  ;;  %2027 = vst.msk [vmem:[%s3574_s29 + $0x398] sm:$0xff] %vm1911_vm2, %v2997_v37  ;;  %3016 = vtanh.f32 %v1740_v34  ;;  %v1505_v41 = vadd.f32 %v3867_v23, %v2683_v38  ;;  %v1496_v42 = vpop.f32.mrb[57].mxu0 }
 0x171   : > { %v3001_v43 = vpop.eup %3000  ;;  %1961 = vst.msk [vmem:[%s3574_s29 + $0x188] sm:$0xff] %vm1911_vm2, %v2999_v39  ;;  %v2747_v44 = vpop.f32.mrb[56].mxu1  ;;  %v1497_v45 = vadd.f32 %v3867_v23, %v1496_v42 }
 0x172   : > { %v2684_v16 = vpop.f32.mrb[58].mxu0  ;;  %2025 = vst.msk [vmem:[%s3574_s29 + $0x388] sm:$0xff] %vm1911_vm2, %v3001_v43  ;;  %3018 = vtanh.f32 %v1505_v41  ;;  %v1761_v46 = vadd.f32 %v3867_v23, %v2747_v44  ;;  %v1752_v47 = vpop.f32.mrb[57].mxu1 }
 0x173   : > { %v1508_v48 = vadd.f32 %v3867_v23, %v2684_v16  ;;  %v1499_v49 = vpop.f32.mrb[59].mxu0  ;;  %v3003_v50 = vpop.eup %3002  ;;  %3020 = vtanh.f32 %v1497_v45  ;;  %v1753_v51 = vadd.f32 %v3867_v23, %v1752_v47 }
 0x174   : > { %v2748_v52 = vpop.f32.mrb[58].mxu1  ;;  %v3005_v53 = vpop.eup %3004  ;;  %1966 = vst.msk [vmem:[%s3574_s29 + $0x1b0] sm:$0xff] %vm1911_vm2, %v3003_v50  ;;  %3022 = vtanh.f32 %v1761_v46  ;;  %v1500_v55 = vadd.f32 %v3867_v23, %v1499_v49 }
 0x175   : > { %v1764_v54 = vadd.f32 %v3867_v23, %v2748_v52  ;;  %v1755_v56 = vpop.f32.mrb[59].mxu1  ;;  %v3007_v57 = vpop.eup %3006  ;;  %1964 = vst.msk [vmem:[%s3574_s29 + $0x1a0] sm:$0xff] %vm1911_vm2, %v3005_v53  ;;  %3024 = vtanh.f32 %v1753_v51 }
 0x176   : > { %v1756_v58 = vadd.f32 %v3867_v23, %v1755_v56  ;;  %v3009_v59 = vpop.eup %3008  ;;  %2030 = vst.msk [vmem:[%s3574_s29 + $0x3b0] sm:$0xff] %vm1911_vm2, %v3007_v57  ;;  %3026 = vtanh.f32 %v1508_v48 }
 0x177   : > { %v3011_v60 = vpop.eup %3010  ;;  %2028 = vst.msk [vmem:[%s3574_s29 + $0x3a0] sm:$0xff] %vm1911_vm2, %v3009_v59  ;;  %3028 = vtanh.f32 %v1764_v54 }
 0x178   : > { %v3013_v61 = vpop.eup %3012  ;;  %1967 = vst.msk [vmem:[%s3574_s29 + $0x1b8] sm:$0xff] %vm1911_vm2, %v3011_v60  ;;  %3030 = vtanh.f32 %v1500_v55  ;;  %v2687_v62 = vpop.f32.mrb[60].mxu0 }
 0x179   : > { %v3015_v63 = vpop.eup %3014  ;;  %2031 = vst.msk [vmem:[%s3574_s29 + $0x3b8] sm:$0xff] %vm1911_vm2, %v3013_v61  ;;  %3032 = vtanh.f32 %v1756_v58  ;;  %v1521_v0 = vadd.f32 %v3867_v23, %v2687_v62  ;;  %v1512_v1 = vpop.f32.mrb[61].mxu0 }
 0x17a   : > { %v3017_v2 = vpop.eup %3016  ;;  %1965 = vst.msk [vmem:[%s3574_s29 + $0x1a8] sm:$0xff] %vm1911_vm2, %v3015_v63  ;;  %v2751_v3 = vpop.f32.mrb[60].mxu1  ;;  %v1513_v4 = vadd.f32 %v3867_v23, %v1512_v1 }
 0x17b   : > { %v2688_v6 = vpop.f32.mrb[62].mxu0  ;;  %2029 = vst.msk [vmem:[%s3574_s29 + $0x3a8] sm:$0xff] %vm1911_vm2, %v3017_v2  ;;  %3034 = vtanh.f32 %v1521_v0  ;;  %v1777_v7 = vadd.f32 %v3867_v23, %v2751_v3  ;;  %v1768_v8 = vpop.f32.mrb[61].mxu1 }
 0x17c   : > { %v1524_v9 = vadd.f32 %v3867_v23, %v2688_v6  ;;  %v1515_v10 = vpop.f32.mrb[63].mxu0  ;;  %v3019_v11 = vpop.eup %3018  ;;  %3036 = vtanh.f32 %v1513_v4  ;;  %v1769_v12 = vadd.f32 %v3867_v23, %v1768_v8 }
 0x17d   : > { %v2752_v13 = vpop.f32.mrb[62].mxu1  ;;  %v3021_v14 = vpop.eup %3020  ;;  %1970 = vst.msk [vmem:[%s3574_s29 + $0x1d0] sm:$0xff] %vm1911_vm2, %v3019_v11  ;;  %3038 = vtanh.f32 %v1777_v7  ;;  %v1516_v17 = vadd.f32 %v3867_v23, %v1515_v10 }
 0x17e   : > { %v1780_v15 = vadd.f32 %v3867_v23, %v2752_v13  ;;  %v1771_v18 = vpop.f32.mrb[63].mxu1  ;;  %v3023_v19 = vpop.eup %3022  ;;  %1968 = vst.msk [vmem:[%s3574_s29 + $0x1c0] sm:$0xff] %vm1911_vm2, %v3021_v14  ;;  %3040 = vtanh.f32 %v1769_v12 }
 0x17f   : > { %v1772_v20 = vadd.f32 %v3867_v23, %v1771_v18  ;;  %v3025_v21 = vpop.eup %3024  ;;  %2034 = vst.msk [vmem:[%s3574_s29 + $0x3d0] sm:$0xff] %vm1911_vm2, %v3023_v19  ;;  %3042 = vtanh.f32 %v1524_v9 }
 0x180   : > { %v3027_v22 = vpop.eup %3026  ;;  %2032 = vst.msk [vmem:[%s3574_s29 + $0x3c0] sm:$0xff] %vm1911_vm2, %v3025_v21  ;;  %3044 = vtanh.f32 %v1780_v15 }
 0x181   : > { %v3029_v24 = vpop.eup %3028  ;;  %1971 = vst.msk [vmem:[%s3574_s29 + $0x1d8] sm:$0xff] %vm1911_vm2, %v3027_v22  ;;  %3046 = vtanh.f32 %v1516_v17 }
 0x182   : > { %v3031_v25 = vpop.eup %3030  ;;  %2035 = vst.msk [vmem:[%s3574_s29 + $0x3d8] sm:$0xff] %vm1911_vm2, %v3029_v24  ;;  %3048 = vtanh.f32 %v1772_v20 }
 0x183   : > { %v3033_v23 = vpop.eup %3032  ;;  %1969 = vst.msk [vmem:[%s3574_s29 + $0x1c8] sm:$0xff] %vm1911_vm2, %v3031_v25 }
 0x184   : > { %2033 = vst.msk [vmem:[%s3574_s29 + $0x3c8] sm:$0xff] %vm1911_vm2, %v3033_v23 }
 0x185   : > { %v3035_v26 = vpop.eup %3034 }
 0x186   : > { %v3037_v27 = vpop.eup %3036  ;;  %1974 = vst.msk [vmem:[%s3574_s29 + $0x1f0] sm:$0xff] %vm1911_vm2, %v3035_v26 }
 0x187   : > { %v3039_v29 = vpop.eup %3038  ;;  %1972 = vst.msk [vmem:[%s3574_s29 + $0x1e0] sm:$0xff] %vm1911_vm2, %v3037_v27 }
 0x188   : > { %v3041_v28 = vpop.eup %3040  ;;  %2038 = vst.msk [vmem:[%s3574_s29 + $0x3f0] sm:$0xff] %vm1911_vm2, %v3039_v29 }
 0x189   : > { %v3043_v30 = vpop.eup %3042  ;;  %2036 = vst.msk [vmem:[%s3574_s29 + $0x3e0] sm:$0xff] %vm1911_vm2, %v3041_v28 }
 0x18a   : > { %v3045_v31 = vpop.eup %3044  ;;  %1975 = vst.msk [vmem:[%s3574_s29 + $0x1f8] sm:$0xff] %vm1911_vm2, %v3043_v30 }
 0x18b   : > { %v3047_v40 = vpop.eup %3046  ;;  %2039 = vst.msk [vmem:[%s3574_s29 + $0x3f8] sm:$0xff] %vm1911_vm2, %v3045_v31 }
 0x18c   : > { %v3049_v32 = vpop.eup %3048  ;;  %1973 = vst.msk [vmem:[%s3574_s29 + $0x1e8] sm:$0xff] %vm1911_vm2, %v3047_v40 }
 0x18d   : > { %2037 = vst.msk [vmem:[%s3574_s29 + $0x3e8] sm:$0xff] %vm1911_vm2, %v3049_v32 }
 0x18e PF: > { %s15_s20 = sadd.s32 1, %s3075_s20   ;;  %s3970_s18 = smov %s3071_s19 }
 0x18f   : > { %p12_p5 = scmp.ge.s32.totalorder %s15_s20, 4   ;;  %s3971_s19 = smov %s3973_s21 }
 0x191   :  { %14 = sbr.rel (!%p12_p5) target bundleno = 2 (0x2), region = 76 }

</bundles_post_ra>
